<compile_context>
chip_gen: v7x
topology: tpu7x:2x2x1
jax: 0.10.0
libtpu: 0.0.40
codegen_flags: <defaults>
</compile_context>

<pallas_src>
import jax
import jax.numpy as jnp
import numpy as np
from jax.experimental import pallas as pl
from jax.experimental.pallas import tpu as pltpu


# ----------------------------------------------------------------------------
# Pallas kernel 1: fused conv-as-matmul + bias + ReLU + 2x2 max-pool.
#   w: (OC, K) bf16, x: (4, K, T) bf16 (the 4 pool-window positions),
#   b: (OC, 1) f32, o: (OC, T) bf16  (T = pooled-column tile).
# relu(max_q(W@x_q) + b) == max-pool(relu(conv)) since bias is shared and
# relu is monotone.
# ----------------------------------------------------------------------------
def _conv_pool_kernel(w_ref, x_ref, b_ref, o_ref):
    w = w_ref[...]
    y0 = jnp.dot(w, x_ref[0], preferred_element_type=jnp.float32)
    y1 = jnp.dot(w, x_ref[1], preferred_element_type=jnp.float32)
    y2 = jnp.dot(w, x_ref[2], preferred_element_type=jnp.float32)
    y3 = jnp.dot(w, x_ref[3], preferred_element_type=jnp.float32)
    y = jnp.maximum(jnp.maximum(y0, y1), jnp.maximum(y2, y3))
    o_ref[...] = jnp.maximum(y + b_ref[...], 0.0).astype(o_ref.dtype)


# ----------------------------------------------------------------------------
# im2col glue (pure XLA data movement), pool-grouped:
#   x: (C, N, H, W) -> patches (4, C*kh*kw, Mp) with Mp = N*PH*PW,
# where group q = dy*2+dx holds the patches of conv-output position
# (2*ph+dy, 2*pw+dx) for every pool cell (ph, pw).  Row order is (c, i, j)
# (matches torch w.reshape(OC, -1)); column order is (n, ph, pw).
# ----------------------------------------------------------------------------
def im2col_pool_groups(x, kh, kw, stride, pad):
    C, N, H, W = x.shape
    xp = jnp.pad(x, ((0, 0), (0, 0), (pad, pad), (pad, pad)))
    oh = (H + 2 * pad - kh) // stride + 1
    ow = (W + 2 * pad - kw) // stride + 1
    PH, PW = oh // 2, ow // 2              # floor, like F.max_pool2d(2)
    s2 = 2 * stride
    groups = []
    for dy in range(2):
        for dx in range(2):
            taps = []
            for i in range(kh):
                for j in range(kw):
                    r0 = stride * dy + i
                    c0 = stride * dx + j
                    taps.append(xp[:, :,
                                   r0:r0 + s2 * (PH - 1) + 1:s2,
                                   c0:c0 + s2 * (PW - 1) + 1:s2])
            g = jnp.stack(taps, axis=1)            # (C, kh*kw, N, PH, PW)
            groups.append(g.reshape(C * kh * kw, N * PH * PW))
    return jnp.stack(groups, axis=0), PH, PW       # (4, K, Mp)


def conv_relu_pool(x, w, b, *, kh, kw, stride, pad, tn=None):
    """x: (C, N, H, W) bf16; w: (OC, C*kh*kw) bf16; b: (OC, 1) f32.
    Returns maxpool2x2(relu(conv(x))) as (OC, N, PH, PW) bf16."""
    C, N, H, W = x.shape
    OC, K = w.shape
    assert K == C * kh * kw, (K, C, kh, kw)

    patches, PH, PW = im2col_pool_groups(x, kh, kw, stride, pad)
    Mp = N * PH * PW

    if tn is None or tn >= Mp:
        tn, Mpp = Mp, Mp                    # single full-extent block
    else:
        # tn must be a multiple of 128; pad Mp with zero columns so every
        # block is full (garbage-free) and the block count is even (v7x 2-TC).
        Mpp = pl.cdiv(Mp, tn) * tn
        patches = jnp.pad(patches, ((0, 0), (0, 0), (0, Mpp - Mp)))

    y = pl.pallas_call(
        _conv_pool_kernel,
        out_shape=jax.ShapeDtypeStruct((OC, Mpp), jnp.bfloat16),
        grid_spec=pltpu.PrefetchScalarGridSpec(
            num_scalar_prefetch=0,
            grid=(pl.cdiv(Mpp, tn),),
            in_specs=[
                pl.BlockSpec((OC, K), lambda i: (0, 0)),       # weights resident
                pl.BlockSpec((4, K, tn), lambda i: (0, 0, i)),  # patch tile
                pl.BlockSpec((OC, 1), lambda i: (0, 0)),       # bias resident
            ],
            out_specs=pl.BlockSpec((OC, tn), lambda i: (0, i)),
        ),
        compiler_params=pltpu.CompilerParams(
            dimension_semantics=("parallel",)),
    )(w, patches, b)

    if Mpp != Mp:
        y = y[:, :Mp]
    return y.reshape(OC, N, PH, PW)


# ----------------------------------------------------------------------------
# Pallas kernel 2: fused fc1(+ReLU) -> fc2(+ReLU) -> fc3 -> log_softmax.
# All weights resident in VMEM; logits reductions use the exact logical width.
# ----------------------------------------------------------------------------
def _mlp_kernel(x_ref, w1_ref, b1_ref, w2_ref, b2_ref, w3_ref, b3_ref, o_ref):
    h1 = jnp.dot(x_ref[...], w1_ref[...], preferred_element_type=jnp.float32)
    h1 = jnp.maximum(h1 + b1_ref[...], 0.0)
    h2 = jnp.dot(h1.astype(jnp.bfloat16), w2_ref[...],
                 preferred_element_type=jnp.float32)
    h2 = jnp.maximum(h2 + b2_ref[...], 0.0)
    y = jnp.dot(h2.astype(jnp.bfloat16), w3_ref[...],
                preferred_element_type=jnp.float32) + b3_ref[...]
    m = jnp.max(y, axis=-1, keepdims=True)
    s = y - m
    o_ref[...] = (s - jnp.log(jnp.sum(jnp.exp(s), axis=-1, keepdims=True))
                  ).astype(o_ref.dtype)


def mlp_head(x, w1, b1, w2, b2, w3, b3):
    """x: (B, K1) bf16; weights already (in, out) bf16, biases (1, out) f32."""
    B = x.shape[0]
    O = w3.shape[1]
    args = [x, w1, b1, w2, b2, w3, b3]
    return pl.pallas_call(
        _mlp_kernel,
        out_shape=jax.ShapeDtypeStruct((B, O), jnp.float32),
        grid_spec=pltpu.PrefetchScalarGridSpec(
            num_scalar_prefetch=0,
            grid=(1,),
            in_specs=[pl.BlockSpec(a.shape, lambda i: (0, 0)) for a in args],
            out_specs=pl.BlockSpec((B, O), lambda i: (0, 0)),
        ),
        compiler_params=pltpu.CompilerParams(
            dimension_semantics=("arbitrary",)),
    )(*args)


# ----------------------------------------------------------------------------
# Parameters: deterministic PyTorch-default-style uniform init, stored
# PRE-TRANSPOSED / PRE-RESHAPED / PRE-CAST so the forward does no weight prep.
# ----------------------------------------------------------------------------
def init_params(key, output_size=4, fc1_input_size=2304):
    ks = jax.random.split(key, 12)

    def uni(k, shape, fan_in):
        bound = 1.0 / np.sqrt(fan_in)
        return jax.random.uniform(k, shape, jnp.float32, -bound, bound)

    def conv(kw_, kb_, oc, ic, kh, kwd):
        fan = ic * kh * kwd
        w = uni(kw_, (oc, ic, kh, kwd), fan)
        b = uni(kb_, (oc,), fan)
        return (w.reshape(oc, fan).astype(jnp.bfloat16),       # (OC, K) bf16
                b.reshape(oc, 1).astype(jnp.float32))           # (OC, 1) f32

    def fc(kw_, kb_, out, inp):
        w = uni(kw_, (out, inp), inp)
        b = uni(kb_, (out,), inp)
        return (w.T.astype(jnp.bfloat16),                       # (in, out) bf16
                b.reshape(1, -1).astype(jnp.float32))           # (1, out) f32

    p = {}
    p["conv1_w"], p["conv1_b"] = conv(ks[0], ks[1], 16, 3, 5, 5)
    p["conv2_w"], p["conv2_b"] = conv(ks[2], ks[3], 32, 16, 5, 5)
    p["conv3_w"], p["conv3_b"] = conv(ks[4], ks[5], 64, 32, 3, 3)
    p["fc1_w"], p["fc1_b"] = fc(ks[6], ks[7], 500, fc1_input_size)
    p["fc2_w"], p["fc2_b"] = fc(ks[8], ks[9], 50, 500)
    p["fc3_w"], p["fc3_b"] = fc(ks[10], ks[11], output_size, 50)
    return p


# ----------------------------------------------------------------------------
# Forward pass (mirrors CNN.forward): 4 pallas_calls total.
# ----------------------------------------------------------------------------
def cnn_forward(x, p):
    # x: (N, 3, H, W) NCHW; cast to bf16 first, then go channel-major once.
    N = x.shape[0]
    y = jnp.transpose(x.astype(jnp.bfloat16), (1, 0, 2, 3))     # (C, N, H, W)

    # conv1 (5x5, s=2, p=1) + ReLU + pool  -> (16, N, 55, 55)
    # Mp = N*55*55 = 6050 -> padded to 6144 = 2 blocks of 3072 (even for v7x).
    y = conv_relu_pool(y, p["conv1_w"], p["conv1_b"],
                       kh=5, kw=5, stride=2, pad=1, tn=3072)
    # conv2 (5x5, s=2, p=1) + ReLU + pool  -> (32, N, 13, 13); single block.
    y = conv_relu_pool(y, p["conv2_w"], p["conv2_b"],
                       kh=5, kw=5, stride=2, pad=1)
    # conv3 (3x3, s=1, p=1) + ReLU + pool  -> (64, N, 6, 6); single block.
    y = conv_relu_pool(y, p["conv3_w"], p["conv3_b"],
                       kh=3, kw=3, stride=1, pad=1)

    # PyTorch x.view(N, -1) flattens (c, h, w) per sample: tiny (9 KB) transpose.
    flat = jnp.transpose(y, (1, 0, 2, 3)).reshape(N, -1)         # (N, 2304) bf16
    return mlp_head(flat,
                    p["fc1_w"], p["fc1_b"],
                    p["fc2_w"], p["fc2_b"],
                    p["fc3_w"], p["fc3_b"])


if __name__ == "__main__":
    key = jax.random.PRNGKey(0)
    k_x, k_p = jax.random.split(key)

    # Input must be 224x224 because the module pins fc1_input_size via a
    # 224x224 dummy forward in __init__. Keep batch small.
    x = jax.random.normal(k_x, (2, 3, 224, 224), dtype=jnp.float32)
    params = init_params(k_p, output_size=4, fc1_input_size=64 * 6 * 6)

    out = jax.jit(cnn_forward)(x, params)
    out = jax.block_until_ready(out)

    assert out.shape == (2, 4), out.shape
    assert bool(jnp.all(jnp.isfinite(out)))
    # log_softmax self-consistency: logsumexp of each row must be ~0.
    lse = jnp.log(jnp.sum(jnp.exp(out), axis=1))
    assert bool(jnp.all(jnp.abs(lse) < 1e-4)), lse

    print("KERNEL_OK")
</pallas_src>

<mosaic_0001>
module attributes {stable_mosaic.version = 11 : i64} {
  func.func @_conv_pool_kernel(%arg0: i32, %arg1: memref<16x75xbf16, #tpu.memory_space<vmem>>, %arg2: memref<4x75x3072xbf16, #tpu.memory_space<vmem>>, %arg3: memref<16x1xf32, #tpu.memory_space<vmem>>, %arg4: memref<16x3072xbf16, #tpu.memory_space<vmem>>) attributes {dimension_semantics = [#tpu.dimension_semantics<parallel>], iteration_bounds = array<i64: 2>, scalar_prefetch = 0 : i64, scratch_operands = 0 : i64, tpu.core_type = #tpu.core_type<tc>, window_params = [{pipeline_mode = #tpu.pipeline_mode<synchronous>, transform_indices = @transform_0, window_bounds = array<i64: 16, 75>}, {transform_indices = @transform_1, window_bounds = array<i64: 4, 75, 3072>}, {pipeline_mode = #tpu.pipeline_mode<synchronous>, transform_indices = @transform_2, window_bounds = array<i64: 16, 1>}, {transform_indices = @transform_3, window_bounds = array<i64: 16, 3072>}]} {
    %c0 = arith.constant 0 : index
    %c0_0 = arith.constant 0 : index
    %0 = vector.load %arg1[%c0, %c0_0] : memref<16x75xbf16, #tpu.memory_space<vmem>>, vector<16x75xbf16>
    %c0_1 = arith.constant 0 : index
    %c0_2 = arith.constant 0 : index
    %c0_3 = arith.constant 0 : index
    %1 = vector.load %arg2[%c0_1, %c0_2, %c0_3] : memref<4x75x3072xbf16, #tpu.memory_space<vmem>>, vector<1x75x3072xbf16>
    %2 = vector.shape_cast %1 : vector<1x75x3072xbf16> to vector<75x3072xbf16>
    %cst = arith.constant dense<0.000000e+00> : vector<16x3072xf32>
    %3 = tpu.matmul %0, %2, %cst {dimension_numbers = #tpu.dot_dimension_numbers<[1], [0], [0], [1], [0, 0, 1, 1], [], []>} : vector<16x75xbf16>, vector<75x3072xbf16>, vector<16x3072xf32> -> vector<16x3072xf32>
    %c1 = arith.constant 1 : index
    %c0_4 = arith.constant 0 : index
    %c0_5 = arith.constant 0 : index
    %4 = vector.load %arg2[%c1, %c0_4, %c0_5] : memref<4x75x3072xbf16, #tpu.memory_space<vmem>>, vector<1x75x3072xbf16>
    %5 = vector.shape_cast %4 : vector<1x75x3072xbf16> to vector<75x3072xbf16>
    %cst_6 = arith.constant dense<0.000000e+00> : vector<16x3072xf32>
    %6 = tpu.matmul %0, %5, %cst_6 {dimension_numbers = #tpu.dot_dimension_numbers<[1], [0], [0], [1], [0, 0, 1, 1], [], []>} : vector<16x75xbf16>, vector<75x3072xbf16>, vector<16x3072xf32> -> vector<16x3072xf32>
    %c2 = arith.constant 2 : index
    %c0_7 = arith.constant 0 : index
    %c0_8 = arith.constant 0 : index
    %7 = vector.load %arg2[%c2, %c0_7, %c0_8] : memref<4x75x3072xbf16, #tpu.memory_space<vmem>>, vector<1x75x3072xbf16>
    %8 = vector.shape_cast %7 : vector<1x75x3072xbf16> to vector<75x3072xbf16>
    %cst_9 = arith.constant dense<0.000000e+00> : vector<16x3072xf32>
    %9 = tpu.matmul %0, %8, %cst_9 {dimension_numbers = #tpu.dot_dimension_numbers<[1], [0], [0], [1], [0, 0, 1, 1], [], []>} : vector<16x75xbf16>, vector<75x3072xbf16>, vector<16x3072xf32> -> vector<16x3072xf32>
    %c3 = arith.constant 3 : index
    %c0_10 = arith.constant 0 : index
    %c0_11 = arith.constant 0 : index
    %10 = vector.load %arg2[%c3, %c0_10, %c0_11] : memref<4x75x3072xbf16, #tpu.memory_space<vmem>>, vector<1x75x3072xbf16>
    %11 = vector.shape_cast %10 : vector<1x75x3072xbf16> to vector<75x3072xbf16>
    %cst_12 = arith.constant dense<0.000000e+00> : vector<16x3072xf32>
    %12 = tpu.matmul %0, %11, %cst_12 {dimension_numbers = #tpu.dot_dimension_numbers<[1], [0], [0], [1], [0, 0, 1, 1], [], []>} : vector<16x75xbf16>, vector<75x3072xbf16>, vector<16x3072xf32> -> vector<16x3072xf32>
    %13 = arith.maximumf %3, %6 : vector<16x3072xf32>
    %14 = arith.maximumf %9, %12 : vector<16x3072xf32>
    %15 = arith.maximumf %13, %14 : vector<16x3072xf32>
    %c0_13 = arith.constant 0 : index
    %c0_14 = arith.constant 0 : index
    %16 = vector.load %arg3[%c0_13, %c0_14] : memref<16x1xf32, #tpu.memory_space<vmem>>, vector<16x1xf32>
    %17 = vector.broadcast %16 : vector<16x1xf32> to vector<16x3072xf32>
    %18 = arith.addf %15, %17 : vector<16x3072xf32>
    %cst_15 = arith.constant 0.000000e+00 : f32
    %19 = vector.broadcast %cst_15 : f32 to vector<16x3072xf32>
    %20 = arith.maximumf %18, %19 : vector<16x3072xf32>
    %21 = arith.truncf %20 : vector<16x3072xf32> to vector<16x3072xbf16>
    %c0_16 = arith.constant 0 : index
    %c0_17 = arith.constant 0 : index
    %22 = vector.load %arg4[%c0_16, %c0_17] : memref<16x3072xbf16, #tpu.memory_space<vmem>>, vector<16x3072xbf16>
    tpu.vector_store %arg4[%c0_16, %c0_17], %21 {strides = array<i32>} : memref<16x3072xbf16, #tpu.memory_space<vmem>>, vector<16x3072xbf16>,
    return
  }
  func.func @transform_0(%arg0: i32) -> (i32, i32) {
    %c0_i32 = arith.constant 0 : i32
    %c0_i32_0 = arith.constant 0 : i32
    %c0_i32_1 = arith.constant 0 : i32
    return %c0_i32, %c0_i32_0 : i32, i32
  }
  func.func @transform_1(%arg0: i32) -> (i32, i32, i32) {
    %c0_i32 = arith.constant 0 : i32
    %c0_i32_0 = arith.constant 0 : i32
    %c0_i32_1 = arith.constant 0 : i32
    return %c0_i32, %c0_i32_0, %arg0 : i32, i32, i32
  }
  func.func @transform_2(%arg0: i32) -> (i32, i32) {
    %c0_i32 = arith.constant 0 : i32
    %c0_i32_0 = arith.constant 0 : i32
    %c0_i32_1 = arith.constant 0 : i32
    return %c0_i32, %c0_i32_0 : i32, i32
  }
  func.func @transform_3(%arg0: i32) -> (i32, i32) {
    %c0_i32 = arith.constant 0 : i32
    %c0_i32_0 = arith.constant 0 : i32
    return %c0_i32, %arg0 : i32, i32
  }
}

module attributes {stable_mosaic.version = 11 : i64} {
  func.func @_conv_pool_kernel(%arg0: i32, %arg1: memref<32x400xbf16, #tpu.memory_space<vmem>>, %arg2: memref<4x400x338xbf16, #tpu.memory_space<vmem>>, %arg3: memref<32x1xf32, #tpu.memory_space<vmem>>, %arg4: memref<32x338xbf16, #tpu.memory_space<vmem>>) attributes {dimension_semantics = [#tpu.dimension_semantics<parallel>], iteration_bounds = array<i64: 1>, scalar_prefetch = 0 : i64, scratch_operands = 0 : i64, tpu.core_type = #tpu.core_type<tc>, window_params = [{pipeline_mode = #tpu.pipeline_mode<synchronous>, transform_indices = @transform_0, window_bounds = array<i64: 32, 400>}, {transform_indices = @transform_1, window_bounds = array<i64: 4, 400, 338>}, {pipeline_mode = #tpu.pipeline_mode<synchronous>, transform_indices = @transform_2, window_bounds = array<i64: 32, 1>}, {transform_indices = @transform_3, window_bounds = array<i64: 32, 338>}]} {
    %c0 = arith.constant 0 : index
    %c0_0 = arith.constant 0 : index
    %0 = vector.load %arg1[%c0, %c0_0] : memref<32x400xbf16, #tpu.memory_space<vmem>>, vector<32x400xbf16>
    %c0_1 = arith.constant 0 : index
    %c0_2 = arith.constant 0 : index
    %c0_3 = arith.constant 0 : index
    %1 = vector.load %arg2[%c0_1, %c0_2, %c0_3] : memref<4x400x338xbf16, #tpu.memory_space<vmem>>, vector<1x400x338xbf16>
    %2 = vector.shape_cast %1 : vector<1x400x338xbf16> to vector<400x338xbf16>
    %cst = arith.constant dense<0.000000e+00> : vector<32x338xf32>
    %3 = tpu.matmul %0, %2, %cst {dimension_numbers = #tpu.dot_dimension_numbers<[1], [0], [0], [1], [0, 0, 1, 1], [], []>} : vector<32x400xbf16>, vector<400x338xbf16>, vector<32x338xf32> -> vector<32x338xf32>
    %c1 = arith.constant 1 : index
    %c0_4 = arith.constant 0 : index
    %c0_5 = arith.constant 0 : index
    %4 = vector.load %arg2[%c1, %c0_4, %c0_5] : memref<4x400x338xbf16, #tpu.memory_space<vmem>>, vector<1x400x338xbf16>
    %5 = vector.shape_cast %4 : vector<1x400x338xbf16> to vector<400x338xbf16>
    %cst_6 = arith.constant dense<0.000000e+00> : vector<32x338xf32>
    %6 = tpu.matmul %0, %5, %cst_6 {dimension_numbers = #tpu.dot_dimension_numbers<[1], [0], [0], [1], [0, 0, 1, 1], [], []>} : vector<32x400xbf16>, vector<400x338xbf16>, vector<32x338xf32> -> vector<32x338xf32>
    %c2 = arith.constant 2 : index
    %c0_7 = arith.constant 0 : index
    %c0_8 = arith.constant 0 : index
    %7 = vector.load %arg2[%c2, %c0_7, %c0_8] : memref<4x400x338xbf16, #tpu.memory_space<vmem>>, vector<1x400x338xbf16>
    %8 = vector.shape_cast %7 : vector<1x400x338xbf16> to vector<400x338xbf16>
    %cst_9 = arith.constant dense<0.000000e+00> : vector<32x338xf32>
    %9 = tpu.matmul %0, %8, %cst_9 {dimension_numbers = #tpu.dot_dimension_numbers<[1], [0], [0], [1], [0, 0, 1, 1], [], []>} : vector<32x400xbf16>, vector<400x338xbf16>, vector<32x338xf32> -> vector<32x338xf32>
    %c3 = arith.constant 3 : index
    %c0_10 = arith.constant 0 : index
    %c0_11 = arith.constant 0 : index
    %10 = vector.load %arg2[%c3, %c0_10, %c0_11] : memref<4x400x338xbf16, #tpu.memory_space<vmem>>, vector<1x400x338xbf16>
    %11 = vector.shape_cast %10 : vector<1x400x338xbf16> to vector<400x338xbf16>
    %cst_12 = arith.constant dense<0.000000e+00> : vector<32x338xf32>
    %12 = tpu.matmul %0, %11, %cst_12 {dimension_numbers = #tpu.dot_dimension_numbers<[1], [0], [0], [1], [0, 0, 1, 1], [], []>} : vector<32x400xbf16>, vector<400x338xbf16>, vector<32x338xf32> -> vector<32x338xf32>
    %13 = arith.maximumf %3, %6 : vector<32x338xf32>
    %14 = arith.maximumf %9, %12 : vector<32x338xf32>
    %15 = arith.maximumf %13, %14 : vector<32x338xf32>
    %c0_13 = arith.constant 0 : index
    %c0_14 = arith.constant 0 : index
    %16 = vector.load %arg3[%c0_13, %c0_14] : memref<32x1xf32, #tpu.memory_space<vmem>>, vector<32x1xf32>
    %17 = vector.broadcast %16 : vector<32x1xf32> to vector<32x338xf32>
    %18 = arith.addf %15, %17 : vector<32x338xf32>
    %cst_15 = arith.constant 0.000000e+00 : f32
    %19 = vector.broadcast %cst_15 : f32 to vector<32x338xf32>
    %20 = arith.maximumf %18, %19 : vector<32x338xf32>
    %21 = arith.truncf %20 : vector<32x338xf32> to vector<32x338xbf16>
    %c0_16 = arith.constant 0 : index
    %c0_17 = arith.constant 0 : index
    %22 = vector.load %arg4[%c0_16, %c0_17] : memref<32x338xbf16, #tpu.memory_space<vmem>>, vector<32x338xbf16>
    tpu.vector_store %arg4[%c0_16, %c0_17], %21 {strides = array<i32>} : memref<32x338xbf16, #tpu.memory_space<vmem>>, vector<32x338xbf16>,
    return
  }
  func.func @transform_0(%arg0: i32) -> (i32, i32) {
    %c0_i32 = arith.constant 0 : i32
    %c0_i32_0 = arith.constant 0 : i32
    %c0_i32_1 = arith.constant 0 : i32
    return %c0_i32, %c0_i32_0 : i32, i32
  }
  func.func @transform_1(%arg0: i32) -> (i32, i32, i32) {
    %c0_i32 = arith.constant 0 : i32
    %c0_i32_0 = arith.constant 0 : i32
    %c0_i32_1 = arith.constant 0 : i32
    return %c0_i32, %c0_i32_0, %arg0 : i32, i32, i32
  }
  func.func @transform_2(%arg0: i32) -> (i32, i32) {
    %c0_i32 = arith.constant 0 : i32
    %c0_i32_0 = arith.constant 0 : i32
    %c0_i32_1 = arith.constant 0 : i32
    return %c0_i32, %c0_i32_0 : i32, i32
  }
  func.func @transform_3(%arg0: i32) -> (i32, i32) {
    %c0_i32 = arith.constant 0 : i32
    %c0_i32_0 = arith.constant 0 : i32
    return %c0_i32, %arg0 : i32, i32
  }
}

module attributes {stable_mosaic.version = 11 : i64} {
  func.func @_conv_pool_kernel(%arg0: i32, %arg1: memref<64x288xbf16, #tpu.memory_space<vmem>>, %arg2: memref<4x288x72xbf16, #tpu.memory_space<vmem>>, %arg3: memref<64x1xf32, #tpu.memory_space<vmem>>, %arg4: memref<64x72xbf16, #tpu.memory_space<vmem>>) attributes {dimension_semantics = [#tpu.dimension_semantics<parallel>], iteration_bounds = array<i64: 1>, scalar_prefetch = 0 : i64, scratch_operands = 0 : i64, tpu.core_type = #tpu.core_type<tc>, window_params = [{pipeline_mode = #tpu.pipeline_mode<synchronous>, transform_indices = @transform_0, window_bounds = array<i64: 64, 288>}, {transform_indices = @transform_1, window_bounds = array<i64: 4, 288, 72>}, {pipeline_mode = #tpu.pipeline_mode<synchronous>, transform_indices = @transform_2, window_bounds = array<i64: 64, 1>}, {transform_indices = @transform_3, window_bounds = array<i64: 64, 72>}]} {
    %c0 = arith.constant 0 : index
    %c0_0 = arith.constant 0 : index
    %0 = vector.load %arg1[%c0, %c0_0] : memref<64x288xbf16, #tpu.memory_space<vmem>>, vector<64x288xbf16>
    %c0_1 = arith.constant 0 : index
    %c0_2 = arith.constant 0 : index
    %c0_3 = arith.constant 0 : index
    %1 = vector.load %arg2[%c0_1, %c0_2, %c0_3] : memref<4x288x72xbf16, #tpu.memory_space<vmem>>, vector<1x288x72xbf16>
    %2 = vector.shape_cast %1 : vector<1x288x72xbf16> to vector<288x72xbf16>
    %cst = arith.constant dense<0.000000e+00> : vector<64x72xf32>
    %3 = tpu.matmul %0, %2, %cst {dimension_numbers = #tpu.dot_dimension_numbers<[1], [0], [0], [1], [0, 0, 1, 1], [], []>} : vector<64x288xbf16>, vector<288x72xbf16>, vector<64x72xf32> -> vector<64x72xf32>
    %c1 = arith.constant 1 : index
    %c0_4 = arith.constant 0 : index
    %c0_5 = arith.constant 0 : index
    %4 = vector.load %arg2[%c1, %c0_4, %c0_5] : memref<4x288x72xbf16, #tpu.memory_space<vmem>>, vector<1x288x72xbf16>
    %5 = vector.shape_cast %4 : vector<1x288x72xbf16> to vector<288x72xbf16>
    %cst_6 = arith.constant dense<0.000000e+00> : vector<64x72xf32>
    %6 = tpu.matmul %0, %5, %cst_6 {dimension_numbers = #tpu.dot_dimension_numbers<[1], [0], [0], [1], [0, 0, 1, 1], [], []>} : vector<64x288xbf16>, vector<288x72xbf16>, vector<64x72xf32> -> vector<64x72xf32>
    %c2 = arith.constant 2 : index
    %c0_7 = arith.constant 0 : index
    %c0_8 = arith.constant 0 : index
    %7 = vector.load %arg2[%c2, %c0_7, %c0_8] : memref<4x288x72xbf16, #tpu.memory_space<vmem>>, vector<1x288x72xbf16>
    %8 = vector.shape_cast %7 : vector<1x288x72xbf16> to vector<288x72xbf16>
    %cst_9 = arith.constant dense<0.000000e+00> : vector<64x72xf32>
    %9 = tpu.matmul %0, %8, %cst_9 {dimension_numbers = #tpu.dot_dimension_numbers<[1], [0], [0], [1], [0, 0, 1, 1], [], []>} : vector<64x288xbf16>, vector<288x72xbf16>, vector<64x72xf32> -> vector<64x72xf32>
    %c3 = arith.constant 3 : index
    %c0_10 = arith.constant 0 : index
    %c0_11 = arith.constant 0 : index
    %10 = vector.load %arg2[%c3, %c0_10, %c0_11] : memref<4x288x72xbf16, #tpu.memory_space<vmem>>, vector<1x288x72xbf16>
    %11 = vector.shape_cast %10 : vector<1x288x72xbf16> to vector<288x72xbf16>
    %cst_12 = arith.constant dense<0.000000e+00> : vector<64x72xf32>
    %12 = tpu.matmul %0, %11, %cst_12 {dimension_numbers = #tpu.dot_dimension_numbers<[1], [0], [0], [1], [0, 0, 1, 1], [], []>} : vector<64x288xbf16>, vector<288x72xbf16>, vector<64x72xf32> -> vector<64x72xf32>
    %13 = arith.maximumf %3, %6 : vector<64x72xf32>
    %14 = arith.maximumf %9, %12 : vector<64x72xf32>
    %15 = arith.maximumf %13, %14 : vector<64x72xf32>
    %c0_13 = arith.constant 0 : index
    %c0_14 = arith.constant 0 : index
    %16 = vector.load %arg3[%c0_13, %c0_14] : memref<64x1xf32, #tpu.memory_space<vmem>>, vector<64x1xf32>
    %17 = vector.broadcast %16 : vector<64x1xf32> to vector<64x72xf32>
    %18 = arith.addf %15, %17 : vector<64x72xf32>
    %cst_15 = arith.constant 0.000000e+00 : f32
    %19 = vector.broadcast %cst_15 : f32 to vector<64x72xf32>
    %20 = arith.maximumf %18, %19 : vector<64x72xf32>
    %21 = arith.truncf %20 : vector<64x72xf32> to vector<64x72xbf16>
    %c0_16 = arith.constant 0 : index
    %c0_17 = arith.constant 0 : index
    %22 = vector.load %arg4[%c0_16, %c0_17] : memref<64x72xbf16, #tpu.memory_space<vmem>>, vector<64x72xbf16>
    tpu.vector_store %arg4[%c0_16, %c0_17], %21 {strides = array<i32>} : memref<64x72xbf16, #tpu.memory_space<vmem>>, vector<64x72xbf16>,
    return
  }
  func.func @transform_0(%arg0: i32) -> (i32, i32) {
    %c0_i32 = arith.constant 0 : i32
    %c0_i32_0 = arith.constant 0 : i32
    %c0_i32_1 = arith.constant 0 : i32
    return %c0_i32, %c0_i32_0 : i32, i32
  }
  func.func @transform_1(%arg0: i32) -> (i32, i32, i32) {
    %c0_i32 = arith.constant 0 : i32
    %c0_i32_0 = arith.constant 0 : i32
    %c0_i32_1 = arith.constant 0 : i32
    return %c0_i32, %c0_i32_0, %arg0 : i32, i32, i32
  }
  func.func @transform_2(%arg0: i32) -> (i32, i32) {
    %c0_i32 = arith.constant 0 : i32
    %c0_i32_0 = arith.constant 0 : i32
    %c0_i32_1 = arith.constant 0 : i32
    return %c0_i32, %c0_i32_0 : i32, i32
  }
  func.func @transform_3(%arg0: i32) -> (i32, i32) {
    %c0_i32 = arith.constant 0 : i32
    %c0_i32_0 = arith.constant 0 : i32
    return %c0_i32, %arg0 : i32, i32
  }
}

module attributes {stable_mosaic.version = 11 : i64} {
  func.func @_mlp_kernel(%arg0: i32, %arg1: memref<2x2304xbf16, #tpu.memory_space<vmem>>, %arg2: memref<2304x500xbf16, #tpu.memory_space<vmem>>, %arg3: memref<1x500xf32, #tpu.memory_space<vmem>>, %arg4: memref<500x50xbf16, #tpu.memory_space<vmem>>, %arg5: memref<1x50xf32, #tpu.memory_space<vmem>>, %arg6: memref<50x4xbf16, #tpu.memory_space<vmem>>, %arg7: memref<1x4xf32, #tpu.memory_space<vmem>>, %arg8: memref<2x4xf32, #tpu.memory_space<vmem>>) attributes {dimension_semantics = [#tpu.dimension_semantics<arbitrary>], iteration_bounds = array<i64: 1>, scalar_prefetch = 0 : i64, scratch_operands = 0 : i64, tpu.core_type = #tpu.core_type<tc>, window_params = [{pipeline_mode = #tpu.pipeline_mode<synchronous>, transform_indices = @transform_0, window_bounds = array<i64: 2, 2304>}, {pipeline_mode = #tpu.pipeline_mode<synchronous>, transform_indices = @transform_1, window_bounds = array<i64: 2304, 500>}, {pipeline_mode = #tpu.pipeline_mode<synchronous>, transform_indices = @transform_2, window_bounds = array<i64: 1, 500>}, {pipeline_mode = #tpu.pipeline_mode<synchronous>, transform_indices = @transform_3, window_bounds = array<i64: 500, 50>}, {pipeline_mode = #tpu.pipeline_mode<synchronous>, transform_indices = @transform_4, window_bounds = array<i64: 1, 50>}, {pipeline_mode = #tpu.pipeline_mode<synchronous>, transform_indices = @transform_5, window_bounds = array<i64: 50, 4>}, {pipeline_mode = #tpu.pipeline_mode<synchronous>, transform_indices = @transform_6, window_bounds = array<i64: 1, 4>}, {pipeline_mode = #tpu.pipeline_mode<synchronous>, transform_indices = @transform_7, window_bounds = array<i64: 2, 4>}]} {
    %c0 = arith.constant 0 : index
    %c0_0 = arith.constant 0 : index
    %0 = vector.load %arg1[%c0, %c0_0] : memref<2x2304xbf16, #tpu.memory_space<vmem>>, vector<2x2304xbf16>
    %c0_1 = arith.constant 0 : index
    %c0_2 = arith.constant 0 : index
    %1 = vector.load %arg2[%c0_1, %c0_2] : memref<2304x500xbf16, #tpu.memory_space<vmem>>, vector<2304x500xbf16>
    %cst = arith.constant dense<0.000000e+00> : vector<2x500xf32>
    %2 = tpu.matmul %0, %1, %cst {dimension_numbers = #tpu.dot_dimension_numbers<[1], [0], [0], [1], [0, 0, 1, 1], [], []>} : vector<2x2304xbf16>, vector<2304x500xbf16>, vector<2x500xf32> -> vector<2x500xf32>
    %c0_3 = arith.constant 0 : index
    %c0_4 = arith.constant 0 : index
    %3 = vector.load %arg3[%c0_3, %c0_4] : memref<1x500xf32, #tpu.memory_space<vmem>>, vector<1x500xf32>
    %4 = vector.broadcast %3 : vector<1x500xf32> to vector<2x500xf32>
    %5 = arith.addf %2, %4 : vector<2x500xf32>
    %cst_5 = arith.constant 0.000000e+00 : f32
    %6 = vector.broadcast %cst_5 : f32 to vector<2x500xf32>
    %7 = arith.maximumf %5, %6 : vector<2x500xf32>
    %8 = arith.truncf %7 : vector<2x500xf32> to vector<2x500xbf16>
    %c0_6 = arith.constant 0 : index
    %c0_7 = arith.constant 0 : index
    %9 = vector.load %arg4[%c0_6, %c0_7] : memref<500x50xbf16, #tpu.memory_space<vmem>>, vector<500x50xbf16>
    %cst_8 = arith.constant dense<0.000000e+00> : vector<2x50xf32>
    %10 = tpu.matmul %8, %9, %cst_8 {dimension_numbers = #tpu.dot_dimension_numbers<[1], [0], [0], [1], [0, 0, 1, 1], [], []>} : vector<2x500xbf16>, vector<500x50xbf16>, vector<2x50xf32> -> vector<2x50xf32>
    %c0_9 = arith.constant 0 : index
    %c0_10 = arith.constant 0 : index
    %11 = vector.load %arg5[%c0_9, %c0_10] : memref<1x50xf32, #tpu.memory_space<vmem>>, vector<1x50xf32>
    %12 = vector.broadcast %11 : vector<1x50xf32> to vector<2x50xf32>
    %13 = arith.addf %10, %12 : vector<2x50xf32>
    %cst_11 = arith.constant 0.000000e+00 : f32
    %14 = vector.broadcast %cst_11 : f32 to vector<2x50xf32>
    %15 = arith.maximumf %13, %14 : vector<2x50xf32>
    %16 = arith.truncf %15 : vector<2x50xf32> to vector<2x50xbf16>
    %c0_12 = arith.constant 0 : index
    %c0_13 = arith.constant 0 : index
    %17 = vector.load %arg6[%c0_12, %c0_13] : memref<50x4xbf16, #tpu.memory_space<vmem>>, vector<50x4xbf16>
    %cst_14 = arith.constant dense<0.000000e+00> : vector<2x4xf32>
    %18 = tpu.matmul %16, %17, %cst_14 {dimension_numbers = #tpu.dot_dimension_numbers<[1], [0], [0], [1], [0, 0, 1, 1], [], []>} : vector<2x50xbf16>, vector<50x4xbf16>, vector<2x4xf32> -> vector<2x4xf32>
    %c0_15 = arith.constant 0 : index
    %c0_16 = arith.constant 0 : index
    %19 = vector.load %arg7[%c0_15, %c0_16] : memref<1x4xf32, #tpu.memory_space<vmem>>, vector<1x4xf32>
    %20 = vector.broadcast %19 : vector<1x4xf32> to vector<2x4xf32>
    %21 = arith.addf %18, %20 : vector<2x4xf32>
    %cst_17 = arith.constant dense<0xFF800000> : vector<2xf32>
    %22 = vector.multi_reduction <maximumf>, %21, %cst_17 [1] : vector<2x4xf32> to vector<2xf32>
    %23 = vector.shape_cast %22 : vector<2xf32> to vector<2x1xf32>
    %24 = vector.broadcast %23 : vector<2x1xf32> to vector<2x4xf32>
    %25 = arith.subf %21, %24 : vector<2x4xf32>
    %26 = math.exp %25 : vector<2x4xf32>
    %cst_18 = arith.constant dense<0.000000e+00> : vector<2xf32>
    %27 = vector.multi_reduction <add>, %26, %cst_18 [1] : vector<2x4xf32> to vector<2xf32>
    %28 = vector.shape_cast %27 : vector<2xf32> to vector<2x1xf32>
    %29 = math.log %28 : vector<2x1xf32>
    %30 = vector.broadcast %29 : vector<2x1xf32> to vector<2x4xf32>
    %31 = arith.subf %25, %30 : vector<2x4xf32>
    %c0_19 = arith.constant 0 : index
    %c0_20 = arith.constant 0 : index
    %32 = vector.load %arg8[%c0_19, %c0_20] : memref<2x4xf32, #tpu.memory_space<vmem>>, vector<2x4xf32>
    tpu.vector_store %arg8[%c0_19, %c0_20], %31 {strides = array<i32>} : memref<2x4xf32, #tpu.memory_space<vmem>>, vector<2x4xf32>,
    return
  }
  func.func @transform_0(%arg0: i32) -> (i32, i32) {
    %c0_i32 = arith.constant 0 : i32
    %c0_i32_0 = arith.constant 0 : i32
    %c0_i32_1 = arith.constant 0 : i32
    return %c0_i32, %c0_i32_0 : i32, i32
  }
  func.func @transform_1(%arg0: i32) -> (i32, i32) {
    %c0_i32 = arith.constant 0 : i32
    %c0_i32_0 = arith.constant 0 : i32
    %c0_i32_1 = arith.constant 0 : i32
    return %c0_i32, %c0_i32_0 : i32, i32
  }
  func.func @transform_2(%arg0: i32) -> (i32, i32) {
    %c0_i32 = arith.constant 0 : i32
    %c0_i32_0 = arith.constant 0 : i32
    %c0_i32_1 = arith.constant 0 : i32
    return %c0_i32, %c0_i32_0 : i32, i32
  }
  func.func @transform_3(%arg0: i32) -> (i32, i32) {
    %c0_i32 = arith.constant 0 : i32
    %c0_i32_0 = arith.constant 0 : i32
    %c0_i32_1 = arith.constant 0 : i32
    return %c0_i32, %c0_i32_0 : i32, i32
  }
  func.func @transform_4(%arg0: i32) -> (i32, i32) {
    %c0_i32 = arith.constant 0 : i32
    %c0_i32_0 = arith.constant 0 : i32
    %c0_i32_1 = arith.constant 0 : i32
    return %c0_i32, %c0_i32_0 : i32, i32
  }
  func.func @transform_5(%arg0: i32) -> (i32, i32) {
    %c0_i32 = arith.constant 0 : i32
    %c0_i32_0 = arith.constant 0 : i32
    %c0_i32_1 = arith.constant 0 : i32
    return %c0_i32, %c0_i32_0 : i32, i32
  }
  func.func @transform_6(%arg0: i32) -> (i32, i32) {
    %c0_i32 = arith.constant 0 : i32
    %c0_i32_0 = arith.constant 0 : i32
    %c0_i32_1 = arith.constant 0 : i32
    return %c0_i32, %c0_i32_0 : i32, i32
  }
  func.func @transform_7(%arg0: i32) -> (i32, i32) {
    %c0_i32 = arith.constant 0 : i32
    %c0_i32_0 = arith.constant 0 : i32
    %c0_i32_1 = arith.constant 0 : i32
    return %c0_i32, %c0_i32_0 : i32, i32
  }
}

</mosaic_0001>

<bundles_post_ra>
// kernel: cnn_forward.4
= control target key start
LH: loop header
LB: loop body
LE: loop exit
PB: predicated region body
PF: predicated region fallthrough
CT: control target
= control target key end

     0   :  { %s7877_s12 = smov 0   ;;  %s7879_s13 = smov 0   ;;  %s10354_s0 = inlined_call_operand.vmem [shape: bf16[16,75], index: 0, kind: input, shape index: {}]   ;;  %s10355_s1 = inlined_call_operand.vmem [shape: bf16[4,75,6144], index: 1, kind: input, shape index: {}]   ;;  %s10356_s2 = inlined_call_operand.vmem [shape: f32[16,1], index: 2, kind: input, shape index: {}]   ;;  %s10357_s3 = inlined_call_operand.vmem [shape: bf16[16,6144], index: 3, kind: output, shape index: {}]  }
   0x1   :  { %s7881_s14 = smov 0  }
   0x2 LB: > { %s6849_s15 = sadd.s32 4294967295, %s7853_s14   ;;  %s7894_s16 = sadd.s32 1, %s7853_s14   ;;  %s7853_s14 = sphi %s7881_s14, %s10686_s14   ;;  %s7849_s13 = sphi %s7879_s13, %s10685_s13   ;;  %s7845_s12 = sphi %s7877_s12, %s10684_s12  }
   0x3   : > { %s38_s17 = ssub.s32 %s7853_s14, %s7894_s16  ;;  %s41_s18 = sadd.s32 1, %s7849_s13 }
   0x4   : > { %p39_p0 = scmp.eq.s32.totalorder %s38_s17, 0  ;;  %p48_p1 = scmp.ne.s32.totalorder %s7849_s13, %s7845_s12 }
   0x5   : > { %p49_p2 = scmp.eq.s32.totalorder %s7853_s14, 0  ;;  %p99_p3 = scmp.eq.s32.totalorder %s6849_s15, 1 }
   0x6   : > { %s7905_s19 = scalar_select %p39_p0, %s7849_s13, %s41_s18  }
   0x7   : > { %p50_p4 = por %p49_p2, %p48_p1  ;;  %p7907_p5 = por %p99_p3, %p48_p1 }
   0x8   : > { %p6852_p6 = scmp.ge.s32.totalorder %s7853_s14, 2 }
   0xa   : > { %127 = sbr.rel (%p6852_p6) target bundleno = 262 (0x106), region = 24 }
  0x11   : > { %130 = sbr.rel (!%p50_p4) target bundleno = 262 (0x106), region = 28  ;;  %s132_s21 = sand.u32 (%p50_p4), 1, %s7849_s13  }
  0x12   : > { %s7771_s22 = smul.u32 (%p50_p4), 96, %s7853_s14 }
  0x13   : > { %s7797_s23 = smul.u32 (%p50_p4), 3840, %s132_s21 }
  0x14   : > { %s7917_s26 = scalar_lea.vmem (%p50_p4), %s10355_s1, %s7771_s22 }
  0x15   : > { %v150_v0 = vld [vmem:[%s7917_s26] sm:$0xff] (%p50_p4)  ;;  %v152_v1 = vld [vmem:[%s7917_s26 + $0x8] sm:$0xff] (%p50_p4)  ;;  %v154_v2 = vld [vmem:[%s7917_s26 + $0x10] sm:$0xff] (%p50_p4)  ;;  %s7922_s27 = scalar_lea.vmem (%p50_p4), [#allocation2], %s7797_s23 }
  0x16   : > { %151 = vst [vmem:[%s7922_s27] sm:$0xff] (%p50_p4), %v150_v0  ;;  %153 = vst [vmem:[%s7922_s27 + $0x8] sm:$0xff] (%p50_p4), %v152_v1  ;;  %v156_v3 = vld [vmem:[%s7917_s26 + $0x18] sm:$0xff] (%p50_p4)  ;;  %v158_v4 = vld [vmem:[%s7917_s26 + $0x20] sm:$0xff] (%p50_p4) }
  0x17   : > { %155 = vst [vmem:[%s7922_s27 + $0x10] sm:$0xff] (%p50_p4), %v154_v2  ;;  %v160_v5 = vld [vmem:[%s7917_s26 + $0x28] sm:$0xff] (%p50_p4)  ;;  %157 = vst [vmem:[%s7922_s27 + $0x18] sm:$0xff] (%p50_p4), %v156_v3  ;;  %v162_v6 = vld [vmem:[%s7917_s26 + $0x30] sm:$0xff] (%p50_p4) }
  0x18   : > { %159 = vst [vmem:[%s7922_s27 + $0x20] sm:$0xff] %v158_v4  ;;  %161 = vst [vmem:[%s7922_s27 + $0x28] sm:$0xff] %v160_v5  ;;  %v164_v7 = vld [vmem:[%s7917_s26 + $0x38] sm:$0xff]  ;;  %v166_v8 = vld [vmem:[%s7917_s26 + $0x40] sm:$0xff] }
  0x19   : > { %163 = vst [vmem:[%s7922_s27 + $0x30] sm:$0xff] %v162_v6  ;;  %165 = vst [vmem:[%s7922_s27 + $0x38] sm:$0xff] %v164_v7  ;;  %v168_v9 = vld [vmem:[%s7917_s26 + $0x48] sm:$0xff]  ;;  %v170_v10 = vld [vmem:[%s7917_s26 + $0x50] sm:$0xff] }
  0x1a   : > { %167 = vst [vmem:[%s7922_s27 + $0x40] sm:$0xff] %v166_v8  ;;  %v172_v11 = vld [vmem:[%s7917_s26 + $0x58] sm:$0xff]  ;;  %169 = vst [vmem:[%s7922_s27 + $0x48] sm:$0xff] %v168_v9  ;;  %v174_v12 = vld [vmem:[%s7917_s26 + $0xc0] sm:$0xff] }
  0x1b   : > { %171 = vst [vmem:[%s7922_s27 + $0x50] sm:$0xff] %v170_v10  ;;  %173 = vst [vmem:[%s7922_s27 + $0x58] sm:$0xff] %v172_v11  ;;  %v176_v13 = vld [vmem:[%s7917_s26 + $0xc8] sm:$0xff]  ;;  %v178_v14 = vld [vmem:[%s7917_s26 + $0xd0] sm:$0xff] }
  0x1c   : > { %175 = vst [vmem:[%s7922_s27 + $0x60] sm:$0xff] %v174_v12  ;;  %177 = vst [vmem:[%s7922_s27 + $0x68] sm:$0xff] %v176_v13  ;;  %v180_v15 = vld [vmem:[%s7917_s26 + $0xd8] sm:$0xff]  ;;  %v182_v16 = vld [vmem:[%s7917_s26 + $0xe0] sm:$0xff] }
  0x1d   : > { %179 = vst [vmem:[%s7922_s27 + $0x70] sm:$0xff] %v178_v14  ;;  %v184_v17 = vld [vmem:[%s7917_s26 + $0xe8] sm:$0xff]  ;;  %181 = vst [vmem:[%s7922_s27 + $0x78] sm:$0xff] %v180_v15  ;;  %v186_v18 = vld [vmem:[%s7917_s26 + $0xf0] sm:$0xff] }
  0x1e   : > { %183 = vst [vmem:[%s7922_s27 + $0x80] sm:$0xff] %v182_v16  ;;  %185 = vst [vmem:[%s7922_s27 + $0x88] sm:$0xff] %v184_v17  ;;  %v188_v19 = vld [vmem:[%s7917_s26 + $0xf8] sm:$0xff]  ;;  %v190_v20 = vld [vmem:[%s7917_s26 + $0x100] sm:$0xff] }
  0x1f   : > { %187 = vst [vmem:[%s7922_s27 + $0x90] sm:$0xff] %v186_v18  ;;  %189 = vst [vmem:[%s7922_s27 + $0x98] sm:$0xff] %v188_v19  ;;  %v192_v21 = vld [vmem:[%s7917_s26 + $0x108] sm:$0xff]  ;;  %v194_v22 = vld [vmem:[%s7917_s26 + $0x110] sm:$0xff] }
  0x20   : > { %191 = vst [vmem:[%s7922_s27 + $0xa0] sm:$0xff] %v190_v20  ;;  %v196_v23 = vld [vmem:[%s7917_s26 + $0x118] sm:$0xff]  ;;  %193 = vst [vmem:[%s7922_s27 + $0xa8] sm:$0xff] %v192_v21  ;;  %v198_v24 = vld [vmem:[%s7917_s26 + $0x180] sm:$0xff] }
  0x21   : > { %195 = vst [vmem:[%s7922_s27 + $0xb0] sm:$0xff] %v194_v22  ;;  %197 = vst [vmem:[%s7922_s27 + $0xb8] sm:$0xff] %v196_v23  ;;  %v200_v25 = vld [vmem:[%s7917_s26 + $0x188] sm:$0xff]  ;;  %v202_v26 = vld [vmem:[%s7917_s26 + $0x190] sm:$0xff] }
  0x22   : > { %199 = vst [vmem:[%s7922_s27 + $0xc0] sm:$0xff] %v198_v24  ;;  %201 = vst [vmem:[%s7922_s27 + $0xc8] sm:$0xff] %v200_v25  ;;  %v204_v27 = vld [vmem:[%s7917_s26 + $0x198] sm:$0xff]  ;;  %v206_v28 = vld [vmem:[%s7917_s26 + $0x1a0] sm:$0xff] }
  0x23   : > { %203 = vst [vmem:[%s7922_s27 + $0xd0] sm:$0xff] %v202_v26  ;;  %v208_v29 = vld [vmem:[%s7917_s26 + $0x1a8] sm:$0xff]  ;;  %205 = vst [vmem:[%s7922_s27 + $0xd8] sm:$0xff] %v204_v27  ;;  %v210_v30 = vld [vmem:[%s7917_s26 + $0x1b0] sm:$0xff] }
  0x24   : > { %207 = vst [vmem:[%s7922_s27 + $0xe0] sm:$0xff] %v206_v28  ;;  %209 = vst [vmem:[%s7922_s27 + $0xe8] sm:$0xff] %v208_v29  ;;  %v212_v31 = vld [vmem:[%s7917_s26 + $0x1b8] sm:$0xff]  ;;  %v214_v32 = vld [vmem:[%s7917_s26 + $0x1c0] sm:$0xff] }
  0x25   : > { %211 = vst [vmem:[%s7922_s27 + $0xf0] sm:$0xff] %v210_v30  ;;  %213 = vst [vmem:[%s7922_s27 + $0xf8] sm:$0xff] %v212_v31  ;;  %v216_v33 = vld [vmem:[%s7917_s26 + $0x1c8] sm:$0xff]  ;;  %v218_v34 = vld [vmem:[%s7917_s26 + $0x1d0] sm:$0xff] }
  0x26   : > { %215 = vst [vmem:[%s7922_s27 + $0x100] sm:$0xff] %v214_v32  ;;  %v220_v35 = vld [vmem:[%s7917_s26 + $0x1d8] sm:$0xff]  ;;  %217 = vst [vmem:[%s7922_s27 + $0x108] sm:$0xff] %v216_v33  ;;  %v222_v36 = vld [vmem:[%s7917_s26 + $0x240] sm:$0xff] }
  0x27   : > { %219 = vst [vmem:[%s7922_s27 + $0x110] sm:$0xff] %v218_v34  ;;  %221 = vst [vmem:[%s7922_s27 + $0x118] sm:$0xff] %v220_v35  ;;  %v224_v37 = vld [vmem:[%s7917_s26 + $0x248] sm:$0xff]  ;;  %v226_v38 = vld [vmem:[%s7917_s26 + $0x250] sm:$0xff] }
  0x28   : > { %223 = vst [vmem:[%s7922_s27 + $0x120] sm:$0xff] %v222_v36  ;;  %225 = vst [vmem:[%s7922_s27 + $0x128] sm:$0xff] %v224_v37  ;;  %v228_v39 = vld [vmem:[%s7917_s26 + $0x258] sm:$0xff]  ;;  %v230_v40 = vld [vmem:[%s7917_s26 + $0x260] sm:$0xff] }
  0x29   : > { %227 = vst [vmem:[%s7922_s27 + $0x130] sm:$0xff] %v226_v38  ;;  %v232_v41 = vld [vmem:[%s7917_s26 + $0x268] sm:$0xff]  ;;  %229 = vst [vmem:[%s7922_s27 + $0x138] sm:$0xff] %v228_v39  ;;  %v234_v42 = vld [vmem:[%s7917_s26 + $0x270] sm:$0xff] }
  0x2a   : > { %231 = vst [vmem:[%s7922_s27 + $0x140] sm:$0xff] %v230_v40  ;;  %233 = vst [vmem:[%s7922_s27 + $0x148] sm:$0xff] %v232_v41  ;;  %v236_v43 = vld [vmem:[%s7917_s26 + $0x278] sm:$0xff]  ;;  %v238_v44 = vld [vmem:[%s7917_s26 + $0x280] sm:$0xff] }
  0x2b   : > { %235 = vst [vmem:[%s7922_s27 + $0x150] sm:$0xff] %v234_v42  ;;  %237 = vst [vmem:[%s7922_s27 + $0x158] sm:$0xff] %v236_v43  ;;  %v240_v45 = vld [vmem:[%s7917_s26 + $0x288] sm:$0xff]  ;;  %v242_v46 = vld [vmem:[%s7917_s26 + $0x290] sm:$0xff] }
  0x2c   : > { %239 = vst [vmem:[%s7922_s27 + $0x160] sm:$0xff] %v238_v44  ;;  %v244_v47 = vld [vmem:[%s7917_s26 + $0x298] sm:$0xff]  ;;  %241 = vst [vmem:[%s7922_s27 + $0x168] sm:$0xff] %v240_v45  ;;  %v246_v48 = vld [vmem:[%s7917_s26 + $0x300] sm:$0xff] }
  0x2d   : > { %243 = vst [vmem:[%s7922_s27 + $0x170] sm:$0xff] %v242_v46  ;;  %245 = vst [vmem:[%s7922_s27 + $0x178] sm:$0xff] %v244_v47  ;;  %v248_v49 = vld [vmem:[%s7917_s26 + $0x308] sm:$0xff]  ;;  %v250_v50 = vld [vmem:[%s7917_s26 + $0x310] sm:$0xff] }
  0x2e   : > { %247 = vst [vmem:[%s7922_s27 + $0x180] sm:$0xff] %v246_v48  ;;  %249 = vst [vmem:[%s7922_s27 + $0x188] sm:$0xff] %v248_v49  ;;  %v252_v51 = vld [vmem:[%s7917_s26 + $0x318] sm:$0xff]  ;;  %v254_v52 = vld [vmem:[%s7917_s26 + $0x320] sm:$0xff] }
  0x2f   : > { %251 = vst [vmem:[%s7922_s27 + $0x190] sm:$0xff] %v250_v50  ;;  %v256_v53 = vld [vmem:[%s7917_s26 + $0x328] sm:$0xff]  ;;  %253 = vst [vmem:[%s7922_s27 + $0x198] sm:$0xff] %v252_v51  ;;  %v258_v54 = vld [vmem:[%s7917_s26 + $0x330] sm:$0xff] }
  0x30   : > { %255 = vst [vmem:[%s7922_s27 + $0x1a0] sm:$0xff] %v254_v52  ;;  %257 = vst [vmem:[%s7922_s27 + $0x1a8] sm:$0xff] %v256_v53  ;;  %v260_v55 = vld [vmem:[%s7917_s26 + $0x338] sm:$0xff]  ;;  %v262_v56 = vld [vmem:[%s7917_s26 + $0x340] sm:$0xff] }
  0x31   : > { %259 = vst [vmem:[%s7922_s27 + $0x1b0] sm:$0xff] %v258_v54  ;;  %261 = vst [vmem:[%s7922_s27 + $0x1b8] sm:$0xff] %v260_v55  ;;  %v264_v57 = vld [vmem:[%s7917_s26 + $0x348] sm:$0xff]  ;;  %v266_v58 = vld [vmem:[%s7917_s26 + $0x350] sm:$0xff] }
  0x32   : > { %263 = vst [vmem:[%s7922_s27 + $0x1c0] sm:$0xff] %v262_v56  ;;  %v268_v59 = vld [vmem:[%s7917_s26 + $0x358] sm:$0xff]  ;;  %265 = vst [vmem:[%s7922_s27 + $0x1c8] sm:$0xff] %v264_v57  ;;  %v270_v60 = vld [vmem:[%s7917_s26 + $0x3c0] sm:$0xff] }
  0x33   : > { %267 = vst [vmem:[%s7922_s27 + $0x1d0] sm:$0xff] %v266_v58  ;;  %269 = vst [vmem:[%s7922_s27 + $0x1d8] sm:$0xff] %v268_v59  ;;  %v272_v61 = vld [vmem:[%s7917_s26 + $0x3c8] sm:$0xff]  ;;  %v274_v62 = vld [vmem:[%s7917_s26 + $0x3d0] sm:$0xff] }
  0x34   : > { %271 = vst [vmem:[%s7922_s27 + $0x1e0] sm:$0xff] %v270_v60  ;;  %273 = vst [vmem:[%s7922_s27 + $0x1e8] sm:$0xff] %v272_v61  ;;  %v276_v63 = vld [vmem:[%s7917_s26 + $0x3d8] sm:$0xff]  ;;  %v278_v0 = vld [vmem:[%s7917_s26 + $0x3e0] sm:$0xff] }
  0x35   : > { %275 = vst [vmem:[%s7922_s27 + $0x1f0] sm:$0xff] %v274_v62  ;;  %v280_v1 = vld [vmem:[%s7917_s26 + $0x3e8] sm:$0xff]  ;;  %277 = vst [vmem:[%s7922_s27 + $0x1f8] sm:$0xff] %v276_v63  ;;  %v282_v2 = vld [vmem:[%s7917_s26 + $0x3f0] sm:$0xff] }
  0x36   : > { %279 = vst [vmem:[%s7922_s27 + $0x200] sm:$0xff] %v278_v0  ;;  %281 = vst [vmem:[%s7922_s27 + $0x208] sm:$0xff] %v280_v1  ;;  %v284_v3 = vld [vmem:[%s7917_s26 + $0x3f8] sm:$0xff]  ;;  %v286_v4 = vld [vmem:[%s7917_s26 + $0x400] sm:$0xff] }
  0x37   : > { %283 = vst [vmem:[%s7922_s27 + $0x210] sm:$0xff] %v282_v2  ;;  %285 = vst [vmem:[%s7922_s27 + $0x218] sm:$0xff] %v284_v3  ;;  %v288_v5 = vld [vmem:[%s7917_s26 + $0x408] sm:$0xff]  ;;  %v290_v6 = vld [vmem:[%s7917_s26 + $0x410] sm:$0xff] }
  0x38   : > { %287 = vst [vmem:[%s7922_s27 + $0x220] sm:$0xff] %v286_v4  ;;  %v292_v7 = vld [vmem:[%s7917_s26 + $0x418] sm:$0xff]  ;;  %289 = vst [vmem:[%s7922_s27 + $0x228] sm:$0xff] %v288_v5  ;;  %v294_v8 = vld [vmem:[%s7917_s26 + $0x480] sm:$0xff] }
  0x39   : > { %291 = vst [vmem:[%s7922_s27 + $0x230] sm:$0xff] %v290_v6  ;;  %293 = vst [vmem:[%s7922_s27 + $0x238] sm:$0xff] %v292_v7  ;;  %v296_v9 = vld [vmem:[%s7917_s26 + $0x488] sm:$0xff]  ;;  %v298_v10 = vld [vmem:[%s7917_s26 + $0x490] sm:$0xff] }
  0x3a   : > { %295 = vst [vmem:[%s7922_s27 + $0x240] sm:$0xff] %v294_v8  ;;  %297 = vst [vmem:[%s7922_s27 + $0x248] sm:$0xff] %v296_v9  ;;  %v300_v11 = vld [vmem:[%s7917_s26 + $0x498] sm:$0xff]  ;;  %v302_v12 = vld [vmem:[%s7917_s26 + $0x4a0] sm:$0xff] }
  0x3b   : > { %299 = vst [vmem:[%s7922_s27 + $0x250] sm:$0xff] %v298_v10  ;;  %v304_v13 = vld [vmem:[%s7917_s26 + $0x4a8] sm:$0xff]  ;;  %301 = vst [vmem:[%s7922_s27 + $0x258] sm:$0xff] %v300_v11  ;;  %v306_v14 = vld [vmem:[%s7917_s26 + $0x4b0] sm:$0xff] }
  0x3c   : > { %303 = vst [vmem:[%s7922_s27 + $0x260] sm:$0xff] %v302_v12  ;;  %305 = vst [vmem:[%s7922_s27 + $0x268] sm:$0xff] %v304_v13  ;;  %v308_v15 = vld [vmem:[%s7917_s26 + $0x4b8] sm:$0xff]  ;;  %v310_v16 = vld [vmem:[%s7917_s26 + $0x4c0] sm:$0xff] }
  0x3d   : > { %307 = vst [vmem:[%s7922_s27 + $0x270] sm:$0xff] %v306_v14  ;;  %309 = vst [vmem:[%s7922_s27 + $0x278] sm:$0xff] %v308_v15  ;;  %v312_v17 = vld [vmem:[%s7917_s26 + $0x4c8] sm:$0xff]  ;;  %v314_v18 = vld [vmem:[%s7917_s26 + $0x4d0] sm:$0xff] }
  0x3e   : > { %311 = vst [vmem:[%s7922_s27 + $0x280] sm:$0xff] %v310_v16  ;;  %v316_v19 = vld [vmem:[%s7917_s26 + $0x4d8] sm:$0xff]  ;;  %313 = vst [vmem:[%s7922_s27 + $0x288] sm:$0xff] %v312_v17  ;;  %v318_v20 = vld [vmem:[%s7917_s26 + $0x540] sm:$0xff] }
  0x3f   : > { %315 = vst [vmem:[%s7922_s27 + $0x290] sm:$0xff] %v314_v18  ;;  %317 = vst [vmem:[%s7922_s27 + $0x298] sm:$0xff] %v316_v19  ;;  %v320_v21 = vld [vmem:[%s7917_s26 + $0x548] sm:$0xff]  ;;  %v322_v22 = vld [vmem:[%s7917_s26 + $0x550] sm:$0xff] }
  0x40   : > { %319 = vst [vmem:[%s7922_s27 + $0x2a0] sm:$0xff] %v318_v20  ;;  %321 = vst [vmem:[%s7922_s27 + $0x2a8] sm:$0xff] %v320_v21  ;;  %v324_v23 = vld [vmem:[%s7917_s26 + $0x558] sm:$0xff]  ;;  %v326_v24 = vld [vmem:[%s7917_s26 + $0x560] sm:$0xff] }
  0x41   : > { %323 = vst [vmem:[%s7922_s27 + $0x2b0] sm:$0xff] %v322_v22  ;;  %v328_v25 = vld [vmem:[%s7917_s26 + $0x568] sm:$0xff]  ;;  %325 = vst [vmem:[%s7922_s27 + $0x2b8] sm:$0xff] %v324_v23  ;;  %v330_v26 = vld [vmem:[%s7917_s26 + $0x570] sm:$0xff] }
  0x42   : > { %327 = vst [vmem:[%s7922_s27 + $0x2c0] sm:$0xff] %v326_v24  ;;  %329 = vst [vmem:[%s7922_s27 + $0x2c8] sm:$0xff] %v328_v25  ;;  %v332_v27 = vld [vmem:[%s7917_s26 + $0x578] sm:$0xff]  ;;  %v334_v28 = vld [vmem:[%s7917_s26 + $0x580] sm:$0xff] }
  0x43   : > { %331 = vst [vmem:[%s7922_s27 + $0x2d0] sm:$0xff] %v330_v26  ;;  %333 = vst [vmem:[%s7922_s27 + $0x2d8] sm:$0xff] %v332_v27  ;;  %v336_v29 = vld [vmem:[%s7917_s26 + $0x588] sm:$0xff]  ;;  %v338_v30 = vld [vmem:[%s7917_s26 + $0x590] sm:$0xff] }
  0x44   : > { %335 = vst [vmem:[%s7922_s27 + $0x2e0] sm:$0xff] %v334_v28  ;;  %v340_v31 = vld [vmem:[%s7917_s26 + $0x598] sm:$0xff]  ;;  %337 = vst [vmem:[%s7922_s27 + $0x2e8] sm:$0xff] %v336_v29  ;;  %v342_v32 = vld [vmem:[%s7917_s26 + $0x600] sm:$0xff] }
  0x45   : > { %339 = vst [vmem:[%s7922_s27 + $0x2f0] sm:$0xff] %v338_v30  ;;  %341 = vst [vmem:[%s7922_s27 + $0x2f8] sm:$0xff] %v340_v31  ;;  %v344_v33 = vld [vmem:[%s7917_s26 + $0x608] sm:$0xff]  ;;  %v346_v34 = vld [vmem:[%s7917_s26 + $0x610] sm:$0xff] }
  0x46   : > { %343 = vst [vmem:[%s7922_s27 + $0x300] sm:$0xff] %v342_v32  ;;  %345 = vst [vmem:[%s7922_s27 + $0x308] sm:$0xff] %v344_v33  ;;  %v348_v35 = vld [vmem:[%s7917_s26 + $0x618] sm:$0xff]  ;;  %v350_v36 = vld [vmem:[%s7917_s26 + $0x620] sm:$0xff] }
  0x47   : > { %347 = vst [vmem:[%s7922_s27 + $0x310] sm:$0xff] %v346_v34  ;;  %v352_v37 = vld [vmem:[%s7917_s26 + $0x628] sm:$0xff]  ;;  %349 = vst [vmem:[%s7922_s27 + $0x318] sm:$0xff] %v348_v35  ;;  %v354_v38 = vld [vmem:[%s7917_s26 + $0x630] sm:$0xff] }
  0x48   : > { %351 = vst [vmem:[%s7922_s27 + $0x320] sm:$0xff] %v350_v36  ;;  %353 = vst [vmem:[%s7922_s27 + $0x328] sm:$0xff] %v352_v37  ;;  %v356_v39 = vld [vmem:[%s7917_s26 + $0x638] sm:$0xff]  ;;  %v358_v40 = vld [vmem:[%s7917_s26 + $0x640] sm:$0xff] }
  0x49   : > { %355 = vst [vmem:[%s7922_s27 + $0x330] sm:$0xff] %v354_v38  ;;  %357 = vst [vmem:[%s7922_s27 + $0x338] sm:$0xff] %v356_v39  ;;  %v360_v41 = vld [vmem:[%s7917_s26 + $0x648] sm:$0xff]  ;;  %v362_v42 = vld [vmem:[%s7917_s26 + $0x650] sm:$0xff] }
  0x4a   : > { %359 = vst [vmem:[%s7922_s27 + $0x340] sm:$0xff] %v358_v40  ;;  %v364_v43 = vld [vmem:[%s7917_s26 + $0x658] sm:$0xff]  ;;  %361 = vst [vmem:[%s7922_s27 + $0x348] sm:$0xff] %v360_v41  ;;  %v366_v44 = vld [vmem:[%s7917_s26 + $0x6c0] sm:$0xff] }
  0x4b   : > { %363 = vst [vmem:[%s7922_s27 + $0x350] sm:$0xff] %v362_v42  ;;  %365 = vst [vmem:[%s7922_s27 + $0x358] sm:$0xff] %v364_v43  ;;  %v368_v45 = vld [vmem:[%s7917_s26 + $0x6c8] sm:$0xff]  ;;  %v370_v46 = vld [vmem:[%s7917_s26 + $0x6d0] sm:$0xff] }
  0x4c   : > { %367 = vst [vmem:[%s7922_s27 + $0x360] sm:$0xff] %v366_v44  ;;  %369 = vst [vmem:[%s7922_s27 + $0x368] sm:$0xff] %v368_v45  ;;  %v372_v47 = vld [vmem:[%s7917_s26 + $0x6d8] sm:$0xff]  ;;  %v374_v48 = vld [vmem:[%s7917_s26 + $0x6e0] sm:$0xff] }
  0x4d   : > { %371 = vst [vmem:[%s7922_s27 + $0x370] sm:$0xff] %v370_v46  ;;  %v376_v49 = vld [vmem:[%s7917_s26 + $0x6e8] sm:$0xff]  ;;  %373 = vst [vmem:[%s7922_s27 + $0x378] sm:$0xff] %v372_v47  ;;  %v378_v50 = vld [vmem:[%s7917_s26 + $0x6f0] sm:$0xff] }
  0x4e   : > { %375 = vst [vmem:[%s7922_s27 + $0x380] sm:$0xff] %v374_v48  ;;  %377 = vst [vmem:[%s7922_s27 + $0x388] sm:$0xff] %v376_v49  ;;  %v380_v51 = vld [vmem:[%s7917_s26 + $0x6f8] sm:$0xff]  ;;  %v382_v52 = vld [vmem:[%s7917_s26 + $0x700] sm:$0xff] }
  0x4f   : > { %379 = vst [vmem:[%s7922_s27 + $0x390] sm:$0xff] %v378_v50  ;;  %381 = vst [vmem:[%s7922_s27 + $0x398] sm:$0xff] %v380_v51  ;;  %v384_v53 = vld [vmem:[%s7917_s26 + $0x708] sm:$0xff]  ;;  %v386_v54 = vld [vmem:[%s7917_s26 + $0x710] sm:$0xff] }
  0x50   : > { %383 = vst [vmem:[%s7922_s27 + $0x3a0] sm:$0xff] %v382_v52  ;;  %v388_v55 = vld [vmem:[%s7917_s26 + $0x718] sm:$0xff]  ;;  %385 = vst [vmem:[%s7922_s27 + $0x3a8] sm:$0xff] %v384_v53  ;;  %v390_v56 = vld [vmem:[%s7917_s26 + $0x780] sm:$0xff] }
  0x51   : > { %387 = vst [vmem:[%s7922_s27 + $0x3b0] sm:$0xff] %v386_v54  ;;  %389 = vst [vmem:[%s7922_s27 + $0x3b8] sm:$0xff] %v388_v55  ;;  %v392_v57 = vld [vmem:[%s7917_s26 + $0x788] sm:$0xff]  ;;  %v394_v58 = vld [vmem:[%s7917_s26 + $0x790] sm:$0xff] }
  0x52   : > { %391 = vst [vmem:[%s7922_s27 + $0x3c0] sm:$0xff] %v390_v56  ;;  %393 = vst [vmem:[%s7922_s27 + $0x3c8] sm:$0xff] %v392_v57  ;;  %v396_v59 = vld [vmem:[%s7917_s26 + $0x798] sm:$0xff]  ;;  %v398_v60 = vld [vmem:[%s7917_s26 + $0x7a0] sm:$0xff] }
  0x53   : > { %395 = vst [vmem:[%s7922_s27 + $0x3d0] sm:$0xff] %v394_v58  ;;  %v400_v61 = vld [vmem:[%s7917_s26 + $0x7a8] sm:$0xff]  ;;  %397 = vst [vmem:[%s7922_s27 + $0x3d8] sm:$0xff] %v396_v59  ;;  %v402_v62 = vld [vmem:[%s7917_s26 + $0x7b0] sm:$0xff] }
  0x54   : > { %399 = vst [vmem:[%s7922_s27 + $0x3e0] sm:$0xff] %v398_v60  ;;  %401 = vst [vmem:[%s7922_s27 + $0x3e8] sm:$0xff] %v400_v61  ;;  %v404_v63 = vld [vmem:[%s7917_s26 + $0x7b8] sm:$0xff]  ;;  %v406_v0 = vld [vmem:[%s7917_s26 + $0x7c0] sm:$0xff] }
  0x55   : > { %403 = vst [vmem:[%s7922_s27 + $0x3f0] sm:$0xff] %v402_v62  ;;  %405 = vst [vmem:[%s7922_s27 + $0x3f8] sm:$0xff] %v404_v63  ;;  %v408_v1 = vld [vmem:[%s7917_s26 + $0x7c8] sm:$0xff]  ;;  %v410_v2 = vld [vmem:[%s7917_s26 + $0x7d0] sm:$0xff] }
  0x56   : > { %407 = vst [vmem:[%s7922_s27 + $0x400] sm:$0xff] %v406_v0  ;;  %v412_v3 = vld [vmem:[%s7917_s26 + $0x7d8] sm:$0xff]  ;;  %409 = vst [vmem:[%s7922_s27 + $0x408] sm:$0xff] %v408_v1  ;;  %v414_v4 = vld [vmem:[%s7917_s26 + $0x840] sm:$0xff] }
  0x57   : > { %411 = vst [vmem:[%s7922_s27 + $0x410] sm:$0xff] %v410_v2  ;;  %413 = vst [vmem:[%s7922_s27 + $0x418] sm:$0xff] %v412_v3  ;;  %v416_v5 = vld [vmem:[%s7917_s26 + $0x848] sm:$0xff]  ;;  %v418_v6 = vld [vmem:[%s7917_s26 + $0x850] sm:$0xff] }
  0x58   : > { %415 = vst [vmem:[%s7922_s27 + $0x420] sm:$0xff] %v414_v4  ;;  %417 = vst [vmem:[%s7922_s27 + $0x428] sm:$0xff] %v416_v5  ;;  %v420_v7 = vld [vmem:[%s7917_s26 + $0x858] sm:$0xff]  ;;  %v422_v8 = vld [vmem:[%s7917_s26 + $0x860] sm:$0xff] }
  0x59   : > { %419 = vst [vmem:[%s7922_s27 + $0x430] sm:$0xff] %v418_v6  ;;  %v424_v9 = vld [vmem:[%s7917_s26 + $0x868] sm:$0xff]  ;;  %421 = vst [vmem:[%s7922_s27 + $0x438] sm:$0xff] %v420_v7  ;;  %v426_v10 = vld [vmem:[%s7917_s26 + $0x870] sm:$0xff] }
  0x5a   : > { %423 = vst [vmem:[%s7922_s27 + $0x440] sm:$0xff] %v422_v8  ;;  %425 = vst [vmem:[%s7922_s27 + $0x448] sm:$0xff] %v424_v9  ;;  %v428_v11 = vld [vmem:[%s7917_s26 + $0x878] sm:$0xff]  ;;  %v430_v12 = vld [vmem:[%s7917_s26 + $0x880] sm:$0xff] }
  0x5b   : > { %427 = vst [vmem:[%s7922_s27 + $0x450] sm:$0xff] %v426_v10  ;;  %429 = vst [vmem:[%s7922_s27 + $0x458] sm:$0xff] %v428_v11  ;;  %v432_v13 = vld [vmem:[%s7917_s26 + $0x888] sm:$0xff]  ;;  %v434_v14 = vld [vmem:[%s7917_s26 + $0x890] sm:$0xff] }
  0x5c   : > { %431 = vst [vmem:[%s7922_s27 + $0x460] sm:$0xff] %v430_v12  ;;  %v436_v15 = vld [vmem:[%s7917_s26 + $0x898] sm:$0xff]  ;;  %433 = vst [vmem:[%s7922_s27 + $0x468] sm:$0xff] %v432_v13  ;;  %v438_v16 = vld [vmem:[%s7917_s26 + $0x900] sm:$0xff] }
  0x5d   : > { %435 = vst [vmem:[%s7922_s27 + $0x470] sm:$0xff] %v434_v14  ;;  %437 = vst [vmem:[%s7922_s27 + $0x478] sm:$0xff] %v436_v15  ;;  %v440_v17 = vld [vmem:[%s7917_s26 + $0x908] sm:$0xff]  ;;  %v442_v18 = vld [vmem:[%s7917_s26 + $0x910] sm:$0xff] }
  0x5e   : > { %439 = vst [vmem:[%s7922_s27 + $0x480] sm:$0xff] %v438_v16  ;;  %441 = vst [vmem:[%s7922_s27 + $0x488] sm:$0xff] %v440_v17  ;;  %v444_v19 = vld [vmem:[%s7917_s26 + $0x918] sm:$0xff]  ;;  %v446_v20 = vld [vmem:[%s7917_s26 + $0x920] sm:$0xff] }
  0x5f   : > { %443 = vst [vmem:[%s7922_s27 + $0x490] sm:$0xff] %v442_v18  ;;  %v448_v21 = vld [vmem:[%s7917_s26 + $0x928] sm:$0xff]  ;;  %445 = vst [vmem:[%s7922_s27 + $0x498] sm:$0xff] %v444_v19  ;;  %v450_v22 = vld [vmem:[%s7917_s26 + $0x930] sm:$0xff] }
  0x60   : > { %447 = vst [vmem:[%s7922_s27 + $0x4a0] sm:$0xff] %v446_v20  ;;  %449 = vst [vmem:[%s7922_s27 + $0x4a8] sm:$0xff] %v448_v21  ;;  %v452_v23 = vld [vmem:[%s7917_s26 + $0x938] sm:$0xff]  ;;  %v454_v24 = vld [vmem:[%s7917_s26 + $0x940] sm:$0xff] }
  0x61   : > { %451 = vst [vmem:[%s7922_s27 + $0x4b0] sm:$0xff] %v450_v22  ;;  %453 = vst [vmem:[%s7922_s27 + $0x4b8] sm:$0xff] %v452_v23  ;;  %v456_v25 = vld [vmem:[%s7917_s26 + $0x948] sm:$0xff]  ;;  %v458_v26 = vld [vmem:[%s7917_s26 + $0x950] sm:$0xff] }
  0x62   : > { %455 = vst [vmem:[%s7922_s27 + $0x4c0] sm:$0xff] %v454_v24  ;;  %v460_v27 = vld [vmem:[%s7917_s26 + $0x958] sm:$0xff]  ;;  %457 = vst [vmem:[%s7922_s27 + $0x4c8] sm:$0xff] %v456_v25  ;;  %v462_v28 = vld [vmem:[%s7917_s26 + $0x9c0] sm:$0xff] }
  0x63   : > { %459 = vst [vmem:[%s7922_s27 + $0x4d0] sm:$0xff] %v458_v26  ;;  %461 = vst [vmem:[%s7922_s27 + $0x4d8] sm:$0xff] %v460_v27  ;;  %v464_v29 = vld [vmem:[%s7917_s26 + $0x9c8] sm:$0xff]  ;;  %v466_v30 = vld [vmem:[%s7917_s26 + $0x9d0] sm:$0xff] }
  0x64   : > { %463 = vst [vmem:[%s7922_s27 + $0x4e0] sm:$0xff] %v462_v28  ;;  %465 = vst [vmem:[%s7922_s27 + $0x4e8] sm:$0xff] %v464_v29  ;;  %v468_v31 = vld [vmem:[%s7917_s26 + $0x9d8] sm:$0xff]  ;;  %v470_v32 = vld [vmem:[%s7917_s26 + $0x9e0] sm:$0xff] }
  0x65   : > { %467 = vst [vmem:[%s7922_s27 + $0x4f0] sm:$0xff] %v466_v30  ;;  %v472_v33 = vld [vmem:[%s7917_s26 + $0x9e8] sm:$0xff]  ;;  %469 = vst [vmem:[%s7922_s27 + $0x4f8] sm:$0xff] %v468_v31  ;;  %v474_v34 = vld [vmem:[%s7917_s26 + $0x9f0] sm:$0xff] }
  0x66   : > { %471 = vst [vmem:[%s7922_s27 + $0x500] sm:$0xff] %v470_v32  ;;  %473 = vst [vmem:[%s7922_s27 + $0x508] sm:$0xff] %v472_v33  ;;  %v476_v35 = vld [vmem:[%s7917_s26 + $0x9f8] sm:$0xff]  ;;  %v478_v36 = vld [vmem:[%s7917_s26 + $0xa00] sm:$0xff] }
  0x67   : > { %475 = vst [vmem:[%s7922_s27 + $0x510] sm:$0xff] %v474_v34  ;;  %477 = vst [vmem:[%s7922_s27 + $0x518] sm:$0xff] %v476_v35  ;;  %v480_v37 = vld [vmem:[%s7917_s26 + $0xa08] sm:$0xff]  ;;  %v482_v38 = vld [vmem:[%s7917_s26 + $0xa10] sm:$0xff] }
  0x68   : > { %479 = vst [vmem:[%s7922_s27 + $0x520] sm:$0xff] %v478_v36  ;;  %v484_v39 = vld [vmem:[%s7917_s26 + $0xa18] sm:$0xff]  ;;  %481 = vst [vmem:[%s7922_s27 + $0x528] sm:$0xff] %v480_v37  ;;  %v486_v40 = vld [vmem:[%s7917_s26 + $0xa80] sm:$0xff] }
  0x69   : > { %483 = vst [vmem:[%s7922_s27 + $0x530] sm:$0xff] %v482_v38  ;;  %485 = vst [vmem:[%s7922_s27 + $0x538] sm:$0xff] %v484_v39  ;;  %v488_v41 = vld [vmem:[%s7917_s26 + $0xa88] sm:$0xff]  ;;  %v490_v42 = vld [vmem:[%s7917_s26 + $0xa90] sm:$0xff] }
  0x6a   : > { %487 = vst [vmem:[%s7922_s27 + $0x540] sm:$0xff] %v486_v40  ;;  %489 = vst [vmem:[%s7922_s27 + $0x548] sm:$0xff] %v488_v41  ;;  %v492_v43 = vld [vmem:[%s7917_s26 + $0xa98] sm:$0xff]  ;;  %v494_v44 = vld [vmem:[%s7917_s26 + $0xaa0] sm:$0xff] }
  0x6b   : > { %491 = vst [vmem:[%s7922_s27 + $0x550] sm:$0xff] %v490_v42  ;;  %v496_v45 = vld [vmem:[%s7917_s26 + $0xaa8] sm:$0xff]  ;;  %493 = vst [vmem:[%s7922_s27 + $0x558] sm:$0xff] %v492_v43  ;;  %v498_v46 = vld [vmem:[%s7917_s26 + $0xab0] sm:$0xff] }
  0x6c   : > { %495 = vst [vmem:[%s7922_s27 + $0x560] sm:$0xff] %v494_v44  ;;  %497 = vst [vmem:[%s7922_s27 + $0x568] sm:$0xff] %v496_v45  ;;  %v500_v47 = vld [vmem:[%s7917_s26 + $0xab8] sm:$0xff]  ;;  %v502_v48 = vld [vmem:[%s7917_s26 + $0xac0] sm:$0xff] }
  0x6d   : > { %499 = vst [vmem:[%s7922_s27 + $0x570] sm:$0xff] %v498_v46  ;;  %501 = vst [vmem:[%s7922_s27 + $0x578] sm:$0xff] %v500_v47  ;;  %v504_v49 = vld [vmem:[%s7917_s26 + $0xac8] sm:$0xff]  ;;  %v506_v50 = vld [vmem:[%s7917_s26 + $0xad0] sm:$0xff] }
  0x6e   : > { %503 = vst [vmem:[%s7922_s27 + $0x580] sm:$0xff] %v502_v48  ;;  %v508_v51 = vld [vmem:[%s7917_s26 + $0xad8] sm:$0xff]  ;;  %505 = vst [vmem:[%s7922_s27 + $0x588] sm:$0xff] %v504_v49  ;;  %v510_v52 = vld [vmem:[%s7917_s26 + $0xb40] sm:$0xff] }
  0x6f   : > { %507 = vst [vmem:[%s7922_s27 + $0x590] sm:$0xff] %v506_v50  ;;  %509 = vst [vmem:[%s7922_s27 + $0x598] sm:$0xff] %v508_v51  ;;  %v512_v53 = vld [vmem:[%s7917_s26 + $0xb48] sm:$0xff]  ;;  %v514_v54 = vld [vmem:[%s7917_s26 + $0xb50] sm:$0xff] }
  0x70   : > { %511 = vst [vmem:[%s7922_s27 + $0x5a0] sm:$0xff] %v510_v52  ;;  %513 = vst [vmem:[%s7922_s27 + $0x5a8] sm:$0xff] %v512_v53  ;;  %v516_v55 = vld [vmem:[%s7917_s26 + $0xb58] sm:$0xff]  ;;  %v518_v56 = vld [vmem:[%s7917_s26 + $0xb60] sm:$0xff] }
  0x71   : > { %515 = vst [vmem:[%s7922_s27 + $0x5b0] sm:$0xff] %v514_v54  ;;  %v520_v57 = vld [vmem:[%s7917_s26 + $0xb68] sm:$0xff]  ;;  %517 = vst [vmem:[%s7922_s27 + $0x5b8] sm:$0xff] %v516_v55  ;;  %v522_v58 = vld [vmem:[%s7917_s26 + $0xb70] sm:$0xff] }
  0x72   : > { %519 = vst [vmem:[%s7922_s27 + $0x5c0] sm:$0xff] %v518_v56  ;;  %521 = vst [vmem:[%s7922_s27 + $0x5c8] sm:$0xff] %v520_v57  ;;  %v524_v59 = vld [vmem:[%s7917_s26 + $0xb78] sm:$0xff]  ;;  %v526_v60 = vld [vmem:[%s7917_s26 + $0xb80] sm:$0xff] }
  0x73   : > { %523 = vst [vmem:[%s7922_s27 + $0x5d0] sm:$0xff] %v522_v58  ;;  %525 = vst [vmem:[%s7922_s27 + $0x5d8] sm:$0xff] %v524_v59  ;;  %v528_v61 = vld [vmem:[%s7917_s26 + $0xb88] sm:$0xff]  ;;  %v530_v62 = vld [vmem:[%s7917_s26 + $0xb90] sm:$0xff] }
  0x74   : > { %527 = vst [vmem:[%s7922_s27 + $0x5e0] sm:$0xff] %v526_v60  ;;  %v532_v63 = vld [vmem:[%s7917_s26 + $0xb98] sm:$0xff]  ;;  %529 = vst [vmem:[%s7922_s27 + $0x5e8] sm:$0xff] %v528_v61  ;;  %v534_v0 = vld [vmem:[%s7917_s26 + $0xc00] sm:$0xff] }
  0x75   : > { %531 = vst [vmem:[%s7922_s27 + $0x5f0] sm:$0xff] %v530_v62  ;;  %533 = vst [vmem:[%s7922_s27 + $0x5f8] sm:$0xff] %v532_v63  ;;  %v536_v1 = vld [vmem:[%s7917_s26 + $0xc08] sm:$0xff]  ;;  %v538_v2 = vld [vmem:[%s7917_s26 + $0xc10] sm:$0xff] }
  0x76   : > { %535 = vst [vmem:[%s7922_s27 + $0x600] sm:$0xff] %v534_v0  ;;  %537 = vst [vmem:[%s7922_s27 + $0x608] sm:$0xff] %v536_v1  ;;  %v540_v3 = vld [vmem:[%s7917_s26 + $0xc18] sm:$0xff]  ;;  %v542_v4 = vld [vmem:[%s7917_s26 + $0xc20] sm:$0xff] }
  0x77   : > { %539 = vst [vmem:[%s7922_s27 + $0x610] sm:$0xff] %v538_v2  ;;  %v544_v5 = vld [vmem:[%s7917_s26 + $0xc28] sm:$0xff]  ;;  %541 = vst [vmem:[%s7922_s27 + $0x618] sm:$0xff] %v540_v3  ;;  %v546_v6 = vld [vmem:[%s7917_s26 + $0xc30] sm:$0xff] }
  0x78   : > { %543 = vst [vmem:[%s7922_s27 + $0x620] sm:$0xff] %v542_v4  ;;  %545 = vst [vmem:[%s7922_s27 + $0x628] sm:$0xff] %v544_v5  ;;  %v548_v7 = vld [vmem:[%s7917_s26 + $0xc38] sm:$0xff]  ;;  %v550_v8 = vld [vmem:[%s7917_s26 + $0xc40] sm:$0xff] }
  0x79   : > { %547 = vst [vmem:[%s7922_s27 + $0x630] sm:$0xff] %v546_v6  ;;  %549 = vst [vmem:[%s7922_s27 + $0x638] sm:$0xff] %v548_v7  ;;  %v552_v9 = vld [vmem:[%s7917_s26 + $0xc48] sm:$0xff]  ;;  %v554_v10 = vld [vmem:[%s7917_s26 + $0xc50] sm:$0xff] }
  0x7a   : > { %551 = vst [vmem:[%s7922_s27 + $0x640] sm:$0xff] %v550_v8  ;;  %v556_v11 = vld [vmem:[%s7917_s26 + $0xc58] sm:$0xff]  ;;  %553 = vst [vmem:[%s7922_s27 + $0x648] sm:$0xff] %v552_v9  ;;  %v558_v12 = vld [vmem:[%s7917_s26 + $0xcc0] sm:$0xff] }
  0x7b   : > { %555 = vst [vmem:[%s7922_s27 + $0x650] sm:$0xff] %v554_v10  ;;  %557 = vst [vmem:[%s7922_s27 + $0x658] sm:$0xff] %v556_v11  ;;  %v560_v13 = vld [vmem:[%s7917_s26 + $0xcc8] sm:$0xff]  ;;  %v562_v14 = vld [vmem:[%s7917_s26 + $0xcd0] sm:$0xff] }
  0x7c   : > { %559 = vst [vmem:[%s7922_s27 + $0x660] sm:$0xff] %v558_v12  ;;  %561 = vst [vmem:[%s7922_s27 + $0x668] sm:$0xff] %v560_v13  ;;  %v564_v15 = vld [vmem:[%s7917_s26 + $0xcd8] sm:$0xff]  ;;  %v566_v16 = vld [vmem:[%s7917_s26 + $0xce0] sm:$0xff] }
  0x7d   : > { %563 = vst [vmem:[%s7922_s27 + $0x670] sm:$0xff] %v562_v14  ;;  %v568_v17 = vld [vmem:[%s7917_s26 + $0xce8] sm:$0xff]  ;;  %565 = vst [vmem:[%s7922_s27 + $0x678] sm:$0xff] %v564_v15  ;;  %v570_v18 = vld [vmem:[%s7917_s26 + $0xcf0] sm:$0xff] }
  0x7e   : > { %567 = vst [vmem:[%s7922_s27 + $0x680] sm:$0xff] %v566_v16  ;;  %569 = vst [vmem:[%s7922_s27 + $0x688] sm:$0xff] %v568_v17  ;;  %v572_v19 = vld [vmem:[%s7917_s26 + $0xcf8] sm:$0xff]  ;;  %v574_v20 = vld [vmem:[%s7917_s26 + $0xd00] sm:$0xff] }
  0x7f   : > { %571 = vst [vmem:[%s7922_s27 + $0x690] sm:$0xff] %v570_v18  ;;  %573 = vst [vmem:[%s7922_s27 + $0x698] sm:$0xff] %v572_v19  ;;  %v576_v21 = vld [vmem:[%s7917_s26 + $0xd08] sm:$0xff]  ;;  %v578_v22 = vld [vmem:[%s7917_s26 + $0xd10] sm:$0xff] }
  0x80   : > { %575 = vst [vmem:[%s7922_s27 + $0x6a0] sm:$0xff] %v574_v20  ;;  %v580_v23 = vld [vmem:[%s7917_s26 + $0xd18] sm:$0xff]  ;;  %577 = vst [vmem:[%s7922_s27 + $0x6a8] sm:$0xff] %v576_v21  ;;  %v582_v24 = vld [vmem:[%s7917_s26 + $0xd80] sm:$0xff] }
  0x81   : > { %579 = vst [vmem:[%s7922_s27 + $0x6b0] sm:$0xff] %v578_v22  ;;  %581 = vst [vmem:[%s7922_s27 + $0x6b8] sm:$0xff] %v580_v23  ;;  %v584_v25 = vld [vmem:[%s7917_s26 + $0xd88] sm:$0xff]  ;;  %v586_v26 = vld [vmem:[%s7917_s26 + $0xd90] sm:$0xff] }
  0x82   : > { %583 = vst [vmem:[%s7922_s27 + $0x6c0] sm:$0xff] %v582_v24  ;;  %585 = vst [vmem:[%s7922_s27 + $0x6c8] sm:$0xff] %v584_v25  ;;  %v588_v27 = vld [vmem:[%s7917_s26 + $0xd98] sm:$0xff]  ;;  %v590_v28 = vld [vmem:[%s7917_s26 + $0xda0] sm:$0xff] }
  0x83   : > { %587 = vst [vmem:[%s7922_s27 + $0x6d0] sm:$0xff] %v586_v26  ;;  %v592_v29 = vld [vmem:[%s7917_s26 + $0xda8] sm:$0xff]  ;;  %589 = vst [vmem:[%s7922_s27 + $0x6d8] sm:$0xff] %v588_v27  ;;  %v594_v30 = vld [vmem:[%s7917_s26 + $0xdb0] sm:$0xff] }
  0x84   : > { %591 = vst [vmem:[%s7922_s27 + $0x6e0] sm:$0xff] %v590_v28  ;;  %593 = vst [vmem:[%s7922_s27 + $0x6e8] sm:$0xff] %v592_v29  ;;  %v596_v31 = vld [vmem:[%s7917_s26 + $0xdb8] sm:$0xff]  ;;  %v598_v32 = vld [vmem:[%s7917_s26 + $0xdc0] sm:$0xff] }
  0x85   : > { %595 = vst [vmem:[%s7922_s27 + $0x6f0] sm:$0xff] %v594_v30  ;;  %597 = vst [vmem:[%s7922_s27 + $0x6f8] sm:$0xff] %v596_v31  ;;  %v600_v33 = vld [vmem:[%s7917_s26 + $0xdc8] sm:$0xff]  ;;  %v602_v34 = vld [vmem:[%s7917_s26 + $0xdd0] sm:$0xff] }
  0x86   : > { %599 = vst [vmem:[%s7922_s27 + $0x700] sm:$0xff] %v598_v32  ;;  %v604_v35 = vld [vmem:[%s7917_s26 + $0xdd8] sm:$0xff]  ;;  %601 = vst [vmem:[%s7922_s27 + $0x708] sm:$0xff] %v600_v33  ;;  %v606_v36 = vld [vmem:[%s7917_s26 + $0xe40] sm:$0xff] }
  0x87   : > { %603 = vst [vmem:[%s7922_s27 + $0x710] sm:$0xff] %v602_v34  ;;  %605 = vst [vmem:[%s7922_s27 + $0x718] sm:$0xff] %v604_v35  ;;  %v608_v37 = vld [vmem:[%s7917_s26 + $0xe48] sm:$0xff]  ;;  %v610_v38 = vld [vmem:[%s7917_s26 + $0xe50] sm:$0xff] }
  0x88   : > { %607 = vst [vmem:[%s7922_s27 + $0x720] sm:$0xff] %v606_v36  ;;  %609 = vst [vmem:[%s7922_s27 + $0x728] sm:$0xff] %v608_v37  ;;  %v612_v39 = vld [vmem:[%s7917_s26 + $0xe58] sm:$0xff]  ;;  %v614_v40 = vld [vmem:[%s7917_s26 + $0xe60] sm:$0xff] }
  0x89   : > { %611 = vst [vmem:[%s7922_s27 + $0x730] sm:$0xff] %v610_v38  ;;  %v616_v41 = vld [vmem:[%s7917_s26 + $0xe68] sm:$0xff]  ;;  %613 = vst [vmem:[%s7922_s27 + $0x738] sm:$0xff] %v612_v39  ;;  %v618_v42 = vld [vmem:[%s7917_s26 + $0xe70] sm:$0xff] }
  0x8a   : > { %615 = vst [vmem:[%s7922_s27 + $0x740] sm:$0xff] %v614_v40  ;;  %617 = vst [vmem:[%s7922_s27 + $0x748] sm:$0xff] %v616_v41  ;;  %v620_v43 = vld [vmem:[%s7917_s26 + $0xe78] sm:$0xff]  ;;  %v622_v44 = vld [vmem:[%s7917_s26 + $0xe80] sm:$0xff] }
  0x8b   : > { %619 = vst [vmem:[%s7922_s27 + $0x750] sm:$0xff] %v618_v42  ;;  %621 = vst [vmem:[%s7922_s27 + $0x758] sm:$0xff] %v620_v43  ;;  %v624_v45 = vld [vmem:[%s7917_s26 + $0xe88] sm:$0xff]  ;;  %v626_v46 = vld [vmem:[%s7917_s26 + $0xe90] sm:$0xff] }
  0x8c   : > { %623 = vst [vmem:[%s7922_s27 + $0x760] sm:$0xff] %v622_v44  ;;  %v628_v47 = vld [vmem:[%s7917_s26 + $0xe98] sm:$0xff]  ;;  %625 = vst [vmem:[%s7922_s27 + $0x768] sm:$0xff] %v624_v45  ;;  %v630_v48 = vld [vmem:[%s7917_s26 + $0xf00] sm:$0xff] }
  0x8d   : > { %627 = vst [vmem:[%s7922_s27 + $0x770] sm:$0xff] %v626_v46  ;;  %629 = vst [vmem:[%s7922_s27 + $0x778] sm:$0xff] %v628_v47  ;;  %v632_v49 = vld [vmem:[%s7917_s26 + $0xf08] sm:$0xff]  ;;  %v634_v50 = vld [vmem:[%s7917_s26 + $0xf10] sm:$0xff] }
  0x8e   : > { %631 = vst [vmem:[%s7922_s27 + $0x780] sm:$0xff] %v630_v48  ;;  %633 = vst [vmem:[%s7922_s27 + $0x788] sm:$0xff] %v632_v49  ;;  %v636_v51 = vld [vmem:[%s7917_s26 + $0xf18] sm:$0xff]  ;;  %v638_v52 = vld [vmem:[%s7917_s26 + $0xf20] sm:$0xff] }
  0x8f   : > { %635 = vst [vmem:[%s7922_s27 + $0x790] sm:$0xff] %v634_v50  ;;  %v640_v53 = vld [vmem:[%s7917_s26 + $0xf28] sm:$0xff]  ;;  %637 = vst [vmem:[%s7922_s27 + $0x798] sm:$0xff] %v636_v51  ;;  %v642_v54 = vld [vmem:[%s7917_s26 + $0xf30] sm:$0xff] }
  0x90   : > { %639 = vst [vmem:[%s7922_s27 + $0x7a0] sm:$0xff] %v638_v52  ;;  %641 = vst [vmem:[%s7922_s27 + $0x7a8] sm:$0xff] %v640_v53  ;;  %v644_v55 = vld [vmem:[%s7917_s26 + $0xf38] sm:$0xff]  ;;  %v646_v56 = vld [vmem:[%s7917_s26 + $0xf40] sm:$0xff] }
  0x91   : > { %643 = vst [vmem:[%s7922_s27 + $0x7b0] sm:$0xff] %v642_v54  ;;  %645 = vst [vmem:[%s7922_s27 + $0x7b8] sm:$0xff] %v644_v55  ;;  %v648_v57 = vld [vmem:[%s7917_s26 + $0xf48] sm:$0xff]  ;;  %v650_v58 = vld [vmem:[%s7917_s26 + $0xf50] sm:$0xff] }
  0x92   : > { %647 = vst [vmem:[%s7922_s27 + $0x7c0] sm:$0xff] %v646_v56  ;;  %v652_v59 = vld [vmem:[%s7917_s26 + $0xf58] sm:$0xff]  ;;  %649 = vst [vmem:[%s7922_s27 + $0x7c8] sm:$0xff] %v648_v57  ;;  %v654_v60 = vld [vmem:[%s7917_s26 + $0xfc0] sm:$0xff] }
  0x93   : > { %651 = vst [vmem:[%s7922_s27 + $0x7d0] sm:$0xff] %v650_v58  ;;  %653 = vst [vmem:[%s7922_s27 + $0x7d8] sm:$0xff] %v652_v59  ;;  %v656_v61 = vld [vmem:[%s7917_s26 + $0xfc8] sm:$0xff]  ;;  %v658_v62 = vld [vmem:[%s7917_s26 + $0xfd0] sm:$0xff] }
  0x94   : > { %655 = vst [vmem:[%s7922_s27 + $0x7e0] sm:$0xff] %v654_v60  ;;  %657 = vst [vmem:[%s7922_s27 + $0x7e8] sm:$0xff] %v656_v61  ;;  %v660_v63 = vld [vmem:[%s7917_s26 + $0xfd8] sm:$0xff]  ;;  %v662_v0 = vld [vmem:[%s7917_s26 + $0xfe0] sm:$0xff] }
  0x95   : > { %659 = vst [vmem:[%s7922_s27 + $0x7f0] sm:$0xff] %v658_v62  ;;  %v664_v1 = vld [vmem:[%s7917_s26 + $0xfe8] sm:$0xff]  ;;  %661 = vst [vmem:[%s7922_s27 + $0x7f8] sm:$0xff] %v660_v63  ;;  %v666_v2 = vld [vmem:[%s7917_s26 + $0xff0] sm:$0xff] }
  0x96   : > { %663 = vst [vmem:[%s7922_s27 + $0x800] sm:$0xff] %v662_v0  ;;  %665 = vst [vmem:[%s7922_s27 + $0x808] sm:$0xff] %v664_v1  ;;  %v668_v3 = vld [vmem:[%s7917_s26 + $0xff8] sm:$0xff]  ;;  %v670_v4 = vld [vmem:[%s7917_s26 + $0x1000] sm:$0xff] }
  0x97   : > { %667 = vst [vmem:[%s7922_s27 + $0x810] sm:$0xff] %v666_v2  ;;  %669 = vst [vmem:[%s7922_s27 + $0x818] sm:$0xff] %v668_v3  ;;  %v672_v5 = vld [vmem:[%s7917_s26 + $0x1008] sm:$0xff]  ;;  %v674_v6 = vld [vmem:[%s7917_s26 + $0x1010] sm:$0xff] }
  0x98   : > { %671 = vst [vmem:[%s7922_s27 + $0x820] sm:$0xff] %v670_v4  ;;  %v676_v7 = vld [vmem:[%s7917_s26 + $0x1018] sm:$0xff]  ;;  %673 = vst [vmem:[%s7922_s27 + $0x828] sm:$0xff] %v672_v5  ;;  %v678_v8 = vld [vmem:[%s7917_s26 + $0x1080] sm:$0xff] }
  0x99   : > { %675 = vst [vmem:[%s7922_s27 + $0x830] sm:$0xff] %v674_v6  ;;  %677 = vst [vmem:[%s7922_s27 + $0x838] sm:$0xff] %v676_v7  ;;  %v680_v9 = vld [vmem:[%s7917_s26 + $0x1088] sm:$0xff]  ;;  %v682_v10 = vld [vmem:[%s7917_s26 + $0x1090] sm:$0xff] }
  0x9a   : > { %679 = vst [vmem:[%s7922_s27 + $0x840] sm:$0xff] %v678_v8  ;;  %681 = vst [vmem:[%s7922_s27 + $0x848] sm:$0xff] %v680_v9  ;;  %v684_v11 = vld [vmem:[%s7917_s26 + $0x1098] sm:$0xff]  ;;  %v686_v12 = vld [vmem:[%s7917_s26 + $0x10a0] sm:$0xff] }
  0x9b   : > { %683 = vst [vmem:[%s7922_s27 + $0x850] sm:$0xff] %v682_v10  ;;  %v688_v13 = vld [vmem:[%s7917_s26 + $0x10a8] sm:$0xff]  ;;  %685 = vst [vmem:[%s7922_s27 + $0x858] sm:$0xff] %v684_v11  ;;  %v690_v14 = vld [vmem:[%s7917_s26 + $0x10b0] sm:$0xff] }
  0x9c   : > { %687 = vst [vmem:[%s7922_s27 + $0x860] sm:$0xff] %v686_v12  ;;  %689 = vst [vmem:[%s7922_s27 + $0x868] sm:$0xff] %v688_v13  ;;  %v692_v15 = vld [vmem:[%s7917_s26 + $0x10b8] sm:$0xff]  ;;  %v694_v16 = vld [vmem:[%s7917_s26 + $0x10c0] sm:$0xff] }
  0x9d   : > { %691 = vst [vmem:[%s7922_s27 + $0x870] sm:$0xff] %v690_v14  ;;  %693 = vst [vmem:[%s7922_s27 + $0x878] sm:$0xff] %v692_v15  ;;  %v696_v17 = vld [vmem:[%s7917_s26 + $0x10c8] sm:$0xff]  ;;  %v698_v18 = vld [vmem:[%s7917_s26 + $0x10d0] sm:$0xff] }
  0x9e   : > { %695 = vst [vmem:[%s7922_s27 + $0x880] sm:$0xff] %v694_v16  ;;  %v700_v19 = vld [vmem:[%s7917_s26 + $0x10d8] sm:$0xff]  ;;  %697 = vst [vmem:[%s7922_s27 + $0x888] sm:$0xff] %v696_v17  ;;  %v702_v20 = vld [vmem:[%s7917_s26 + $0x1140] sm:$0xff] }
  0x9f   : > { %699 = vst [vmem:[%s7922_s27 + $0x890] sm:$0xff] %v698_v18  ;;  %701 = vst [vmem:[%s7922_s27 + $0x898] sm:$0xff] %v700_v19  ;;  %v704_v21 = vld [vmem:[%s7917_s26 + $0x1148] sm:$0xff]  ;;  %v706_v22 = vld [vmem:[%s7917_s26 + $0x1150] sm:$0xff] }
  0xa0   : > { %703 = vst [vmem:[%s7922_s27 + $0x8a0] sm:$0xff] %v702_v20  ;;  %705 = vst [vmem:[%s7922_s27 + $0x8a8] sm:$0xff] %v704_v21  ;;  %v708_v23 = vld [vmem:[%s7917_s26 + $0x1158] sm:$0xff]  ;;  %v710_v24 = vld [vmem:[%s7917_s26 + $0x1160] sm:$0xff] }
  0xa1   : > { %707 = vst [vmem:[%s7922_s27 + $0x8b0] sm:$0xff] %v706_v22  ;;  %v712_v25 = vld [vmem:[%s7917_s26 + $0x1168] sm:$0xff]  ;;  %709 = vst [vmem:[%s7922_s27 + $0x8b8] sm:$0xff] %v708_v23  ;;  %v714_v26 = vld [vmem:[%s7917_s26 + $0x1170] sm:$0xff] }
  0xa2   : > { %711 = vst [vmem:[%s7922_s27 + $0x8c0] sm:$0xff] %v710_v24  ;;  %713 = vst [vmem:[%s7922_s27 + $0x8c8] sm:$0xff] %v712_v25  ;;  %v716_v27 = vld [vmem:[%s7917_s26 + $0x1178] sm:$0xff]  ;;  %v718_v28 = vld [vmem:[%s7917_s26 + $0x1180] sm:$0xff] }
  0xa3   : > { %715 = vst [vmem:[%s7922_s27 + $0x8d0] sm:$0xff] %v714_v26  ;;  %717 = vst [vmem:[%s7922_s27 + $0x8d8] sm:$0xff] %v716_v27  ;;  %v720_v29 = vld [vmem:[%s7917_s26 + $0x1188] sm:$0xff]  ;;  %v722_v30 = vld [vmem:[%s7917_s26 + $0x1190] sm:$0xff] }
  0xa4   : > { %719 = vst [vmem:[%s7922_s27 + $0x8e0] sm:$0xff] %v718_v28  ;;  %v724_v31 = vld [vmem:[%s7917_s26 + $0x1198] sm:$0xff]  ;;  %721 = vst [vmem:[%s7922_s27 + $0x8e8] sm:$0xff] %v720_v29  ;;  %v726_v32 = vld [vmem:[%s7917_s26 + $0x1200] sm:$0xff] }
  0xa5   : > { %723 = vst [vmem:[%s7922_s27 + $0x8f0] sm:$0xff] %v722_v30  ;;  %725 = vst [vmem:[%s7922_s27 + $0x8f8] sm:$0xff] %v724_v31  ;;  %v728_v33 = vld [vmem:[%s7917_s26 + $0x1208] sm:$0xff]  ;;  %v730_v34 = vld [vmem:[%s7917_s26 + $0x1210] sm:$0xff] }
  0xa6   : > { %727 = vst [vmem:[%s7922_s27 + $0x900] sm:$0xff] %v726_v32  ;;  %729 = vst [vmem:[%s7922_s27 + $0x908] sm:$0xff] %v728_v33  ;;  %v732_v35 = vld [vmem:[%s7917_s26 + $0x1218] sm:$0xff]  ;;  %v734_v36 = vld [vmem:[%s7917_s26 + $0x1220] sm:$0xff] }
  0xa7   : > { %731 = vst [vmem:[%s7922_s27 + $0x910] sm:$0xff] %v730_v34  ;;  %v736_v37 = vld [vmem:[%s7917_s26 + $0x1228] sm:$0xff]  ;;  %733 = vst [vmem:[%s7922_s27 + $0x918] sm:$0xff] %v732_v35  ;;  %v738_v38 = vld [vmem:[%s7917_s26 + $0x1230] sm:$0xff] }
  0xa8   : > { %735 = vst [vmem:[%s7922_s27 + $0x920] sm:$0xff] %v734_v36  ;;  %737 = vst [vmem:[%s7922_s27 + $0x928] sm:$0xff] %v736_v37  ;;  %v740_v39 = vld [vmem:[%s7917_s26 + $0x1238] sm:$0xff]  ;;  %v742_v40 = vld [vmem:[%s7917_s26 + $0x1240] sm:$0xff] }
  0xa9   : > { %739 = vst [vmem:[%s7922_s27 + $0x930] sm:$0xff] %v738_v38  ;;  %741 = vst [vmem:[%s7922_s27 + $0x938] sm:$0xff] %v740_v39  ;;  %v744_v41 = vld [vmem:[%s7917_s26 + $0x1248] sm:$0xff]  ;;  %v746_v42 = vld [vmem:[%s7917_s26 + $0x1250] sm:$0xff] }
  0xaa   : > { %743 = vst [vmem:[%s7922_s27 + $0x940] sm:$0xff] %v742_v40  ;;  %v748_v43 = vld [vmem:[%s7917_s26 + $0x1258] sm:$0xff]  ;;  %745 = vst [vmem:[%s7922_s27 + $0x948] sm:$0xff] %v744_v41  ;;  %v750_v44 = vld [vmem:[%s7917_s26 + $0x12c0] sm:$0xff] }
  0xab   : > { %747 = vst [vmem:[%s7922_s27 + $0x950] sm:$0xff] %v746_v42  ;;  %749 = vst [vmem:[%s7922_s27 + $0x958] sm:$0xff] %v748_v43  ;;  %v752_v45 = vld [vmem:[%s7917_s26 + $0x12c8] sm:$0xff]  ;;  %v754_v46 = vld [vmem:[%s7917_s26 + $0x12d0] sm:$0xff] }
  0xac   : > { %751 = vst [vmem:[%s7922_s27 + $0x960] sm:$0xff] %v750_v44  ;;  %753 = vst [vmem:[%s7922_s27 + $0x968] sm:$0xff] %v752_v45  ;;  %v756_v47 = vld [vmem:[%s7917_s26 + $0x12d8] sm:$0xff]  ;;  %v758_v48 = vld [vmem:[%s7917_s26 + $0x12e0] sm:$0xff] }
  0xad   : > { %755 = vst [vmem:[%s7922_s27 + $0x970] sm:$0xff] %v754_v46  ;;  %v760_v49 = vld [vmem:[%s7917_s26 + $0x12e8] sm:$0xff]  ;;  %757 = vst [vmem:[%s7922_s27 + $0x978] sm:$0xff] %v756_v47  ;;  %v762_v50 = vld [vmem:[%s7917_s26 + $0x12f0] sm:$0xff] }
  0xae   : > { %759 = vst [vmem:[%s7922_s27 + $0x980] sm:$0xff] %v758_v48  ;;  %761 = vst [vmem:[%s7922_s27 + $0x988] sm:$0xff] %v760_v49  ;;  %v764_v51 = vld [vmem:[%s7917_s26 + $0x12f8] sm:$0xff]  ;;  %v766_v52 = vld [vmem:[%s7917_s26 + $0x1300] sm:$0xff] }
  0xaf   : > { %763 = vst [vmem:[%s7922_s27 + $0x990] sm:$0xff] %v762_v50  ;;  %765 = vst [vmem:[%s7922_s27 + $0x998] sm:$0xff] %v764_v51  ;;  %v768_v53 = vld [vmem:[%s7917_s26 + $0x1308] sm:$0xff]  ;;  %v770_v54 = vld [vmem:[%s7917_s26 + $0x1310] sm:$0xff] }
  0xb0   : > { %767 = vst [vmem:[%s7922_s27 + $0x9a0] sm:$0xff] %v766_v52  ;;  %v772_v55 = vld [vmem:[%s7917_s26 + $0x1318] sm:$0xff]  ;;  %769 = vst [vmem:[%s7922_s27 + $0x9a8] sm:$0xff] %v768_v53  ;;  %v774_v56 = vld [vmem:[%s7917_s26 + $0x1380] sm:$0xff] }
  0xb1   : > { %771 = vst [vmem:[%s7922_s27 + $0x9b0] sm:$0xff] %v770_v54  ;;  %773 = vst [vmem:[%s7922_s27 + $0x9b8] sm:$0xff] %v772_v55  ;;  %v776_v57 = vld [vmem:[%s7917_s26 + $0x1388] sm:$0xff]  ;;  %v778_v58 = vld [vmem:[%s7917_s26 + $0x1390] sm:$0xff] }
  0xb2   : > { %775 = vst [vmem:[%s7922_s27 + $0x9c0] sm:$0xff] %v774_v56  ;;  %777 = vst [vmem:[%s7922_s27 + $0x9c8] sm:$0xff] %v776_v57  ;;  %v780_v59 = vld [vmem:[%s7917_s26 + $0x1398] sm:$0xff]  ;;  %v782_v60 = vld [vmem:[%s7917_s26 + $0x13a0] sm:$0xff] }
  0xb3   : > { %779 = vst [vmem:[%s7922_s27 + $0x9d0] sm:$0xff] %v778_v58  ;;  %v784_v61 = vld [vmem:[%s7917_s26 + $0x13a8] sm:$0xff]  ;;  %781 = vst [vmem:[%s7922_s27 + $0x9d8] sm:$0xff] %v780_v59  ;;  %v786_v62 = vld [vmem:[%s7917_s26 + $0x13b0] sm:$0xff] }
  0xb4   : > { %783 = vst [vmem:[%s7922_s27 + $0x9e0] sm:$0xff] %v782_v60  ;;  %785 = vst [vmem:[%s7922_s27 + $0x9e8] sm:$0xff] %v784_v61  ;;  %v788_v63 = vld [vmem:[%s7917_s26 + $0x13b8] sm:$0xff]  ;;  %v790_v0 = vld [vmem:[%s7917_s26 + $0x13c0] sm:$0xff] }
  0xb5   : > { %787 = vst [vmem:[%s7922_s27 + $0x9f0] sm:$0xff] %v786_v62  ;;  %789 = vst [vmem:[%s7922_s27 + $0x9f8] sm:$0xff] %v788_v63  ;;  %v792_v1 = vld [vmem:[%s7917_s26 + $0x13c8] sm:$0xff]  ;;  %v794_v2 = vld [vmem:[%s7917_s26 + $0x13d0] sm:$0xff] }
  0xb6   : > { %791 = vst [vmem:[%s7922_s27 + $0xa00] sm:$0xff] %v790_v0  ;;  %v796_v3 = vld [vmem:[%s7917_s26 + $0x13d8] sm:$0xff]  ;;  %793 = vst [vmem:[%s7922_s27 + $0xa08] sm:$0xff] %v792_v1  ;;  %v798_v4 = vld [vmem:[%s7917_s26 + $0x1440] sm:$0xff] }
  0xb7   : > { %795 = vst [vmem:[%s7922_s27 + $0xa10] sm:$0xff] %v794_v2  ;;  %797 = vst [vmem:[%s7922_s27 + $0xa18] sm:$0xff] %v796_v3  ;;  %v800_v5 = vld [vmem:[%s7917_s26 + $0x1448] sm:$0xff]  ;;  %v802_v6 = vld [vmem:[%s7917_s26 + $0x1450] sm:$0xff] }
  0xb8   : > { %799 = vst [vmem:[%s7922_s27 + $0xa20] sm:$0xff] %v798_v4  ;;  %801 = vst [vmem:[%s7922_s27 + $0xa28] sm:$0xff] %v800_v5  ;;  %v804_v7 = vld [vmem:[%s7917_s26 + $0x1458] sm:$0xff]  ;;  %v806_v8 = vld [vmem:[%s7917_s26 + $0x1460] sm:$0xff] }
  0xb9   : > { %803 = vst [vmem:[%s7922_s27 + $0xa30] sm:$0xff] %v802_v6  ;;  %v808_v9 = vld [vmem:[%s7917_s26 + $0x1468] sm:$0xff]  ;;  %805 = vst [vmem:[%s7922_s27 + $0xa38] sm:$0xff] %v804_v7  ;;  %v810_v10 = vld [vmem:[%s7917_s26 + $0x1470] sm:$0xff] }
  0xba   : > { %807 = vst [vmem:[%s7922_s27 + $0xa40] sm:$0xff] %v806_v8  ;;  %809 = vst [vmem:[%s7922_s27 + $0xa48] sm:$0xff] %v808_v9  ;;  %v812_v11 = vld [vmem:[%s7917_s26 + $0x1478] sm:$0xff]  ;;  %v814_v12 = vld [vmem:[%s7917_s26 + $0x1480] sm:$0xff] }
  0xbb   : > { %811 = vst [vmem:[%s7922_s27 + $0xa50] sm:$0xff] %v810_v10  ;;  %813 = vst [vmem:[%s7922_s27 + $0xa58] sm:$0xff] %v812_v11  ;;  %v816_v13 = vld [vmem:[%s7917_s26 + $0x1488] sm:$0xff]  ;;  %v818_v14 = vld [vmem:[%s7917_s26 + $0x1490] sm:$0xff] }
  0xbc   : > { %815 = vst [vmem:[%s7922_s27 + $0xa60] sm:$0xff] %v814_v12  ;;  %v820_v15 = vld [vmem:[%s7917_s26 + $0x1498] sm:$0xff]  ;;  %817 = vst [vmem:[%s7922_s27 + $0xa68] sm:$0xff] %v816_v13  ;;  %v822_v16 = vld [vmem:[%s7917_s26 + $0x1500] sm:$0xff] }
  0xbd   : > { %819 = vst [vmem:[%s7922_s27 + $0xa70] sm:$0xff] %v818_v14  ;;  %821 = vst [vmem:[%s7922_s27 + $0xa78] sm:$0xff] %v820_v15  ;;  %v824_v17 = vld [vmem:[%s7917_s26 + $0x1508] sm:$0xff]  ;;  %v826_v18 = vld [vmem:[%s7917_s26 + $0x1510] sm:$0xff] }
  0xbe   : > { %823 = vst [vmem:[%s7922_s27 + $0xa80] sm:$0xff] %v822_v16  ;;  %825 = vst [vmem:[%s7922_s27 + $0xa88] sm:$0xff] %v824_v17  ;;  %v828_v19 = vld [vmem:[%s7917_s26 + $0x1518] sm:$0xff]  ;;  %v830_v20 = vld [vmem:[%s7917_s26 + $0x1520] sm:$0xff] }
  0xbf   : > { %827 = vst [vmem:[%s7922_s27 + $0xa90] sm:$0xff] %v826_v18  ;;  %v832_v21 = vld [vmem:[%s7917_s26 + $0x1528] sm:$0xff]  ;;  %829 = vst [vmem:[%s7922_s27 + $0xa98] sm:$0xff] %v828_v19  ;;  %v834_v22 = vld [vmem:[%s7917_s26 + $0x1530] sm:$0xff] }
  0xc0   : > { %831 = vst [vmem:[%s7922_s27 + $0xaa0] sm:$0xff] %v830_v20  ;;  %833 = vst [vmem:[%s7922_s27 + $0xaa8] sm:$0xff] %v832_v21  ;;  %v836_v23 = vld [vmem:[%s7917_s26 + $0x1538] sm:$0xff]  ;;  %v838_v24 = vld [vmem:[%s7917_s26 + $0x1540] sm:$0xff] }
  0xc1   : > { %835 = vst [vmem:[%s7922_s27 + $0xab0] sm:$0xff] %v834_v22  ;;  %837 = vst [vmem:[%s7922_s27 + $0xab8] sm:$0xff] %v836_v23  ;;  %v840_v25 = vld [vmem:[%s7917_s26 + $0x1548] sm:$0xff]  ;;  %v842_v26 = vld [vmem:[%s7917_s26 + $0x1550] sm:$0xff] }
  0xc2   : > { %839 = vst [vmem:[%s7922_s27 + $0xac0] sm:$0xff] %v838_v24  ;;  %v844_v27 = vld [vmem:[%s7917_s26 + $0x1558] sm:$0xff]  ;;  %841 = vst [vmem:[%s7922_s27 + $0xac8] sm:$0xff] %v840_v25  ;;  %v846_v28 = vld [vmem:[%s7917_s26 + $0x15c0] sm:$0xff] }
  0xc3   : > { %843 = vst [vmem:[%s7922_s27 + $0xad0] sm:$0xff] %v842_v26  ;;  %845 = vst [vmem:[%s7922_s27 + $0xad8] sm:$0xff] %v844_v27  ;;  %v848_v29 = vld [vmem:[%s7917_s26 + $0x15c8] sm:$0xff]  ;;  %v850_v30 = vld [vmem:[%s7917_s26 + $0x15d0] sm:$0xff] }
  0xc4   : > { %847 = vst [vmem:[%s7922_s27 + $0xae0] sm:$0xff] %v846_v28  ;;  %849 = vst [vmem:[%s7922_s27 + $0xae8] sm:$0xff] %v848_v29  ;;  %v852_v31 = vld [vmem:[%s7917_s26 + $0x15d8] sm:$0xff]  ;;  %v854_v32 = vld [vmem:[%s7917_s26 + $0x15e0] sm:$0xff] }
  0xc5   : > { %851 = vst [vmem:[%s7922_s27 + $0xaf0] sm:$0xff] %v850_v30  ;;  %v856_v33 = vld [vmem:[%s7917_s26 + $0x15e8] sm:$0xff]  ;;  %853 = vst [vmem:[%s7922_s27 + $0xaf8] sm:$0xff] %v852_v31  ;;  %v858_v34 = vld [vmem:[%s7917_s26 + $0x15f0] sm:$0xff] }
  0xc6   : > { %855 = vst [vmem:[%s7922_s27 + $0xb00] sm:$0xff] %v854_v32  ;;  %857 = vst [vmem:[%s7922_s27 + $0xb08] sm:$0xff] %v856_v33  ;;  %v860_v35 = vld [vmem:[%s7917_s26 + $0x15f8] sm:$0xff]  ;;  %v862_v36 = vld [vmem:[%s7917_s26 + $0x1600] sm:$0xff] }
  0xc7   : > { %859 = vst [vmem:[%s7922_s27 + $0xb10] sm:$0xff] %v858_v34  ;;  %861 = vst [vmem:[%s7922_s27 + $0xb18] sm:$0xff] %v860_v35  ;;  %v864_v37 = vld [vmem:[%s7917_s26 + $0x1608] sm:$0xff]  ;;  %v866_v38 = vld [vmem:[%s7917_s26 + $0x1610] sm:$0xff] }
  0xc8   : > { %863 = vst [vmem:[%s7922_s27 + $0xb20] sm:$0xff] %v862_v36  ;;  %v868_v39 = vld [vmem:[%s7917_s26 + $0x1618] sm:$0xff]  ;;  %865 = vst [vmem:[%s7922_s27 + $0xb28] sm:$0xff] %v864_v37  ;;  %v870_v40 = vld [vmem:[%s7917_s26 + $0x1680] sm:$0xff] }
  0xc9   : > { %867 = vst [vmem:[%s7922_s27 + $0xb30] sm:$0xff] %v866_v38  ;;  %869 = vst [vmem:[%s7922_s27 + $0xb38] sm:$0xff] %v868_v39  ;;  %v872_v41 = vld [vmem:[%s7917_s26 + $0x1688] sm:$0xff]  ;;  %v874_v42 = vld [vmem:[%s7917_s26 + $0x1690] sm:$0xff] }
  0xca   : > { %871 = vst [vmem:[%s7922_s27 + $0xb40] sm:$0xff] %v870_v40  ;;  %873 = vst [vmem:[%s7922_s27 + $0xb48] sm:$0xff] %v872_v41  ;;  %v876_v43 = vld [vmem:[%s7917_s26 + $0x1698] sm:$0xff]  ;;  %v878_v44 = vld [vmem:[%s7917_s26 + $0x16a0] sm:$0xff] }
  0xcb   : > { %875 = vst [vmem:[%s7922_s27 + $0xb50] sm:$0xff] %v874_v42  ;;  %v880_v45 = vld [vmem:[%s7917_s26 + $0x16a8] sm:$0xff]  ;;  %877 = vst [vmem:[%s7922_s27 + $0xb58] sm:$0xff] %v876_v43  ;;  %v882_v46 = vld [vmem:[%s7917_s26 + $0x16b0] sm:$0xff] }
  0xcc   : > { %879 = vst [vmem:[%s7922_s27 + $0xb60] sm:$0xff] %v878_v44  ;;  %881 = vst [vmem:[%s7922_s27 + $0xb68] sm:$0xff] %v880_v45  ;;  %v884_v47 = vld [vmem:[%s7917_s26 + $0x16b8] sm:$0xff]  ;;  %v886_v48 = vld [vmem:[%s7917_s26 + $0x16c0] sm:$0xff] }
  0xcd   : > { %883 = vst [vmem:[%s7922_s27 + $0xb70] sm:$0xff] %v882_v46  ;;  %885 = vst [vmem:[%s7922_s27 + $0xb78] sm:$0xff] %v884_v47  ;;  %v888_v49 = vld [vmem:[%s7917_s26 + $0x16c8] sm:$0xff]  ;;  %v890_v50 = vld [vmem:[%s7917_s26 + $0x16d0] sm:$0xff] }
  0xce   : > { %887 = vst [vmem:[%s7922_s27 + $0xb80] sm:$0xff] %v886_v48  ;;  %v892_v51 = vld [vmem:[%s7917_s26 + $0x16d8] sm:$0xff]  ;;  %889 = vst [vmem:[%s7922_s27 + $0xb88] sm:$0xff] %v888_v49  ;;  %v894_v52 = vld [vmem:[%s7917_s26 + $0x1740] sm:$0xff] }
  0xcf   : > { %891 = vst [vmem:[%s7922_s27 + $0xb90] sm:$0xff] %v890_v50  ;;  %893 = vst [vmem:[%s7922_s27 + $0xb98] sm:$0xff] %v892_v51  ;;  %v896_v53 = vld [vmem:[%s7917_s26 + $0x1748] sm:$0xff]  ;;  %v898_v54 = vld [vmem:[%s7917_s26 + $0x1750] sm:$0xff] }
  0xd0   : > { %895 = vst [vmem:[%s7922_s27 + $0xba0] sm:$0xff] %v894_v52  ;;  %897 = vst [vmem:[%s7922_s27 + $0xba8] sm:$0xff] %v896_v53  ;;  %v900_v55 = vld [vmem:[%s7917_s26 + $0x1758] sm:$0xff]  ;;  %v902_v56 = vld [vmem:[%s7917_s26 + $0x1760] sm:$0xff] }
  0xd1   : > { %899 = vst [vmem:[%s7922_s27 + $0xbb0] sm:$0xff] %v898_v54  ;;  %v904_v57 = vld [vmem:[%s7917_s26 + $0x1768] sm:$0xff]  ;;  %901 = vst [vmem:[%s7922_s27 + $0xbb8] sm:$0xff] %v900_v55  ;;  %v906_v58 = vld [vmem:[%s7917_s26 + $0x1770] sm:$0xff] }
  0xd2   : > { %903 = vst [vmem:[%s7922_s27 + $0xbc0] sm:$0xff] %v902_v56  ;;  %905 = vst [vmem:[%s7922_s27 + $0xbc8] sm:$0xff] %v904_v57  ;;  %v908_v59 = vld [vmem:[%s7917_s26 + $0x1778] sm:$0xff]  ;;  %v910_v60 = vld [vmem:[%s7917_s26 + $0x1780] sm:$0xff] }
  0xd3   : > { %907 = vst [vmem:[%s7922_s27 + $0xbd0] sm:$0xff] %v906_v58  ;;  %909 = vst [vmem:[%s7922_s27 + $0xbd8] sm:$0xff] %v908_v59  ;;  %v912_v61 = vld [vmem:[%s7917_s26 + $0x1788] sm:$0xff]  ;;  %v914_v62 = vld [vmem:[%s7917_s26 + $0x1790] sm:$0xff] }
  0xd4   : > { %911 = vst [vmem:[%s7922_s27 + $0xbe0] sm:$0xff] %v910_v60  ;;  %v916_v63 = vld [vmem:[%s7917_s26 + $0x1798] sm:$0xff]  ;;  %913 = vst [vmem:[%s7922_s27 + $0xbe8] sm:$0xff] %v912_v61  ;;  %v918_v0 = vld [vmem:[%s7917_s26 + $0x1800] sm:$0xff] }
  0xd5   : > { %915 = vst [vmem:[%s7922_s27 + $0xbf0] sm:$0xff] %v914_v62  ;;  %917 = vst [vmem:[%s7922_s27 + $0xbf8] sm:$0xff] %v916_v63  ;;  %v920_v1 = vld [vmem:[%s7917_s26 + $0x1808] sm:$0xff]  ;;  %v922_v2 = vld [vmem:[%s7917_s26 + $0x1810] sm:$0xff] }
  0xd6   : > { %919 = vst [vmem:[%s7922_s27 + $0xc00] sm:$0xff] %v918_v0  ;;  %921 = vst [vmem:[%s7922_s27 + $0xc08] sm:$0xff] %v920_v1  ;;  %v924_v3 = vld [vmem:[%s7917_s26 + $0x1818] sm:$0xff]  ;;  %v926_v4 = vld [vmem:[%s7917_s26 + $0x1820] sm:$0xff] }
  0xd7   : > { %923 = vst [vmem:[%s7922_s27 + $0xc10] sm:$0xff] %v922_v2  ;;  %v928_v5 = vld [vmem:[%s7917_s26 + $0x1828] sm:$0xff]  ;;  %925 = vst [vmem:[%s7922_s27 + $0xc18] sm:$0xff] %v924_v3  ;;  %v930_v6 = vld [vmem:[%s7917_s26 + $0x1830] sm:$0xff] }
  0xd8   : > { %927 = vst [vmem:[%s7922_s27 + $0xc20] sm:$0xff] %v926_v4  ;;  %929 = vst [vmem:[%s7922_s27 + $0xc28] sm:$0xff] %v928_v5  ;;  %v932_v7 = vld [vmem:[%s7917_s26 + $0x1838] sm:$0xff]  ;;  %v934_v8 = vld [vmem:[%s7917_s26 + $0x1840] sm:$0xff] }
  0xd9   : > { %931 = vst [vmem:[%s7922_s27 + $0xc30] sm:$0xff] %v930_v6  ;;  %933 = vst [vmem:[%s7922_s27 + $0xc38] sm:$0xff] %v932_v7  ;;  %v936_v9 = vld [vmem:[%s7917_s26 + $0x1848] sm:$0xff]  ;;  %v938_v10 = vld [vmem:[%s7917_s26 + $0x1850] sm:$0xff] }
  0xda   : > { %935 = vst [vmem:[%s7922_s27 + $0xc40] sm:$0xff] %v934_v8  ;;  %v940_v11 = vld [vmem:[%s7917_s26 + $0x1858] sm:$0xff]  ;;  %937 = vst [vmem:[%s7922_s27 + $0xc48] sm:$0xff] %v936_v9  ;;  %v942_v12 = vld [vmem:[%s7917_s26 + $0x18c0] sm:$0xff] }
  0xdb   : > { %939 = vst [vmem:[%s7922_s27 + $0xc50] sm:$0xff] %v938_v10  ;;  %941 = vst [vmem:[%s7922_s27 + $0xc58] sm:$0xff] %v940_v11  ;;  %v944_v13 = vld [vmem:[%s7917_s26 + $0x18c8] sm:$0xff]  ;;  %v946_v14 = vld [vmem:[%s7917_s26 + $0x18d0] sm:$0xff] }
  0xdc   : > { %943 = vst [vmem:[%s7922_s27 + $0xc60] sm:$0xff] %v942_v12  ;;  %945 = vst [vmem:[%s7922_s27 + $0xc68] sm:$0xff] %v944_v13  ;;  %v948_v15 = vld [vmem:[%s7917_s26 + $0x18d8] sm:$0xff]  ;;  %v950_v16 = vld [vmem:[%s7917_s26 + $0x18e0] sm:$0xff] }
  0xdd   : > { %947 = vst [vmem:[%s7922_s27 + $0xc70] sm:$0xff] %v946_v14  ;;  %v952_v17 = vld [vmem:[%s7917_s26 + $0x18e8] sm:$0xff]  ;;  %949 = vst [vmem:[%s7922_s27 + $0xc78] sm:$0xff] %v948_v15  ;;  %v954_v18 = vld [vmem:[%s7917_s26 + $0x18f0] sm:$0xff] }
  0xde   : > { %951 = vst [vmem:[%s7922_s27 + $0xc80] sm:$0xff] %v950_v16  ;;  %953 = vst [vmem:[%s7922_s27 + $0xc88] sm:$0xff] %v952_v17  ;;  %v956_v19 = vld [vmem:[%s7917_s26 + $0x18f8] sm:$0xff]  ;;  %v958_v20 = vld [vmem:[%s7917_s26 + $0x1900] sm:$0xff] }
  0xdf   : > { %955 = vst [vmem:[%s7922_s27 + $0xc90] sm:$0xff] %v954_v18  ;;  %957 = vst [vmem:[%s7922_s27 + $0xc98] sm:$0xff] %v956_v19  ;;  %v960_v21 = vld [vmem:[%s7917_s26 + $0x1908] sm:$0xff]  ;;  %v962_v22 = vld [vmem:[%s7917_s26 + $0x1910] sm:$0xff] }
  0xe0   : > { %959 = vst [vmem:[%s7922_s27 + $0xca0] sm:$0xff] %v958_v20  ;;  %v964_v23 = vld [vmem:[%s7917_s26 + $0x1918] sm:$0xff]  ;;  %961 = vst [vmem:[%s7922_s27 + $0xca8] sm:$0xff] %v960_v21  ;;  %v966_v24 = vld [vmem:[%s7917_s26 + $0x1980] sm:$0xff] }
  0xe1   : > { %963 = vst [vmem:[%s7922_s27 + $0xcb0] sm:$0xff] %v962_v22  ;;  %965 = vst [vmem:[%s7922_s27 + $0xcb8] sm:$0xff] %v964_v23  ;;  %v968_v25 = vld [vmem:[%s7917_s26 + $0x1988] sm:$0xff]  ;;  %v970_v26 = vld [vmem:[%s7917_s26 + $0x1990] sm:$0xff] }
  0xe2   : > { %967 = vst [vmem:[%s7922_s27 + $0xcc0] sm:$0xff] %v966_v24  ;;  %969 = vst [vmem:[%s7922_s27 + $0xcc8] sm:$0xff] %v968_v25  ;;  %v972_v27 = vld [vmem:[%s7917_s26 + $0x1998] sm:$0xff]  ;;  %v974_v28 = vld [vmem:[%s7917_s26 + $0x19a0] sm:$0xff] }
  0xe3   : > { %971 = vst [vmem:[%s7922_s27 + $0xcd0] sm:$0xff] %v970_v26  ;;  %v976_v29 = vld [vmem:[%s7917_s26 + $0x19a8] sm:$0xff]  ;;  %973 = vst [vmem:[%s7922_s27 + $0xcd8] sm:$0xff] %v972_v27  ;;  %v978_v30 = vld [vmem:[%s7917_s26 + $0x19b0] sm:$0xff] }
  0xe4   : > { %975 = vst [vmem:[%s7922_s27 + $0xce0] sm:$0xff] %v974_v28  ;;  %977 = vst [vmem:[%s7922_s27 + $0xce8] sm:$0xff] %v976_v29  ;;  %v980_v31 = vld [vmem:[%s7917_s26 + $0x19b8] sm:$0xff]  ;;  %v982_v32 = vld [vmem:[%s7917_s26 + $0x19c0] sm:$0xff] }
  0xe5   : > { %979 = vst [vmem:[%s7922_s27 + $0xcf0] sm:$0xff] %v978_v30  ;;  %981 = vst [vmem:[%s7922_s27 + $0xcf8] sm:$0xff] %v980_v31  ;;  %v984_v33 = vld [vmem:[%s7917_s26 + $0x19c8] sm:$0xff]  ;;  %v986_v34 = vld [vmem:[%s7917_s26 + $0x19d0] sm:$0xff] }
  0xe6   : > { %983 = vst [vmem:[%s7922_s27 + $0xd00] sm:$0xff] %v982_v32  ;;  %v988_v35 = vld [vmem:[%s7917_s26 + $0x19d8] sm:$0xff]  ;;  %985 = vst [vmem:[%s7922_s27 + $0xd08] sm:$0xff] %v984_v33  ;;  %v990_v36 = vld [vmem:[%s7917_s26 + $0x1a40] sm:$0xff] }
  0xe7   : > { %987 = vst [vmem:[%s7922_s27 + $0xd10] sm:$0xff] %v986_v34  ;;  %989 = vst [vmem:[%s7922_s27 + $0xd18] sm:$0xff] %v988_v35  ;;  %v992_v37 = vld [vmem:[%s7917_s26 + $0x1a48] sm:$0xff]  ;;  %v994_v38 = vld [vmem:[%s7917_s26 + $0x1a50] sm:$0xff] }
  0xe8   : > { %991 = vst [vmem:[%s7922_s27 + $0xd20] sm:$0xff] %v990_v36  ;;  %993 = vst [vmem:[%s7922_s27 + $0xd28] sm:$0xff] %v992_v37  ;;  %v996_v39 = vld [vmem:[%s7917_s26 + $0x1a58] sm:$0xff]  ;;  %v998_v40 = vld [vmem:[%s7917_s26 + $0x1a60] sm:$0xff] }
  0xe9   : > { %995 = vst [vmem:[%s7922_s27 + $0xd30] sm:$0xff] %v994_v38  ;;  %v1000_v41 = vld [vmem:[%s7917_s26 + $0x1a68] sm:$0xff]  ;;  %997 = vst [vmem:[%s7922_s27 + $0xd38] sm:$0xff] %v996_v39  ;;  %v1002_v42 = vld [vmem:[%s7917_s26 + $0x1a70] sm:$0xff] }
  0xea   : > { %999 = vst [vmem:[%s7922_s27 + $0xd40] sm:$0xff] %v998_v40  ;;  %1001 = vst [vmem:[%s7922_s27 + $0xd48] sm:$0xff] %v1000_v41  ;;  %v1004_v43 = vld [vmem:[%s7917_s26 + $0x1a78] sm:$0xff]  ;;  %v1006_v44 = vld [vmem:[%s7917_s26 + $0x1a80] sm:$0xff] }
  0xeb   : > { %1003 = vst [vmem:[%s7922_s27 + $0xd50] sm:$0xff] %v1002_v42  ;;  %1005 = vst [vmem:[%s7922_s27 + $0xd58] sm:$0xff] %v1004_v43  ;;  %v1008_v45 = vld [vmem:[%s7917_s26 + $0x1a88] sm:$0xff]  ;;  %v1010_v46 = vld [vmem:[%s7917_s26 + $0x1a90] sm:$0xff] }
  0xec   : > { %1007 = vst [vmem:[%s7922_s27 + $0xd60] sm:$0xff] %v1006_v44  ;;  %v1012_v47 = vld [vmem:[%s7917_s26 + $0x1a98] sm:$0xff]  ;;  %1009 = vst [vmem:[%s7922_s27 + $0xd68] sm:$0xff] %v1008_v45  ;;  %v1014_v48 = vld [vmem:[%s7917_s26 + $0x1b00] sm:$0xff] }
  0xed   : > { %1011 = vst [vmem:[%s7922_s27 + $0xd70] sm:$0xff] %v1010_v46  ;;  %1013 = vst [vmem:[%s7922_s27 + $0xd78] sm:$0xff] %v1012_v47  ;;  %v1016_v49 = vld [vmem:[%s7917_s26 + $0x1b08] sm:$0xff]  ;;  %v1018_v50 = vld [vmem:[%s7917_s26 + $0x1b10] sm:$0xff] }
  0xee   : > { %1015 = vst [vmem:[%s7922_s27 + $0xd80] sm:$0xff] %v1014_v48  ;;  %1017 = vst [vmem:[%s7922_s27 + $0xd88] sm:$0xff] %v1016_v49  ;;  %v1020_v51 = vld [vmem:[%s7917_s26 + $0x1b18] sm:$0xff]  ;;  %v1022_v52 = vld [vmem:[%s7917_s26 + $0x1b20] sm:$0xff] }
  0xef   : > { %1019 = vst [vmem:[%s7922_s27 + $0xd90] sm:$0xff] %v1018_v50  ;;  %v1024_v53 = vld [vmem:[%s7917_s26 + $0x1b28] sm:$0xff]  ;;  %1021 = vst [vmem:[%s7922_s27 + $0xd98] sm:$0xff] %v1020_v51  ;;  %v1026_v54 = vld [vmem:[%s7917_s26 + $0x1b30] sm:$0xff] }
  0xf0   : > { %1023 = vst [vmem:[%s7922_s27 + $0xda0] sm:$0xff] %v1022_v52  ;;  %1025 = vst [vmem:[%s7922_s27 + $0xda8] sm:$0xff] %v1024_v53  ;;  %v1028_v55 = vld [vmem:[%s7917_s26 + $0x1b38] sm:$0xff]  ;;  %v1030_v56 = vld [vmem:[%s7917_s26 + $0x1b40] sm:$0xff] }
  0xf1   : > { %1027 = vst [vmem:[%s7922_s27 + $0xdb0] sm:$0xff] %v1026_v54  ;;  %1029 = vst [vmem:[%s7922_s27 + $0xdb8] sm:$0xff] %v1028_v55  ;;  %v1032_v57 = vld [vmem:[%s7917_s26 + $0x1b48] sm:$0xff]  ;;  %v1034_v58 = vld [vmem:[%s7917_s26 + $0x1b50] sm:$0xff] }
  0xf2   : > { %1031 = vst [vmem:[%s7922_s27 + $0xdc0] sm:$0xff] %v1030_v56  ;;  %v1036_v59 = vld [vmem:[%s7917_s26 + $0x1b58] sm:$0xff]  ;;  %1033 = vst [vmem:[%s7922_s27 + $0xdc8] sm:$0xff] %v1032_v57  ;;  %v1038_v60 = vld [vmem:[%s7917_s26 + $0x1bc0] sm:$0xff] }
  0xf3   : > { %1035 = vst [vmem:[%s7922_s27 + $0xdd0] sm:$0xff] %v1034_v58  ;;  %1037 = vst [vmem:[%s7922_s27 + $0xdd8] sm:$0xff] %v1036_v59  ;;  %v1040_v61 = vld [vmem:[%s7917_s26 + $0x1bc8] sm:$0xff]  ;;  %v1042_v62 = vld [vmem:[%s7917_s26 + $0x1bd0] sm:$0xff] }
  0xf4   : > { %1039 = vst [vmem:[%s7922_s27 + $0xde0] sm:$0xff] %v1038_v60  ;;  %1041 = vst [vmem:[%s7922_s27 + $0xde8] sm:$0xff] %v1040_v61  ;;  %v1044_v63 = vld [vmem:[%s7917_s26 + $0x1bd8] sm:$0xff]  ;;  %v1046_v0 = vld [vmem:[%s7917_s26 + $0x1be0] sm:$0xff] }
  0xf5   : > { %1043 = vst [vmem:[%s7922_s27 + $0xdf0] sm:$0xff] %v1042_v62  ;;  %v1048_v1 = vld [vmem:[%s7917_s26 + $0x1be8] sm:$0xff]  ;;  %1045 = vst [vmem:[%s7922_s27 + $0xdf8] sm:$0xff] %v1044_v63  ;;  %v1050_v2 = vld [vmem:[%s7917_s26 + $0x1bf0] sm:$0xff] }
  0xf6   : > { %1047 = vst [vmem:[%s7922_s27 + $0xe00] sm:$0xff] %v1046_v0  ;;  %1049 = vst [vmem:[%s7922_s27 + $0xe08] sm:$0xff] %v1048_v1  ;;  %v1052_v3 = vld [vmem:[%s7917_s26 + $0x1bf8] sm:$0xff]  ;;  %v1054_v4 = vld [vmem:[%s7917_s26 + $0x1c00] sm:$0xff] }
  0xf7   : > { %1051 = vst [vmem:[%s7922_s27 + $0xe10] sm:$0xff] %v1050_v2  ;;  %1053 = vst [vmem:[%s7922_s27 + $0xe18] sm:$0xff] %v1052_v3  ;;  %v1056_v5 = vld [vmem:[%s7917_s26 + $0x1c08] sm:$0xff]  ;;  %v1058_v6 = vld [vmem:[%s7917_s26 + $0x1c10] sm:$0xff] }
  0xf8   : > { %1055 = vst [vmem:[%s7922_s27 + $0xe20] sm:$0xff] %v1054_v4  ;;  %v1060_v7 = vld [vmem:[%s7917_s26 + $0x1c18] sm:$0xff]  ;;  %1057 = vst [vmem:[%s7922_s27 + $0xe28] sm:$0xff] %v1056_v5  ;;  %v1062_v8 = vld [vmem:[%s7917_s26 + $0x1c80] sm:$0xff] }
  0xf9   : > { %1059 = vst [vmem:[%s7922_s27 + $0xe30] sm:$0xff] %v1058_v6  ;;  %1061 = vst [vmem:[%s7922_s27 + $0xe38] sm:$0xff] %v1060_v7  ;;  %v1064_v9 = vld [vmem:[%s7917_s26 + $0x1c88] sm:$0xff]  ;;  %v1066_v10 = vld [vmem:[%s7917_s26 + $0x1c90] sm:$0xff] }
  0xfa   : > { %1063 = vst [vmem:[%s7922_s27 + $0xe40] sm:$0xff] %v1062_v8  ;;  %1065 = vst [vmem:[%s7922_s27 + $0xe48] sm:$0xff] %v1064_v9  ;;  %v1068_v11 = vld [vmem:[%s7917_s26 + $0x1c98] sm:$0xff]  ;;  %v1070_v12 = vld [vmem:[%s7917_s26 + $0x1ca0] sm:$0xff] }
  0xfb   : > { %1067 = vst [vmem:[%s7922_s27 + $0xe50] sm:$0xff] %v1066_v10  ;;  %v1072_v13 = vld [vmem:[%s7917_s26 + $0x1ca8] sm:$0xff]  ;;  %1069 = vst [vmem:[%s7922_s27 + $0xe58] sm:$0xff] %v1068_v11  ;;  %v1074_v14 = vld [vmem:[%s7917_s26 + $0x1cb0] sm:$0xff] }
  0xfc   : > { %1071 = vst [vmem:[%s7922_s27 + $0xe60] sm:$0xff] %v1070_v12  ;;  %1073 = vst [vmem:[%s7922_s27 + $0xe68] sm:$0xff] %v1072_v13  ;;  %v1076_v15 = vld [vmem:[%s7917_s26 + $0x1cb8] sm:$0xff]  ;;  %v1078_v16 = vld [vmem:[%s7917_s26 + $0x1cc0] sm:$0xff] }
  0xfd   : > { %1075 = vst [vmem:[%s7922_s27 + $0xe70] sm:$0xff] %v1074_v14  ;;  %1077 = vst [vmem:[%s7922_s27 + $0xe78] sm:$0xff] %v1076_v15  ;;  %v1080_v17 = vld [vmem:[%s7917_s26 + $0x1cc8] sm:$0xff]  ;;  %v1082_v18 = vld [vmem:[%s7917_s26 + $0x1cd0] sm:$0xff] }
  0xfe   : > { %1079 = vst [vmem:[%s7922_s27 + $0xe80] sm:$0xff] %v1078_v16  ;;  %v1084_v19 = vld [vmem:[%s7917_s26 + $0x1cd8] sm:$0xff]  ;;  %1081 = vst [vmem:[%s7922_s27 + $0xe88] sm:$0xff] %v1080_v17  ;;  %v1086_v20 = vld [vmem:[%s7917_s26 + $0x1d40] sm:$0xff] }
  0xff   : > { %1083 = vst [vmem:[%s7922_s27 + $0xe90] sm:$0xff] %v1082_v18  ;;  %1085 = vst [vmem:[%s7922_s27 + $0xe98] sm:$0xff] %v1084_v19  ;;  %v1088_v21 = vld [vmem:[%s7917_s26 + $0x1d48] sm:$0xff]  ;;  %v1090_v22 = vld [vmem:[%s7917_s26 + $0x1d50] sm:$0xff] }
 0x100   : > { %1087 = vst [vmem:[%s7922_s27 + $0xea0] sm:$0xff] %v1086_v20  ;;  %1089 = vst [vmem:[%s7922_s27 + $0xea8] sm:$0xff] %v1088_v21  ;;  %v1092_v23 = vld [vmem:[%s7917_s26 + $0x1d58] sm:$0xff]  ;;  %v1094_v24 = vld [vmem:[%s7917_s26 + $0x1d60] sm:$0xff] }
 0x101   : > { %1091 = vst [vmem:[%s7922_s27 + $0xeb0] sm:$0xff] %v1090_v22  ;;  %v1096_v25 = vld [vmem:[%s7917_s26 + $0x1d68] sm:$0xff]  ;;  %1093 = vst [vmem:[%s7922_s27 + $0xeb8] sm:$0xff] %v1092_v23  ;;  %v1098_v26 = vld [vmem:[%s7917_s26 + $0x1d70] sm:$0xff] }
 0x102   : > { %1095 = vst [vmem:[%s7922_s27 + $0xec0] sm:$0xff] %v1094_v24  ;;  %1097 = vst [vmem:[%s7922_s27 + $0xec8] sm:$0xff] %v1096_v25  ;;  %v1100_v27 = vld [vmem:[%s7917_s26 + $0x1d78] sm:$0xff]  ;;  %v1102_v28 = vld [vmem:[%s7917_s26 + $0x1d80] sm:$0xff] }
 0x103   : > { %1099 = vst [vmem:[%s7922_s27 + $0xed0] sm:$0xff] %v1098_v26  ;;  %1101 = vst [vmem:[%s7922_s27 + $0xed8] sm:$0xff] %v1100_v27  ;;  %v1104_v29 = vld [vmem:[%s7917_s26 + $0x1d88] sm:$0xff]  ;;  %v1106_v30 = vld [vmem:[%s7917_s26 + $0x1d90] sm:$0xff] }
 0x104   : > { %1103 = vst [vmem:[%s7922_s27 + $0xee0] sm:$0xff] %v1102_v28  ;;  %v1108_v31 = vld [vmem:[%s7917_s26 + $0x1d98] sm:$0xff]  ;;  %1105 = vst [vmem:[%s7922_s27 + $0xee8] sm:$0xff] %v1104_v29 }
 0x105   : > { %1107 = vst [vmem:[%s7922_s27 + $0xef0] sm:$0xff] %v1106_v30  ;;  %1109 = vst [vmem:[%s7922_s27 + $0xef8] sm:$0xff] %v1108_v31 }
 0x106 PF: > { %p6854_p7 = scmp.ge.s32.totalorder %s7853_s14, 1  ;;  %p1114_p8 = scmp.lt.s32.totalorder %s7853_s14, 3 }
 0x108   : > { %p1115_p9 = pnand %p6854_p7, %p1114_p8 }
 0x10a   : > { %1118 = sbr.rel (%p1115_p9) target bundleno = 995 (0x3e3), region = 51 }
 0x111   : > { %s1121_s28 = sand.u32 1, %s7845_s12   ;;  %v10361_v32 = vmov 0   ;;  %vm1853_vm0 = vcmask 1044480   ;;  %vm1854_vm1 = vcmask 1045504   ;;  %v7856_v61 = vmov 65535   ;;  %v8926_v24 = vld [vmem:[%s10354_s0] sm:$0xff]  }
 0x112   : > { %s7798_s29 = smul.u32 3840, %s1121_s28  ;;  %1961 = vmatprep.mubr.bf16.mxu0 %v10361_v32  ;;  %2004 = vmatprep.mubr.bf16.mxu1 %v10361_v32  ;;  %v1855_v62 = vsel %vm1853_vm0, 4294967295, %v7856_v61  ;;  %vm1849_vm2 = vcmask 613376  }
 0x113   : > { %7826 = vset.pattern.permute.xlu0 %v10361_v32  ;;  %v8911_v6 = vsel %vm1854_vm1, %v1855_v62, 0  ;;  %s7799_s23 = smul.u32 192, %s1121_s28 }
 0x114   : > { %s8889_s30 = scalar_lea.vmem [#allocation2], %s7798_s29  ;;  %s7796_s24 = smul.u32 (%p7907_p5), 96, %s6849_s15 }
 0x115   : > { %v1148_v33 = vld [vmem:[%s8889_s30] sm:$0xff]  ;;  %v1149_v35 = vld [vmem:[%s8889_s30 + $0x8] sm:$0xff]  ;;  %v1150_v14 = vld [vmem:[%s8889_s30 + $0x10] sm:$0xff]  ;;  %s10061_s12 = scalar_lea.vmem [#allocation3], %s7799_s23 }
 0x116   : > { %v1160_v34 = vld [vmem:[%s8889_s30 + $0x60] sm:$0xff]  ;;  %v1161_v37 = vld [vmem:[%s8889_s30 + $0x68] sm:$0xff]  ;;  %v1162_v15 = vld [vmem:[%s8889_s30 + $0x70] sm:$0xff]  ;;  %s10300_s25 = scalar_lea.vmem (%p7907_p5), %s10357_s3, %s7796_s24 }
 0x117   : > { %v6857_v36 = vcombine.high %v1148_v33, %v1160_v34  ;;  %v6856_v38 = vcombine.low %v1148_v33, %v1160_v34  ;;  %v1172_v39 = vld [vmem:[%s8889_s30 + $0xc0] sm:$0xff]  ;;  %v6859_v41 = vcombine.high %v1149_v35, %v1161_v37  ;;  %v6858_v42 = vcombine.low %v1149_v35, %v1161_v37  ;;  %v1173_v44 = vld [vmem:[%s8889_s30 + $0xc8] sm:$0xff]  ;;  %v1151_v16 = vld [vmem:[%s8889_s30 + $0x18] sm:$0xff] }
 0x118   : > { %v1184_v40 = vld [vmem:[%s8889_s30 + $0x120] sm:$0xff]  ;;  %v1185_v45 = vld [vmem:[%s8889_s30 + $0x128] sm:$0xff]  ;;  %v1163_v17 = vld [vmem:[%s8889_s30 + $0x78] sm:$0xff]  ;;  %v6861_v20 = vcombine.high %v1150_v14, %v1162_v15  ;;  %v6860_v27 = vcombine.low %v1150_v14, %v1162_v15 }
 0x119   : > { %v6881_v43 = vcombine.high %v1172_v39, %v1184_v40  ;;  %v1196_v46 = vld [vmem:[%s8889_s30 + $0x180] sm:$0xff]  ;;  %1929 = vmatprep.subr.bf16.mxu0 %v6857_v36  ;;  %v6883_v47 = vcombine.high %v1173_v44, %v1185_v45  ;;  %v1197_v49 = vld [vmem:[%s8889_s30 + $0x188] sm:$0xff]  ;;  %1972 = vmatprep.subr.bf16.mxu1 %v6859_v41  ;;  %v6880_v51 = vcombine.low %v1172_v39, %v1184_v40  ;;  %v1174_v22 = vld [vmem:[%s8889_s30 + $0xd0] sm:$0xff] }
 0x11a   : > { %v1208_v48 = vld [vmem:[%s8889_s30 + $0x1e0] sm:$0xff]  ;;  %v1209_v50 = vld [vmem:[%s8889_s30 + $0x1e8] sm:$0xff]  ;;  %1930 = vmatpush1.bf16.msra.mxu0 %v6856_v38  ;;  %1973 = vmatpush1.bf16.msra.mxu1 %v6858_v42  ;;  %v6882_v52 = vcombine.low %v1173_v44, %v1185_v45  ;;  %v6863_v21 = vcombine.high %v1151_v16, %v1163_v17  ;;  %v1186_v23 = vld [vmem:[%s8889_s30 + $0x130] sm:$0xff]  ;;  %v6862_v28 = vcombine.low %v1151_v16, %v1163_v17 }
 0x11b   : > { %1931 = vmatprep.subr.bf16.mxu0 %v6881_v43  ;;  %v6905_v53 = vcombine.high %v1196_v46, %v1208_v48  ;;  %v1220_v54 = vld [vmem:[%s8889_s30 + $0x240] sm:$0xff]  ;;  %1974 = vmatprep.subr.bf16.mxu1 %v6883_v47  ;;  %v6907_v56 = vcombine.high %v1197_v49, %v1209_v50  ;;  %v1221_v57 = vld [vmem:[%s8889_s30 + $0x248] sm:$0xff]  ;;  %v6904_v1 = vcombine.low %v1196_v46, %v1208_v48  ;;  %v1175_v25 = vld [vmem:[%s8889_s30 + $0xd8] sm:$0xff] }
 0x11c   : > { %v1232_v55 = vld [vmem:[%s8889_s30 + $0x2a0] sm:$0xff]  ;;  %v1233_v60 = vld [vmem:[%s8889_s30 + $0x2a8] sm:$0xff]  ;;  %v6906_v2 = vcombine.low %v1197_v49, %v1209_v50  ;;  %v1187_v26 = vld [vmem:[%s8889_s30 + $0x138] sm:$0xff]  ;;  %v6885_v29 = vcombine.high %v1174_v22, %v1186_v23  ;;  %v6884_v36 = vcombine.low %v1174_v22, %v1186_v23 }
 0x11d   : > { %v1244_v58 = vld [vmem:[%s8889_s30 + $0x300] sm:$0xff]  ;;  %v1245_v63 = vld [vmem:[%s8889_s30 + $0x308] sm:$0xff]  ;;  %v6929_v3 = vcombine.high %v1220_v54, %v1232_v55  ;;  %v6931_v5 = vcombine.high %v1221_v57, %v1233_v60  ;;  %v6928_v8 = vcombine.low %v1220_v54, %v1232_v55  ;;  %v6930_v10 = vcombine.low %v1221_v57, %v1233_v60  ;;  %v1198_v31 = vld [vmem:[%s8889_s30 + $0x190] sm:$0xff] }
 0x11e   : > { %v1256_v59 = vld [vmem:[%s8889_s30 + $0x360] sm:$0x33]  ;;  %v1257_v0 = vld [vmem:[%s8889_s30 + $0x368] sm:$0x33]  ;;  %1932 = vmatpush1.bf16.msra.mxu0 %v6880_v51  ;;  %1975 = vmatpush1.bf16.msra.mxu1 %v6882_v52  ;;  %v6887_v30 = vcombine.high %v1175_v25, %v1187_v26  ;;  %v1210_v33 = vld [vmem:[%s8889_s30 + $0x1f0] sm:$0xff]  ;;  %v6886_v37 = vcombine.low %v1175_v25, %v1187_v26 }
 0x11f   : > { %1933 = vmatprep.subr.bf16.mxu0 %v6905_v53  ;;  %v6953_v4 = vcombine.high %v1244_v58, %v1256_v59  ;;  %1976 = vmatprep.subr.bf16.mxu1 %v6907_v56  ;;  %v6955_v7 = vcombine.high %v1245_v63, %v1257_v0  ;;  %v6952_v9 = vcombine.low %v1244_v58, %v1256_v59  ;;  %v1199_v34 = vld [vmem:[%s8889_s30 + $0x198] sm:$0xff]  ;;  %v1222_v39 = vld [vmem:[%s8889_s30 + $0x250] sm:$0xff]  ;;  %v1152_v60 = vld [vmem:[%s8889_s30 + $0x20] sm:$0xff] }
 0x120   : > { %v6954_v12 = vcombine.low %v1245_v63, %v1257_v0  ;;  %v1211_v35 = vld [vmem:[%s8889_s30 + $0x1f8] sm:$0xff]  ;;  %v6909_v38 = vcombine.high %v1198_v31, %v1210_v33  ;;  %v1234_v40 = vld [vmem:[%s8889_s30 + $0x2b0] sm:$0xff]  ;;  %v6908_v48 = vcombine.low %v1198_v31, %v1210_v33  ;;  %v1164_v61 = vld [vmem:[%s8889_s30 + $0x80] sm:$0xff] }
 0x121   : > { %v1861_v11 = vand.u32 %v6953_v4, %v8911_v6  ;;  %v1867_v13 = vand.u32 %v6955_v7, %v8911_v6  ;;  %v1858_v18 = vand.u32 %v6952_v9, %v8911_v6  ;;  %v6911_v41 = vcombine.high %v1199_v34, %v1211_v35  ;;  %v1223_v42 = vld [vmem:[%s8889_s30 + $0x258] sm:$0xff]  ;;  %v1246_v43 = vld [vmem:[%s8889_s30 + $0x310] sm:$0xff]  ;;  %v1153_v62 = vld [vmem:[%s8889_s30 + $0x28] sm:$0xff] }
 0x122   : > { %1934 = vmatpush1.bf16.msra.mxu0 %v6904_v1  ;;  %1977 = vmatpush1.bf16.msra.mxu1 %v6906_v2  ;;  %v1864_v19 = vand.u32 %v6954_v12, %v8911_v6  ;;  %v1258_v44 = vld [vmem:[%s8889_s30 + $0x370] sm:$0x33]  ;;  %v1235_v45 = vld [vmem:[%s8889_s30 + $0x2b8] sm:$0xff]  ;;  %v6910_v49 = vcombine.low %v1199_v34, %v1211_v35  ;;  %v6933_v50 = vcombine.high %v1222_v39, %v1234_v40  ;;  %v1165_v63 = vld [vmem:[%s8889_s30 + $0x88] sm:$0xff] }
 0x123   : > { %1935 = vmatprep.subr.bf16.mxu0 %v6929_v3  ;;  %1978 = vmatprep.subr.bf16.mxu1 %v6931_v5  ;;  %v1247_v46 = vld [vmem:[%s8889_s30 + $0x318] sm:$0xff]  ;;  %v6957_v51 = vcombine.high %v1246_v43, %v1258_v44  ;;  %v6935_v52 = vcombine.high %v1223_v42, %v1235_v45  ;;  %v6932_v54 = vcombine.low %v1222_v39, %v1234_v40  ;;  %v1176_v4 = vld [vmem:[%s8889_s30 + $0xe0] sm:$0xff]  ;;  %v1177_v7 = vld [vmem:[%s8889_s30 + $0xe8] sm:$0xff] }
 0x124   : > { %v1259_v47 = vld [vmem:[%s8889_s30 + $0x378] sm:$0x33]  ;;  %v6956_v55 = vcombine.low %v1246_v43, %v1258_v44  ;;  %v6934_v56 = vcombine.low %v1223_v42, %v1235_v45  ;;  %v6865_v2 = vcombine.high %v1152_v60, %v1164_v61  ;;  %v6867_v3 = vcombine.high %v1153_v62, %v1165_v63  ;;  %v1188_v5 = vld [vmem:[%s8889_s30 + $0x140] sm:$0xff]  ;;  %v1201_v15 = vld [vmem:[%s8889_s30 + $0x1a8] sm:$0xff] }
 0x125   : > { %v6959_v53 = vcombine.high %v1247_v46, %v1259_v47  ;;  %v1873_v57 = vand.u32 %v6957_v51, %v8911_v6  ;;  %v6958_v58 = vcombine.low %v1247_v46, %v1259_v47  ;;  %v6864_v9 = vcombine.low %v1152_v60, %v1164_v61  ;;  %v1212_v14 = vld [vmem:[%s8889_s30 + $0x200] sm:$0xff]  ;;  %v1213_v16 = vld [vmem:[%s8889_s30 + $0x208] sm:$0xff]  ;;  %v1154_v43 = vld [vmem:[%s8889_s30 + $0x30] sm:$0xff] }
 0x126   : > { %1936 = vmatpush1.bf16.msra.mxu0 %v6928_v8  ;;  %1979 = vmatpush1.bf16.msra.mxu1 %v6930_v10  ;;  %v1870_v0 = vand.u32 %v6956_v55, %v8911_v6  ;;  %v1189_v8 = vld [vmem:[%s8889_s30 + $0x148] sm:$0xff]  ;;  %v6866_v10 = vcombine.low %v1153_v62, %v1165_v63  ;;  %v6888_v17 = vcombine.low %v1176_v4, %v1188_v5  ;;  %v1248_v25 = vld [vmem:[%s8889_s30 + $0x320] sm:$0xff]  ;;  %v1166_v44 = vld [vmem:[%s8889_s30 + $0x90] sm:$0xff] }
 0x127   : > { %1937 = vmatprep.subr.bf16.mxu0 %v1861_v11  ;;  %1980 = vmatprep.subr.bf16.mxu1 %v1867_v13  ;;  %v1879_v59 = vand.u32 %v6959_v53, %v8911_v6  ;;  %v1876_v1 = vand.u32 %v6958_v58, %v8911_v6  ;;  %v6889_v11 = vcombine.high %v1176_v4, %v1188_v5  ;;  %v1200_v13 = vld [vmem:[%s8889_s30 + $0x1a0] sm:$0xff]  ;;  %v1225_v23 = vld [vmem:[%s8889_s30 + $0x268] sm:$0xff]  ;;  %v1155_v45 = vld [vmem:[%s8889_s30 + $0x38] sm:$0xff] }
 0x128   : > { %v6891_v12 = vcombine.high %v1177_v7, %v1189_v8  ;;  %v6915_v22 = vcombine.high %v1201_v15, %v1213_v16  ;;  %v1260_v26 = vld [vmem:[%s8889_s30 + $0x380] sm:$0x33]  ;;  %v6914_v31 = vcombine.low %v1201_v15, %v1213_v16  ;;  %v1167_v46 = vld [vmem:[%s8889_s30 + $0x98] sm:$0xff]  ;;  %v1178_v51 = vld [vmem:[%s8889_s30 + $0xf0] sm:$0xff]  ;;  %v6868_v55 = vcombine.low %v1154_v43, %v1166_v44 }
 0x129   : > { %v6961_v34 = vcombine.high %v1248_v25, %v1260_v26  ;;  %v1179_v53 = vld [vmem:[%s8889_s30 + $0xf8] sm:$0xff]  ;;  %v1214_v60 = vld [vmem:[%s8889_s30 + $0x210] sm:$0xff] }
 0x12a   : > { %1938 = vmatpush1.bf16.msra.mxu0 %v1858_v18  ;;  %1981 = vmatpush1.bf16.msra.mxu1 %v1864_v19  ;;  %v6890_v18 = vcombine.low %v1177_v7, %v1189_v8  ;;  %v6913_v19 = vcombine.high %v1200_v13, %v1212_v14  ;;  %v1203_v61 = vld [vmem:[%s8889_s30 + $0x1b8] sm:$0xff]  ;;  %v1250_v7 = vld [vmem:[%s8889_s30 + $0x330] sm:$0xff] }
 0x12b   : > { %2015 = vmatprep.subr.bf16.mxu0 %v6861_v20  ;;  %2058 = vmatprep.subr.bf16.mxu1 %v6863_v21  ;;  %v1224_v20 = vld [vmem:[%s8889_s30 + $0x260] sm:$0xff]  ;;  %v1885_v40 = vand.u32 %v6961_v34, %v8911_v6  ;;  %v1215_v62 = vld [vmem:[%s8889_s30 + $0x218] sm:$0xff]  ;;  %v1262_v8 = vld [vmem:[%s8889_s30 + $0x390] sm:$0x33] }
 0x12c   : > { %v1236_v21 = vld [vmem:[%s8889_s30 + $0x2c0] sm:$0xff]  ;;  %v6919_v4 = vcombine.high %v1203_v61, %v1215_v62  ;;  %v1227_v5 = vld [vmem:[%s8889_s30 + $0x278] sm:$0xff]  ;;  %v6965_v15 = vcombine.high %v1250_v7, %v1262_v8 }
 0x12d   : > { %6976 = vmatmul.mubr.msk.bf16.vlgmr.msra.gmra.mrb[0].mxu0 %vm1849_vm2, %v8926_v24  ;;  %6977 = vmatmul.mubr.msk.bf16.vlgmr.msra.gmra.mrb[0].mxu1 %vm1849_vm2, %v8926_v24  ;;  %v6937_v33 = vcombine.high %v1224_v20, %v1236_v21  ;;  %v1180_v34 = vld [vmem:[%s8889_s30 + $0x100] sm:$0xff] }
 0x12e   : > { %2016 = vmatpush1.bf16.msra.mxu0 %v6860_v27  ;;  %2059 = vmatpush1.bf16.msra.mxu1 %v6862_v28  ;;  %v1237_v27 = vld [vmem:[%s8889_s30 + $0x2c8] sm:$0xff] }
 0x12f   : > { %2017 = vmatprep.subr.bf16.mxu0 %v6885_v29  ;;  %2060 = vmatprep.subr.bf16.mxu1 %v6887_v30  ;;  %v1249_v28 = vld [vmem:[%s8889_s30 + $0x328] sm:$0xff]  ;;  %v6912_v30 = vcombine.low %v1200_v13, %v1212_v14  ;;  %v6939_v35 = vcombine.high %v1225_v23, %v1237_v27  ;;  %v6938_v39 = vcombine.low %v1225_v23, %v1237_v27 }
 0x130   : > { %2047 = vmatprep.mubr.bf16.mxu0 %v10361_v32  ;;  %2090 = vmatprep.mubr.bf16.mxu1 %v10361_v32  ;;  %v1261_v29 = vld [vmem:[%s8889_s30 + $0x388] sm:$0x33]  ;;  %v6918_v13 = vcombine.low %v1203_v61, %v1215_v62 }
 0x131   : > { %v1157_v27 = vld [vmem:[%s8889_s30 + $0x48] sm:$0xff] }
 0x132   : > { %2018 = vmatpush1.bf16.msra.mxu0 %v6884_v36  ;;  %2061 = vmatpush1.bf16.msra.mxu1 %v6886_v37  ;;  %v6963_v36 = vcombine.high %v1249_v28, %v1261_v29  ;;  %v6936_v37 = vcombine.low %v1224_v20, %v1236_v21  ;;  %v1897_v21 = vand.u32 %v6965_v15, %v8911_v6  ;;  %v1182_v15 = vld [vmem:[%s8889_s30 + $0x110] sm:$0xff] }
 0x133   : > { %2019 = vmatprep.subr.bf16.mxu0 %v6909_v38  ;;  %2062 = vmatprep.subr.bf16.mxu1 %v6911_v41  ;;  %v6960_v38 = vcombine.low %v1248_v25, %v1260_v26  ;;  %v6962_v41 = vcombine.low %v1249_v28, %v1261_v29  ;;  %v1156_v25 = vld [vmem:[%s8889_s30 + $0x40] sm:$0xff]  ;;  %v1169_v28 = vld [vmem:[%s8889_s30 + $0xa8] sm:$0xff] }
 0x134   : > { %v1891_v42 = vand.u32 %v6963_v36, %v8911_v6  ;;  %v1168_v26 = vld [vmem:[%s8889_s30 + $0xa0] sm:$0xff]  ;;  %v1181_v36 = vld [vmem:[%s8889_s30 + $0x108] sm:$0xff] }
 0x135   : > { %v1882_v47 = vand.u32 %v6960_v38, %v8911_v6  ;;  %v6872_v38 = vcombine.low %v1156_v25, %v1168_v26 }
 0x136   : > { %2020 = vmatpush1.bf16.msra.mxu0 %v6908_v48  ;;  %2063 = vmatpush1.bf16.msra.mxu1 %v6910_v49  ;;  %v1888_v48 = vand.u32 %v6962_v41, %v8911_v6  ;;  %v6869_v49 = vcombine.high %v1154_v43, %v1166_v44  ;;  %v1216_v43 = vld [vmem:[%s8889_s30 + $0x220] sm:$0xff]  ;;  %v1205_v44 = vld [vmem:[%s8889_s30 + $0x1c8] sm:$0xff] }
 0x137   : > { %2021 = vmatprep.subr.bf16.mxu0 %v6933_v50  ;;  %2064 = vmatprep.subr.bf16.mxu1 %v6935_v52  ;;  %v6871_v50 = vcombine.high %v1155_v45, %v1167_v46  ;;  %v1190_v52 = vld [vmem:[%s8889_s30 + $0x150] sm:$0xff] }
 0x138   : > { %v6892_v63 = vcombine.low %v1178_v51, %v1190_v52 }
 0x13a   : > { %2022 = vmatpush1.bf16.msra.mxu0 %v6932_v54  ;;  %2065 = vmatpush1.bf16.msra.mxu1 %v6934_v56  ;;  %v1191_v54 = vld [vmem:[%s8889_s30 + $0x158] sm:$0xff]  ;;  %v6870_v56 = vcombine.low %v1155_v45, %v1167_v46  ;;  %v1217_v45 = vld [vmem:[%s8889_s30 + $0x228] sm:$0xff] }
 0x13b   : > { %2023 = vmatprep.subr.bf16.mxu0 %v1873_v57  ;;  %2066 = vmatprep.subr.bf16.mxu1 %v1879_v59  ;;  %v6893_v57 = vcombine.high %v1178_v51, %v1190_v52  ;;  %v6895_v58 = vcombine.high %v1179_v53, %v1191_v54  ;;  %v1202_v59 = vld [vmem:[%s8889_s30 + $0x1b0] sm:$0xff]  ;;  %v6923_v51 = vcombine.high %v1205_v44, %v1217_v45  ;;  %v1229_v52 = vld [vmem:[%s8889_s30 + $0x288] sm:$0xff] }
 0x13e   : > { %2024 = vmatpush1.bf16.msra.mxu0 %v1870_v0  ;;  %2067 = vmatpush1.bf16.msra.mxu1 %v1876_v1  ;;  %v6894_v0 = vcombine.low %v1179_v53, %v1191_v54  ;;  %v6917_v1 = vcombine.high %v1202_v59, %v1214_v60  ;;  %v1252_v53 = vld [vmem:[%s8889_s30 + $0x340] sm:$0xff] }
 0x13f   : > { %2101 = vmatprep.subr.bf16.mxu0 %v6865_v2  ;;  %2144 = vmatprep.subr.bf16.mxu1 %v6867_v3  ;;  %v1226_v2 = vld [vmem:[%s8889_s30 + $0x270] sm:$0xff]  ;;  %v1264_v54 = vld [vmem:[%s8889_s30 + $0x3a0] sm:$0x33] }
 0x140   : > { %v1238_v3 = vld [vmem:[%s8889_s30 + $0x2d0] sm:$0xff]  ;;  %v6969_v61 = vcombine.high %v1252_v53, %v1264_v54 }
 0x141   : > { %6978 = vmatmul.mubr.msk.bf16.vlgmr.msra.gmra.mrb[4].mxu0 %vm1849_vm2, %v8926_v24  ;;  %6979 = vmatmul.mubr.msk.bf16.vlgmr.msra.gmra.mrb[4].mxu1 %vm1849_vm2, %v8926_v24  ;;  %v6941_v14 = vcombine.high %v1226_v2, %v1238_v3 }
 0x142   : > { %2102 = vmatpush1.bf16.msra.mxu0 %v6864_v9  ;;  %2145 = vmatpush1.bf16.msra.mxu1 %v6866_v10  ;;  %v1239_v9 = vld [vmem:[%s8889_s30 + $0x2d8] sm:$0xff] }
 0x143   : > { %2103 = vmatprep.subr.bf16.mxu0 %v6889_v11  ;;  %2146 = vmatprep.subr.bf16.mxu1 %v6891_v12  ;;  %v1251_v10 = vld [vmem:[%s8889_s30 + $0x338] sm:$0xff]  ;;  %v6916_v12 = vcombine.low %v1202_v59, %v1214_v60  ;;  %v6943_v16 = vcombine.high %v1227_v5, %v1239_v9  ;;  %v6942_v20 = vcombine.low %v1227_v5, %v1239_v9 }
 0x144   : > { %2133 = vmatprep.mubr.bf16.mxu0 %v10361_v32  ;;  %2176 = vmatprep.mubr.bf16.mxu1 %v10361_v32  ;;  %v1263_v11 = vld [vmem:[%s8889_s30 + $0x398] sm:$0x33]  ;;  %v6922_v59 = vcombine.low %v1205_v44, %v1217_v45 }
 0x145   : > { %v1159_v9 = vld [vmem:[%s8889_s30 + $0x58] sm:$0xff] }
 0x146   : > { %2104 = vmatpush1.bf16.msra.mxu0 %v6888_v17  ;;  %2147 = vmatpush1.bf16.msra.mxu1 %v6890_v18  ;;  %v6967_v17 = vcombine.high %v1251_v10, %v1263_v11  ;;  %v6940_v18 = vcombine.low %v1226_v2, %v1238_v3  ;;  %v1909_v3 = vand.u32 %v6969_v61, %v8911_v6  ;;  %v7012_v61 = vld [vmem:[%s8889_s30 + $0x480] sm:$0xff] }
 0x147   : > { %2105 = vmatprep.subr.bf16.mxu0 %v6913_v19  ;;  %2148 = vmatprep.subr.bf16.mxu1 %v6915_v22  ;;  %v6964_v19 = vcombine.low %v1250_v7, %v1262_v8  ;;  %v6966_v22 = vcombine.low %v1251_v10, %v1263_v11  ;;  %v1158_v7 = vld [vmem:[%s8889_s30 + $0x50] sm:$0xff]  ;;  %v1171_v10 = vld [vmem:[%s8889_s30 + $0xb8] sm:$0xff] }
 0x148   : > { %v1903_v23 = vand.u32 %v6967_v17, %v8911_v6  ;;  %v1170_v8 = vld [vmem:[%s8889_s30 + $0xb0] sm:$0xff]  ;;  %v1183_v17 = vld [vmem:[%s8889_s30 + $0x118] sm:$0xff] }
 0x149   : > { %v1894_v29 = vand.u32 %v6964_v19, %v8911_v6  ;;  %v6876_v19 = vcombine.low %v1158_v7, %v1170_v8 }
 0x14a   : > { %2106 = vmatpush1.bf16.msra.mxu0 %v6912_v30  ;;  %2149 = vmatpush1.bf16.msra.mxu1 %v6914_v31  ;;  %v1900_v30 = vand.u32 %v6966_v22, %v8911_v6  ;;  %v6873_v31 = vcombine.high %v1156_v25, %v1168_v26  ;;  %v1218_v25 = vld [vmem:[%s8889_s30 + $0x230] sm:$0xff]  ;;  %v1207_v26 = vld [vmem:[%s8889_s30 + $0x1d8] sm:$0xff] }
 0x14b   : > { %2107 = vmatprep.subr.bf16.mxu0 %v6937_v33  ;;  %2150 = vmatprep.subr.bf16.mxu1 %v6939_v35  ;;  %v6875_v33 = vcombine.high %v1157_v27, %v1169_v28  ;;  %v1192_v35 = vld [vmem:[%s8889_s30 + $0x160] sm:$0xff] }
 0x14c   : > { %v6896_v46 = vcombine.low %v1180_v34, %v1192_v35 }
 0x14e   : > { %2108 = vmatpush1.bf16.msra.mxu0 %v6936_v37  ;;  %2151 = vmatpush1.bf16.msra.mxu1 %v6938_v39  ;;  %v1193_v37 = vld [vmem:[%s8889_s30 + $0x168] sm:$0xff]  ;;  %v6874_v39 = vcombine.low %v1157_v27, %v1169_v28  ;;  %v1219_v27 = vld [vmem:[%s8889_s30 + $0x238] sm:$0xff] }
 0x14f   : > { %2109 = vmatprep.subr.bf16.mxu0 %v1885_v40  ;;  %2152 = vmatprep.subr.bf16.mxu1 %v1891_v42  ;;  %v6897_v40 = vcombine.high %v1180_v34, %v1192_v35  ;;  %v6899_v41 = vcombine.high %v1181_v36, %v1193_v37  ;;  %v1204_v42 = vld [vmem:[%s8889_s30 + $0x1c0] sm:$0xff]  ;;  %v6927_v34 = vcombine.high %v1207_v26, %v1219_v27  ;;  %v1231_v35 = vld [vmem:[%s8889_s30 + $0x298] sm:$0xff] }
 0x152   : > { %2110 = vmatpush1.bf16.msra.mxu0 %v1882_v47  ;;  %2153 = vmatpush1.bf16.msra.mxu1 %v1888_v48  ;;  %v6898_v47 = vcombine.low %v1181_v36, %v1193_v37  ;;  %v6921_v48 = vcombine.high %v1204_v42, %v1216_v43  ;;  %v1254_v36 = vld [vmem:[%s8889_s30 + $0x350] sm:$0xff] }
 0x153   : > { %2187 = vmatprep.subr.bf16.mxu0 %v6869_v49  ;;  %2230 = vmatprep.subr.bf16.mxu1 %v6871_v50  ;;  %v1228_v49 = vld [vmem:[%s8889_s30 + $0x280] sm:$0xff]  ;;  %v1266_v37 = vld [vmem:[%s8889_s30 + $0x3b0] sm:$0x33] }
 0x154   : > { %v1240_v50 = vld [vmem:[%s8889_s30 + $0x2e0] sm:$0xff]  ;;  %v6973_v44 = vcombine.high %v1254_v36, %v1266_v37 }
 0x155   : > { %6980 = vmatmul.mubr.msk.bf16.vlgmr.msra.gmra.mrb[8].mxu0 %vm1849_vm2, %v8926_v24  ;;  %6981 = vmatmul.mubr.msk.bf16.vlgmr.msra.gmra.mrb[8].mxu1 %vm1849_vm2, %v8926_v24  ;;  %v6945_v60 = vcombine.high %v1228_v49, %v1240_v50 }
 0x156   : > { %2188 = vmatpush1.bf16.msra.mxu0 %v6868_v55  ;;  %2231 = vmatpush1.bf16.msra.mxu1 %v6870_v56  ;;  %v1241_v55 = vld [vmem:[%s8889_s30 + $0x2e8] sm:$0xff] }
 0x157   : > { %2189 = vmatprep.subr.bf16.mxu0 %v6893_v57  ;;  %2232 = vmatprep.subr.bf16.mxu1 %v6895_v58  ;;  %v1253_v56 = vld [vmem:[%s8889_s30 + $0x348] sm:$0xff]  ;;  %v6920_v58 = vcombine.low %v1204_v42, %v1216_v43  ;;  %v6947_v62 = vcombine.high %v1229_v52, %v1241_v55  ;;  %v6946_v2 = vcombine.low %v1229_v52, %v1241_v55 }
 0x158   : > { %2219 = vmatprep.mubr.bf16.mxu0 %v10361_v32  ;;  %2262 = vmatprep.mubr.bf16.mxu1 %v10361_v32  ;;  %v1265_v57 = vld [vmem:[%s8889_s30 + $0x3a8] sm:$0x33]  ;;  %v6926_v42 = vcombine.low %v1207_v26, %v1219_v27 }
 0x159   : > { %v6989_v55 = vld [vmem:[%s8889_s30 + $0x3c8] sm:$0xff] }
 0x15a   : > { %2190 = vmatpush1.bf16.msra.mxu0 %v6892_v63  ;;  %2233 = vmatpush1.bf16.msra.mxu1 %v6894_v0  ;;  %v6971_v63 = vcombine.high %v1253_v56, %v1265_v57  ;;  %v6944_v0 = vcombine.low %v1228_v49, %v1240_v50  ;;  %v1921_v50 = vand.u32 %v6973_v44, %v8911_v6  ;;  %v7014_v44 = vld [vmem:[%s8889_s30 + $0x490] sm:$0xff] }
 0x15b   : > { %2191 = vmatprep.subr.bf16.mxu0 %v6917_v1  ;;  %2234 = vmatprep.subr.bf16.mxu1 %v6919_v4  ;;  %v6968_v1 = vcombine.low %v1252_v53, %v1264_v54  ;;  %v6970_v4 = vcombine.low %v1253_v56, %v1265_v57  ;;  %v6988_v53 = vld [vmem:[%s8889_s30 + $0x3c0] sm:$0xff]  ;;  %v7001_v56 = vld [vmem:[%s8889_s30 + $0x428] sm:$0xff] }
 0x15c   : > { %v1915_v5 = vand.u32 %v6971_v63, %v8911_v6  ;;  %v7000_v54 = vld [vmem:[%s8889_s30 + $0x420] sm:$0xff]  ;;  %v7013_v63 = vld [vmem:[%s8889_s30 + $0x488] sm:$0xff] }
 0x15d   : > { %v1906_v11 = vand.u32 %v6968_v1, %v8911_v6  ;;  %v7108_v1 = vcombine.low %v6988_v53, %v7000_v54 }
 0x15e   : > { %2192 = vmatpush1.bf16.msra.mxu0 %v6916_v12  ;;  %2235 = vmatpush1.bf16.msra.mxu1 %v6918_v13  ;;  %v1912_v12 = vand.u32 %v6970_v4, %v8911_v6  ;;  %v6877_v13 = vcombine.high %v1158_v7, %v1170_v8  ;;  %v7048_v7 = vld [vmem:[%s8889_s30 + $0x5a0] sm:$0xff]  ;;  %v7037_v8 = vld [vmem:[%s8889_s30 + $0x548] sm:$0xff] }
 0x15f   : > { %2193 = vmatprep.subr.bf16.mxu0 %v6941_v14  ;;  %2236 = vmatprep.subr.bf16.mxu1 %v6943_v16  ;;  %v6879_v14 = vcombine.high %v1159_v9, %v1171_v10  ;;  %v1194_v16 = vld [vmem:[%s8889_s30 + $0x170] sm:$0xff] }
 0x160   : > { %v6900_v28 = vcombine.low %v1182_v15, %v1194_v16 }
 0x162   : > { %2194 = vmatpush1.bf16.msra.mxu0 %v6940_v18  ;;  %2237 = vmatpush1.bf16.msra.mxu1 %v6942_v20  ;;  %v1195_v18 = vld [vmem:[%s8889_s30 + $0x178] sm:$0xff]  ;;  %v6878_v20 = vcombine.low %v1159_v9, %v1171_v10  ;;  %v7049_v9 = vld [vmem:[%s8889_s30 + $0x5a8] sm:$0xff] }
 0x163   : > { %2195 = vmatprep.subr.bf16.mxu0 %v1897_v21  ;;  %2238 = vmatprep.subr.bf16.mxu1 %v1903_v23  ;;  %v6901_v21 = vcombine.high %v1182_v15, %v1194_v16  ;;  %v6903_v22 = vcombine.high %v1183_v17, %v1195_v18  ;;  %v1206_v23 = vld [vmem:[%s8889_s30 + $0x1d0] sm:$0xff]  ;;  %v7159_v15 = vcombine.high %v7037_v8, %v7049_v9  ;;  %v7061_v16 = vld [vmem:[%s8889_s30 + $0x608] sm:$0xff] }
 0x166   : > { %2196 = vmatpush1.bf16.msra.mxu0 %v1894_v29  ;;  %2239 = vmatpush1.bf16.msra.mxu1 %v1900_v30  ;;  %v6902_v29 = vcombine.low %v1183_v17, %v1195_v18  ;;  %v6925_v30 = vcombine.high %v1206_v23, %v1218_v25  ;;  %v7084_v17 = vld [vmem:[%s8889_s30 + $0x6c0] sm:$0xff] }
 0x167   : > { %2273 = vmatprep.subr.bf16.mxu0 %v6873_v31  ;;  %2316 = vmatprep.subr.bf16.mxu1 %v6875_v33  ;;  %v1230_v31 = vld [vmem:[%s8889_s30 + $0x290] sm:$0xff]  ;;  %v7096_v18 = vld [vmem:[%s8889_s30 + $0x720] sm:$0x33] }
 0x168   : > { %v1242_v33 = vld [vmem:[%s8889_s30 + $0x2f0] sm:$0xff]  ;;  %v7205_v26 = vcombine.high %v7084_v17, %v7096_v18 }
 0x169   : > { %6982 = vmatmul.mubr.msk.bf16.vlgmr.msra.gmra.mrb[12].mxu0 %vm1849_vm2, %v8926_v24  ;;  %6983 = vmatmul.mubr.msk.bf16.vlgmr.msra.gmra.mrb[12].mxu1 %vm1849_vm2, %v8926_v24  ;;  %v6949_v43 = vcombine.high %v1230_v31, %v1242_v33 }
 0x16a   : > { %2274 = vmatpush1.bf16.msra.mxu0 %v6872_v38  ;;  %2317 = vmatpush1.bf16.msra.mxu1 %v6874_v39  ;;  %v1243_v38 = vld [vmem:[%s8889_s30 + $0x2f8] sm:$0xff] }
 0x16b   : > { %2275 = vmatprep.subr.bf16.mxu0 %v6897_v40  ;;  %2318 = vmatprep.subr.bf16.mxu1 %v6899_v41  ;;  %v1255_v39 = vld [vmem:[%s8889_s30 + $0x358] sm:$0xff]  ;;  %v6924_v41 = vcombine.low %v1206_v23, %v1218_v25  ;;  %v6951_v45 = vcombine.high %v1231_v35, %v1243_v38  ;;  %v6950_v49 = vcombine.low %v1231_v35, %v1243_v38 }
 0x16c   : > { %2305 = vmatprep.mubr.bf16.mxu0 %v10361_v32  ;;  %2348 = vmatprep.mubr.bf16.mxu1 %v10361_v32  ;;  %v1267_v40 = vld [vmem:[%s8889_s30 + $0x3b8] sm:$0x33]  ;;  %v7158_v23 = vcombine.low %v7037_v8, %v7049_v9 }
 0x16d   : > { %v6991_v38 = vld [vmem:[%s8889_s30 + $0x3d8] sm:$0xff] }
 0x16e   : > { %2276 = vmatpush1.bf16.msra.mxu0 %v6896_v46  ;;  %2319 = vmatpush1.bf16.msra.mxu1 %v6898_v47  ;;  %v6975_v46 = vcombine.high %v1255_v39, %v1267_v40  ;;  %v6948_v47 = vcombine.low %v1230_v31, %v1242_v33  ;;  %v3146_v33 = vand.u32 %v7205_v26, %v8911_v6  ;;  %v7016_v26 = vld [vmem:[%s8889_s30 + $0x4a0] sm:$0xff] }
 0x16f   : > { %2277 = vmatprep.subr.bf16.mxu0 %v6921_v48  ;;  %2320 = vmatprep.subr.bf16.mxu1 %v6923_v51  ;;  %v6972_v48 = vcombine.low %v1254_v36, %v1266_v37  ;;  %v6974_v51 = vcombine.low %v1255_v39, %v1267_v40  ;;  %v6990_v36 = vld [vmem:[%s8889_s30 + $0x3d0] sm:$0xff]  ;;  %v7003_v39 = vld [vmem:[%s8889_s30 + $0x438] sm:$0xff] }
 0x170   : > { %v1927_v52 = vand.u32 %v6975_v46, %v8911_v6  ;;  %v7002_v37 = vld [vmem:[%s8889_s30 + $0x430] sm:$0xff]  ;;  %v7015_v46 = vld [vmem:[%s8889_s30 + $0x498] sm:$0xff] }
 0x171   : > { %v1918_v57 = vand.u32 %v6972_v48, %v8911_v6  ;;  %v7112_v48 = vcombine.low %v6990_v36, %v7002_v37 }
 0x172   : > { %2278 = vmatpush1.bf16.msra.mxu0 %v6920_v58  ;;  %2321 = vmatpush1.bf16.msra.mxu1 %v6922_v59  ;;  %v1924_v58 = vand.u32 %v6974_v51, %v8911_v6  ;;  %v7109_v59 = vcombine.high %v6988_v53, %v7000_v54  ;;  %v7050_v53 = vld [vmem:[%s8889_s30 + $0x5b0] sm:$0xff]  ;;  %v7039_v54 = vld [vmem:[%s8889_s30 + $0x558] sm:$0xff] }
 0x173   : > { %2279 = vmatprep.subr.bf16.mxu0 %v6945_v60  ;;  %2322 = vmatprep.subr.bf16.mxu1 %v6947_v62  ;;  %v7111_v60 = vcombine.high %v6989_v55, %v7001_v56  ;;  %v7024_v62 = vld [vmem:[%s8889_s30 + $0x4e0] sm:$0xff] }
 0x174   : > { %v7132_v10 = vcombine.low %v7012_v61, %v7024_v62 }
 0x176   : > { %2280 = vmatpush1.bf16.msra.mxu0 %v6944_v0  ;;  %2323 = vmatpush1.bf16.msra.mxu1 %v6946_v2  ;;  %v7025_v0 = vld [vmem:[%s8889_s30 + $0x4e8] sm:$0xff]  ;;  %v7110_v2 = vcombine.low %v6989_v55, %v7001_v56  ;;  %v7051_v55 = vld [vmem:[%s8889_s30 + $0x5b8] sm:$0xff] }
 0x177   : > { %2281 = vmatprep.subr.bf16.mxu0 %v1909_v3  ;;  %2324 = vmatprep.subr.bf16.mxu1 %v1915_v5  ;;  %v7133_v3 = vcombine.high %v7012_v61, %v7024_v62  ;;  %v7135_v4 = vcombine.high %v7013_v63, %v7025_v0  ;;  %v7036_v5 = vld [vmem:[%s8889_s30 + $0x540] sm:$0xff]  ;;  %v7163_v61 = vcombine.high %v7039_v54, %v7051_v55  ;;  %v7063_v62 = vld [vmem:[%s8889_s30 + $0x618] sm:$0xff] }
 0x17a   : > { %2282 = vmatpush1.bf16.msra.mxu0 %v1906_v11  ;;  %2325 = vmatpush1.bf16.msra.mxu1 %v1912_v12  ;;  %v7134_v11 = vcombine.low %v7013_v63, %v7025_v0  ;;  %v7157_v12 = vcombine.high %v7036_v5, %v7048_v7  ;;  %v7086_v63 = vld [vmem:[%s8889_s30 + $0x6d0] sm:$0xff] }
 0x17b   : > { %2359 = vmatprep.subr.bf16.mxu0 %v6877_v13  ;;  %2402 = vmatprep.subr.bf16.mxu1 %v6879_v14  ;;  %v7060_v13 = vld [vmem:[%s8889_s30 + $0x600] sm:$0xff]  ;;  %v7098_v0 = vld [vmem:[%s8889_s30 + $0x730] sm:$0x33] }
 0x17c   : > { %v7072_v14 = vld [vmem:[%s8889_s30 + $0x660] sm:$0xff]  ;;  %v7209_v8 = vcombine.high %v7086_v63, %v7098_v0 }
 0x17d   : > { %6984 = vmatmul.mubr.msk.bf16.vlgmr.msra.gmra.mrb[16].mxu0 %vm1849_vm2, %v8926_v24  ;;  %6985 = vmatmul.mubr.msk.bf16.vlgmr.msra.gmra.mrb[16].mxu1 %vm1849_vm2, %v8926_v24  ;;  %v7181_v25 = vcombine.high %v7060_v13, %v7072_v14 }
 0x17e   : > { %2360 = vmatpush1.bf16.msra.mxu0 %v6876_v19  ;;  %2403 = vmatpush1.bf16.msra.mxu1 %v6878_v20  ;;  %v7073_v19 = vld [vmem:[%s8889_s30 + $0x668] sm:$0xff] }
 0x17f   : > { %2361 = vmatprep.subr.bf16.mxu0 %v6901_v21  ;;  %2404 = vmatprep.subr.bf16.mxu1 %v6903_v22  ;;  %v7085_v20 = vld [vmem:[%s8889_s30 + $0x6c8] sm:$0xff]  ;;  %v7156_v22 = vcombine.low %v7036_v5, %v7048_v7  ;;  %v7183_v27 = vcombine.high %v7061_v16, %v7073_v19  ;;  %v7182_v31 = vcombine.low %v7061_v16, %v7073_v19 }
 0x180   : > { %2391 = vmatprep.mubr.bf16.mxu0 %v10361_v32  ;;  %2434 = vmatprep.mubr.bf16.mxu1 %v10361_v32  ;;  %v7097_v21 = vld [vmem:[%s8889_s30 + $0x728] sm:$0x33]  ;;  %v7162_v5 = vcombine.low %v7039_v54, %v7051_v55 }
 0x181   : > { %v6993_v19 = vld [vmem:[%s8889_s30 + $0x3e8] sm:$0xff] }
 0x182   : > { %2362 = vmatpush1.bf16.msra.mxu0 %v6900_v28  ;;  %2405 = vmatpush1.bf16.msra.mxu1 %v6902_v29  ;;  %v7207_v28 = vcombine.high %v7085_v20, %v7097_v21  ;;  %v7180_v29 = vcombine.low %v7060_v13, %v7072_v14  ;;  %v3158_v14 = vand.u32 %v7209_v8, %v8911_v6  ;;  %v7030_v8 = vld [vmem:[%s8889_s30 + $0x510] sm:$0xff] }
 0x183   : > { %2363 = vmatprep.subr.bf16.mxu0 %v6925_v30  ;;  %2406 = vmatprep.subr.bf16.mxu1 %v6927_v34  ;;  %v7204_v30 = vcombine.low %v7084_v17, %v7096_v18  ;;  %v7206_v34 = vcombine.low %v7085_v20, %v7097_v21  ;;  %v6992_v17 = vld [vmem:[%s8889_s30 + $0x3e0] sm:$0xff]  ;;  %v7005_v20 = vld [vmem:[%s8889_s30 + $0x448] sm:$0xff] }
 0x184   : > { %v3152_v35 = vand.u32 %v7207_v28, %v8911_v6  ;;  %v7004_v18 = vld [vmem:[%s8889_s30 + $0x440] sm:$0xff]  ;;  %v7017_v28 = vld [vmem:[%s8889_s30 + $0x4a8] sm:$0xff] }
 0x185   : > { %v3143_v40 = vand.u32 %v7204_v30, %v8911_v6  ;;  %v7116_v30 = vcombine.low %v6992_v17, %v7004_v18 }
 0x186   : > { %2364 = vmatpush1.bf16.msra.mxu0 %v6924_v41  ;;  %2407 = vmatpush1.bf16.msra.mxu1 %v6926_v42  ;;  %v3149_v41 = vand.u32 %v7206_v34, %v8911_v6  ;;  %v7113_v42 = vcombine.high %v6990_v36, %v7002_v37  ;;  %v7052_v36 = vld [vmem:[%s8889_s30 + $0x5c0] sm:$0xff]  ;;  %v7041_v37 = vld [vmem:[%s8889_s30 + $0x568] sm:$0xff] }
 0x187   : > { %2365 = vmatprep.subr.bf16.mxu0 %v6949_v43  ;;  %2408 = vmatprep.subr.bf16.mxu1 %v6951_v45  ;;  %v7115_v43 = vcombine.high %v6991_v38, %v7003_v39  ;;  %v7026_v45 = vld [vmem:[%s8889_s30 + $0x4f0] sm:$0xff] }
 0x188   : > { %v7136_v56 = vcombine.low %v7014_v44, %v7026_v45 }
 0x18a   : > { %2366 = vmatpush1.bf16.msra.mxu0 %v6948_v47  ;;  %2409 = vmatpush1.bf16.msra.mxu1 %v6950_v49  ;;  %v7027_v47 = vld [vmem:[%s8889_s30 + $0x4f8] sm:$0xff]  ;;  %v7114_v49 = vcombine.low %v6991_v38, %v7003_v39  ;;  %v7053_v38 = vld [vmem:[%s8889_s30 + $0x5c8] sm:$0xff] }
 0x18b   : > { %2367 = vmatprep.subr.bf16.mxu0 %v1921_v50  ;;  %2410 = vmatprep.subr.bf16.mxu1 %v1927_v52  ;;  %v7137_v50 = vcombine.high %v7014_v44, %v7026_v45  ;;  %v7139_v51 = vcombine.high %v7015_v46, %v7027_v47  ;;  %v7038_v52 = vld [vmem:[%s8889_s30 + $0x550] sm:$0xff]  ;;  %v7167_v44 = vcombine.high %v7041_v37, %v7053_v38  ;;  %v7065_v45 = vld [vmem:[%s8889_s30 + $0x628] sm:$0xff] }
 0x18e   : > { %2368 = vmatpush1.bf16.msra.mxu0 %v1918_v57  ;;  %2411 = vmatpush1.bf16.msra.mxu1 %v1924_v58  ;;  %v7138_v57 = vcombine.low %v7015_v46, %v7027_v47  ;;  %v7161_v58 = vcombine.high %v7038_v52, %v7050_v53  ;;  %v7088_v46 = vld [vmem:[%s8889_s30 + $0x6e0] sm:$0xff] }
 0x18f   : > { %3214 = vmatprep.subr.bf16.mxu0 %v7109_v59  ;;  %3257 = vmatprep.subr.bf16.mxu1 %v7111_v60  ;;  %v7062_v59 = vld [vmem:[%s8889_s30 + $0x610] sm:$0xff]  ;;  %v7100_v47 = vld [vmem:[%s8889_s30 + $0x740] sm:$0x33] }
 0x190   : > { %v7074_v60 = vld [vmem:[%s8889_s30 + $0x670] sm:$0xff] }
 0x191   : > { %6986 = vmatmul.mubr.msk.bf16.vlgmr.msra.gmra.mrb[20].mxu0 %vm1849_vm2, %v8926_v24  ;;  %6987 = vmatmul.mubr.msk.bf16.vlgmr.msra.gmra.mrb[20].mxu1 %vm1849_vm2, %v8926_v24  ;;  %v7185_v7 = vcombine.high %v7062_v59, %v7074_v60 }
 0x192   : > { %3215 = vmatpush1.bf16.msra.mxu0 %v7108_v1  ;;  %3258 = vmatpush1.bf16.msra.mxu1 %v7110_v2  ;;  %v7075_v1 = vld [vmem:[%s8889_s30 + $0x678] sm:$0xff] }
 0x193   : > { %3216 = vmatprep.subr.bf16.mxu0 %v7133_v3  ;;  %3259 = vmatprep.subr.bf16.mxu1 %v7135_v4  ;;  %v7087_v2 = vld [vmem:[%s8889_s30 + $0x6d8] sm:$0xff]  ;;  %v7160_v4 = vcombine.low %v7038_v52, %v7050_v53  ;;  %v7187_v9 = vcombine.high %v7063_v62, %v7075_v1  ;;  %v7186_v13 = vcombine.low %v7063_v62, %v7075_v1  ;;  %v6994_v62 = vld [vmem:[%s8889_s30 + $0x3f0] sm:$0xff] }
 0x194   : > { %3246 = vmatprep.mubr.bf16.mxu0 %v10361_v32  ;;  %3289 = vmatprep.mubr.bf16.mxu1 %v10361_v32  ;;  %v7099_v3 = vld [vmem:[%s8889_s30 + $0x738] sm:$0x33]  ;;  %v7213_v53 = vcombine.high %v7088_v46, %v7100_v47 }
 0x195   : > { %v7007_v1 = vld [vmem:[%s8889_s30 + $0x458] sm:$0xff] }
 0x196   : > { %3217 = vmatpush1.bf16.msra.mxu0 %v7132_v10  ;;  %3260 = vmatpush1.bf16.msra.mxu1 %v7134_v11  ;;  %v7211_v10 = vcombine.high %v7087_v2, %v7099_v3  ;;  %v7184_v11 = vcombine.low %v7062_v59, %v7074_v60  ;;  %v3170_v59 = vand.u32 %v7213_v53, %v8911_v6  ;;  %v7020_v53 = vld [vmem:[%s8889_s30 + $0x4c0] sm:$0xff] }
 0x197   : > { %3218 = vmatprep.subr.bf16.mxu0 %v7157_v12  ;;  %3261 = vmatprep.subr.bf16.mxu1 %v7159_v15  ;;  %v7208_v12 = vcombine.low %v7086_v63, %v7098_v0  ;;  %v7210_v15 = vcombine.low %v7087_v2, %v7099_v3  ;;  %v7006_v63 = vld [vmem:[%s8889_s30 + $0x450] sm:$0xff]  ;;  %v6995_v0 = vld [vmem:[%s8889_s30 + $0x3f8] sm:$0xff] }
 0x198   : > { %v3164_v16 = vand.u32 %v7211_v10, %v8911_v6  ;;  %v7031_v10 = vld [vmem:[%s8889_s30 + $0x518] sm:$0xff] }
 0x199   : > { %v3155_v21 = vand.u32 %v7208_v12, %v8911_v6  ;;  %v7122_v12 = vcombine.low %v6995_v0, %v7007_v1 }
 0x19a   : > { %3219 = vmatpush1.bf16.msra.mxu0 %v7156_v22  ;;  %3262 = vmatpush1.bf16.msra.mxu1 %v7158_v23  ;;  %v3161_v22 = vand.u32 %v7210_v15, %v8911_v6  ;;  %v7117_v23 = vcombine.high %v6992_v17, %v7004_v18  ;;  %v7042_v15 = vld [vmem:[%s8889_s30 + $0x570] sm:$0xff]  ;;  %v9175_v17 = vld [vmem:[%s10354_s0] sm:$0xff]   ;;  %v7043_v18 = vld [vmem:[%s8889_s30 + $0x578] sm:$0xff] }
 0x19b   : > { %3220 = vmatprep.subr.bf16.mxu0 %v7181_v25  ;;  %3263 = vmatprep.subr.bf16.mxu1 %v7183_v27  ;;  %v7119_v25 = vcombine.high %v6993_v19, %v7005_v20  ;;  %v7028_v27 = vld [vmem:[%s8889_s30 + $0x500] sm:$0xff] }
 0x19c   : > { %v7140_v39 = vcombine.low %v7016_v26, %v7028_v27 }
 0x19e   : > { %3221 = vmatpush1.bf16.msra.mxu0 %v7180_v29  ;;  %3264 = vmatpush1.bf16.msra.mxu1 %v7182_v31  ;;  %v7029_v29 = vld [vmem:[%s8889_s30 + $0x508] sm:$0xff]  ;;  %v7118_v31 = vcombine.low %v6993_v19, %v7005_v20  ;;  %v7055_v19 = vld [vmem:[%s8889_s30 + $0x5d8] sm:$0xff] }
 0x19f   : > { %3222 = vmatprep.subr.bf16.mxu0 %v3146_v33  ;;  %3265 = vmatprep.subr.bf16.mxu1 %v3152_v35  ;;  %v7141_v33 = vcombine.high %v7016_v26, %v7028_v27  ;;  %v7143_v34 = vcombine.high %v7017_v28, %v7029_v29  ;;  %v7040_v35 = vld [vmem:[%s8889_s30 + $0x560] sm:$0xff]  ;;  %v7171_v26 = vcombine.high %v7043_v18, %v7055_v19  ;;  %v7067_v27 = vld [vmem:[%s8889_s30 + $0x638] sm:$0xff] }
 0x1a2   : > { %3223 = vmatpush1.bf16.msra.mxu0 %v3143_v40  ;;  %3266 = vmatpush1.bf16.msra.mxu1 %v3149_v41  ;;  %v7142_v40 = vcombine.low %v7017_v28, %v7029_v29  ;;  %v7165_v41 = vcombine.high %v7040_v35, %v7052_v36  ;;  %v7090_v28 = vld [vmem:[%s8889_s30 + $0x6f0] sm:$0xff] }
 0x1a3   : > { %3300 = vmatprep.subr.bf16.mxu0 %v7113_v42  ;;  %3343 = vmatprep.subr.bf16.mxu1 %v7115_v43  ;;  %v7064_v42 = vld [vmem:[%s8889_s30 + $0x620] sm:$0xff]  ;;  %v7102_v29 = vld [vmem:[%s8889_s30 + $0x750] sm:$0x33] }
 0x1a4   : > { %v7076_v43 = vld [vmem:[%s8889_s30 + $0x680] sm:$0xff] }
 0x1a5   : > { %7228 = vmatmul.mubr.msk.bf16.vlgmr.msra.gmra.mrb[24].mxu0 %vm1849_vm2, %v8926_v24  ;;  %7229 = vmatmul.mubr.msk.bf16.vlgmr.msra.gmra.mrb[24].mxu1 %vm1849_vm2, %v8926_v24  ;;  %v7189_v52 = vcombine.high %v7064_v42, %v7076_v43 }
 0x1a6   : > { %3301 = vmatpush1.bf16.msra.mxu0 %v7112_v48  ;;  %3344 = vmatpush1.bf16.msra.mxu1 %v7114_v49  ;;  %v7077_v48 = vld [vmem:[%s8889_s30 + $0x688] sm:$0xff] }
 0x1a7   : > { %3302 = vmatprep.subr.bf16.mxu0 %v7137_v50  ;;  %3345 = vmatprep.subr.bf16.mxu1 %v7139_v51  ;;  %v7089_v49 = vld [vmem:[%s8889_s30 + $0x6e8] sm:$0xff]  ;;  %v7164_v50 = vcombine.low %v7040_v35, %v7052_v36  ;;  %v7166_v51 = vcombine.low %v7041_v37, %v7053_v38  ;;  %v7191_v54 = vcombine.high %v7065_v45, %v7077_v48 }
 0x1a8   : > { %3332 = vmatprep.mubr.bf16.mxu0 %v10361_v32  ;;  %3375 = vmatprep.mubr.bf16.mxu1 %v10361_v32  ;;  %v7170_v35 = vcombine.low %v7043_v18, %v7055_v19  ;;  %v7217_v37 = vcombine.high %v7090_v28, %v7102_v29 }
 0x1aa   : > { %3303 = vmatpush1.bf16.msra.mxu0 %v7136_v56  ;;  %3346 = vmatpush1.bf16.msra.mxu1 %v7138_v57  ;;  %v7188_v56 = vcombine.low %v7064_v42, %v7076_v43  ;;  %v7212_v57 = vcombine.low %v7088_v46, %v7100_v47  ;;  %v3182_v43 = vand.u32 %v7217_v37, %v8911_v6  ;;  %v6996_v46 = vld [vmem:[%s8889_s30 + $0x400] sm:$0xff]  ;;  %v7022_v37 = vld [vmem:[%s8889_s30 + $0x4d0] sm:$0xff] }
 0x1ab   : > { %3304 = vmatprep.subr.bf16.mxu0 %v7161_v58  ;;  %3347 = vmatprep.subr.bf16.mxu1 %v7163_v61  ;;  %v7190_v58 = vcombine.low %v7065_v45, %v7077_v48  ;;  %v7008_v47 = vld [vmem:[%s8889_s30 + $0x460] sm:$0xff]  ;;  %v6997_v48 = vld [vmem:[%s8889_s30 + $0x408] sm:$0xff] }
 0x1ac   : > { %v3167_v2 = vand.u32 %v7212_v57, %v8911_v6  ;;  %v7124_v57 = vcombine.low %v6996_v46, %v7008_v47 }
 0x1ae   : > { %3305 = vmatpush1.bf16.msra.mxu0 %v7160_v4  ;;  %3348 = vmatpush1.bf16.msra.mxu1 %v7162_v5  ;;  %v7121_v4 = vcombine.high %v6994_v62, %v7006_v63  ;;  %v7123_v5 = vcombine.high %v6995_v0, %v7007_v1  ;;  %v7057_v0 = vld [vmem:[%s8889_s30 + $0x5e8] sm:$0xff] }
 0x1af   : > { %3306 = vmatprep.subr.bf16.mxu0 %v7185_v7  ;;  %3349 = vmatprep.subr.bf16.mxu1 %v7187_v9  ;;  %v7018_v7 = vld [vmem:[%s8889_s30 + $0x4b0] sm:$0xff]  ;;  %v7019_v9 = vld [vmem:[%s8889_s30 + $0x4b8] sm:$0xff] }
 0x1b0   : > { %v7144_v20 = vcombine.low %v7018_v7, %v7030_v8 }
 0x1b2   : > { %3307 = vmatpush1.bf16.msra.mxu0 %v7184_v11  ;;  %3350 = vmatpush1.bf16.msra.mxu1 %v7186_v13  ;;  %v7120_v11 = vcombine.low %v6994_v62, %v7006_v63  ;;  %v7145_v13 = vcombine.high %v7018_v7, %v7030_v8  ;;  %v7056_v62 = vld [vmem:[%s8889_s30 + $0x5e0] sm:$0xff]  ;;  %v7045_v63 = vld [vmem:[%s8889_s30 + $0x588] sm:$0xff] }
 0x1b3   : > { %3308 = vmatprep.subr.bf16.mxu0 %v3158_v14  ;;  %3351 = vmatprep.subr.bf16.mxu1 %v3164_v16  ;;  %v7147_v14 = vcombine.high %v7019_v9, %v7031_v10  ;;  %v7054_v16 = vld [vmem:[%s8889_s30 + $0x5d0] sm:$0xff]  ;;  %v7175_v7 = vcombine.high %v7045_v63, %v7057_v0  ;;  %v7069_v8 = vld [vmem:[%s8889_s30 + $0x648] sm:$0xff] }
 0x1b6   : > { %3309 = vmatpush1.bf16.msra.mxu0 %v3155_v21  ;;  %3352 = vmatpush1.bf16.msra.mxu1 %v3161_v22  ;;  %v7146_v21 = vcombine.low %v7019_v9, %v7031_v10  ;;  %v7169_v22 = vcombine.high %v7042_v15, %v7054_v16  ;;  %v7092_v9 = vld [vmem:[%s8889_s30 + $0x700] sm:$0xff] }
 0x1b7   : > { %3386 = vmatprep.subr.bf16.mxu0 %v7117_v23  ;;  %3429 = vmatprep.subr.bf16.mxu1 %v7119_v25  ;;  %v7066_v23 = vld [vmem:[%s8889_s30 + $0x630] sm:$0xff]  ;;  %v7104_v10 = vld [vmem:[%s8889_s30 + $0x760] sm:$0x33] }
 0x1b8   : > { %v7078_v25 = vld [vmem:[%s8889_s30 + $0x690] sm:$0xff]  ;;  %v7221_v18 = vcombine.high %v7092_v9, %v7104_v10 }
 0x1b9   : > { %7230 = vmatmul.mubr.msk.bf16.vlgmr.msra.gmra.mrb[28].mxu0 %vm1849_vm2, %v8926_v24  ;;  %7231 = vmatmul.mubr.msk.bf16.vlgmr.msra.gmra.mrb[28].mxu1 %vm1849_vm2, %v8926_v24  ;;  %v7101_v24 = vld [vmem:[%s8889_s30 + $0x748] sm:$0x33]  ;;  %v7193_v36 = vcombine.high %v7066_v23, %v7078_v25 }
 0x1ba   : > { %3387 = vmatpush1.bf16.msra.mxu0 %v7116_v30  ;;  %3430 = vmatpush1.bf16.msra.mxu1 %v7118_v31  ;;  %v7215_v55 = vcombine.high %v7089_v49, %v7101_v24  ;;  %v7214_v60 = vcombine.low %v7089_v49, %v7101_v24  ;;  %v7079_v30 = vld [vmem:[%s8889_s30 + $0x698] sm:$0xff]  ;;  %v7009_v49 = vld [vmem:[%s8889_s30 + $0x468] sm:$0xff] }
 0x1bb   : > { %3388 = vmatprep.subr.bf16.mxu0 %v7141_v33  ;;  %3431 = vmatprep.subr.bf16.mxu1 %v7143_v34  ;;  %v7091_v31 = vld [vmem:[%s8889_s30 + $0x6f8] sm:$0xff]  ;;  %v7168_v34 = vcombine.low %v7042_v15, %v7054_v16  ;;  %v7195_v38 = vcombine.high %v7067_v27, %v7079_v30  ;;  %v7194_v42 = vcombine.low %v7067_v27, %v7079_v30 }
 0x1bc   : > { %3418 = vmatprep.mubr.bf16.mxu0 %v10361_v32  ;;  %3461 = vmatprep.mubr.bf16.mxu1 %v10361_v32  ;;  %v3176_v61 = vand.u32 %v7215_v55, %v8911_v6  ;;  %v3173_v3 = vand.u32 %v7214_v60, %v8911_v6  ;;  %v7103_v33 = vld [vmem:[%s8889_s30 + $0x758] sm:$0x33]  ;;  %v7021_v55 = vld [vmem:[%s8889_s30 + $0x4c8] sm:$0xff]  ;;  %v7174_v15 = vcombine.low %v7045_v63, %v7057_v0 }
 0x1bd   : > { %v6999_v30 = vld [vmem:[%s8889_s30 + $0x418] sm:$0xff] }
 0x1be   : > { %3389 = vmatpush1.bf16.msra.mxu0 %v7140_v39  ;;  %3432 = vmatpush1.bf16.msra.mxu1 %v7142_v40  ;;  %v7219_v39 = vcombine.high %v7091_v31, %v7103_v33  ;;  %v7192_v40 = vcombine.low %v7066_v23, %v7078_v25  ;;  %v3194_v25 = vand.u32 %v7221_v18, %v8911_v6 }
 0x1bf   : > { %3390 = vmatprep.subr.bf16.mxu0 %v7165_v41  ;;  %3433 = vmatprep.subr.bf16.mxu1 %v7167_v44  ;;  %v7216_v41 = vcombine.low %v7090_v28, %v7102_v29  ;;  %v7218_v44 = vcombine.low %v7091_v31, %v7103_v33  ;;  %v6998_v28 = vld [vmem:[%s8889_s30 + $0x410] sm:$0xff]  ;;  %v7011_v31 = vld [vmem:[%s8889_s30 + $0x478] sm:$0xff] }
 0x1c0   : > { %v3188_v45 = vand.u32 %v7219_v39, %v8911_v6  ;;  %v7010_v29 = vld [vmem:[%s8889_s30 + $0x470] sm:$0xff]  ;;  %v7023_v39 = vld [vmem:[%s8889_s30 + $0x4d8] sm:$0xff] }
 0x1c1   : > { %v3179_v24 = vand.u32 %v7216_v41, %v8911_v6  ;;  %v7128_v41 = vcombine.low %v6998_v28, %v7010_v29 }
 0x1c2   : > { %3391 = vmatpush1.bf16.msra.mxu0 %v7164_v50  ;;  %3434 = vmatpush1.bf16.msra.mxu1 %v7166_v51  ;;  %v3185_v50 = vand.u32 %v7218_v44, %v8911_v6  ;;  %v7125_v51 = vcombine.high %v6996_v46, %v7008_v47  ;;  %v7058_v46 = vld [vmem:[%s8889_s30 + $0x5f0] sm:$0xff]  ;;  %v7047_v47 = vld [vmem:[%s8889_s30 + $0x598] sm:$0xff] }
 0x1c3   : > { %3392 = vmatprep.subr.bf16.mxu0 %v7189_v52  ;;  %3435 = vmatprep.subr.bf16.mxu1 %v7191_v54  ;;  %v7127_v52 = vcombine.high %v6997_v48, %v7009_v49  ;;  %v7032_v54 = vld [vmem:[%s8889_s30 + $0x520] sm:$0xff] }
 0x1c4   : > { %v7148_v1 = vcombine.low %v7020_v53, %v7032_v54 }
 0x1c6   : > { %3393 = vmatpush1.bf16.msra.mxu0 %v7188_v56  ;;  %3436 = vmatpush1.bf16.msra.mxu1 %v7190_v58  ;;  %v7033_v56 = vld [vmem:[%s8889_s30 + $0x528] sm:$0xff]  ;;  %v7126_v58 = vcombine.low %v6997_v48, %v7009_v49  ;;  %v7059_v48 = vld [vmem:[%s8889_s30 + $0x5f8] sm:$0xff] }
 0x1c7   : > { %3394 = vmatprep.subr.bf16.mxu0 %v3170_v59  ;;  %3437 = vmatprep.subr.bf16.mxu1 %v3176_v61  ;;  %v7149_v59 = vcombine.high %v7020_v53, %v7032_v54  ;;  %v7151_v60 = vcombine.high %v7021_v55, %v7033_v56  ;;  %v7044_v61 = vld [vmem:[%s8889_s30 + $0x580] sm:$0xff]  ;;  %v7179_v53 = vcombine.high %v7047_v47, %v7059_v48  ;;  %v7071_v54 = vld [vmem:[%s8889_s30 + $0x658] sm:$0xff] }
 0x1ca   : > { %3395 = vmatpush1.bf16.msra.mxu0 %v3167_v2  ;;  %3438 = vmatpush1.bf16.msra.mxu1 %v3173_v3  ;;  %v7150_v2 = vcombine.low %v7021_v55, %v7033_v56  ;;  %v7173_v3 = vcombine.high %v7044_v61, %v7056_v62  ;;  %v7094_v55 = vld [vmem:[%s8889_s30 + $0x710] sm:$0xff] }
 0x1cb   : > { %3472 = vmatprep.subr.bf16.mxu0 %v7121_v4  ;;  %3515 = vmatprep.subr.bf16.mxu1 %v7123_v5  ;;  %v7068_v4 = vld [vmem:[%s8889_s30 + $0x640] sm:$0xff]  ;;  %v7106_v56 = vld [vmem:[%s8889_s30 + $0x770] sm:$0x33] }
 0x1cc   : > { %v7080_v5 = vld [vmem:[%s8889_s30 + $0x6a0] sm:$0xff]  ;;  %v7225_v63 = vcombine.high %v7094_v55, %v7106_v56 }
 0x1cd   : > { %7232 = vmatmul.mubr.msk.bf16.vlgmr.msra.gmra.mrb[32].mxu0 %vm1849_vm2, %v9175_v17  ;;  %7233 = vmatmul.mubr.msk.bf16.vlgmr.msra.gmra.mrb[32].mxu1 %vm1849_vm2, %v9175_v17  ;;  %v7197_v16 = vcombine.high %v7068_v4, %v7080_v5 }
 0x1ce   : > { %3473 = vmatpush1.bf16.msra.mxu0 %v7120_v11  ;;  %3516 = vmatpush1.bf16.msra.mxu1 %v7122_v12  ;;  %v7081_v11 = vld [vmem:[%s8889_s30 + $0x6a8] sm:$0xff] }
 0x1cf   : > { %3474 = vmatprep.subr.bf16.mxu0 %v7145_v13  ;;  %3517 = vmatprep.subr.bf16.mxu1 %v7147_v14  ;;  %v7093_v12 = vld [vmem:[%s8889_s30 + $0x708] sm:$0xff]  ;;  %v7172_v14 = vcombine.low %v7044_v61, %v7056_v62  ;;  %v7199_v19 = vcombine.high %v7069_v8, %v7081_v11  ;;  %v7198_v23 = vcombine.low %v7069_v8, %v7081_v11  ;;  %v7252_v11 = vld [vmem:[%s8889_s30 + $0x7e0] sm:$0xff] }
 0x1d0   : > { %3504 = vmatprep.mubr.bf16.mxu0 %v10361_v32  ;;  %3547 = vmatprep.mubr.bf16.mxu1 %v10361_v32  ;;  %v7105_v13 = vld [vmem:[%s8889_s30 + $0x768] sm:$0x33]  ;;  %v7178_v61 = vcombine.low %v7047_v47, %v7059_v48  ;;  %v7336_v47 = vld [vmem:[%s8889_s30 + $0xa80] sm:$0xff] }
 0x1d1   : > { %v7348_v48 = vld [vmem:[%s8889_s30 + $0xae0] sm:$0x33] }
 0x1d2   : > { %3475 = vmatpush1.bf16.msra.mxu0 %v7144_v20  ;;  %3518 = vmatpush1.bf16.msra.mxu1 %v7146_v21  ;;  %v7223_v20 = vcombine.high %v7093_v12, %v7105_v13  ;;  %v7196_v21 = vcombine.low %v7068_v4, %v7080_v5  ;;  %v3206_v5 = vand.u32 %v7225_v63, %v8911_v6 }
 0x1d3   : > { %3476 = vmatprep.subr.bf16.mxu0 %v7169_v22  ;;  %3519 = vmatprep.subr.bf16.mxu1 %v7171_v26  ;;  %v7220_v22 = vcombine.low %v7092_v9, %v7104_v10  ;;  %v7222_v26 = vcombine.low %v7093_v12, %v7105_v13  ;;  %v7240_v10 = vld [vmem:[%s8889_s30 + $0x780] sm:$0xff] }
 0x1d4   : > { %v3200_v27 = vand.u32 %v7223_v20, %v8911_v6 }
 0x1d5   : > { %v3191_v33 = vand.u32 %v7220_v22, %v8911_v6 }
 0x1d6   : > { %3477 = vmatpush1.bf16.msra.mxu0 %v7168_v34  ;;  %3520 = vmatpush1.bf16.msra.mxu1 %v7170_v35  ;;  %v3197_v34 = vand.u32 %v7222_v26, %v8911_v6  ;;  %v7129_v35 = vcombine.high %v6998_v28, %v7010_v29  ;;  %v7276_v28 = vld [vmem:[%s8889_s30 + $0x8a0] sm:$0xff]  ;;  %v7265_v29 = vld [vmem:[%s8889_s30 + $0x848] sm:$0xff] }
 0x1d7   : > { %3478 = vmatprep.subr.bf16.mxu0 %v7193_v36  ;;  %3521 = vmatprep.subr.bf16.mxu1 %v7195_v38  ;;  %v7131_v36 = vcombine.high %v6999_v30, %v7011_v31  ;;  %v7034_v38 = vld [vmem:[%s8889_s30 + $0x530] sm:$0xff] }
 0x1d8   : > { %v7152_v49 = vcombine.low %v7022_v37, %v7034_v38 }
 0x1da   : > { %3479 = vmatpush1.bf16.msra.mxu0 %v7192_v40  ;;  %3522 = vmatpush1.bf16.msra.mxu1 %v7194_v42  ;;  %v7035_v40 = vld [vmem:[%s8889_s30 + $0x538] sm:$0xff]  ;;  %v7130_v42 = vcombine.low %v6999_v30, %v7011_v31  ;;  %v7277_v30 = vld [vmem:[%s8889_s30 + $0x8a8] sm:$0xff]  ;;  %v7360_v31 = vcombine.low %v7240_v10, %v7252_v11 }
 0x1db   : > { %3480 = vmatprep.subr.bf16.mxu0 %v3182_v43  ;;  %3523 = vmatprep.subr.bf16.mxu1 %v3188_v45  ;;  %v7153_v43 = vcombine.high %v7022_v37, %v7034_v38  ;;  %v7155_v44 = vcombine.high %v7023_v39, %v7035_v40  ;;  %v7046_v45 = vld [vmem:[%s8889_s30 + $0x590] sm:$0xff]  ;;  %v7300_v37 = vld [vmem:[%s8889_s30 + $0x960] sm:$0xff]  ;;  %v7289_v38 = vld [vmem:[%s8889_s30 + $0x908] sm:$0xff] }
 0x1de   : > { %3481 = vmatpush1.bf16.msra.mxu0 %v3179_v24  ;;  %3524 = vmatpush1.bf16.msra.mxu1 %v3185_v50  ;;  %v7154_v24 = vcombine.low %v7023_v39, %v7035_v40  ;;  %v7177_v50 = vcombine.high %v7046_v45, %v7058_v46  ;;  %v7301_v39 = vld [vmem:[%s8889_s30 + $0x968] sm:$0xff] }
 0x1df   : > { %3558 = vmatprep.subr.bf16.mxu0 %v7125_v51  ;;  %3601 = vmatprep.subr.bf16.mxu1 %v7127_v52  ;;  %v7070_v51 = vld [vmem:[%s8889_s30 + $0x650] sm:$0xff] }
 0x1e0   : > { %v7082_v52 = vld [vmem:[%s8889_s30 + $0x6b0] sm:$0xff] }
 0x1e1   : > { %7234 = vmatmul.mubr.msk.bf16.vlgmr.msra.gmra.mrb[36].mxu0 %vm1849_vm2, %v9175_v17  ;;  %7235 = vmatmul.mubr.msk.bf16.vlgmr.msra.gmra.mrb[36].mxu1 %vm1849_vm2, %v9175_v17  ;;  %v7201_v62 = vcombine.high %v7070_v51, %v7082_v52 }
 0x1e2   : > { %3559 = vmatpush1.bf16.msra.mxu0 %v7124_v57  ;;  %3602 = vmatpush1.bf16.msra.mxu1 %v7126_v58  ;;  %v7083_v57 = vld [vmem:[%s8889_s30 + $0x6b8] sm:$0xff] }
 0x1e3   : > { %3560 = vmatprep.subr.bf16.mxu0 %v7149_v59  ;;  %3603 = vmatprep.subr.bf16.mxu1 %v7151_v60  ;;  %v7095_v58 = vld [vmem:[%s8889_s30 + $0x718] sm:$0xff]  ;;  %v7176_v60 = vcombine.low %v7046_v45, %v7058_v46  ;;  %v7203_v0 = vcombine.high %v7071_v54, %v7083_v57  ;;  %v7202_v4 = vcombine.low %v7071_v54, %v7083_v57  ;;  %v7313_v46 = vld [vmem:[%s8889_s30 + $0x9c8] sm:$0xff] }
 0x1e4   : > { %3590 = vmatprep.mubr.bf16.mxu0 %v10361_v32  ;;  %3633 = vmatprep.mubr.bf16.mxu1 %v10361_v32  ;;  %v7107_v59 = vld [vmem:[%s8889_s30 + $0x778] sm:$0x33]  ;;  %v7411_v45 = vcombine.high %v7289_v38, %v7301_v39  ;;  %v7457_v54 = vcombine.high %v7336_v47, %v7348_v48 }
 0x1e6   : > { %3561 = vmatpush1.bf16.msra.mxu0 %v7148_v1  ;;  %3604 = vmatpush1.bf16.msra.mxu1 %v7150_v2  ;;  %v7227_v1 = vcombine.high %v7095_v58, %v7107_v59  ;;  %v7200_v2 = vcombine.low %v7070_v51, %v7082_v52  ;;  %v7410_v52 = vcombine.low %v7289_v38, %v7301_v39  ;;  %v7303_v38 = vld [vmem:[%s8889_s30 + $0x978] sm:$0xff] }
 0x1e7   : > { %3562 = vmatprep.subr.bf16.mxu0 %v7173_v3  ;;  %3605 = vmatprep.subr.bf16.mxu1 %v7175_v7  ;;  %v7224_v3 = vcombine.low %v7094_v55, %v7106_v56  ;;  %v7226_v7 = vcombine.low %v7095_v58, %v7107_v59  ;;  %v7456_v58 = vcombine.low %v7336_v47, %v7348_v48  ;;  %v7350_v47 = vld [vmem:[%s8889_s30 + $0xaf0] sm:$0x33]  ;;  %v7327_v48 = vld [vmem:[%s8889_s30 + $0xa38] sm:$0xff] }
 0x1e8   : > { %v3212_v9 = vand.u32 %v7227_v1, %v8911_v6  ;;  %v7254_v1 = vld [vmem:[%s8889_s30 + $0x7f0] sm:$0xff] }
 0x1e9   : > { %v3209_v22 = vand.u32 %v7226_v7, %v8911_v6 }
 0x1ea   : > { %3563 = vmatpush1.bf16.msra.mxu0 %v7172_v14  ;;  %3606 = vmatpush1.bf16.msra.mxu1 %v7174_v15  ;;  %v7241_v14 = vld [vmem:[%s8889_s30 + $0x788] sm:$0xff] }
 0x1eb   : > { %3564 = vmatprep.subr.bf16.mxu0 %v7197_v16  ;;  %3607 = vmatprep.subr.bf16.mxu1 %v7199_v19  ;;  %v7253_v15 = vld [vmem:[%s8889_s30 + $0x7e8] sm:$0xff]  ;;  %v3203_v19 = vand.u32 %v7224_v3, %v8911_v6 }
 0x1ec   : > { %v7363_v26 = vcombine.high %v7241_v14, %v7253_v15 }
 0x1ee   : > { %3565 = vmatpush1.bf16.msra.mxu0 %v7196_v21  ;;  %3608 = vmatpush1.bf16.msra.mxu1 %v7198_v23  ;;  %v7361_v23 = vcombine.high %v7240_v10, %v7252_v11  ;;  %v4428_v10 = vand.u32 %v7456_v58, %v8911_v6 }
 0x1ef   : > { %3566 = vmatprep.subr.bf16.mxu0 %v3194_v25  ;;  %3609 = vmatprep.subr.bf16.mxu1 %v3200_v27  ;;  %v7264_v27 = vld [vmem:[%s8889_s30 + $0x840] sm:$0xff] }
 0x1f0   : > { %v7384_v40 = vcombine.low %v7264_v27, %v7276_v28 }
 0x1f2   : > { %3567 = vmatpush1.bf16.msra.mxu0 %v3191_v33  ;;  %3610 = vmatpush1.bf16.msra.mxu1 %v3197_v34  ;;  %v7362_v33 = vcombine.low %v7241_v14, %v7253_v15  ;;  %v7385_v34 = vcombine.high %v7264_v27, %v7276_v28  ;;  %v7278_v27 = vld [vmem:[%s8889_s30 + $0x8b0] sm:$0xff]  ;;  %v7267_v28 = vld [vmem:[%s8889_s30 + $0x858] sm:$0xff] }
 0x1f3   : > { %3644 = vmatprep.subr.bf16.mxu0 %v7129_v35  ;;  %3687 = vmatprep.subr.bf16.mxu1 %v7131_v36  ;;  %v7387_v35 = vcombine.high %v7265_v29, %v7277_v30  ;;  %v7288_v36 = vld [vmem:[%s8889_s30 + $0x900] sm:$0xff] }
 0x1f4   : > { %v7408_v51 = vcombine.low %v7288_v36, %v7300_v37 }
 0x1f5   : > { %7236 = vmatmul.mubr.msk.bf16.vlgmr.msra.gmra.mrb[40].mxu0 %vm1849_vm2, %v9175_v17  ;;  %7237 = vmatmul.mubr.msk.bf16.vlgmr.msra.gmra.mrb[40].mxu1 %vm1849_vm2, %v9175_v17 }
 0x1f6   : > { %3645 = vmatpush1.bf16.msra.mxu0 %v7128_v41  ;;  %3688 = vmatpush1.bf16.msra.mxu1 %v7130_v42  ;;  %v7386_v41 = vcombine.low %v7265_v29, %v7277_v30  ;;  %v7409_v42 = vcombine.high %v7288_v36, %v7300_v37  ;;  %v7279_v29 = vld [vmem:[%s8889_s30 + $0x8b8] sm:$0xff]  ;;  %v7302_v36 = vld [vmem:[%s8889_s30 + $0x970] sm:$0xff] }
 0x1f7   : > { %3646 = vmatprep.subr.bf16.mxu0 %v7153_v43  ;;  %3689 = vmatprep.subr.bf16.mxu1 %v7155_v44  ;;  %v7312_v43 = vld [vmem:[%s8889_s30 + $0x9c0] sm:$0xff]  ;;  %v7291_v37 = vld [vmem:[%s8889_s30 + $0x918] sm:$0xff] }
 0x1f8   : > { %3676 = vmatprep.mubr.bf16.mxu0 %v10361_v32  ;;  %3719 = vmatprep.mubr.bf16.mxu1 %v10361_v32  ;;  %v7324_v44 = vld [vmem:[%s8889_s30 + $0xa20] sm:$0xff] }
 0x1f9   : > { %v7432_v57 = vcombine.low %v7312_v43, %v7324_v44 }
 0x1fa   : > { %3647 = vmatpush1.bf16.msra.mxu0 %v7152_v49  ;;  %3690 = vmatpush1.bf16.msra.mxu1 %v7154_v24  ;;  %v7325_v49 = vld [vmem:[%s8889_s30 + $0xa28] sm:$0xff] }
 0x1fb   : > { %3648 = vmatprep.subr.bf16.mxu0 %v7177_v50  ;;  %3691 = vmatprep.subr.bf16.mxu1 %v7179_v53  ;;  %v7337_v24 = vld [vmem:[%s8889_s30 + $0xa88] sm:$0xff]  ;;  %v7433_v53 = vcombine.high %v7312_v43, %v7324_v44  ;;  %v7435_v55 = vcombine.high %v7313_v46, %v7325_v49  ;;  %v7434_v59 = vcombine.low %v7313_v46, %v7325_v49  ;;  %v7326_v43 = vld [vmem:[%s8889_s30 + $0xa30] sm:$0xff]  ;;  %v7339_v49 = vld [vmem:[%s8889_s30 + $0xa98] sm:$0xff] }
 0x1fc   : > { %v7349_v50 = vld [vmem:[%s8889_s30 + $0xae8] sm:$0x33]  ;;  %v7415_v44 = vcombine.high %v7291_v37, %v7303_v38  ;;  %v7338_v46 = vld [vmem:[%s8889_s30 + $0xa90] sm:$0xff] }
 0x1fd   : > { %v7459_v56 = vcombine.high %v7337_v24, %v7349_v50 }
 0x1fe   : > { %3649 = vmatpush1.bf16.msra.mxu0 %v7176_v60  ;;  %3692 = vmatpush1.bf16.msra.mxu1 %v7178_v61  ;;  %v4431_v60 = vand.u32 %v7457_v54, %v8911_v6  ;;  %v7458_v61 = vcombine.low %v7337_v24, %v7349_v50  ;;  %v7351_v24 = vld [vmem:[%s8889_s30 + $0xaf8] sm:$0x33] }
 0x1ff   : > { %3650 = vmatprep.subr.bf16.mxu0 %v7201_v62  ;;  %3693 = vmatprep.subr.bf16.mxu1 %v7203_v0  ;;  %v4437_v63 = vand.u32 %v7459_v56, %v8911_v6  ;;  %v7242_v0 = vld [vmem:[%s8889_s30 + $0x790] sm:$0xff] }
 0x200   : > { %v9254_v8 = vpop.f32.mrb[0].mxu0  ;;  %v9259_v12 = vpop.f32.mrb[0].mxu1  ;;  %v4434_v15 = vand.u32 %v7458_v61, %v8911_v6  ;;  %v7364_v30 = vcombine.low %v7242_v0, %v7254_v1 }
 0x201   : > { %v9261_v13 = vpop.f32.mrb[1].mxu0  ;;  %v9265_v16 = vpop.f32.mrb[1].mxu1 }
 0x202   : > { %v9267_v18 = vpop.f32.mrb[2].mxu0  ;;  %3651 = vmatpush1.bf16.msra.mxu0 %v7200_v2  ;;  %v9270_v20 = vpop.f32.mrb[2].mxu1  ;;  %3694 = vmatpush1.bf16.msra.mxu1 %v7202_v4  ;;  %v7243_v4 = vld [vmem:[%s8889_s30 + $0x798] sm:$0xff] }
 0x203   : > { %10432 = vst [vmem:[#allocation4_spill] sm:$0xff] %v9270_v20  ;;  %v9272_v21 = vpop.f32.mrb[3].mxu0  ;;  %3652 = vmatprep.subr.bf16.mxu0 %v3206_v5  ;;  %v9275_v25 = vpop.f32.mrb[3].mxu1  ;;  %3695 = vmatprep.subr.bf16.mxu1 %v3212_v9  ;;  %v7255_v5 = vld [vmem:[%s8889_s30 + $0x7f8] sm:$0xff]  ;;  %v7601_v20 = vld [vmem:[%s8889_s30 + $0xea8] sm:$0x33] }
 0x204   : > { %10433 = vst [vmem:[#allocation5_spill] sm:$0xff] %v9272_v21  ;;  %10434 = vst [vmem:[#allocation6_spill] sm:$0xff] %v9275_v25  ;;  %v7600_v25 = vld [vmem:[%s8889_s30 + $0xea0] sm:$0x33]  ;;  %v7577_v21 = vld [vmem:[%s8889_s30 + $0xde8] sm:$0xff] }
 0x206   : > { %3653 = vmatpush1.bf16.msra.mxu0 %v3203_v19  ;;  %3696 = vmatpush1.bf16.msra.mxu1 %v3209_v22  ;;  %v7365_v19 = vcombine.high %v7242_v0, %v7254_v1  ;;  %v7244_v0 = vld [vmem:[%s8889_s30 + $0x7a0] sm:$0xff] }
 0x207   : > { %4499 = vmatprep.subr.bf16.mxu0 %v7361_v23  ;;  %4542 = vmatprep.subr.bf16.mxu1 %v7363_v26  ;;  %v7367_v23 = vcombine.high %v7243_v4, %v7255_v5  ;;  %v7266_v26 = vld [vmem:[%s8889_s30 + $0x850] sm:$0xff]  ;;  %v7256_v1 = vld [vmem:[%s8889_s30 + $0x800] sm:$0xff] }
 0x208   : > { %v7388_v39 = vcombine.low %v7266_v26, %v7278_v27 }
 0x209   : > { %7238 = vmatmul.mubr.msk.bf16.vlgmr.msra.gmra.mrb[44].mxu0 %vm1849_vm2, %v9175_v17  ;;  %7239 = vmatmul.mubr.msk.bf16.vlgmr.msra.gmra.mrb[44].mxu1 %vm1849_vm2, %v9175_v17 }
 0x20a   : > { %4500 = vmatpush1.bf16.msra.mxu0 %v7360_v31  ;;  %4543 = vmatpush1.bf16.msra.mxu1 %v7362_v33  ;;  %v7366_v31 = vcombine.low %v7243_v4, %v7255_v5  ;;  %v7389_v33 = vcombine.high %v7266_v26, %v7278_v27 }
 0x20b   : > { %4501 = vmatprep.subr.bf16.mxu0 %v7385_v34  ;;  %4544 = vmatprep.subr.bf16.mxu1 %v7387_v35  ;;  %v7391_v34 = vcombine.high %v7267_v28, %v7279_v29  ;;  %v7290_v35 = vld [vmem:[%s8889_s30 + $0x910] sm:$0xff] }
 0x20c   : > { %4531 = vmatprep.mubr.bf16.mxu0 %v10361_v32  ;;  %4574 = vmatprep.mubr.bf16.mxu1 %v10361_v32  ;;  %v7412_v50 = vcombine.low %v7290_v35, %v7302_v36 }
 0x20e   : > { %4502 = vmatpush1.bf16.msra.mxu0 %v7384_v40  ;;  %4545 = vmatpush1.bf16.msra.mxu1 %v7386_v41  ;;  %v7390_v40 = vcombine.low %v7267_v28, %v7279_v29  ;;  %v7413_v41 = vcombine.high %v7290_v35, %v7302_v36  ;;  %v7280_v35 = vld [vmem:[%s8889_s30 + $0x8c0] sm:$0xff]  ;;  %v7269_v36 = vld [vmem:[%s8889_s30 + $0x868] sm:$0xff] }
 0x20f   : > { %4503 = vmatprep.subr.bf16.mxu0 %v7409_v42  ;;  %4546 = vmatprep.subr.bf16.mxu1 %v7411_v45  ;;  %v7314_v42 = vld [vmem:[%s8889_s30 + $0x9d0] sm:$0xff]  ;;  %v7315_v45 = vld [vmem:[%s8889_s30 + $0x9d8] sm:$0xff] }
 0x210   : > { %v7439_v54 = vcombine.high %v7315_v45, %v7327_v48  ;;  %v7436_v56 = vcombine.low %v7314_v42, %v7326_v43  ;;  %v7438_v58 = vcombine.low %v7315_v45, %v7327_v48  ;;  %v7305_v45 = vld [vmem:[%s8889_s30 + $0x988] sm:$0xff] }
 0x212   : > { %4504 = vmatpush1.bf16.msra.mxu0 %v7408_v51  ;;  %4547 = vmatpush1.bf16.msra.mxu1 %v7410_v52  ;;  %v7414_v51 = vcombine.low %v7291_v37, %v7303_v38  ;;  %v7437_v52 = vcombine.high %v7314_v42, %v7326_v43  ;;  %v7281_v37 = vld [vmem:[%s8889_s30 + $0x8c8] sm:$0xff]  ;;  %v7368_v38 = vcombine.low %v7244_v0, %v7256_v1  ;;  %v7292_v42 = vld [vmem:[%s8889_s30 + $0x920] sm:$0xff] }
 0x213   : > { %4505 = vmatprep.subr.bf16.mxu0 %v7433_v53  ;;  %4548 = vmatprep.subr.bf16.mxu1 %v7435_v55  ;;  %v7461_v53 = vcombine.high %v7338_v46, %v7350_v47  ;;  %v7463_v55 = vcombine.high %v7339_v49, %v7351_v24  ;;  %v7304_v43 = vld [vmem:[%s8889_s30 + $0x980] sm:$0xff] }
 0x214   : > { %v9300_v62 = vpop.f32.mrb[4].mxu0  ;;  %v9305_v2 = vpop.f32.mrb[4].mxu1  ;;  %v7417_v48 = vcombine.high %v7292_v42, %v7304_v43 }
 0x215   : > { %v9307_v3 = vpop.f32.mrb[5].mxu0  ;;  %v9311_v7 = vpop.f32.mrb[5].mxu1 }
 0x216   : > { %v9313_v9 = vpop.f32.mrb[6].mxu0  ;;  %4506 = vmatpush1.bf16.msra.mxu0 %v7432_v57  ;;  %v9316_v11 = vpop.f32.mrb[6].mxu1  ;;  %4549 = vmatpush1.bf16.msra.mxu1 %v7434_v59  ;;  %v7460_v57 = vcombine.low %v7338_v46, %v7350_v47  ;;  %v4443_v59 = vand.u32 %v7461_v53, %v8911_v6  ;;  %v7394_v47 = vcombine.low %v7269_v36, %v7281_v37  ;;  %v7352_v53 = vld [vmem:[%s8889_s30 + $0xb00] sm:$0x33] }
 0x217   : > { %10435 = vst [vmem:[#allocation7_spill] sm:$0xff] %v9313_v9  ;;  %10436 = vst [vmem:[#allocation8_spill] sm:$0xff] %v9316_v11  ;;  %v9318_v14 = vpop.f32.mrb[7].mxu0  ;;  %4507 = vmatprep.subr.bf16.mxu0 %v4431_v60  ;;  %v9321_v22 = vpop.f32.mrb[7].mxu1  ;;  %4550 = vmatprep.subr.bf16.mxu1 %v4437_v63  ;;  %v7462_v60 = vcombine.low %v7339_v49, %v7351_v24  ;;  %v4449_v63 = vand.u32 %v7463_v55, %v8911_v6  ;;  %v7316_v49 = vld [vmem:[%s8889_s30 + $0x9e0] sm:$0xff]  ;;  %v7341_v55 = vld [vmem:[%s8889_s30 + $0xaa8] sm:$0xff] }
 0x218   : > { %10437 = vst [vmem:[#allocation9_spill] sm:$0xff] %v9318_v14  ;;  %10438 = vst [vmem:[#allocation10_spill] sm:$0xff] %v9321_v22  ;;  %v4440_v26 = vand.u32 %v7460_v57, %v8911_v6  ;;  %v7328_v24 = vld [vmem:[%s8889_s30 + $0xa40] sm:$0xff]  ;;  %v7416_v57 = vcombine.low %v7292_v42, %v7304_v43  ;;  %v7554_v14 = vld [vmem:[%s8889_s30 + $0xd30] sm:$0xff] }
 0x219   : > { %v4446_v29 = vand.u32 %v7462_v60, %v8911_v6  ;;  %v7602_v22 = vld [vmem:[%s8889_s30 + $0xeb0] sm:$0x33]  ;;  %v7591_v11 = vld [vmem:[%s8889_s30 + $0xe58] sm:$0xff] }
 0x21a   : > { %4508 = vmatpush1.bf16.msra.mxu0 %v4428_v10  ;;  %4551 = vmatpush1.bf16.msra.mxu1 %v4434_v15  ;;  %v7245_v10 = vld [vmem:[%s8889_s30 + $0x7a8] sm:$0xff] }
 0x21b   : > { %4585 = vmatprep.subr.bf16.mxu0 %v7365_v19  ;;  %4628 = vmatprep.subr.bf16.mxu1 %v7367_v23  ;;  %v7257_v15 = vld [vmem:[%s8889_s30 + $0x808] sm:$0xff] }
 0x21d   : > { %7480 = vmatmul.mubr.msk.bf16.vlgmr.msra.gmra.mrb[48].mxu0 %vm1849_vm2, %v9175_v17  ;;  %7481 = vmatmul.mubr.msk.bf16.vlgmr.msra.gmra.mrb[48].mxu1 %vm1849_vm2, %v9175_v17 }
 0x21e   : > { %4586 = vmatpush1.bf16.msra.mxu0 %v7364_v30  ;;  %4629 = vmatpush1.bf16.msra.mxu1 %v7366_v31  ;;  %v7369_v30 = vcombine.high %v7244_v0, %v7256_v1  ;;  %v7440_v1 = vcombine.low %v7316_v49, %v7328_v24 }
 0x21f   : > { %4587 = vmatprep.subr.bf16.mxu0 %v7389_v33  ;;  %4630 = vmatprep.subr.bf16.mxu1 %v7391_v34  ;;  %v7371_v33 = vcombine.high %v7245_v10, %v7257_v15  ;;  %v7268_v34 = vld [vmem:[%s8889_s30 + $0x860] sm:$0xff] }
 0x220   : > { %4617 = vmatprep.mubr.bf16.mxu0 %v10361_v32  ;;  %4660 = vmatprep.mubr.bf16.mxu1 %v10361_v32  ;;  %v7392_v46 = vcombine.low %v7268_v34, %v7280_v35 }
 0x222   : > { %4588 = vmatpush1.bf16.msra.mxu0 %v7388_v39  ;;  %4631 = vmatpush1.bf16.msra.mxu1 %v7390_v40  ;;  %v7370_v39 = vcombine.low %v7245_v10, %v7257_v15  ;;  %v7393_v40 = vcombine.high %v7268_v34, %v7280_v35  ;;  %v7246_v34 = vld [vmem:[%s8889_s30 + $0x7b0] sm:$0xff] }
 0x223   : > { %4589 = vmatprep.subr.bf16.mxu0 %v7413_v41  ;;  %4632 = vmatprep.subr.bf16.mxu1 %v7415_v44  ;;  %v7395_v41 = vcombine.high %v7269_v36, %v7281_v37  ;;  %v7293_v44 = vld [vmem:[%s8889_s30 + $0x928] sm:$0xff]  ;;  %v7258_v35 = vld [vmem:[%s8889_s30 + $0x810] sm:$0xff] }
 0x226   : > { %4590 = vmatpush1.bf16.msra.mxu0 %v7412_v50  ;;  %4633 = vmatpush1.bf16.msra.mxu1 %v7414_v51  ;;  %v7419_v50 = vcombine.high %v7293_v44, %v7305_v45  ;;  %v7317_v51 = vld [vmem:[%s8889_s30 + $0x9e8] sm:$0xff] }
 0x227   : > { %4591 = vmatprep.subr.bf16.mxu0 %v7437_v52  ;;  %4634 = vmatprep.subr.bf16.mxu1 %v7439_v54  ;;  %v7340_v52 = vld [vmem:[%s8889_s30 + $0xaa0] sm:$0xff]  ;;  %v7329_v54 = vld [vmem:[%s8889_s30 + $0xa48] sm:$0xff] }
 0x228   : > { %v9346_v61 = vpop.f32.mrb[8].mxu0  ;;  %v9351_v4 = vpop.f32.mrb[8].mxu1  ;;  %v7465_v60 = vcombine.high %v7340_v52, %v7352_v53  ;;  %v7464_v10 = vcombine.low %v7340_v52, %v7352_v53  ;;  %v7442_v15 = vcombine.low %v7317_v51, %v7329_v54  ;;  %v7372_v52 = vcombine.low %v7246_v34, %v7258_v35 }
 0x229   : > { %v9353_v5 = vpop.f32.mrb[9].mxu0  ;;  %v9357_v19 = vpop.f32.mrb[9].mxu1 }
 0x22a   : > { %v9359_v23 = vpop.f32.mrb[10].mxu0  ;;  %4592 = vmatpush1.bf16.msra.mxu0 %v7436_v56  ;;  %v9362_v27 = vpop.f32.mrb[10].mxu1  ;;  %4635 = vmatpush1.bf16.msra.mxu1 %v7438_v58  ;;  %v7353_v56 = vld [vmem:[%s8889_s30 + $0xb08] sm:$0x33]  ;;  %v7418_v58 = vcombine.low %v7293_v44, %v7305_v45  ;;  %v4452_v42 = vand.u32 %v7464_v10, %v8911_v6  ;;  %v7330_v10 = vld [vmem:[%s8889_s30 + $0xa50] sm:$0xff] }
 0x22b   : > { %10439 = vst [vmem:[#allocation11_spill] sm:$0xff] %v9359_v23  ;;  %10440 = vst [vmem:[#allocation12_spill] sm:$0xff] %v9362_v27  ;;  %v9364_v28 = vpop.f32.mrb[11].mxu0  ;;  %4593 = vmatprep.subr.bf16.mxu0 %v4443_v59  ;;  %v9367_v31 = vpop.f32.mrb[11].mxu1  ;;  %4636 = vmatprep.subr.bf16.mxu1 %v4449_v63  ;;  %v7441_v59 = vcombine.high %v7316_v49, %v7328_v24  ;;  %v7443_v63 = vcombine.high %v7317_v51, %v7329_v54  ;;  %v7270_v49 = vld [vmem:[%s8889_s30 + $0x870] sm:$0xff]  ;;  %v7283_v51 = vld [vmem:[%s8889_s30 + $0x8d8] sm:$0xff] }
 0x22c   : > { %10441 = vst [vmem:[#allocation13_spill] sm:$0xff] %v9364_v28  ;;  %10442 = vst [vmem:[#allocation14_spill] sm:$0xff] %v9367_v31  ;;  %v7467_v0 = vcombine.high %v7341_v55, %v7353_v56  ;;  %v7282_v24 = vld [vmem:[%s8889_s30 + $0x8d0] sm:$0xff]  ;;  %v7556_v28 = vld [vmem:[%s8889_s30 + $0xd40] sm:$0xff] }
 0x22d   : > { %v7397_v54 = vcombine.high %v7270_v49, %v7282_v24  ;;  %v7604_v31 = vld [vmem:[%s8889_s30 + $0xec0] sm:$0x33]  ;;  %v7593_v27 = vld [vmem:[%s8889_s30 + $0xe68] sm:$0xff] }
 0x22e   : > { %4594 = vmatpush1.bf16.msra.mxu0 %v4440_v26  ;;  %4637 = vmatpush1.bf16.msra.mxu1 %v4446_v29  ;;  %v4455_v26 = vand.u32 %v7465_v60, %v8911_v6  ;;  %v7466_v29 = vcombine.low %v7341_v55, %v7353_v56  ;;  %v7294_v56 = vld [vmem:[%s8889_s30 + $0x930] sm:$0xff]  ;;  %v7396_v60 = vcombine.low %v7270_v49, %v7282_v24 }
 0x22f   : > { %4671 = vmatprep.subr.bf16.mxu0 %v7369_v30  ;;  %4714 = vmatprep.subr.bf16.mxu1 %v7371_v33  ;;  %v4461_v33 = vand.u32 %v7467_v0, %v8911_v6 }
 0x230   : > { %v4458_v45 = vand.u32 %v7466_v29, %v8911_v6  ;;  %v7342_v29 = vld [vmem:[%s8889_s30 + $0xab0] sm:$0xff] }
 0x231   : > { %7482 = vmatmul.mubr.msk.bf16.vlgmr.msra.gmra.mrb[52].mxu0 %vm1849_vm2, %v9175_v17  ;;  %7483 = vmatmul.mubr.msk.bf16.vlgmr.msra.gmra.mrb[52].mxu1 %vm1849_vm2, %v9175_v17 }
 0x232   : > { %4672 = vmatpush1.bf16.msra.mxu0 %v7368_v38  ;;  %4715 = vmatpush1.bf16.msra.mxu1 %v7370_v39  ;;  %v7247_v38 = vld [vmem:[%s8889_s30 + $0x7b8] sm:$0xff] }
 0x233   : > { %4673 = vmatprep.subr.bf16.mxu0 %v7393_v40  ;;  %4716 = vmatprep.subr.bf16.mxu1 %v7395_v41  ;;  %v7259_v39 = vld [vmem:[%s8889_s30 + $0x818] sm:$0xff] }
 0x234   : > { %4703 = vmatprep.mubr.bf16.mxu0 %v10361_v32  ;;  %4746 = vmatprep.mubr.bf16.mxu1 %v10361_v32  ;;  %v7374_v53 = vcombine.low %v7247_v38, %v7259_v39 }
 0x236   : > { %4674 = vmatpush1.bf16.msra.mxu0 %v7392_v46  ;;  %4717 = vmatpush1.bf16.msra.mxu1 %v7394_v47  ;;  %v7373_v46 = vcombine.high %v7246_v34, %v7258_v35  ;;  %v7331_v34 = vld [vmem:[%s8889_s30 + $0xa58] sm:$0xff] }
 0x237   : > { %4675 = vmatprep.subr.bf16.mxu0 %v7417_v48  ;;  %4718 = vmatprep.subr.bf16.mxu1 %v7419_v50  ;;  %v7375_v48 = vcombine.high %v7247_v38, %v7259_v39  ;;  %v7271_v50 = vld [vmem:[%s8889_s30 + $0x878] sm:$0xff] }
 0x238   : > { %v7399_v55 = vcombine.high %v7271_v50, %v7283_v51  ;;  %v7343_v35 = vld [vmem:[%s8889_s30 + $0xab8] sm:$0xff] }
 0x23a   : > { %4676 = vmatpush1.bf16.msra.mxu0 %v7416_v57  ;;  %4719 = vmatpush1.bf16.msra.mxu1 %v7418_v58  ;;  %v7306_v57 = vld [vmem:[%s8889_s30 + $0x990] sm:$0xff]  ;;  %v7295_v58 = vld [vmem:[%s8889_s30 + $0x938] sm:$0xff] }
 0x23b   : > { %4677 = vmatprep.subr.bf16.mxu0 %v7441_v59  ;;  %4720 = vmatprep.subr.bf16.mxu1 %v7443_v63  ;;  %v7307_v59 = vld [vmem:[%s8889_s30 + $0x998] sm:$0xff]  ;;  %v7398_v63 = vcombine.low %v7271_v50, %v7283_v51  ;;  %v7421_v0 = vcombine.high %v7294_v56, %v7306_v57  ;;  %v7420_v38 = vcombine.low %v7294_v56, %v7306_v57  ;;  %v7260_v56 = vld [vmem:[%s8889_s30 + $0x820] sm:$0xff] }
 0x23c   : > { %v9392_v30 = vpop.f32.mrb[12].mxu0  ;;  %v9397_v36 = vpop.f32.mrb[12].mxu1  ;;  %v7422_v39 = vcombine.low %v7295_v58, %v7307_v59 }
 0x23d   : > { %10443 = vst [vmem:[#allocation15_spill] sm:$0xff] %v9392_v30  ;;  %10444 = vst [vmem:[#allocation16_spill] sm:$0xff] %v9397_v36  ;;  %v9399_v37 = vpop.f32.mrb[13].mxu0  ;;  %v9403_v40 = vpop.f32.mrb[13].mxu1 }
 0x23e   : > { %10445 = vst [vmem:[#allocation17_spill] sm:$0xff] %v9399_v37  ;;  %10446 = vst [vmem:[#allocation18_spill] sm:$0xff] %v9403_v40  ;;  %v9405_v41 = vpop.f32.mrb[14].mxu0  ;;  %4678 = vmatpush1.bf16.msra.mxu0 %v7440_v1  ;;  %v9408_v43 = vpop.f32.mrb[14].mxu1  ;;  %4721 = vmatpush1.bf16.msra.mxu1 %v7442_v15  ;;  %v7318_v1 = vld [vmem:[%s8889_s30 + $0x9f0] sm:$0xff]  ;;  %v7423_v15 = vcombine.high %v7295_v58, %v7307_v59  ;;  %v7249_v59 = vld [vmem:[%s8889_s30 + $0x7c8] sm:$0xff] }
 0x23f   : > { %10447 = vst [vmem:[#allocation19_spill] sm:$0xff] %v9405_v41  ;;  %10448 = vst [vmem:[#allocation20_spill] sm:$0xff] %v9408_v43  ;;  %v9410_v44 = vpop.f32.mrb[15].mxu0  ;;  %4679 = vmatprep.subr.bf16.mxu0 %v4455_v26  ;;  %v9413_v47 = vpop.f32.mrb[15].mxu1  ;;  %4722 = vmatprep.subr.bf16.mxu1 %v4461_v33  ;;  %v7319_v26 = vld [vmem:[%s8889_s30 + $0x9f8] sm:$0xff]  ;;  %v7444_v49 = vcombine.low %v7318_v1, %v7330_v10 }
 0x240   : > { %10449 = vst [vmem:[#allocation21_spill] sm:$0xff] %v9410_v44  ;;  %10450 = vst [vmem:[#allocation22_spill] sm:$0xff] %v9413_v47  ;;  %v7354_v33 = vld [vmem:[%s8889_s30 + $0xb10] sm:$0x33]  ;;  %v7446_v50 = vcombine.low %v7319_v26, %v7331_v34  ;;  %v7595_v43 = vld [vmem:[%s8889_s30 + $0xe78] sm:$0xff] }
 0x241   : > { %v7468_v24 = vcombine.low %v7342_v29, %v7354_v33  ;;  %v7558_v44 = vld [vmem:[%s8889_s30 + $0xd50] sm:$0xff] }
 0x242   : > { %4680 = vmatpush1.bf16.msra.mxu0 %v4452_v42  ;;  %4723 = vmatpush1.bf16.msra.mxu1 %v4458_v45  ;;  %v7445_v42 = vcombine.high %v7318_v1, %v7330_v10  ;;  %v7469_v45 = vcombine.high %v7342_v29, %v7354_v33  ;;  %v7606_v47 = vld [vmem:[%s8889_s30 + $0xed0] sm:$0x33] }
 0x243   : > { %4757 = vmatprep.subr.bf16.mxu0 %v7373_v46  ;;  %4800 = vmatprep.subr.bf16.mxu1 %v7375_v48  ;;  %v7447_v46 = vcombine.high %v7319_v26, %v7331_v34  ;;  %v4464_v1 = vand.u32 %v7468_v24, %v8911_v6  ;;  %v7308_v24 = vld [vmem:[%s8889_s30 + $0x9a0] sm:$0xff] }
 0x244   : > { %v4467_v51 = vand.u32 %v7469_v45, %v8911_v6 }
 0x245   : > { %7484 = vmatmul.mubr.msk.bf16.vlgmr.msra.gmra.mrb[56].mxu0 %vm1849_vm2, %v9175_v17  ;;  %7485 = vmatmul.mubr.msk.bf16.vlgmr.msra.gmra.mrb[56].mxu1 %vm1849_vm2, %v9175_v17  ;;  %v7355_v17 = vld [vmem:[%s8889_s30 + $0xb18] sm:$0x33] }
 0x246   : > { %4758 = vmatpush1.bf16.msra.mxu0 %v7372_v52  ;;  %4801 = vmatpush1.bf16.msra.mxu1 %v7374_v53  ;;  %v7471_v48 = vcombine.high %v7343_v35, %v7355_v17  ;;  %v7470_v52 = vcombine.low %v7343_v35, %v7355_v17  ;;  %v7272_v35 = vld [vmem:[%s8889_s30 + $0x880] sm:$0xff] }
 0x247   : > { %4759 = vmatprep.subr.bf16.mxu0 %v7397_v54  ;;  %4802 = vmatprep.subr.bf16.mxu1 %v7399_v55  ;;  %v7248_v55 = vld [vmem:[%s8889_s30 + $0x7c0] sm:$0xff] }
 0x248   : > { %4789 = vmatprep.mubr.bf16.mxu0 %v10361_v32  ;;  %4832 = vmatprep.mubr.bf16.mxu1 %v10361_v32  ;;  %v4473_v54 = vand.u32 %v7471_v48, %v8911_v6  ;;  %v4470_v26 = vand.u32 %v7470_v52, %v8911_v6  ;;  %v7377_v29 = vcombine.high %v7248_v55, %v7260_v56  ;;  %v7284_v17 = vld [vmem:[%s8889_s30 + $0x8e0] sm:$0xff]  ;;  %v7309_v52 = vld [vmem:[%s8889_s30 + $0x9a8] sm:$0xff] }
 0x24a   : > { %4760 = vmatpush1.bf16.msra.mxu0 %v7396_v60  ;;  %4803 = vmatpush1.bf16.msra.mxu1 %v7398_v63  ;;  %v7261_v60 = vld [vmem:[%s8889_s30 + $0x828] sm:$0xff] }
 0x24b   : > { %4761 = vmatprep.subr.bf16.mxu0 %v7421_v0  ;;  %4804 = vmatprep.subr.bf16.mxu1 %v7423_v15  ;;  %v7379_v34 = vcombine.high %v7249_v59, %v7261_v60  ;;  %v7378_v45 = vcombine.low %v7249_v59, %v7261_v60  ;;  %v7320_v59 = vld [vmem:[%s8889_s30 + $0xa00] sm:$0xff] }
 0x24c   : > { %v7332_v60 = vld [vmem:[%s8889_s30 + $0xa60] sm:$0xff] }
 0x24e   : > { %4762 = vmatpush1.bf16.msra.mxu0 %v7420_v38  ;;  %4805 = vmatpush1.bf16.msra.mxu1 %v7422_v39  ;;  %v7273_v38 = vld [vmem:[%s8889_s30 + $0x888] sm:$0xff] }
 0x24f   : > { %4763 = vmatprep.subr.bf16.mxu0 %v7445_v42  ;;  %4806 = vmatprep.subr.bf16.mxu1 %v7447_v46  ;;  %v7285_v39 = vld [vmem:[%s8889_s30 + $0x8e8] sm:$0xff]  ;;  %v7376_v42 = vcombine.low %v7248_v55, %v7260_v56  ;;  %v7401_v46 = vcombine.high %v7272_v35, %v7284_v17 }
 0x250   : > { %v9438_v53 = vpop.f32.mrb[16].mxu0  ;;  %v9443_v57 = vpop.f32.mrb[16].mxu1  ;;  %v7403_v48 = vcombine.high %v7273_v38, %v7285_v39  ;;  %v7402_v55 = vcombine.low %v7273_v38, %v7285_v39  ;;  %v7449_v38 = vcombine.high %v7320_v59, %v7332_v60 }
 0x251   : > { %10451 = vst [vmem:[#allocation23_spill] sm:$0xff] %v9438_v53  ;;  %10452 = vst [vmem:[#allocation24_spill] sm:$0xff] %v9443_v57  ;;  %v9445_v58 = vpop.f32.mrb[17].mxu0  ;;  %v9449_v63 = vpop.f32.mrb[17].mxu1 }
 0x252   : > { %10453 = vst [vmem:[#allocation25_spill] sm:$0xff] %v9445_v58  ;;  %10454 = vst [vmem:[#allocation26_spill] sm:$0xff] %v9449_v63  ;;  %v9451_v0 = vpop.f32.mrb[18].mxu0  ;;  %4764 = vmatpush1.bf16.msra.mxu0 %v7444_v49  ;;  %v9454_v10 = vpop.f32.mrb[18].mxu1  ;;  %4807 = vmatpush1.bf16.msra.mxu1 %v7446_v50  ;;  %v7296_v49 = vld [vmem:[%s8889_s30 + $0x940] sm:$0xff] }
 0x253   : > { %10455 = vst [vmem:[#allocation27_spill] sm:$0xff] %v9451_v0  ;;  %10456 = vst [vmem:[#allocation28_spill] sm:$0xff] %v9454_v10  ;;  %v9456_v15 = vpop.f32.mrb[19].mxu0  ;;  %4765 = vmatprep.subr.bf16.mxu0 %v4467_v51  ;;  %v9459_v33 = vpop.f32.mrb[19].mxu1  ;;  %4808 = vmatprep.subr.bf16.mxu1 %v4473_v54  ;;  %v9470_v50 = vld [vmem:[%s10354_s0] sm:$0xff]   ;;  %v7297_v51 = vld [vmem:[%s8889_s30 + $0x948] sm:$0xff]  ;;  %v7400_v54 = vcombine.low %v7272_v35, %v7284_v17  ;;  %v7425_v56 = vcombine.high %v7296_v49, %v7308_v24 }
 0x254   : > { %10457 = vst [vmem:[#allocation29_spill] sm:$0xff] %v9456_v15  ;;  %10458 = vst [vmem:[#allocation30_spill] sm:$0xff] %v9459_v33  ;;  %v7333_v33 = vld [vmem:[%s8889_s30 + $0xa68] sm:$0xff]  ;;  %v7424_v35 = vcombine.low %v7296_v49, %v7308_v24  ;;  %v7426_v17 = vcombine.low %v7297_v51, %v7309_v52 }
 0x255   : > { %v7345_v15 = vld [vmem:[%s8889_s30 + $0xac8] sm:$0xff] }
 0x256   : > { %4766 = vmatpush1.bf16.msra.mxu0 %v4464_v1  ;;  %4809 = vmatpush1.bf16.msra.mxu1 %v4470_v26  ;;  %v7427_v1 = vcombine.high %v7297_v51, %v7309_v52  ;;  %v7321_v26 = vld [vmem:[%s8889_s30 + $0xa08] sm:$0xff]  ;;  %v7250_v52 = vld [vmem:[%s8889_s30 + $0x7d0] sm:$0xff] }
 0x257   : > { %4843 = vmatprep.subr.bf16.mxu0 %v7377_v29  ;;  %4886 = vmatprep.subr.bf16.mxu1 %v7379_v34  ;;  %v7344_v29 = vld [vmem:[%s8889_s30 + $0xac0] sm:$0xff]  ;;  %v7357_v10 = vld [vmem:[%s8889_s30 + $0xb28] sm:$0x33] }
 0x258   : > { %v7356_v34 = vld [vmem:[%s8889_s30 + $0xb20] sm:$0x33]  ;;  %v7474_v24 = vcombine.low %v7345_v15, %v7357_v10 }
 0x259   : > { %7486 = vmatmul.mubr.msk.bf16.vlgmr.msra.gmra.mrb[60].mxu0 %vm1849_vm2, %v9470_v50  ;;  %7487 = vmatmul.mubr.msk.bf16.vlgmr.msra.gmra.mrb[60].mxu1 %vm1849_vm2, %v9470_v50  ;;  %v7473_v39 = vcombine.high %v7344_v29, %v7356_v34 }
 0x25a   : > { %4844 = vmatpush1.bf16.msra.mxu0 %v7376_v42  ;;  %4887 = vmatpush1.bf16.msra.mxu1 %v7378_v45  ;;  %v7451_v42 = vcombine.high %v7321_v26, %v7333_v33  ;;  %v7475_v45 = vcombine.high %v7345_v15, %v7357_v10 }
 0x25b   : > { %4845 = vmatprep.subr.bf16.mxu0 %v7401_v46  ;;  %4888 = vmatprep.subr.bf16.mxu1 %v7403_v48  ;;  %v7448_v46 = vcombine.low %v7320_v59, %v7332_v60  ;;  %v7472_v48 = vcombine.low %v7344_v29, %v7356_v34  ;;  %v4479_v49 = vand.u32 %v7473_v39, %v8911_v6  ;;  %v7251_v59 = vld [vmem:[%s8889_s30 + $0x7d8] sm:$0xff]  ;;  %v7274_v39 = vld [vmem:[%s8889_s30 + $0x890] sm:$0xff] }
 0x25c   : > { %4875 = vmatprep.mubr.bf16.mxu0 %v10361_v32  ;;  %4918 = vmatprep.mubr.bf16.mxu1 %v10361_v32  ;;  %v7450_v32 = vcombine.low %v7321_v26, %v7333_v33  ;;  %v4485_v51 = vand.u32 %v7475_v45, %v8911_v6  ;;  %v7263_v60 = vld [vmem:[%s8889_s30 + $0x838] sm:$0xff]  ;;  %v4482_v34 = vand.u32 %v7474_v24, %v8911_v6  ;;  %v6444_v24 = vld [vmem:[%s10356_s2] sm:$0xff] }
 0x25d   : > { %v4476_v15 = vand.u32 %v7472_v48, %v8911_v6  ;;  %v7275_v45 = vld [vmem:[%s8889_s30 + $0x898] sm:$0xff]  ;;  %v7382_v48 = vcombine.low %v7251_v59, %v7263_v60  ;;  %6448 = vperm.xlu0 %7826, %v6444_v24  }
 0x25e   : > { %4846 = vmatpush1.bf16.msra.mxu0 %v7400_v54  ;;  %4889 = vmatpush1.bf16.msra.mxu1 %v7402_v55  ;;  %v7262_v55 = vld [vmem:[%s8889_s30 + $0x830] sm:$0xff] }
 0x25f   : > { %4847 = vmatprep.subr.bf16.mxu0 %v7425_v56  ;;  %4890 = vmatprep.subr.bf16.mxu1 %v7427_v1 }
 0x262   : > { %4848 = vmatpush1.bf16.msra.mxu0 %v7424_v35  ;;  %4891 = vmatpush1.bf16.msra.mxu1 %v7426_v17  ;;  %v7381_v35 = vcombine.high %v7250_v52, %v7262_v55 }
 0x263   : > { %4849 = vmatprep.subr.bf16.mxu0 %v7449_v38  ;;  %4892 = vmatprep.subr.bf16.mxu1 %v7451_v42  ;;  %v7383_v38 = vcombine.high %v7251_v59, %v7263_v60  ;;  %v7286_v42 = vld [vmem:[%s8889_s30 + $0x8f0] sm:$0xff] }
 0x264   : > { %v9489_v54 = vpop.f32.mrb[20].mxu0  ;;  %v9494_v56 = vpop.f32.mrb[20].mxu1  ;;  %v7404_v59 = vcombine.low %v7274_v39, %v7286_v42 }
 0x265   : > { %10459 = vst [vmem:[#allocation31_spill] sm:$0xff] %v9489_v54  ;;  %10460 = vst [vmem:[#allocation32_spill] sm:$0xff] %v9494_v56  ;;  %v9496_v1 = vpop.f32.mrb[21].mxu0  ;;  %v9500_v33 = vpop.f32.mrb[21].mxu1 }
 0x266   : > { %10461 = vst [vmem:[#allocation33_spill] sm:$0xff] %v9496_v1  ;;  %10462 = vst [vmem:[#allocation34_spill] sm:$0xff] %v9500_v33  ;;  %v9502_v10 = vpop.f32.mrb[22].mxu0  ;;  %4850 = vmatpush1.bf16.msra.mxu0 %v7448_v46  ;;  %v9505_v26 = vpop.f32.mrb[22].mxu1  ;;  %4893 = vmatpush1.bf16.msra.mxu1 %v7450_v32  ;;  %v7287_v46 = vld [vmem:[%s8889_s30 + $0x8f8] sm:$0xff]  ;;  %v7380_v32 = vcombine.low %v7250_v52, %v7262_v55  ;;  %v10467_v1 = vmov 0  }
 0x267   : > { %10463 = vst [vmem:[#allocation35_spill] sm:$0xff] %v9502_v10  ;;  %10464 = vst [vmem:[#allocation36_spill] sm:$0xff] %v9505_v26  ;;  %v9507_v29 = vpop.f32.mrb[23].mxu0  ;;  %4851 = vmatprep.subr.bf16.mxu0 %v4479_v49  ;;  %v9510_v17 = vpop.f32.mrb[23].mxu1  ;;  %4894 = vmatprep.subr.bf16.mxu1 %v4485_v51  ;;  %v7405_v49 = vcombine.high %v7274_v39, %v7286_v42  ;;  %v7407_v51 = vcombine.high %v7275_v45, %v7287_v46  ;;  %v7299_v52 = vld [vmem:[%s8889_s30 + $0x958] sm:$0xff]  ;;  %v7346_v10 = vld [vmem:[%s8889_s30 + $0xad0] sm:$0xff] }
 0x268   : > { %10465 = vst [vmem:[#allocation37_spill] sm:$0xff] %v9507_v29  ;;  %10466 = vst [vmem:[#allocation38_spill] sm:$0xff] %v9510_v17  ;;  %v7298_v17 = vld [vmem:[%s8889_s30 + $0x950] sm:$0xff]  ;;  %v7311_v55 = vld [vmem:[%s8889_s30 + $0x9b8] sm:$0xff]  ;;  %v7406_v60 = vcombine.low %v7275_v45, %v7287_v46 }
 0x269   : > { %v7310_v29 = vld [vmem:[%s8889_s30 + $0x9b0] sm:$0xff]  ;;  %v7431_v24 = vcombine.high %v7299_v52, %v7311_v55  ;;  %v7323_v26 = vld [vmem:[%s8889_s30 + $0xa18] sm:$0xff]  ;;  %v7430_v46 = vcombine.low %v7299_v52, %v7311_v55  ;;  %v7492_v55 = vld [vmem:[%s8889_s30 + $0xb40] sm:$0xff] }
 0x26a   : > { %4852 = vmatpush1.bf16.msra.mxu0 %v4476_v15  ;;  %4895 = vmatpush1.bf16.msra.mxu1 %v4482_v34  ;;  %v7429_v15 = vcombine.high %v7298_v17, %v7310_v29  ;;  %v7322_v34 = vld [vmem:[%s8889_s30 + $0xa10] sm:$0xff]  ;;  %v7347_v39 = vld [vmem:[%s8889_s30 + $0xad8] sm:$0xff]  ;;  %v7428_v45 = vcombine.low %v7298_v17, %v7310_v29 }
 0x26b   : > { %4929 = vmatprep.subr.bf16.mxu0 %v7381_v35  ;;  %4972 = vmatprep.subr.bf16.mxu1 %v7383_v38  ;;  %v7334_v35 = vld [vmem:[%s8889_s30 + $0xa70] sm:$0xff]  ;;  %v6445_v38 = vld [vmem:[%s10356_s2 + $0x8] sm:$0xff]  ;;  %v7359_v42 = vld [vmem:[%s8889_s30 + $0xb38] sm:$0x33] }
 0x26c   : > { %v7358_v33 = vld [vmem:[%s8889_s30 + $0xb30] sm:$0x33]  ;;  %6453 = vperm.xlu0 %7826, %v6445_v38   ;;  %v7479_v56 = vcombine.high %v7347_v39, %v7359_v42  ;;  %v7452_v54 = vcombine.low %v7322_v34, %v7334_v35  ;;  %v7478_v63 = vcombine.low %v7347_v39, %v7359_v42  ;;  %v7528_v42 = vld [vmem:[%s8889_s30 + $0xc60] sm:$0xff] }
 0x26d   : > { %7488 = vmatmul.mubr.msk.bf16.vlgmr.msra.gmra.mrb[64].mxu0 %vm1849_vm2, %v9470_v50  ;;  %7489 = vmatmul.mubr.msk.bf16.vlgmr.msra.gmra.mrb[64].mxu1 %vm1849_vm2, %v9470_v50  ;;  %v7476_v0 = vcombine.low %v7346_v10, %v7358_v33 }
 0x26e   : > { %4930 = vmatpush1.bf16.msra.mxu0 %v7380_v32  ;;  %4973 = vmatpush1.bf16.msra.mxu1 %v7382_v48  ;;  %v7335_v32 = vld [vmem:[%s8889_s30 + $0xa78] sm:$0xff]  ;;  %v7453_v48 = vcombine.high %v7322_v34, %v7334_v35  ;;  %v4497_v52 = vand.u32 %v7479_v56, %v8911_v6  ;;  %v4494_v39 = vand.u32 %v7478_v63, %v8911_v6  ;;  %v7529_v35 = vld [vmem:[%s8889_s30 + $0xc68] sm:$0xff] }
 0x26f   : > { %4931 = vmatprep.subr.bf16.mxu0 %v7405_v49  ;;  %4974 = vmatprep.subr.bf16.mxu1 %v7407_v51  ;;  %v7477_v49 = vcombine.high %v7346_v10, %v7358_v33  ;;  %v7455_v51 = vcombine.high %v7323_v26, %v7335_v32  ;;  %v7493_v33 = vld [vmem:[%s8889_s30 + $0xb48] sm:$0xff] }
 0x270   : > { %4961 = vmatprep.mubr.bf16.mxu0 %v10467_v1  ;;  %5004 = vmatprep.mubr.bf16.mxu1 %v10467_v1  ;;  %v7505_v10 = vld [vmem:[%s8889_s30 + $0xba8] sm:$0xff] }
 0x271   : > { %v4491_v29 = vand.u32 %v7477_v49, %v8911_v6  ;;  %v7614_v63 = vcombine.low %v7493_v33, %v7505_v10 }
 0x272   : > { %4932 = vmatpush1.bf16.msra.mxu0 %v7404_v59  ;;  %4975 = vmatpush1.bf16.msra.mxu1 %v7406_v60  ;;  %v7454_v59 = vcombine.low %v7323_v26, %v7335_v32  ;;  %v7504_v60 = vld [vmem:[%s8889_s30 + $0xba0] sm:$0xff]  ;;  %v4488_v32 = vand.u32 %v7476_v0, %v8911_v6 }
 0x273   : > { %4933 = vmatprep.subr.bf16.mxu0 %v7429_v15  ;;  %4976 = vmatprep.subr.bf16.mxu1 %v7431_v24  ;;  %v7612_v0 = vcombine.low %v7492_v55, %v7504_v60  ;;  %v7540_v15 = vld [vmem:[%s8889_s30 + $0xcc0] sm:$0xff] }
 0x276   : > { %4934 = vmatpush1.bf16.msra.mxu0 %v7428_v45  ;;  %4977 = vmatpush1.bf16.msra.mxu1 %v7430_v46  ;;  %v7516_v45 = vld [vmem:[%s8889_s30 + $0xc00] sm:$0xff] }
 0x277   : > { %4935 = vmatprep.subr.bf16.mxu0 %v7453_v48  ;;  %4978 = vmatprep.subr.bf16.mxu1 %v7455_v51  ;;  %v7615_v51 = vcombine.high %v7493_v33, %v7505_v10  ;;  %v7637_v26 = vcombine.high %v7516_v45, %v7528_v42  ;;  %v7564_v10 = vld [vmem:[%s8889_s30 + $0xd80] sm:$0xff] }
 0x278   : > { %v9541_v17 = vpop.f32.mrb[24].mxu0  ;;  %v9548_v38 = vpop.f32.mrb[24].mxu1 }
 0x279   : > { %v9550_v34 = vpop.f32.mrb[25].mxu0  ;;  %v9558_v24 = vpop.f32.mrb[25].mxu1 }
 0x27a   : > { %v9560_v56 = vpop.f32.mrb[26].mxu0  ;;  %4936 = vmatpush1.bf16.msra.mxu0 %v7452_v54  ;;  %v9568_v46 = vpop.f32.mrb[26].mxu1  ;;  %4979 = vmatpush1.bf16.msra.mxu1 %v7454_v59  ;;  %v7613_v54 = vcombine.high %v7492_v55, %v7504_v60  ;;  %v7541_v59 = vld [vmem:[%s8889_s30 + $0xcc8] sm:$0xff]  ;;  %v7636_v55 = vcombine.low %v7516_v45, %v7528_v42 }
 0x27b   : > { %10468 = vst [vmem:[#allocation39_spill] sm:$0xff] %v9560_v56  ;;  %10469 = vst [vmem:[#allocation40_spill] sm:$0xff] %v9568_v46  ;;  %v9570_v48 = vpop.f32.mrb[27].mxu0  ;;  %4937 = vmatprep.subr.bf16.mxu0 %v4491_v29  ;;  %v9576_v49 = vpop.f32.mrb[27].mxu1  ;;  %4980 = vmatprep.subr.bf16.mxu1 %v4497_v52  ;;  %v7517_v29 = vld [vmem:[%s8889_s30 + $0xc08] sm:$0xff] }
 0x27c   : > { %10470 = vst [vmem:[#allocation41_spill] sm:$0xff] %v9570_v48  ;;  %10471 = vst [vmem:[#allocation42_spill] sm:$0xff] %v9576_v49  ;;  %v7639_v52 = vcombine.high %v7517_v29, %v7529_v35  ;;  %v7552_v48 = vld [vmem:[%s8889_s30 + $0xd20] sm:$0xff]  ;;  %v7553_v49 = vld [vmem:[%s8889_s30 + $0xd28] sm:$0xff]  ;;  %v7638_v60 = vcombine.low %v7517_v29, %v7529_v35 }
 0x27d   : > { %v7661_v33 = vcombine.high %v7540_v15, %v7552_v48  ;;  %v7589_v46 = vld [vmem:[%s8889_s30 + $0xe48] sm:$0xff]  ;;  %v7660_v42 = vcombine.low %v7540_v15, %v7552_v48 }
 0x27e   : > { %4938 = vmatpush1.bf16.msra.mxu0 %v4488_v32  ;;  %4981 = vmatpush1.bf16.msra.mxu1 %v4494_v39  ;;  %v7576_v32 = vld [vmem:[%s8889_s30 + $0xde0] sm:$0xff]  ;;  %v7663_v39 = vcombine.high %v7541_v59, %v7553_v49  ;;  %v7710_v56 = vcombine.low %v7589_v46, %v7601_v20 }
 0x27f   : > { %5784 = vmatprep.subr.bf16.mxu0 %v7613_v54  ;;  %5827 = vmatprep.subr.bf16.mxu1 %v7615_v51  ;;  %v7565_v54 = vld [vmem:[%s8889_s30 + $0xd88] sm:$0xff]  ;;  %v7588_v51 = vld [vmem:[%s8889_s30 + $0xe40] sm:$0xff]  ;;  %v7685_v35 = vcombine.high %v7564_v10, %v7576_v32  ;;  %v7684_v29 = vcombine.low %v7564_v10, %v7576_v32 }
 0x280   : > { %v7709_v45 = vcombine.high %v7588_v51, %v7600_v25 }
 0x281   : > { %7490 = vmatmul.mubr.msk.bf16.vlgmr.msra.gmra.mrb[68].mxu0 %vm1849_vm2, %v9470_v50  ;;  %7491 = vmatmul.mubr.msk.bf16.vlgmr.msra.gmra.mrb[68].mxu1 %vm1849_vm2, %v9470_v50 }
 0x282   : > { %5785 = vmatpush1.bf16.msra.mxu0 %v7612_v0  ;;  %5828 = vmatpush1.bf16.msra.mxu1 %v7614_v63  ;;  %v7687_v0 = vcombine.high %v7565_v54, %v7577_v21  ;;  %v7711_v63 = vcombine.high %v7589_v46, %v7601_v20  ;;  %v5716_v15 = vand.u32 %v7709_v45, %v8911_v6  ;;  %v7495_v20 = vld [vmem:[%s8889_s30 + $0xb58] sm:$0xff]  ;;  %v7530_v46 = vld [vmem:[%s8889_s30 + $0xc70] sm:$0xff] }
 0x283   : > { %5786 = vmatprep.subr.bf16.mxu0 %v7637_v26  ;;  %5829 = vmatprep.subr.bf16.mxu1 %v7639_v52  ;;  %v7662_v26 = vcombine.low %v7541_v59, %v7553_v49  ;;  %v7708_v52 = vcombine.low %v7588_v51, %v7600_v25  ;;  %v7494_v59 = vld [vmem:[%s8889_s30 + $0xb50] sm:$0xff]  ;;  %v7507_v25 = vld [vmem:[%s8889_s30 + $0xbb8] sm:$0xff] }
 0x284   : > { %5816 = vmatprep.mubr.bf16.mxu0 %v10467_v1  ;;  %5859 = vmatprep.mubr.bf16.mxu1 %v10467_v1  ;;  %v5722_v49 = vand.u32 %v7711_v63, %v8911_v6 }
 0x285   : > { %v5713_v51 = vand.u32 %v7708_v52, %v8911_v6 }
 0x286   : > { %5787 = vmatpush1.bf16.msra.mxu0 %v7636_v55  ;;  %5830 = vmatpush1.bf16.msra.mxu1 %v7638_v60  ;;  %v7686_v55 = vcombine.low %v7565_v54, %v7577_v21  ;;  %v7506_v60 = vld [vmem:[%s8889_s30 + $0xbb0] sm:$0xff]  ;;  %v7531_v21 = vld [vmem:[%s8889_s30 + $0xc78] sm:$0xff] }
 0x287   : > { %5788 = vmatprep.subr.bf16.mxu0 %v7661_v33  ;;  %5831 = vmatprep.subr.bf16.mxu1 %v7663_v39  ;;  %v7617_v63 = vcombine.high %v7494_v59, %v7506_v60 }
 0x28a   : > { %5789 = vmatpush1.bf16.msra.mxu0 %v7660_v42  ;;  %5832 = vmatpush1.bf16.msra.mxu1 %v7662_v26  ;;  %v5719_v42 = vand.u32 %v7710_v56, %v8911_v6  ;;  %v7619_v26 = vcombine.high %v7495_v20, %v7507_v25  ;;  %v7618_v56 = vcombine.low %v7495_v20, %v7507_v25  ;;  %v7566_v25 = vld [vmem:[%s8889_s30 + $0xd90] sm:$0xff] }
 0x28b   : > { %5790 = vmatprep.subr.bf16.mxu0 %v7685_v35  ;;  %5833 = vmatprep.subr.bf16.mxu1 %v7687_v0  ;;  %v7518_v35 = vld [vmem:[%s8889_s30 + $0xc10] sm:$0xff] }
 0x28c   : > { %v9603_v48 = vpop.f32.mrb[28].mxu0  ;;  %v9610_v39 = vpop.f32.mrb[28].mxu1  ;;  %v7641_v33 = vcombine.high %v7518_v35, %v7530_v46 }
 0x28d   : > { %v9612_v10 = vpop.f32.mrb[29].mxu0  ;;  %v9620_v32 = vpop.f32.mrb[29].mxu1 }
 0x28e   : > { %v9622_v54 = vpop.f32.mrb[30].mxu0  ;;  %5791 = vmatpush1.bf16.msra.mxu0 %v7684_v29  ;;  %v9630_v45 = vpop.f32.mrb[30].mxu1  ;;  %5834 = vmatpush1.bf16.msra.mxu1 %v7686_v55  ;;  %v7616_v29 = vcombine.low %v7494_v59, %v7506_v60  ;;  %v7543_v55 = vld [vmem:[%s8889_s30 + $0xcd8] sm:$0xff]  ;;  %v7640_v59 = vcombine.low %v7518_v35, %v7530_v46 }
 0x28f   : > { %10472 = vst [vmem:[#allocation43_spill] sm:$0xff] %v9622_v54  ;;  %10473 = vst [vmem:[#allocation44_spill] sm:$0xff] %v9630_v45  ;;  %v9632_v0 = vpop.f32.mrb[31].mxu0  ;;  %5792 = vmatprep.subr.bf16.mxu0 %v5716_v15  ;;  %v9638_v52 = vpop.f32.mrb[31].mxu1  ;;  %5835 = vmatprep.subr.bf16.mxu1 %v5722_v49  ;;  %v7519_v15 = vld [vmem:[%s8889_s30 + $0xc18] sm:$0xff] }
 0x290   : > { %10474 = vst [vmem:[#allocation45_spill] sm:$0xff] %v9632_v0  ;;  %10475 = vst [vmem:[#allocation46_spill] sm:$0xff] %v9638_v52  ;;  %v7643_v49 = vcombine.high %v7519_v15, %v7531_v21  ;;  %v7542_v0 = vld [vmem:[%s8889_s30 + $0xcd0] sm:$0xff]  ;;  %v7555_v52 = vld [vmem:[%s8889_s30 + $0xd38] sm:$0xff]  ;;  %v7642_v60 = vcombine.low %v7519_v15, %v7531_v21 }
 0x291   : > { %v7665_v20 = vcombine.high %v7542_v0, %v7554_v14  ;;  %v7579_v45 = vld [vmem:[%s8889_s30 + $0xdf8] sm:$0xff]  ;;  %v7664_v46 = vcombine.low %v7542_v0, %v7554_v14 }
 0x292   : > { %5793 = vmatpush1.bf16.msra.mxu0 %v5713_v51  ;;  %5836 = vmatpush1.bf16.msra.mxu1 %v5719_v42  ;;  %v7578_v51 = vld [vmem:[%s8889_s30 + $0xdf0] sm:$0xff]  ;;  %v7667_v42 = vcombine.high %v7543_v55, %v7555_v52  ;;  %v7603_v54 = vld [vmem:[%s8889_s30 + $0xeb8] sm:$0x33] }
 0x293   : > { %5870 = vmatprep.subr.bf16.mxu0 %v7617_v63  ;;  %5913 = vmatprep.subr.bf16.mxu1 %v7619_v26  ;;  %v7567_v26 = vld [vmem:[%s8889_s30 + $0xd98] sm:$0xff]  ;;  %v7590_v63 = vld [vmem:[%s8889_s30 + $0xe50] sm:$0xff]  ;;  %v7689_v21 = vcombine.high %v7566_v25, %v7578_v51  ;;  %v7688_v15 = vcombine.low %v7566_v25, %v7578_v51  ;;  %v7714_v9 = vcombine.low %v7591_v11, %v7603_v54 }
 0x294   : > { %v7713_v35 = vcombine.high %v7590_v63, %v7602_v22 }
 0x295   : > { %7732 = vmatmul.mubr.msk.bf16.vlgmr.msra.gmra.mrb[72].mxu0 %vm1849_vm2, %v9470_v50  ;;  %7733 = vmatmul.mubr.msk.bf16.vlgmr.msra.gmra.mrb[72].mxu1 %vm1849_vm2, %v9470_v50 }
 0x296   : > { %5871 = vmatpush1.bf16.msra.mxu0 %v7616_v29  ;;  %5914 = vmatpush1.bf16.msra.mxu1 %v7618_v56  ;;  %v7691_v29 = vcombine.high %v7567_v26, %v7579_v45  ;;  %v7715_v56 = vcombine.high %v7591_v11, %v7603_v54  ;;  %v5728_v14 = vand.u32 %v7713_v35, %v8911_v6  ;;  %v7497_v11 = vld [vmem:[%s8889_s30 + $0xb68] sm:$0xff] }
 0x297   : > { %5872 = vmatprep.subr.bf16.mxu0 %v7641_v33  ;;  %5915 = vmatprep.subr.bf16.mxu1 %v7643_v49  ;;  %v7666_v33 = vcombine.low %v7543_v55, %v7555_v52  ;;  %v7712_v49 = vcombine.low %v7590_v63, %v7602_v22  ;;  %v7496_v55 = vld [vmem:[%s8889_s30 + $0xb60] sm:$0xff]  ;;  %v7509_v22 = vld [vmem:[%s8889_s30 + $0xbc8] sm:$0xff] }
 0x298   : > { %5902 = vmatprep.mubr.bf16.mxu0 %v10467_v1  ;;  %5945 = vmatprep.mubr.bf16.mxu1 %v10467_v1  ;;  %v5734_v52 = vand.u32 %v7715_v56, %v8911_v6  ;;  %v7533_v54 = vld [vmem:[%s8889_s30 + $0xc88] sm:$0xff] }
 0x299   : > { %v5725_v63 = vand.u32 %v7712_v49, %v8911_v6 }
 0x29a   : > { %5873 = vmatpush1.bf16.msra.mxu0 %v7640_v59  ;;  %5916 = vmatpush1.bf16.msra.mxu1 %v7642_v60  ;;  %v7690_v59 = vcombine.low %v7567_v26, %v7579_v45  ;;  %v7508_v60 = vld [vmem:[%s8889_s30 + $0xbc0] sm:$0xff] }
 0x29b   : > { %5874 = vmatprep.subr.bf16.mxu0 %v7665_v20  ;;  %5917 = vmatprep.subr.bf16.mxu1 %v7667_v42  ;;  %v7621_v56 = vcombine.high %v7496_v55, %v7508_v60  ;;  %v7532_v45 = vld [vmem:[%s8889_s30 + $0xc80] sm:$0xff] }
 0x29e   : > { %5875 = vmatpush1.bf16.msra.mxu0 %v7664_v46  ;;  %5918 = vmatpush1.bf16.msra.mxu1 %v7666_v33  ;;  %v5731_v46 = vand.u32 %v7714_v9, %v8911_v6  ;;  %v7623_v33 = vcombine.high %v7497_v11, %v7509_v22  ;;  %v7622_v9 = vcombine.low %v7497_v11, %v7509_v22  ;;  %v7568_v22 = vld [vmem:[%s8889_s30 + $0xda0] sm:$0xff] }
 0x29f   : > { %5876 = vmatprep.subr.bf16.mxu0 %v7689_v21  ;;  %5919 = vmatprep.subr.bf16.mxu1 %v7691_v29  ;;  %v7520_v21 = vld [vmem:[%s8889_s30 + $0xc20] sm:$0xff] }
 0x2a0   : > { %v9665_v0 = vpop.f32.mrb[32].mxu0  ;;  %v9672_v42 = vpop.f32.mrb[32].mxu1  ;;  %v7645_v20 = vcombine.high %v7520_v21, %v7532_v45 }
 0x2a1   : > { %v9674_v25 = vpop.f32.mrb[33].mxu0  ;;  %v9682_v51 = vpop.f32.mrb[33].mxu1 }
 0x2a2   : > { %v9684_v26 = vpop.f32.mrb[34].mxu0  ;;  %5877 = vmatpush1.bf16.msra.mxu0 %v7688_v15  ;;  %v9692_v35 = vpop.f32.mrb[34].mxu1  ;;  %5920 = vmatpush1.bf16.msra.mxu1 %v7690_v59  ;;  %v7620_v15 = vcombine.low %v7496_v55, %v7508_v60  ;;  %v7545_v59 = vld [vmem:[%s8889_s30 + $0xce8] sm:$0xff]  ;;  %v7644_v55 = vcombine.low %v7520_v21, %v7532_v45 }
 0x2a3   : > { %10476 = vst [vmem:[#allocation47_spill] sm:$0xff] %v9684_v26  ;;  %10477 = vst [vmem:[#allocation48_spill] sm:$0xff] %v9692_v35  ;;  %v9694_v29 = vpop.f32.mrb[35].mxu0  ;;  %5878 = vmatprep.subr.bf16.mxu0 %v5728_v14  ;;  %v9700_v49 = vpop.f32.mrb[35].mxu1  ;;  %5921 = vmatprep.subr.bf16.mxu1 %v5734_v52  ;;  %v7521_v14 = vld [vmem:[%s8889_s30 + $0xc28] sm:$0xff] }
 0x2a4   : > { %10478 = vst [vmem:[#allocation49_spill] sm:$0xff] %v9694_v29  ;;  %10479 = vst [vmem:[#allocation50_spill] sm:$0xff] %v9700_v49  ;;  %v7647_v52 = vcombine.high %v7521_v14, %v7533_v54  ;;  %v7544_v29 = vld [vmem:[%s8889_s30 + $0xce0] sm:$0xff]  ;;  %v7557_v49 = vld [vmem:[%s8889_s30 + $0xd48] sm:$0xff]  ;;  %v7646_v60 = vcombine.low %v7521_v14, %v7533_v54 }
 0x2a5   : > { %v7669_v11 = vcombine.high %v7544_v29, %v7556_v28  ;;  %v7581_v35 = vld [vmem:[%s8889_s30 + $0xe08] sm:$0xff]  ;;  %v7668_v45 = vcombine.low %v7544_v29, %v7556_v28 }
 0x2a6   : > { %5879 = vmatpush1.bf16.msra.mxu0 %v5725_v63  ;;  %5922 = vmatpush1.bf16.msra.mxu1 %v5731_v46  ;;  %v7580_v63 = vld [vmem:[%s8889_s30 + $0xe00] sm:$0xff]  ;;  %v7671_v46 = vcombine.high %v7545_v59, %v7557_v49  ;;  %v7605_v26 = vld [vmem:[%s8889_s30 + $0xec8] sm:$0x33] }
 0x2a7   : > { %5956 = vmatprep.subr.bf16.mxu0 %v7621_v56  ;;  %5999 = vmatprep.subr.bf16.mxu1 %v7623_v33  ;;  %v7569_v33 = vld [vmem:[%s8889_s30 + $0xda8] sm:$0xff]  ;;  %v7592_v56 = vld [vmem:[%s8889_s30 + $0xe60] sm:$0xff]  ;;  %v7693_v54 = vcombine.high %v7568_v22, %v7580_v63  ;;  %v7692_v14 = vcombine.low %v7568_v22, %v7580_v63  ;;  %v7718_v23 = vcombine.low %v7593_v27, %v7605_v26 }
 0x2a8   : > { %v7717_v21 = vcombine.high %v7592_v56, %v7604_v31 }
 0x2a9   : > { %7734 = vmatmul.mubr.msk.bf16.vlgmr.msra.gmra.mrb[76].mxu0 %vm1849_vm2, %v9470_v50  ;;  %7735 = vmatmul.mubr.msk.bf16.vlgmr.msra.gmra.mrb[76].mxu1 %vm1849_vm2, %v9470_v50 }
 0x2aa   : > { %5957 = vmatpush1.bf16.msra.mxu0 %v7620_v15  ;;  %6000 = vmatpush1.bf16.msra.mxu1 %v7622_v9  ;;  %v7695_v15 = vcombine.high %v7569_v33, %v7581_v35  ;;  %v7719_v9 = vcombine.high %v7593_v27, %v7605_v26  ;;  %v5740_v28 = vand.u32 %v7717_v21, %v8911_v6  ;;  %v7499_v27 = vld [vmem:[%s8889_s30 + $0xb78] sm:$0xff] }
 0x2ab   : > { %5958 = vmatprep.subr.bf16.mxu0 %v7645_v20  ;;  %6001 = vmatprep.subr.bf16.mxu1 %v7647_v52  ;;  %v7670_v20 = vcombine.low %v7545_v59, %v7557_v49  ;;  %v7716_v52 = vcombine.low %v7592_v56, %v7604_v31  ;;  %v7498_v59 = vld [vmem:[%s8889_s30 + $0xb70] sm:$0xff]  ;;  %v7511_v31 = vld [vmem:[%s8889_s30 + $0xbd8] sm:$0xff] }
 0x2ac   : > { %5988 = vmatprep.mubr.bf16.mxu0 %v10467_v1  ;;  %6031 = vmatprep.mubr.bf16.mxu1 %v10467_v1  ;;  %v5746_v49 = vand.u32 %v7719_v9, %v8911_v6  ;;  %v7535_v26 = vld [vmem:[%s8889_s30 + $0xc98] sm:$0xff] }
 0x2ad   : > { %v5737_v56 = vand.u32 %v7716_v52, %v8911_v6 }
 0x2ae   : > { %5959 = vmatpush1.bf16.msra.mxu0 %v7644_v55  ;;  %6002 = vmatpush1.bf16.msra.mxu1 %v7646_v60  ;;  %v7694_v55 = vcombine.low %v7569_v33, %v7581_v35  ;;  %v7510_v60 = vld [vmem:[%s8889_s30 + $0xbd0] sm:$0xff] }
 0x2af   : > { %5960 = vmatprep.subr.bf16.mxu0 %v7669_v11  ;;  %6003 = vmatprep.subr.bf16.mxu1 %v7671_v46  ;;  %v7625_v9 = vcombine.high %v7498_v59, %v7510_v60  ;;  %v7534_v35 = vld [vmem:[%s8889_s30 + $0xc90] sm:$0xff] }
 0x2b2   : > { %5961 = vmatpush1.bf16.msra.mxu0 %v7668_v45  ;;  %6004 = vmatpush1.bf16.msra.mxu1 %v7670_v20  ;;  %v5743_v45 = vand.u32 %v7718_v23, %v8911_v6  ;;  %v7627_v20 = vcombine.high %v7499_v27, %v7511_v31  ;;  %v7626_v23 = vcombine.low %v7499_v27, %v7511_v31  ;;  %v7570_v31 = vld [vmem:[%s8889_s30 + $0xdb0] sm:$0xff] }
 0x2b3   : > { %5962 = vmatprep.subr.bf16.mxu0 %v7693_v54  ;;  %6005 = vmatprep.subr.bf16.mxu1 %v7695_v15  ;;  %v7522_v54 = vld [vmem:[%s8889_s30 + $0xc30] sm:$0xff] }
 0x2b4   : > { %v9727_v29 = vpop.f32.mrb[36].mxu0  ;;  %v9734_v46 = vpop.f32.mrb[36].mxu1  ;;  %v7649_v11 = vcombine.high %v7522_v54, %v7534_v35 }
 0x2b5   : > { %10480 = vst [vmem:[#allocation51_spill] sm:$0xff] %v9727_v29  ;;  %10481 = vst [vmem:[#allocation52_spill] sm:$0xff] %v9734_v46  ;;  %v9736_v22 = vpop.f32.mrb[37].mxu0  ;;  %v9744_v63 = vpop.f32.mrb[37].mxu1 }
 0x2b6   : > { %10482 = vst [vmem:[#allocation53_spill] sm:$0xff] %v9736_v22  ;;  %10483 = vst [vmem:[#allocation54_spill] sm:$0xff] %v9744_v63  ;;  %v9746_v33 = vpop.f32.mrb[38].mxu0  ;;  %5963 = vmatpush1.bf16.msra.mxu0 %v7692_v14  ;;  %v9754_v21 = vpop.f32.mrb[38].mxu1  ;;  %6006 = vmatpush1.bf16.msra.mxu1 %v7694_v55  ;;  %v7624_v14 = vcombine.low %v7498_v59, %v7510_v60  ;;  %v7547_v55 = vld [vmem:[%s8889_s30 + $0xcf8] sm:$0xff]  ;;  %v7648_v59 = vcombine.low %v7522_v54, %v7534_v35 }
 0x2b7   : > { %10484 = vst [vmem:[#allocation55_spill] sm:$0xff] %v9746_v33  ;;  %10485 = vst [vmem:[#allocation56_spill] sm:$0xff] %v9754_v21  ;;  %v9756_v15 = vpop.f32.mrb[39].mxu0  ;;  %5964 = vmatprep.subr.bf16.mxu0 %v5740_v28  ;;  %v9762_v52 = vpop.f32.mrb[39].mxu1  ;;  %6007 = vmatprep.subr.bf16.mxu1 %v5746_v49  ;;  %v7523_v28 = vld [vmem:[%s8889_s30 + $0xc38] sm:$0xff] }
 0x2b8   : > { %10486 = vst [vmem:[#allocation57_spill] sm:$0xff] %v9756_v15  ;;  %10487 = vst [vmem:[#allocation58_spill] sm:$0xff] %v9762_v52  ;;  %v7651_v49 = vcombine.high %v7523_v28, %v7535_v26  ;;  %v7546_v15 = vld [vmem:[%s8889_s30 + $0xcf0] sm:$0xff]  ;;  %v7559_v52 = vld [vmem:[%s8889_s30 + $0xd58] sm:$0xff]  ;;  %v7650_v60 = vcombine.low %v7523_v28, %v7535_v26 }
 0x2b9   : > { %v7673_v27 = vcombine.high %v7546_v15, %v7558_v44  ;;  %v7583_v21 = vld [vmem:[%s8889_s30 + $0xe18] sm:$0xff]  ;;  %v7672_v35 = vcombine.low %v7546_v15, %v7558_v44 }
 0x2ba   : > { %5965 = vmatpush1.bf16.msra.mxu0 %v5737_v56  ;;  %6008 = vmatpush1.bf16.msra.mxu1 %v5743_v45  ;;  %v7582_v56 = vld [vmem:[%s8889_s30 + $0xe10] sm:$0xff]  ;;  %v7675_v45 = vcombine.high %v7547_v55, %v7559_v52  ;;  %v7607_v33 = vld [vmem:[%s8889_s30 + $0xed8] sm:$0x33] }
 0x2bb   : > { %6042 = vmatprep.subr.bf16.mxu0 %v7625_v9  ;;  %6085 = vmatprep.subr.bf16.mxu1 %v7627_v20  ;;  %v7571_v20 = vld [vmem:[%s8889_s30 + $0xdb8] sm:$0xff]  ;;  %v7594_v9 = vld [vmem:[%s8889_s30 + $0xe70] sm:$0xff]  ;;  %v7697_v26 = vcombine.high %v7570_v31, %v7582_v56  ;;  %v7696_v28 = vcombine.low %v7570_v31, %v7582_v56  ;;  %v7722_v41 = vcombine.low %v7595_v43, %v7607_v33 }
 0x2bc   : > { %v7721_v54 = vcombine.high %v7594_v9, %v7606_v47 }
 0x2bd   : > { %7736 = vmatmul.mubr.msk.bf16.vlgmr.msra.gmra.mrb[80].mxu0 %vm1849_vm2, %v9470_v50  ;;  %7737 = vmatmul.mubr.msk.bf16.vlgmr.msra.gmra.mrb[80].mxu1 %vm1849_vm2, %v9470_v50 }
 0x2be   : > { %6043 = vmatpush1.bf16.msra.mxu0 %v7624_v14  ;;  %6086 = vmatpush1.bf16.msra.mxu1 %v7626_v23  ;;  %v7699_v14 = vcombine.high %v7571_v20, %v7583_v21  ;;  %v7723_v23 = vcombine.high %v7595_v43, %v7607_v33  ;;  %v5752_v44 = vand.u32 %v7721_v54, %v8911_v6  ;;  %v7501_v43 = vld [vmem:[%s8889_s30 + $0xb88] sm:$0xff] }
 0x2bf   : > { %6044 = vmatprep.subr.bf16.mxu0 %v7649_v11  ;;  %6087 = vmatprep.subr.bf16.mxu1 %v7651_v49  ;;  %v7674_v11 = vcombine.low %v7547_v55, %v7559_v52  ;;  %v7720_v49 = vcombine.low %v7594_v9, %v7606_v47  ;;  %v7500_v55 = vld [vmem:[%s8889_s30 + $0xb80] sm:$0xff]  ;;  %v7513_v47 = vld [vmem:[%s8889_s30 + $0xbe8] sm:$0xff] }
 0x2c0   : > { %6074 = vmatprep.mubr.bf16.mxu0 %v10467_v1  ;;  %6117 = vmatprep.mubr.bf16.mxu1 %v10467_v1  ;;  %v5758_v52 = vand.u32 %v7723_v23, %v8911_v6  ;;  %v7525_v54 = vld [vmem:[%s8889_s30 + $0xc48] sm:$0xff] }
 0x2c1   : > { %v5749_v9 = vand.u32 %v7720_v49, %v8911_v6  ;;  %v7585_v33 = vld [vmem:[%s8889_s30 + $0xe28] sm:$0xff] }
 0x2c2   : > { %6045 = vmatpush1.bf16.msra.mxu0 %v7648_v59  ;;  %6088 = vmatpush1.bf16.msra.mxu1 %v7650_v60  ;;  %v7698_v59 = vcombine.low %v7571_v20, %v7583_v21  ;;  %v7512_v60 = vld [vmem:[%s8889_s30 + $0xbe0] sm:$0xff] }
 0x2c3   : > { %6046 = vmatprep.subr.bf16.mxu0 %v7673_v27  ;;  %6089 = vmatprep.subr.bf16.mxu1 %v7675_v45  ;;  %v7628_v49 = vcombine.low %v7500_v55, %v7512_v60  ;;  %v7630_v27 = vcombine.low %v7501_v43, %v7513_v47 }
 0x2c6   : > { %6047 = vmatpush1.bf16.msra.mxu0 %v7672_v35  ;;  %6090 = vmatpush1.bf16.msra.mxu1 %v7674_v11  ;;  %v5755_v35 = vand.u32 %v7722_v41, %v8911_v6  ;;  %v7548_v41 = vld [vmem:[%s8889_s30 + $0xd00] sm:$0xff]  ;;  %v7597_v11 = vld [vmem:[%s8889_s30 + $0xe88] sm:$0xff] }
 0x2c7   : > { %6048 = vmatprep.subr.bf16.mxu0 %v7697_v26  ;;  %6091 = vmatprep.subr.bf16.mxu1 %v7699_v14  ;;  %v7631_v26 = vcombine.high %v7501_v43, %v7513_v47  ;;  %v7524_v14 = vld [vmem:[%s8889_s30 + $0xc40] sm:$0xff] }
 0x2c8   : > { %v9789_v15 = vpop.f32.mrb[40].mxu0  ;;  %v9796_v45 = vpop.f32.mrb[40].mxu1  ;;  %v7572_v47 = vld [vmem:[%s8889_s30 + $0xdc0] sm:$0xff] }
 0x2c9   : > { %10488 = vst [vmem:[#allocation59_spill] sm:$0xff] %v9789_v15  ;;  %10489 = vst [vmem:[#allocation60_spill] sm:$0xff] %v9796_v45  ;;  %v9798_v31 = vpop.f32.mrb[41].mxu0  ;;  %v9806_v56 = vpop.f32.mrb[41].mxu1 }
 0x2ca   : > { %10490 = vst [vmem:[#allocation61_spill] sm:$0xff] %v9798_v31  ;;  %10491 = vst [vmem:[#allocation62_spill] sm:$0xff] %v9806_v56  ;;  %v9808_v20 = vpop.f32.mrb[42].mxu0  ;;  %6049 = vmatpush1.bf16.msra.mxu0 %v7696_v28  ;;  %v9816_v23 = vpop.f32.mrb[42].mxu1  ;;  %6092 = vmatpush1.bf16.msra.mxu1 %v7698_v59  ;;  %v7629_v28 = vcombine.high %v7500_v55, %v7512_v60  ;;  %v7537_v56 = vld [vmem:[%s8889_s30 + $0xca8] sm:$0xff] }
 0x2cb   : > { %10492 = vst [vmem:[#allocation63_spill] sm:$0xff] %v9808_v20  ;;  %10495 = vst [vmem:[#allocation64_spill] sm:$0xff] %v9816_v23  ;;  %v9818_v21 = vpop.f32.mrb[43].mxu0  ;;  %6050 = vmatprep.subr.bf16.mxu0 %v5752_v44  ;;  %v9824_v31 = vpop.f32.mrb[43].mxu1  ;;  %6093 = vmatprep.subr.bf16.mxu1 %v5758_v52  ;;  %v7536_v20 = vld [vmem:[%s8889_s30 + $0xca0] sm:$0xff]  ;;  %v7655_v52 = vcombine.high %v7525_v54, %v7537_v56  ;;  %v7549_v44 = vld [vmem:[%s8889_s30 + $0xd08] sm:$0xff]  ;;  %v7654_v60 = vcombine.low %v7525_v54, %v7537_v56 }
 0x2cc   : > { %10496 = vst [vmem:[#allocation65_spill] sm:$0xff] %v9818_v21  ;;  %10499 = vst [vmem:[#allocation66_spill] sm:$0xff] %v9824_v31  ;;  %v7653_v21 = vcombine.high %v7524_v14, %v7536_v20  ;;  %v7560_v23 = vld [vmem:[%s8889_s30 + $0xd60] sm:$0xff]  ;;  %v7561_v31 = vld [vmem:[%s8889_s30 + $0xd68] sm:$0xff]  ;;  %v7652_v55 = vcombine.low %v7524_v14, %v7536_v20 }
 0x2cd   : > { %v7677_v43 = vcombine.high %v7548_v41, %v7560_v23  ;;  %v7608_v59 = vld [vmem:[%s8889_s30 + $0xee0] sm:$0x33]  ;;  %v7676_v20 = vcombine.low %v7548_v41, %v7560_v23 }
 0x2ce   : > { %6051 = vmatpush1.bf16.msra.mxu0 %v5749_v9  ;;  %6094 = vmatpush1.bf16.msra.mxu1 %v5755_v35  ;;  %v7584_v9 = vld [vmem:[%s8889_s30 + $0xe20] sm:$0xff]  ;;  %v7679_v35 = vcombine.high %v7549_v44, %v7561_v31 }
 0x2cf   : > { %6128 = vmatprep.subr.bf16.mxu0 %v7629_v28  ;;  %6171 = vmatprep.subr.bf16.mxu1 %v7631_v26  ;;  %v7573_v26 = vld [vmem:[%s8889_s30 + $0xdc8] sm:$0xff]  ;;  %v7596_v28 = vld [vmem:[%s8889_s30 + $0xe80] sm:$0xff] }
 0x2d0   : > { %v7725_v56 = vcombine.high %v7596_v28, %v7608_v59  ;;  %v7703_v54 = vcombine.high %v7573_v26, %v7585_v33 }
 0x2d1   : > { %7738 = vmatmul.mubr.msk.bf16.vlgmr.msra.gmra.mrb[84].mxu0 %vm1849_vm2, %v9470_v50  ;;  %7739 = vmatmul.mubr.msk.bf16.vlgmr.msra.gmra.mrb[84].mxu1 %vm1849_vm2, %v9470_v50  ;;  %v7609_v50 = vld [vmem:[%s8889_s30 + $0xee8] sm:$0x33] }
 0x2d2   : > { %6129 = vmatpush1.bf16.msra.mxu0 %v7628_v49  ;;  %6172 = vmatpush1.bf16.msra.mxu1 %v7630_v27  ;;  %v7678_v27 = vcombine.low %v7549_v44, %v7561_v31  ;;  %v7727_v14 = vcombine.high %v7597_v11, %v7609_v50  ;;  %v7700_v49 = vcombine.low %v7572_v47, %v7584_v9  ;;  %v7502_v44 = vld [vmem:[%s8889_s30 + $0xb90] sm:$0xff] }
 0x2d3   : > { %6130 = vmatprep.subr.bf16.mxu0 %v7653_v21  ;;  %6173 = vmatprep.subr.bf16.mxu1 %v7655_v52  ;;  %v7701_v21 = vcombine.high %v7572_v47, %v7584_v9  ;;  %v7724_v52 = vcombine.low %v7596_v28, %v7608_v59  ;;  %v7726_v58 = vcombine.low %v7597_v11, %v7609_v50  ;;  %v7503_v11 = vld [vmem:[%s8889_s30 + $0xb98] sm:$0xff]  ;;  %v7830_v9 = vld [vmem:[%s10354_s0] sm:$0xff]  }
 0x2d4   : > { %6160 = vmatprep.mubr.bf16.mxu0 %v10467_v1  ;;  %6203 = vmatprep.mubr.bf16.mxu1 %v10467_v1  ;;  %v5764_v23 = vand.u32 %v7725_v56, %v8911_v6  ;;  %v5770_v31 = vand.u32 %v7727_v14, %v8911_v6  ;;  %v7515_v59 = vld [vmem:[%s8889_s30 + $0xbf8] sm:$0xff] }
 0x2d5   : > { %v5767_v56 = vand.u32 %v7726_v58, %v8911_v6  ;;  %v7635_v14 = vcombine.high %v7503_v11, %v7515_v59  ;;  %v7550_v58 = vld [vmem:[%s8889_s30 + $0xd10] sm:$0xff] }
 0x2d6   : > { %6131 = vmatpush1.bf16.msra.mxu0 %v7652_v55  ;;  %6174 = vmatpush1.bf16.msra.mxu1 %v7654_v60  ;;  %v7702_v55 = vcombine.low %v7573_v26, %v7585_v33  ;;  %v7514_v60 = vld [vmem:[%s8889_s30 + $0xbf0] sm:$0xff] }
 0x2d7   : > { %6132 = vmatprep.subr.bf16.mxu0 %v7677_v43  ;;  %6175 = vmatprep.subr.bf16.mxu1 %v7679_v35  ;;  %v7526_v35 = vld [vmem:[%s8889_s30 + $0xc50] sm:$0xff]  ;;  %v7611_v43 = vld [vmem:[%s8889_s30 + $0xef8] sm:$0x33] }
 0x2d8   : > { %v7610_v26 = vld [vmem:[%s8889_s30 + $0xef0] sm:$0x33] }
 0x2da   : > { %6133 = vmatpush1.bf16.msra.mxu0 %v7676_v20  ;;  %6176 = vmatpush1.bf16.msra.mxu1 %v7678_v27 }
 0x2db   : > { %6134 = vmatprep.subr.bf16.mxu0 %v7701_v21  ;;  %6177 = vmatprep.subr.bf16.mxu1 %v7703_v54  ;;  %v5761_v21 = vand.u32 %v7724_v52, %v8911_v6  ;;  %v7632_v52 = vcombine.low %v7502_v44, %v7514_v60  ;;  %v7587_v54 = vld [vmem:[%s8889_s30 + $0xe38] sm:$0xff] }
 0x2dc   : > { %v9851_v41 = vpop.f32.mrb[44].mxu0  ;;  %v9858_v20 = vpop.f32.mrb[44].mxu1 }
 0x2dd   : > { %10501 = vst [vmem:[#allocation67_spill] sm:$0xff] %v9851_v41  ;;  %10503 = vst [vmem:[#allocation68_spill] sm:$0xff] %v9858_v20  ;;  %v9860_v47 = vpop.f32.mrb[45].mxu0  ;;  %v9868_v50 = vpop.f32.mrb[45].mxu1  ;;  %v7634_v20 = vcombine.low %v7503_v11, %v7515_v59  ;;  %v7599_v41 = vld [vmem:[%s8889_s30 + $0xe98] sm:$0xff] }
 0x2de   : > { %10504 = vst [vmem:[#allocation69_spill] sm:$0xff] %v9860_v47  ;;  %10507 = vst [vmem:[#allocation70_spill] sm:$0xff] %v9868_v50  ;;  %v9870_v27 = vpop.f32.mrb[46].mxu0  ;;  %6135 = vmatpush1.bf16.msra.mxu0 %v7700_v49  ;;  %v9878_v28 = vpop.f32.mrb[46].mxu1  ;;  %6178 = vmatpush1.bf16.msra.mxu1 %v7702_v55  ;;  %v7633_v49 = vcombine.high %v7502_v44, %v7514_v60  ;;  %v7539_v50 = vld [vmem:[%s8889_s30 + $0xcb8] sm:$0xff]  ;;  %v7598_v55 = vld [vmem:[%s8889_s30 + $0xe90] sm:$0xff]  ;;  %v7730_v15 = vcombine.low %v7599_v41, %v7611_v43 }
 0x2df   : > { %10508 = vst [vmem:[#allocation71_spill] sm:$0xff] %v9870_v27  ;;  %10511 = vst [vmem:[#allocation72_spill] sm:$0xff] %v9878_v28  ;;  %v9880_v47 = vpop.f32.mrb[47].mxu0  ;;  %6136 = vmatprep.subr.bf16.mxu0 %v5764_v23  ;;  %v9886_v33 = vpop.f32.mrb[47].mxu1  ;;  %6179 = vmatprep.subr.bf16.mxu1 %v5770_v31  ;;  %v7538_v27 = vld [vmem:[%s8889_s30 + $0xcb0] sm:$0xff]  ;;  %v7527_v23 = vld [vmem:[%s8889_s30 + $0xc58] sm:$0xff] }
 0x2e0   : > { %10512 = vst [vmem:[#allocation73_spill] sm:$0xff] %v9880_v47  ;;  %10515 = vst [vmem:[#allocation74_spill] sm:$0xff] %v9886_v33  ;;  %v7657_v47 = vcombine.high %v7526_v35, %v7538_v27  ;;  %v7659_v31 = vcombine.high %v7527_v23, %v7539_v50  ;;  %v7562_v28 = vld [vmem:[%s8889_s30 + $0xd70] sm:$0xff]  ;;  %v7551_v44 = vld [vmem:[%s8889_s30 + $0xd18] sm:$0xff]  ;;  %v7656_v11 = vcombine.low %v7526_v35, %v7538_v27 }
 0x2e1   : > { %v7563_v60 = vld [vmem:[%s8889_s30 + $0xd78] sm:$0xff]  ;;  %v7658_v59 = vcombine.low %v7527_v23, %v7539_v50  ;;  %v7680_v35 = vcombine.low %v7550_v58, %v7562_v28  ;;  %v7729_v50 = vcombine.high %v7598_v55, %v7610_v26 }
 0x2e2   : > { %6137 = vmatpush1.bf16.msra.mxu0 %v5761_v21  ;;  %6180 = vmatpush1.bf16.msra.mxu1 %v5767_v56  ;;  %v7681_v21 = vcombine.high %v7550_v58, %v7562_v28  ;;  %v7574_v56 = vld [vmem:[%s8889_s30 + $0xdd0] sm:$0xff]  ;;  %v7575_v33 = vld [vmem:[%s8889_s30 + $0xdd8] sm:$0xff] }
 0x2e3   : > { %6214 = vmatprep.subr.bf16.mxu0 %v7633_v49  ;;  %6257 = vmatprep.subr.bf16.mxu1 %v7635_v14  ;;  %v7586_v14 = vld [vmem:[%s8889_s30 + $0xe30] sm:$0xff]  ;;  %v7683_v49 = vcombine.high %v7551_v44, %v7563_v60  ;;  %v7707_v27 = vcombine.high %v7575_v33, %v7587_v54  ;;  %v7706_v45 = vcombine.low %v7575_v33, %v7587_v54 }
 0x2e4   : > { %v7704_v23 = vcombine.low %v7574_v56, %v7586_v14  ;;  %v5776_v57 = vand.u32 %v7729_v50, %v8911_v6 }
 0x2e5   : > { %7740 = vmatmul.mubr.msk.bf16.vlgmr.msra.gmra.mrb[88].mxu0 %vm1849_vm2, %v7830_v9  ;;  %7741 = vmatmul.mubr.msk.bf16.vlgmr.msra.gmra.mrb[88].mxu1 %vm1849_vm2, %v7830_v9 }
 0x2e6   : > { %6215 = vmatpush1.bf16.msra.mxu0 %v7632_v52  ;;  %6258 = vmatpush1.bf16.msra.mxu1 %v7634_v20  ;;  %v7682_v20 = vcombine.low %v7551_v44, %v7563_v60  ;;  %v7731_v52 = vcombine.high %v7599_v41, %v7611_v43  ;;  %v5779_v43 = vand.u32 %v7730_v15, %v8911_v6 }
 0x2e7   : > { %6216 = vmatprep.subr.bf16.mxu0 %v7657_v47  ;;  %6259 = vmatprep.subr.bf16.mxu1 %v7659_v31  ;;  %v7705_v47 = vcombine.high %v7574_v56, %v7586_v14  ;;  %v7728_v31 = vcombine.low %v7598_v55, %v7610_v26 }
 0x2e8   : > { %6246 = vmatprep.mubr.bf16.mxu0 %v10467_v1  ;;  %6289 = vmatprep.mubr.bf16.mxu1 %v10467_v1  ;;  %v5782_v28 = vand.u32 %v7731_v52, %v8911_v6 }
 0x2e9   : > { %v5773_v26 = vand.u32 %v7728_v31, %v8911_v6 }
 0x2ea   : > { %6217 = vmatpush1.bf16.msra.mxu0 %v7656_v11  ;;  %6260 = vmatpush1.bf16.msra.mxu1 %v7658_v59 }
 0x2eb   : > { %6218 = vmatprep.subr.bf16.mxu0 %v7681_v21  ;;  %6261 = vmatprep.subr.bf16.mxu1 %v7683_v49 }
 0x2ee   : > { %6219 = vmatpush1.bf16.msra.mxu0 %v7680_v35  ;;  %6262 = vmatpush1.bf16.msra.mxu1 %v7682_v20 }
 0x2ef   : > { %6220 = vmatprep.subr.bf16.mxu0 %v7705_v47  ;;  %6263 = vmatprep.subr.bf16.mxu1 %v7707_v27 }
 0x2f0   : > { %v9914_v1 = vpop.f32.mrb[48].mxu0  ;;  %v9917_v58 = vpop.f32.mrb[48].mxu1 }
 0x2f1   : > { %v9919_v44 = vpop.f32.mrb[49].mxu0  ;;  %v9921_v60 = vpop.f32.mrb[49].mxu1 }
 0x2f2   : > { %v9923_v11 = vpop.f32.mrb[50].mxu0  ;;  %6221 = vmatpush1.bf16.msra.mxu0 %v7704_v23  ;;  %v9926_v33 = vpop.f32.mrb[50].mxu1  ;;  %6264 = vmatpush1.bf16.msra.mxu1 %v7706_v45 }
 0x2f3   : > { %v9928_v41 = vpop.f32.mrb[51].mxu0  ;;  %6222 = vmatprep.subr.bf16.mxu0 %v5776_v57  ;;  %v9931_v54 = vpop.f32.mrb[51].mxu1  ;;  %6265 = vmatprep.subr.bf16.mxu1 %v5782_v28 }
 0x2f6   : > { %6223 = vmatpush1.bf16.msra.mxu0 %v5773_v26  ;;  %6266 = vmatpush1.bf16.msra.mxu1 %v5779_v43 }
 0x2f9   : > { %7742 = vmatmul.mubr.msk.bf16.vlgmr.msra.gmra.mrb[92].mxu0 %vm1849_vm2, %v7830_v9  ;;  %7743 = vmatmul.mubr.msk.bf16.vlgmr.msra.gmra.mrb[92].mxu1 %vm1849_vm2, %v7830_v9 }
 0x304   : > { %v9935_v55 = vpop.f32.mrb[52].mxu0  ;;  %v9937_v59 = vpop.f32.mrb[52].mxu1 }
 0x305   : > { %v9939_v21 = vpop.f32.mrb[53].mxu0  ;;  %v9941_v45 = vpop.f32.mrb[53].mxu1 }
 0x306   : > { %v9943_v57 = vpop.f32.mrb[54].mxu0  ;;  %v9945_v6 = vpop.f32.mrb[54].mxu1 }
 0x307   : > { %v9947_v15 = vpop.f32.mrb[55].mxu0  ;;  %v9949_v56 = vpop.f32.mrb[55].mxu1 }
 0x318   : > { %v9951_v14 = vpop.f32.mrb[56].mxu0  ;;  %v9953_v49 = vpop.f32.mrb[56].mxu1 }
 0x319   : > { %v9955_v9 = vpop.f32.mrb[57].mxu0  ;;  %v9957_v35 = vpop.f32.mrb[57].mxu1 }
 0x31a   : > { %v9959_v20 = vpop.f32.mrb[58].mxu0  ;;  %v9961_v47 = vpop.f32.mrb[58].mxu1 }
 0x31b   : > { %v9963_v50 = vpop.f32.mrb[59].mxu0  ;;  %v9965_v27 = vpop.f32.mrb[59].mxu1 }
 0x32c   : > { %v9967_v52 = vpop.f32.mrb[60].mxu0  ;;  %v9969_v23 = vpop.f32.mrb[60].mxu1 }
 0x32d   : > { %10517 = vst [vmem:[#allocation75_spill] sm:$0xff] %v9967_v52  ;;  %10518 = vst [vmem:[#allocation76_spill] sm:$0xff] %v9969_v23  ;;  %v9971_v31 = vpop.f32.mrb[61].mxu0  ;;  %v9973_v28 = vpop.f32.mrb[61].mxu1 }
 0x32e   : > { %10519 = vst [vmem:[#allocation77_spill] sm:$0xff] %v9971_v31  ;;  %10520 = vst [vmem:[#allocation78_spill] sm:$0xff] %v9973_v28  ;;  %v9975_v26 = vpop.f32.mrb[62].mxu0  ;;  %v9977_v43 = vpop.f32.mrb[62].mxu1 }
 0x32f   : > { %10521 = vst [vmem:[#allocation79_spill] sm:$0xff] %v9975_v26  ;;  %10522 = vst [vmem:[#allocation80_spill] sm:$0xff] %v9977_v43  ;;  %v9979_v53 = vpop.f32.mrb[63].mxu0  ;;  %v9981_v63 = vpop.f32.mrb[63].mxu1 }
 0x330   : > { %10523 = vst [vmem:[#allocation81_spill] sm:$0xff] %v9979_v53  ;;  %10524 = vst [vmem:[#allocation82_spill] sm:$0xff] %v9981_v63 }
 0x340   : > { %v9983_v40 = vpop.f32.mrb[64].mxu0  ;;  %v9985_v22 = vpop.f32.mrb[64].mxu1 }
 0x341   : > { %10525 = vst [vmem:[#allocation83_spill] sm:$0xff] %v9983_v40  ;;  %10526 = vst [vmem:[#allocation84_spill] sm:$0xff] %v9985_v22  ;;  %v9987_v37 = vpop.f32.mrb[65].mxu0  ;;  %v9989_v46 = vpop.f32.mrb[65].mxu1 }
 0x342   : > { %10527 = vst [vmem:[#allocation85_spill] sm:$0xff] %v9987_v37  ;;  %10528 = vst [vmem:[#allocation86_spill] sm:$0xff] %v9989_v46  ;;  %v9991_v36 = vpop.f32.mrb[66].mxu0  ;;  %v9993_v29 = vpop.f32.mrb[66].mxu1 }
 0x343   : > { %10529 = vst [vmem:[#allocation87_spill] sm:$0xff] %v9991_v36  ;;  %10530 = vst [vmem:[#allocation88_spill] sm:$0xff] %v9993_v29  ;;  %v9995_v28 = vpop.f32.mrb[67].mxu0  ;;  %v9997_v26 = vpop.f32.mrb[67].mxu1 }
 0x344   : > { %10531 = vst [vmem:[#allocation89_spill] sm:$0xff] %v9995_v28  ;;  %10532 = vst [vmem:[#allocation90_spill] sm:$0xff] %v9997_v26  ;;  %v10015_v29 = vpop.permute.xlu0 %6448 }
 0x354   : > { %v9999_v43 = vpop.f32.mrb[68].mxu0  ;;  %v10001_v53 = vpop.f32.mrb[68].mxu1 }
 0x355   : > { %10533 = vst [vmem:[#allocation91_spill] sm:$0xff] %v9999_v43  ;;  %10534 = vst [vmem:[#allocation92_spill] sm:$0xff] %v10001_v53  ;;  %v10003_v63 = vpop.f32.mrb[69].mxu0  ;;  %v10005_v40 = vpop.f32.mrb[69].mxu1 }
 0x356   : > { %10535 = vst [vmem:[#allocation93_spill] sm:$0xff] %v10003_v63  ;;  %10536 = vst [vmem:[#allocation94_spill] sm:$0xff] %v10005_v40  ;;  %v10007_v22 = vpop.f32.mrb[70].mxu0  ;;  %v10009_v37 = vpop.f32.mrb[70].mxu1 }
 0x357   : > { %10537 = vst [vmem:[#allocation95_spill] sm:$0xff] %v10007_v22  ;;  %10538 = vst [vmem:[#allocation96_spill] sm:$0xff] %v10009_v37  ;;  %v10011_v46 = vpop.f32.mrb[71].mxu0  ;;  %v10013_v36 = vpop.f32.mrb[71].mxu1  ;;  %v10541_v37 = vmax.f32 %v9254_v8, %v9541_v17 }
 0x358   : > { %10539 = vst [vmem:[#allocation97_spill] sm:$0xff] %v10011_v46  ;;  %10540 = vst [vmem:[#allocation98_spill] sm:$0xff] %v10013_v36 }
 0x368   : > { %v5818_v28 = vpop.f32.mrb[72].mxu0  ;;  %v5861_v43 = vpop.f32.mrb[72].mxu1 }
 0x369   : > { %v6348_v26 = vmax.f32 %v9914_v1, %v5818_v28  ;;  %v5820_v30 = vpop.f32.mrb[73].mxu0  ;;  %v6350_v53 = vmax.f32 %v9917_v58, %v5861_v43  ;;  %v5863_v40 = vpop.f32.mrb[73].mxu1  ;;  %v10542_v1 = vmax.f32 %v9259_v12, %v9548_v38  ;;  %v10545_v12 = vld [vmem:[#allocation39_spill] sm:$0xff] }
 0x36a   : > { %v6349_v63 = vmax.f32 %v9919_v44, %v5820_v30  ;;  %v5822_v31 = vpop.f32.mrb[74].mxu0  ;;  %v6351_v36 = vmax.f32 %v9921_v60, %v5863_v40  ;;  %v5865_v23 = vpop.f32.mrb[74].mxu1  ;;  %v10543_v30 = vmax.f32 %v9261_v13, %v9550_v34  ;;  %v10544_v40 = vmax.f32 %v9265_v16, %v9558_v24  ;;  %v10550_v16 = vld [vmem:[#allocation5_spill] sm:$0xff] }
 0x36b   : > { %v6396_v46 = vmax.f32 %v10541_v37, %v6348_v26  ;;  %v6372_v22 = vmax.f32 %v9923_v11, %v5822_v31  ;;  %v5824_v52 = vpop.f32.mrb[75].mxu0  ;;  %v6398_v28 = vmax.f32 %v10542_v1, %v6350_v53  ;;  %v6374_v44 = vmax.f32 %v9926_v33, %v5865_v23  ;;  %v5867_v17 = vpop.f32.mrb[75].mxu1  ;;  %v10547_v33 = vld [vmem:[#allocation4_spill] sm:$0xff]  ;;  %v10554_v26 = vld [vmem:[#allocation42_spill] sm:$0xff] }
 0x36c   : > { %v6397_v58 = vmax.f32 %v10543_v30, %v6349_v63  ;;  %v6373_v8 = vmax.f32 %v9928_v41, %v5824_v52  ;;  %v10033_v37 = vpop.permute.xlu0 %6453  ;;  %v6399_v60 = vmax.f32 %v10544_v40, %v6351_v36  ;;  %v10546_v53 = vmax.f32 %v9267_v18, %v10545_v12  ;;  %v10548_v41 = vld [vmem:[#allocation40_spill] sm:$0xff]  ;;  %v10551_v36 = vld [vmem:[#allocation41_spill] sm:$0xff] }
 0x36d   : > { %v6456_v11 = vadd.f32 %v10015_v29, %v6396_v46  ;;  %v6375_v13 = vmax.f32 %v9931_v54, %v5867_v17  ;;  %v6458_v63 = vadd.f32 %v10015_v29, %v6398_v28  ;;  %v10549_v52 = vmax.f32 %v10547_v33, %v10548_v41 }
 0x36e   : > { %v6420_v38 = vmax.f32 %v10546_v53, %v6372_v22  ;;  %v6457_v34 = vadd.f32 %v10015_v29, %v6397_v58  ;;  %v10552_v24 = vmax.f32 %v10550_v16, %v10551_v36  ;;  %v6459_v31 = vadd.f32 %v10015_v29, %v6399_v60  ;;  %v10553_v22 = vld [vmem:[#allocation6_spill] sm:$0xff] }
 0x36f   : > { %v6422_v23 = vmax.f32 %v10549_v52, %v6374_v44  ;;  %v6504_v18 = vmax.f32 %v6456_v11, 0.0  ;;  %v10555_v54 = vmax.f32 %v10553_v22, %v10554_v26  ;;  %v6506_v58 = vmax.f32 %v6458_v63, 0.0 }
 0x370   : > { %v6421_v46 = vmax.f32 %v10552_v24, %v6373_v8  ;;  %v6480_v1 = vadd.f32 %v10033_v37, %v6420_v38  ;;  %v6505_v30 = vmax.f32 %v6457_v34, 0.0  ;;  %v6507_v44 = vmax.f32 %v6459_v31, 0.0 }
 0x371   : > { %v6423_v43 = vmax.f32 %v10555_v54, %v6375_v13  ;;  %v6482_v17 = vadd.f32 %v10033_v37, %v6422_v23 }
 0x372   : > { %v6481_v28 = vadd.f32 %v10033_v37, %v6421_v46  ;;  %v6528_v12 = vmax.f32 %v6480_v1, 0.0  ;;  %v7772_v8 = vpack.c.bf16 %v6505_v30, %v6504_v18  ;;  %v7773_v11 = vpack.c.bf16 %v6507_v44, %v6506_v58  ;;  %v10560_v58 = vld [vmem:[#allocation7_spill] sm:$0xff]  ;;  %v10564_v44 = vld [vmem:[#allocation44_spill] sm:$0xff] }
 0x373   : > { %v6483_v40 = vadd.f32 %v10033_v37, %v6423_v43  ;;  %v6530_v60 = vmax.f32 %v6482_v17, 0.0  ;;  %v10556_v46 = vmax.f32 %v9300_v62, %v9603_v48 }
 0x374   : > { %v6529_v53 = vmax.f32 %v6481_v28, 0.0  ;;  %6696 = vst [vmem:[%s10061_s12] sm:$0xff] %v7772_v8  ;;  %6697 = vst [vmem:[%s10061_s12 + $0x8] sm:$0xff] %v7773_v11  ;;  %v10561_v28 = vld [vmem:[#allocation43_spill] sm:$0xff]  ;;  %v10567_v8 = vld [vmem:[#allocation45_spill] sm:$0xff] }
 0x375   : > { %v6531_v33 = vmax.f32 %v6483_v40, 0.0  ;;  %v10562_v17 = vmax.f32 %v10560_v58, %v10561_v28 }
 0x376   : > { %v7784_v41 = vpack.c.bf16 %v6529_v53, %v6528_v12  ;;  %v10566_v12 = vld [vmem:[#allocation9_spill] sm:$0xff] }
 0x377   : > { %v7785_v38 = vpack.c.bf16 %v6531_v33, %v6530_v60  ;;  %v10568_v53 = vmax.f32 %v10566_v12, %v10567_v8  ;;  %v10569_v33 = vld [vmem:[#allocation10_spill] sm:$0xff]  ;;  %v10582_v8 = vld [vmem:[#allocation13_spill] sm:$0xff] }
 0x378   : > { %6708 = vst [vmem:[%s10061_s12 + $0x60] sm:$0xff] %v7784_v41 }
 0x379   : > { %6709 = vst [vmem:[%s10061_s12 + $0x68] sm:$0xff] %v7785_v38 }
 0x37c   : > { %v5904_v13 = vpop.f32.mrb[76].mxu0  ;;  %v5947_v63 = vpop.f32.mrb[76].mxu1 }
 0x37d   : > { %v6352_v34 = vmax.f32 %v9935_v55, %v5904_v13  ;;  %v5906_v52 = vpop.f32.mrb[77].mxu0  ;;  %v6354_v23 = vmax.f32 %v9937_v59, %v5947_v63  ;;  %v5949_v36 = vpop.f32.mrb[77].mxu1  ;;  %v10557_v55 = vmax.f32 %v9305_v2, %v9610_v39  ;;  %v10558_v59 = vmax.f32 %v9307_v3, %v9612_v10 }
 0x37e   : > { %v6353_v16 = vmax.f32 %v9939_v21, %v5906_v52  ;;  %v5908_v24 = vpop.f32.mrb[78].mxu0  ;;  %v6355_v18 = vmax.f32 %v9941_v45, %v5949_v36  ;;  %v5951_v26 = vpop.f32.mrb[78].mxu1  ;;  %v10559_v45 = vmax.f32 %v9311_v7, %v9620_v32 }
 0x37f   : > { %v6400_v31 = vmax.f32 %v10556_v46, %v6352_v34  ;;  %v6376_v22 = vmax.f32 %v9943_v57, %v5908_v24  ;;  %v5910_v54 = vpop.f32.mrb[79].mxu0  ;;  %v6402_v43 = vmax.f32 %v10557_v55, %v6354_v23  ;;  %v6378_v1 = vmax.f32 %v9945_v6, %v5951_v26  ;;  %v5953_v62 = vpop.f32.mrb[79].mxu1  ;;  %v10563_v6 = vld [vmem:[#allocation8_spill] sm:$0xff] }
 0x380   : > { %v6401_v21 = vmax.f32 %v10558_v59, %v6353_v16  ;;  %v6377_v30 = vmax.f32 %v9947_v15, %v5910_v54  ;;  %v6403_v57 = vmax.f32 %v10559_v45, %v6355_v18  ;;  %v6379_v39 = vmax.f32 %v9949_v56, %v5953_v62  ;;  %v10570_v56 = vld [vmem:[#allocation46_spill] sm:$0xff] }
 0x381   : > { %v6460_v48 = vadd.f32 %v10015_v29, %v6400_v31  ;;  %v6424_v2 = vmax.f32 %v10562_v17, %v6376_v22  ;;  %v6462_v3 = vadd.f32 %v10015_v29, %v6402_v43  ;;  %v10565_v15 = vmax.f32 %v10563_v6, %v10564_v44  ;;  %v10576_v6 = vld [vmem:[#allocation11_spill] sm:$0xff] }
 0x382   : > { %v6461_v10 = vadd.f32 %v10015_v29, %v6401_v21  ;;  %v6425_v60 = vmax.f32 %v10568_v53, %v6377_v30  ;;  %v6463_v32 = vadd.f32 %v10015_v29, %v6403_v57  ;;  %v10571_v41 = vmax.f32 %v10569_v33, %v10570_v56  ;;  %v10577_v44 = vld [vmem:[#allocation47_spill] sm:$0xff]  ;;  %v10583_v53 = vld [vmem:[#allocation49_spill] sm:$0xff] }
 0x383   : > { %v6426_v40 = vmax.f32 %v10565_v15, %v6378_v1  ;;  %v6508_v7 = vmax.f32 %v6460_v48, 0.0  ;;  %v6484_v11 = vadd.f32 %v10033_v37, %v6424_v2  ;;  %v6510_v13 = vmax.f32 %v6462_v3, 0.0 }
 0x384   : > { %v6427_v38 = vmax.f32 %v10571_v41, %v6379_v39  ;;  %v6509_v34 = vmax.f32 %v6461_v10, 0.0  ;;  %v6485_v52 = vadd.f32 %v10033_v37, %v6425_v60  ;;  %v6511_v23 = vmax.f32 %v6463_v32, 0.0 }
 0x385   : > { %v6486_v63 = vadd.f32 %v10033_v37, %v6426_v40  ;;  %v6532_v16 = vmax.f32 %v6484_v11, 0.0  ;;  %v10572_v45 = vmax.f32 %v9346_v61, %v9665_v0  ;;  %v10578_v15 = vmax.f32 %v10576_v6, %v10577_v44  ;;  %v10580_v40 = vld [vmem:[#allocation48_spill] sm:$0xff]  ;;  %v10585_v11 = vld [vmem:[#allocation14_spill] sm:$0xff]  ;;  %v10600_v6 = vld [vmem:[#allocation53_spill] sm:$0xff] }
 0x386   : > { %v6487_v36 = vadd.f32 %v10033_v37, %v6427_v38  ;;  %v7774_v24 = vpack.c.bf16 %v6509_v34, %v6508_v7  ;;  %v6533_v31 = vmax.f32 %v6485_v52, 0.0  ;;  %v7775_v18 = vpack.c.bf16 %v6511_v23, %v6510_v13 }
 0x387   : > { %v6534_v46 = vmax.f32 %v6486_v63, 0.0  ;;  %v10584_v60 = vmax.f32 %v10582_v8, %v10583_v53 }
 0x388   : > { %v6535_v22 = vmax.f32 %v6487_v36, 0.0  ;;  %6698 = vst [vmem:[%s10061_s12 + $0x10] sm:$0xff] %v7774_v24  ;;  %v7786_v26 = vpack.c.bf16 %v6533_v31, %v6532_v16  ;;  %6699 = vst [vmem:[%s10061_s12 + $0x18] sm:$0xff] %v7775_v18 }
 0x38a   : > { %v7787_v54 = vpack.c.bf16 %v6535_v22, %v6534_v46  ;;  %6710 = vst [vmem:[%s10061_s12 + $0x70] sm:$0xff] %v7786_v26 }
 0x38c   : > { %6711 = vst [vmem:[%s10061_s12 + $0x78] sm:$0xff] %v7787_v54  ;;  %v10588_v54 = vld [vmem:[#allocation75_spill] sm:$0xff] }
 0x390   : > { %v5990_v55 = vpop.f32.mrb[80].mxu0  ;;  %v6033_v59 = vpop.f32.mrb[80].mxu1 }
 0x391   : > { %v6356_v43 = vmax.f32 %v9951_v14, %v5990_v55  ;;  %v5992_v21 = vpop.f32.mrb[81].mxu0  ;;  %v6358_v1 = vmax.f32 %v9953_v49, %v6033_v59  ;;  %v6035_v62 = vpop.f32.mrb[81].mxu1  ;;  %v10573_v14 = vmax.f32 %v9351_v4, %v9672_v42  ;;  %v10574_v49 = vmax.f32 %v9353_v5, %v9674_v25 }
 0x392   : > { %v6357_v30 = vmax.f32 %v9955_v9, %v5992_v21  ;;  %v5994_v48 = vpop.f32.mrb[82].mxu0  ;;  %v6359_v58 = vmax.f32 %v9957_v35, %v6035_v62  ;;  %v6037_v17 = vpop.f32.mrb[82].mxu1  ;;  %v10575_v35 = vmax.f32 %v9357_v19, %v9682_v51  ;;  %v10589_v21 = vld [vmem:[#allocation76_spill] sm:$0xff] }
 0x393   : > { %v6404_v57 = vmax.f32 %v10572_v45, %v6356_v43  ;;  %v6380_v28 = vmax.f32 %v9959_v20, %v5994_v48  ;;  %v5996_v2 = vpop.f32.mrb[83].mxu0  ;;  %v6406_v39 = vmax.f32 %v10573_v14, %v6358_v1  ;;  %v6382_v3 = vmax.f32 %v9961_v47, %v6037_v17  ;;  %v6039_v61 = vpop.f32.mrb[83].mxu1  ;;  %v10579_v47 = vld [vmem:[#allocation12_spill] sm:$0xff] }
 0x394   : > { %v6405_v9 = vmax.f32 %v10574_v49, %v6357_v30  ;;  %v6381_v10 = vmax.f32 %v9963_v50, %v5996_v2  ;;  %v6407_v20 = vmax.f32 %v10575_v35, %v6359_v58  ;;  %v6383_v42 = vmax.f32 %v9965_v27, %v6039_v61  ;;  %v10586_v27 = vld [vmem:[#allocation50_spill] sm:$0xff]  ;;  %v10590_v30 = vld [vmem:[#allocation77_spill] sm:$0xff]  ;;  %v10592_v58 = vld [vmem:[#allocation51_spill] sm:$0xff] }
 0x395   : > { %v6464_v0 = vadd.f32 %v10015_v29, %v6404_v57  ;;  %v6428_v4 = vmax.f32 %v10578_v15, %v6380_v28  ;;  %v6466_v5 = vadd.f32 %v10015_v29, %v6406_v39  ;;  %v10581_v50 = vmax.f32 %v10579_v47, %v10580_v40  ;;  %v10591_v57 = vld [vmem:[#allocation15_spill] sm:$0xff]  ;;  %v10594_v2 = vld [vmem:[#allocation78_spill] sm:$0xff]  ;;  %v10597_v61 = vld [vmem:[#allocation52_spill] sm:$0xff] }
 0x396   : > { %v6465_v25 = vadd.f32 %v10015_v29, %v6405_v9  ;;  %v6429_v7 = vmax.f32 %v10584_v60, %v6381_v10  ;;  %v6467_v51 = vadd.f32 %v10015_v29, %v6407_v20  ;;  %v10587_v33 = vmax.f32 %v10585_v11, %v10586_v27  ;;  %v10595_v39 = vld [vmem:[#allocation79_spill] sm:$0xff]  ;;  %v10596_v10 = vld [vmem:[#allocation16_spill] sm:$0xff]  ;;  %v10599_v20 = vld [vmem:[#allocation17_spill] sm:$0xff] }
 0x397   : > { %v6430_v12 = vmax.f32 %v10581_v50, %v6382_v3  ;;  %v6512_v19 = vmax.f32 %v6464_v0, 0.0  ;;  %v6488_v32 = vadd.f32 %v10033_v37, %v6428_v4  ;;  %v6514_v41 = vmax.f32 %v6466_v5, 0.0  ;;  %v10602_v4 = vld [vmem:[#allocation80_spill] sm:$0xff]  ;;  %v10603_v5 = vld [vmem:[#allocation81_spill] sm:$0xff]  ;;  %v10604_v50 = vld [vmem:[#allocation18_spill] sm:$0xff] }
 0x398   : > { %v6431_v56 = vmax.f32 %v10587_v33, %v6383_v42  ;;  %v6513_v38 = vmax.f32 %v6465_v25, 0.0  ;;  %v6489_v34 = vadd.f32 %v10033_v37, %v6429_v7  ;;  %v6515_v63 = vmax.f32 %v6467_v51, 0.0  ;;  %v10607_v60 = vld [vmem:[#allocation19_spill] sm:$0xff] }
 0x399   : > { %v6490_v13 = vadd.f32 %v10033_v37, %v6430_v12  ;;  %v6536_v52 = vmax.f32 %v6488_v32, 0.0  ;;  %v10593_v28 = vmax.f32 %v10591_v57, %v10592_v58  ;;  %v10598_v0 = vmax.f32 %v10596_v10, %v10597_v61  ;;  %v10605_v12 = vld [vmem:[#allocation54_spill] sm:$0xff]  ;;  %v10608_v7 = vld [vmem:[#allocation55_spill] sm:$0xff]  ;;  %v10622_v10 = vld [vmem:[#allocation85_spill] sm:$0xff] }
 0x39a   : > { %v6491_v23 = vadd.f32 %v10033_v37, %v6431_v56  ;;  %v7776_v16 = vpack.c.bf16 %v6513_v38, %v6512_v19  ;;  %v6537_v24 = vmax.f32 %v6489_v34, 0.0  ;;  %v7777_v46 = vpack.c.bf16 %v6515_v63, %v6514_v41  ;;  %v10610_v32 = vld [vmem:[#allocation82_spill] sm:$0xff]  ;;  %v10611_v56 = vld [vmem:[#allocation20_spill] sm:$0xff]  ;;  %v10614_v34 = vld [vmem:[#allocation21_spill] sm:$0xff] }
 0x39b   : > { %v6538_v36 = vmax.f32 %v6490_v13, 0.0  ;;  %v10601_v44 = vmax.f32 %v10599_v20, %v10600_v6  ;;  %v10606_v8 = vmax.f32 %v10604_v50, %v10605_v12  ;;  %v10609_v19 = vmax.f32 %v10607_v60, %v10608_v7  ;;  %v10612_v41 = vld [vmem:[#allocation56_spill] sm:$0xff]  ;;  %v10615_v63 = vld [vmem:[#allocation57_spill] sm:$0xff]  ;;  %v10623_v20 = vld [vmem:[#allocation23_spill] sm:$0xff] }
 0x39c   : > { %v6539_v31 = vmax.f32 %v6491_v23, 0.0  ;;  %6700 = vst [vmem:[%s10061_s12 + $0x20] sm:$0xff] %v7776_v16  ;;  %v7788_v18 = vpack.c.bf16 %v6537_v24, %v6536_v52  ;;  %6701 = vst [vmem:[%s10061_s12 + $0x28] sm:$0xff] %v7777_v46  ;;  %v10613_v38 = vmax.f32 %v10611_v56, %v10612_v41  ;;  %v10616_v52 = vmax.f32 %v10614_v34, %v10615_v63  ;;  %v10617_v46 = vld [vmem:[#allocation22_spill] sm:$0xff]  ;;  %v10624_v6 = vld [vmem:[#allocation59_spill] sm:$0xff] }
 0x39d   : > { %v10628_v50 = vld [vmem:[#allocation24_spill] sm:$0xff]  ;;  %v10631_v60 = vld [vmem:[#allocation25_spill] sm:$0xff] }
 0x39e   : > { %v7789_v22 = vpack.c.bf16 %v6539_v31, %v6538_v36  ;;  %6712 = vst [vmem:[%s10061_s12 + $0x80] sm:$0xff] %v7788_v18  ;;  %v10618_v31 = vld [vmem:[#allocation58_spill] sm:$0xff]  ;;  %v10629_v12 = vld [vmem:[#allocation60_spill] sm:$0xff]  ;;  %v10632_v7 = vld [vmem:[#allocation61_spill] sm:$0xff] }
 0x39f   : > { %v10619_v18 = vmax.f32 %v10617_v46, %v10618_v31 }
 0x3a0   : > { %6713 = vst [vmem:[%s10061_s12 + $0x88] sm:$0xff] %v7789_v22 }
 0x3a4   : > { %v6076_v26 = vpop.f32.mrb[84].mxu0  ;;  %v6119_v43 = vpop.f32.mrb[84].mxu1 }
 0x3a5   : > { %v6360_v55 = vmax.f32 %v10588_v54, %v6076_v26  ;;  %v6078_v59 = vpop.f32.mrb[85].mxu0  ;;  %v6362_v1 = vmax.f32 %v10589_v21, %v6119_v43  ;;  %v6121_v48 = vpop.f32.mrb[85].mxu1 }
 0x3a6   : > { %v6361_v62 = vmax.f32 %v10590_v30, %v6078_v59  ;;  %v6080_v45 = vpop.f32.mrb[86].mxu0  ;;  %v6363_v14 = vmax.f32 %v10594_v2, %v6121_v48  ;;  %v6123_v9 = vpop.f32.mrb[86].mxu1  ;;  %v10620_v2 = vld [vmem:[#allocation83_spill] sm:$0xff] }
 0x3a7   : > { %v6408_v17 = vmax.f32 %v10593_v28, %v6360_v55  ;;  %v6384_v49 = vmax.f32 %v10595_v39, %v6080_v45  ;;  %v6082_v3 = vpop.f32.mrb[87].mxu0  ;;  %v6410_v35 = vmax.f32 %v10598_v0, %v6362_v1  ;;  %v6386_v42 = vmax.f32 %v10602_v4, %v6123_v9  ;;  %v6125_v47 = vpop.f32.mrb[87].mxu1  ;;  %v10621_v9 = vld [vmem:[#allocation84_spill] sm:$0xff]  ;;  %v10626_v4 = vld [vmem:[#allocation86_spill] sm:$0xff] }
 0x3a8   : > { %v6409_v15 = vmax.f32 %v10601_v44, %v6361_v62  ;;  %v6385_v25 = vmax.f32 %v10603_v5, %v6082_v3  ;;  %v6411_v53 = vmax.f32 %v10606_v8, %v6363_v14  ;;  %v6387_v11 = vmax.f32 %v10610_v32, %v6125_v47  ;;  %v10627_v5 = vld [vmem:[#allocation87_spill] sm:$0xff]  ;;  %v10634_v32 = vld [vmem:[#allocation88_spill] sm:$0xff] }
 0x3a9   : > { %v6468_v40 = vadd.f32 %v10015_v29, %v6408_v17  ;;  %v6432_v51 = vmax.f32 %v10609_v19, %v6384_v49  ;;  %v6470_v27 = vadd.f32 %v10015_v29, %v6410_v35  ;;  %v6434_v13 = vmax.f32 %v10613_v38, %v6386_v42  ;;  %v10636_v38 = vld [vmem:[#allocation26_spill] sm:$0xff] }
 0x3aa   : > { %v6469_v33 = vadd.f32 %v10015_v29, %v6409_v15  ;;  %v6433_v23 = vmax.f32 %v10616_v52, %v6385_v25  ;;  %v6471_v36 = vadd.f32 %v10015_v29, %v6411_v53  ;;  %v6435_v22 = vmax.f32 %v10619_v18, %v6387_v11  ;;  %v10639_v52 = vld [vmem:[#allocation27_spill] sm:$0xff] }
 0x3ab   : > { %v6516_v16 = vmax.f32 %v6468_v40, 0.0  ;;  %v6492_v24 = vadd.f32 %v10033_v37, %v6432_v51  ;;  %v6518_v26 = vmax.f32 %v6470_v27, 0.0  ;;  %v6494_v55 = vadd.f32 %v10033_v37, %v6434_v13  ;;  %v10635_v27 = vld [vmem:[#allocation89_spill] sm:$0xff]  ;;  %v10637_v13 = vld [vmem:[#allocation62_spill] sm:$0xff] }
 0x3ac   : > { %v6517_v54 = vmax.f32 %v6469_v33, 0.0  ;;  %v6493_v43 = vadd.f32 %v10033_v37, %v6433_v23  ;;  %v6519_v59 = vmax.f32 %v6471_v36, 0.0  ;;  %v6495_v1 = vadd.f32 %v10033_v37, %v6435_v22  ;;  %v10640_v23 = vld [vmem:[#allocation63_spill] sm:$0xff]  ;;  %v10643_v22 = vld [vmem:[#allocation28_spill] sm:$0xff] }
 0x3ad   : > { %v6540_v21 = vmax.f32 %v6492_v24, 0.0  ;;  %v6542_v62 = vmax.f32 %v6494_v55, 0.0  ;;  %v10625_v44 = vmax.f32 %v10623_v20, %v10624_v6  ;;  %v10630_v8 = vmax.f32 %v10628_v50, %v10629_v12  ;;  %v10642_v24 = vld [vmem:[#allocation90_spill] sm:$0xff]  ;;  %v10654_v50 = vld [vmem:[#allocation93_spill] sm:$0xff] }
 0x3ae   : > { %v7778_v30 = vpack.c.bf16 %v6517_v54, %v6516_v16  ;;  %v6541_v48 = vmax.f32 %v6493_v43, 0.0  ;;  %v7779_v45 = vpack.c.bf16 %v6519_v59, %v6518_v26  ;;  %v6543_v57 = vmax.f32 %v6495_v1, 0.0  ;;  %v10644_v26 = vld [vmem:[#allocation64_spill] sm:$0xff]  ;;  %v10646_v43 = vld [vmem:[#allocation29_spill] sm:$0xff] }
 0x3af   : > { %v10633_v19 = vmax.f32 %v10631_v60, %v10632_v7  ;;  %v10638_v34 = vmax.f32 %v10636_v38, %v10637_v13  ;;  %v10641_v16 = vmax.f32 %v10639_v52, %v10640_v23  ;;  %v10645_v54 = vmax.f32 %v10643_v22, %v10644_v26  ;;  %v10647_v59 = vld [vmem:[#allocation65_spill] sm:$0xff]  ;;  %v10655_v60 = vld [vmem:[#allocation31_spill] sm:$0xff]  ;;  %v10660_v38 = vld [vmem:[#allocation32_spill] sm:$0xff] }
 0x3b0   : > { %6702 = vst [vmem:[%s10061_s12 + $0x30] sm:$0xff] %v7778_v30  ;;  %v7790_v58 = vpack.c.bf16 %v6541_v48, %v6540_v21  ;;  %6703 = vst [vmem:[%s10061_s12 + $0x38] sm:$0xff] %v7779_v45  ;;  %v7791_v28 = vpack.c.bf16 %v6543_v57, %v6542_v62  ;;  %v10648_v21 = vmax.f32 %v10646_v43, %v10647_v59  ;;  %v10649_v45 = vld [vmem:[#allocation30_spill] sm:$0xff]  ;;  %v10656_v7 = vld [vmem:[#allocation67_spill] sm:$0xff] }
 0x3b1   : > { %v10650_v57 = vld [vmem:[#allocation66_spill] sm:$0xff]  ;;  %v10661_v13 = vld [vmem:[#allocation68_spill] sm:$0xff]  ;;  %v10663_v52 = vld [vmem:[#allocation33_spill] sm:$0xff] }
 0x3b2   : > { %6714 = vst [vmem:[%s10061_s12 + $0x90] sm:$0xff] %v7790_v58  ;;  %6715 = vst [vmem:[%s10061_s12 + $0x98] sm:$0xff] %v7791_v28  ;;  %v10651_v58 = vmax.f32 %v10649_v45, %v10650_v57  ;;  %v10664_v23 = vld [vmem:[#allocation69_spill] sm:$0xff] }
 0x3b8   : > { %v6162_v17 = vpop.f32.mrb[88].mxu0  ;;  %v6205_v39 = vpop.f32.mrb[88].mxu1 }
 0x3b9   : > { %v6364_v14 = vmax.f32 %v10620_v2, %v6162_v17  ;;  %v6164_v49 = vpop.f32.mrb[89].mxu0  ;;  %v6366_v3 = vmax.f32 %v10621_v9, %v6205_v39  ;;  %v6207_v0 = vpop.f32.mrb[89].mxu1 }
 0x3ba   : > { %v6365_v61 = vmax.f32 %v10622_v10, %v6164_v49  ;;  %v6166_v35 = vpop.f32.mrb[90].mxu0  ;;  %v6367_v42 = vmax.f32 %v10626_v4, %v6207_v0  ;;  %v6209_v47 = vpop.f32.mrb[90].mxu1  ;;  %v10652_v4 = vld [vmem:[#allocation91_spill] sm:$0xff] }
 0x3bb   : > { %v6412_v15 = vmax.f32 %v10625_v44, %v6364_v14  ;;  %v6388_v25 = vmax.f32 %v10627_v5, %v6166_v35  ;;  %v6168_v40 = vpop.f32.mrb[91].mxu0  ;;  %v6414_v53 = vmax.f32 %v10630_v8, %v6366_v3  ;;  %v6390_v11 = vmax.f32 %v10634_v32, %v6209_v47  ;;  %v6211_v56 = vpop.f32.mrb[91].mxu1  ;;  %v10653_v47 = vld [vmem:[#allocation92_spill] sm:$0xff]  ;;  %v10658_v32 = vld [vmem:[#allocation94_spill] sm:$0xff] }
 0x3bc   : > { %v6413_v51 = vmax.f32 %v10633_v19, %v6365_v61  ;;  %v6389_v33 = vmax.f32 %v10635_v27, %v6168_v40  ;;  %v6415_v63 = vmax.f32 %v10638_v34, %v6367_v42  ;;  %v6391_v46 = vmax.f32 %v10642_v24, %v6211_v56  ;;  %v10659_v27 = vld [vmem:[#allocation95_spill] sm:$0xff]  ;;  %v10666_v24 = vld [vmem:[#allocation96_spill] sm:$0xff] }
 0x3bd   : > { %v6472_v41 = vadd.f32 %v10015_v29, %v6412_v15  ;;  %v6436_v36 = vmax.f32 %v10641_v16, %v6388_v25  ;;  %v6474_v31 = vadd.f32 %v10015_v29, %v6414_v53  ;;  %v6438_v55 = vmax.f32 %v10645_v54, %v6390_v11  ;;  %v10668_v54 = vld [vmem:[#allocation34_spill] sm:$0xff] }
 0x3be   : > { %v6473_v18 = vadd.f32 %v10015_v29, %v6413_v51  ;;  %v6437_v1 = vmax.f32 %v10648_v21, %v6389_v33  ;;  %v6475_v62 = vadd.f32 %v10015_v29, %v6415_v63  ;;  %v6439_v28 = vmax.f32 %v10651_v58, %v6391_v46  ;;  %v10671_v21 = vld [vmem:[#allocation35_spill] sm:$0xff] }
 0x3bf   : > { %v6520_v30 = vmax.f32 %v6472_v41, 0.0  ;;  %v6496_v48 = vadd.f32 %v10033_v37, %v6436_v36  ;;  %v6522_v17 = vmax.f32 %v6474_v31, 0.0  ;;  %v6498_v14 = vadd.f32 %v10033_v37, %v6438_v55  ;;  %v10667_v31 = vld [vmem:[#allocation97_spill] sm:$0xff]  ;;  %v10669_v55 = vld [vmem:[#allocation70_spill] sm:$0xff] }
 0x3c0   : > { %v6521_v2 = vmax.f32 %v6473_v18, 0.0  ;;  %v6497_v39 = vadd.f32 %v10033_v37, %v6437_v1  ;;  %v6523_v49 = vmax.f32 %v6475_v62, 0.0  ;;  %v6499_v3 = vadd.f32 %v10033_v37, %v6439_v28  ;;  %v10672_v1 = vld [vmem:[#allocation71_spill] sm:$0xff]  ;;  %v10675_v28 = vld [vmem:[#allocation36_spill] sm:$0xff] }
 0x3c1   : > { %v6544_v9 = vmax.f32 %v6496_v48, 0.0  ;;  %v6546_v61 = vmax.f32 %v6498_v14, 0.0  ;;  %v10657_v19 = vmax.f32 %v10655_v60, %v10656_v7  ;;  %v10662_v34 = vmax.f32 %v10660_v38, %v10661_v13  ;;  %v10674_v48 = vld [vmem:[#allocation98_spill] sm:$0xff] }
 0x3c2   : > { %v7780_v10 = vpack.c.bf16 %v6521_v2, %v6520_v30  ;;  %v6545_v0 = vmax.f32 %v6497_v39, 0.0  ;;  %v7781_v35 = vpack.c.bf16 %v6523_v49, %v6522_v17  ;;  %v6547_v20 = vmax.f32 %v6499_v3, 0.0  ;;  %v10676_v17 = vld [vmem:[#allocation72_spill] sm:$0xff]  ;;  %v10678_v39 = vld [vmem:[#allocation37_spill] sm:$0xff] }
 0x3c3   : > { %v10665_v16 = vmax.f32 %v10663_v52, %v10664_v23  ;;  %v10670_v43 = vmax.f32 %v10668_v54, %v10669_v55  ;;  %v10673_v30 = vmax.f32 %v10671_v21, %v10672_v1  ;;  %v10677_v2 = vmax.f32 %v10675_v28, %v10676_v17  ;;  %v10679_v49 = vld [vmem:[#allocation73_spill] sm:$0xff]  ;;  %v6770_v23 = vld [vmem:[%s10061_s12 + $0x70] sm:$0xff] (%p7907_p5) }
 0x3c4   : > { %6704 = vst [vmem:[%s10061_s12 + $0x40] sm:$0xff] %v7780_v10  ;;  %v7792_v6 = vpack.c.bf16 %v6545_v0, %v6544_v9  ;;  %6705 = vst [vmem:[%s10061_s12 + $0x48] sm:$0xff] %v7781_v35  ;;  %v7793_v44 = vpack.c.bf16 %v6547_v20, %v6546_v61  ;;  %v10680_v9 = vmax.f32 %v10678_v39, %v10679_v49  ;;  %v10681_v35 = vld [vmem:[#allocation38_spill] sm:$0xff]  ;;  %v6768_v52 = vld [vmem:[%s10061_s12 + $0x68] sm:$0xff] (%p7907_p5) }
 0x3c5   : > { %v10682_v20 = vld [vmem:[#allocation74_spill] sm:$0xff]  ;;  %6769 = vst [vmem:[%s10300_s25 + $0xc8] sm:$0xff] (%p7907_p5), %v6768_v52  ;;  %6771 = vst [vmem:[%s10300_s25 + $0xd0] sm:$0xff] (%p7907_p5), %v6770_v23 }
 0x3c6   : > { %6716 = vst [vmem:[%s10061_s12 + $0xa0] sm:$0xff] %v7792_v6  ;;  %6717 = vst [vmem:[%s10061_s12 + $0xa8] sm:$0xff] %v7793_v44  ;;  %v10683_v6 = vmax.f32 %v10681_v35, %v10682_v20 }
 0x3cb   : > { %v6760_v38 = vld [vmem:[%s10061_s12 + $0x48] sm:$0xff] (%p7907_p5) }
 0x3cc   : > { %v6248_v15 = vpop.f32.mrb[92].mxu0  ;;  %v6291_v5 = vpop.f32.mrb[92].mxu1  ;;  %6761 = vst [vmem:[%s10300_s25 + $0x48] sm:$0xff] (%p7907_p5), %v6760_v38 }
 0x3cd   : > { %v6368_v42 = vmax.f32 %v10652_v4, %v6248_v15  ;;  %v6250_v25 = vpop.f32.mrb[93].mxu0  ;;  %v6370_v40 = vmax.f32 %v10653_v47, %v6291_v5  ;;  %v6293_v8 = vpop.f32.mrb[93].mxu1 }
 0x3ce   : > { %v6369_v12 = vmax.f32 %v10654_v50, %v6250_v25  ;;  %v6252_v53 = vpop.f32.mrb[94].mxu0  ;;  %v6371_v11 = vmax.f32 %v10658_v32, %v6293_v8  ;;  %v6295_v56 = vpop.f32.mrb[94].mxu1  ;;  %v6748_v32 = vld [vmem:[%s10061_s12 + $0x18] sm:$0xff] (%p7907_p5) }
 0x3cf   : > { %v6416_v51 = vmax.f32 %v10657_v19, %v6368_v42  ;;  %v6392_v33 = vmax.f32 %v10659_v27, %v6252_v53  ;;  %v6254_v41 = vpop.f32.mrb[95].mxu0  ;;  %v6418_v63 = vmax.f32 %v10662_v34, %v6370_v40  ;;  %v6394_v46 = vmax.f32 %v10666_v24, %v6295_v56  ;;  %v6297_v22 = vpop.f32.mrb[95].mxu1  ;;  %v6744_v19 = vld [vmem:[%s10061_s12 + $0x8] sm:$0xff] (%p7907_p5)  ;;  %v6756_v56 = vld [vmem:[%s10061_s12 + $0x38] sm:$0xff] (%p7907_p5)  ;;  %6749 = vst [vmem:[%s10300_s25 + $0x18] sm:$0xff] (%p7907_p5), %v6748_v32 }
 0x3d0   : > { %v6417_v36 = vmax.f32 %v10665_v16, %v6369_v12  ;;  %v6393_v18 = vmax.f32 %v10667_v31, %v6254_v41  ;;  %v6419_v59 = vmax.f32 %v10670_v43, %v6371_v11  ;;  %v6395_v45 = vmax.f32 %v10674_v48, %v6297_v22  ;;  %v6750_v11 = vld [vmem:[%s10061_s12 + $0x20] sm:$0xff] (%p7907_p5)  ;;  %v6752_v27 = vld [vmem:[%s10061_s12 + $0x28] sm:$0xff] (%p7907_p5)  ;;  %6745 = vst [vmem:[%s10300_s25 + $0x8] sm:$0xff] (%p7907_p5), %v6744_v19  ;;  %v6772_v16 = vld [vmem:[%s10061_s12 + $0x78] sm:$0xff] (%p7907_p5) }
 0x3d1   : > { %v6476_v26 = vadd.f32 %v10015_v29, %v6416_v51  ;;  %v6440_v62 = vmax.f32 %v10673_v30, %v6392_v33  ;;  %v6478_v57 = vadd.f32 %v10015_v29, %v6418_v63  ;;  %v6442_v14 = vmax.f32 %v10677_v2, %v6394_v46  ;;  %v6746_v51 = vld [vmem:[%s10061_s12 + $0x10] sm:$0xff] (%p7907_p5)  ;;  %v6758_v41 = vld [vmem:[%s10061_s12 + $0x40] sm:$0xff] (%p7907_p5)  ;;  %6751 = vst [vmem:[%s10300_s25 + $0x20] sm:$0xff] (%p7907_p5), %v6750_v11  ;;  %v6776_v24 = vld [vmem:[%s10061_s12 + $0x88] sm:$0xff] (%p7907_p5) }
 0x3d2   : > { %v6477_v58 = vadd.f32 %v10015_v29, %v6417_v36  ;;  %v6441_v3 = vmax.f32 %v10680_v9, %v6393_v18  ;;  %v6479_v61 = vadd.f32 %v10015_v29, %v6419_v59  ;;  %v6443_v44 = vmax.f32 %v10683_v6, %v6395_v45  ;;  %v6754_v33 = vld [vmem:[%s10061_s12 + $0x30] sm:$0xff] (%p7907_p5)  ;;  %6747 = vst [vmem:[%s10300_s25 + $0x10] sm:$0xff] (%p7907_p5), %v6746_v51  ;;  %v6766_v63 = vld [vmem:[%s10061_s12 + $0x60] sm:$0xff] (%p7907_p5)  ;;  %v6780_v31 = vld [vmem:[%s10061_s12 + $0x98] sm:$0xff] (%p7907_p5) }
 0x3d3   : > { %v6524_v10 = vmax.f32 %v6476_v26, 0.0  ;;  %v6500_v0 = vadd.f32 %v10033_v37, %v6440_v62  ;;  %v6526_v15 = vmax.f32 %v6478_v57, 0.0  ;;  %v6502_v42 = vadd.f32 %v10033_v37, %v6442_v14  ;;  %6753 = vst [vmem:[%s10300_s25 + $0x28] sm:$0xff] (%p7907_p5), %v6752_v27  ;;  %6755 = vst [vmem:[%s10300_s25 + $0x30] sm:$0xff] (%p7907_p5), %v6754_v33  ;;  %v6774_v36 = vld [vmem:[%s10061_s12 + $0x80] sm:$0xff] (%p7907_p5)  ;;  %v6778_v46 = vld [vmem:[%s10061_s12 + $0x90] sm:$0xff] (%p7907_p5) }
 0x3d4   : > { %v6525_v4 = vmax.f32 %v6477_v58, 0.0  ;;  %v6501_v5 = vadd.f32 %v10033_v37, %v6441_v3  ;;  %v6527_v25 = vmax.f32 %v6479_v61, 0.0  ;;  %v6503_v40 = vadd.f32 %v10033_v37, %v6443_v44  ;;  %6726 = sbr.rel (!%p7907_p5) target bundleno = 995 (0x3e3), region = 59  ;;  %v6742_v37 = vld [vmem:[%s10061_s12] sm:$0xff] (%p7907_p5)  ;;  %6757 = vst [vmem:[%s10300_s25 + $0x38] sm:$0xff] (%p7907_p5), %v6756_v56  ;;  %6759 = vst [vmem:[%s10300_s25 + $0x40] sm:$0xff] (%p7907_p5), %v6758_v41 }
 0x3d5   : > { %v6548_v47 = vmax.f32 %v6500_v0, 0.0  ;;  %v6550_v50 = vmax.f32 %v6502_v42, 0.0  ;;  %6743 = vst [vmem:[%s10300_s25] sm:$0xff] (%p7907_p5), %v6742_v37  ;;  %6767 = vst [vmem:[%s10300_s25 + $0xc0] sm:$0xff] (%p7907_p5), %v6766_v63  ;;  %v6782_v18 = vld [vmem:[%s10061_s12 + $0xa0] sm:$0xff] (%p7907_p5)  ;;  %v6784_v22 = vld [vmem:[%s10061_s12 + $0xa8] sm:$0xff] (%p7907_p5) }
 0x3d6   : > { %v7782_v29 = vpack.c.bf16 %v6525_v4, %v6524_v10  ;;  %v6549_v12 = vmax.f32 %v6501_v5, 0.0  ;;  %v7783_v8 = vpack.c.bf16 %v6527_v25, %v6526_v15  ;;  %v6551_v53 = vmax.f32 %v6503_v40, 0.0  ;;  %6773 = vst [vmem:[%s10300_s25 + $0xd8] sm:$0xff] (%p7907_p5), %v6772_v16  ;;  %6775 = vst [vmem:[%s10300_s25 + $0xe0] sm:$0xff] (%p7907_p5), %v6774_v36 }
 0x3d7   : > { %6777 = vst [vmem:[%s10300_s25 + $0xe8] sm:$0xff] (%p7907_p5), %v6776_v24  ;;  %6779 = vst [vmem:[%s10300_s25 + $0xf0] sm:$0xff] (%p7907_p5), %v6778_v46 }
 0x3d8   : > { %6706 = vst [vmem:[%s10061_s12 + $0x50] sm:$0xff] %v7782_v29  ;;  %v7794_v60 = vpack.c.bf16 %v6549_v12, %v6548_v47  ;;  %6707 = vst [vmem:[%s10061_s12 + $0x58] sm:$0xff] %v7783_v8  ;;  %v7795_v7 = vpack.c.bf16 %v6551_v53, %v6550_v50 }
 0x3d9   : > { %6781 = vst [vmem:[%s10300_s25 + $0xf8] sm:$0xff] (%p7907_p5), %v6780_v31  ;;  %6783 = vst [vmem:[%s10300_s25 + $0x100] sm:$0xff] (%p7907_p5), %v6782_v18 }
 0x3da   : > { %6718 = vst [vmem:[%s10061_s12 + $0xb0] sm:$0xff] %v7794_v60  ;;  %6719 = vst [vmem:[%s10061_s12 + $0xb8] sm:$0xff] %v7795_v7 }
 0x3db   : > { %6785 = vst [vmem:[%s10300_s25 + $0x108] sm:$0xff] %v6784_v22 }
 0x3df   : > { %v6762_v13 = vld [vmem:[%s10061_s12 + $0x50] sm:$0xff]  ;;  %v6764_v34 = vld [vmem:[%s10061_s12 + $0x58] sm:$0xff] }
 0x3e0   : > { %6763 = vst [vmem:[%s10300_s25 + $0x50] sm:$0xff] %v6762_v13  ;;  %6765 = vst [vmem:[%s10300_s25 + $0x58] sm:$0xff] %v6764_v34 }
 0x3e1   : > { %v6786_v26 = vld [vmem:[%s10061_s12 + $0xb0] sm:$0xff]  ;;  %v6788_v54 = vld [vmem:[%s10061_s12 + $0xb8] sm:$0xff] }
 0x3e2   : > { %6787 = vst [vmem:[%s10300_s25 + $0x110] sm:$0xff] %v6786_v26  ;;  %6789 = vst [vmem:[%s10300_s25 + $0x118] sm:$0xff] %v6788_v54 }
 0x3e3 PF: > { %p10_p10 = scmp.ge.s32.totalorder %s7894_s16, 4   ;;  %s10684_s12 = smov %s7849_s13 }
 0x3e4   : > { %s10685_s13 = smov %s7905_s19  ;;  %s10686_s14 = smov %s7894_s16 }
 0x3e5   :  { %12 = sbr.rel (!%p10_p10) target bundleno = 2 (0x2), region = 116 }

// kernel: cnn_forward.5
= control target key start
LH: loop header
LB: loop body
LE: loop exit
PB: predicated region body
PF: predicated region fallthrough
CT: control target
= control target key end

     0   :  { %v4231_v1 = vmov 0   ;;  %vm561_vm0 = vcmask 130048   ;;  %vm3012_vm1 = vcmask 666624   ;;  %s5528_s1 = inlined_call_operand.vmem [shape: bf16[4,400,338], index: 1, kind: input, shape index: {}]   ;;  %s5529_s0 = inlined_call_operand.vmem [shape: bf16[32,400], index: 0, kind: input, shape index: {}]   ;;  %s5530_s2 = inlined_call_operand.vmem [shape: f32[32,1], index: 2, kind: input, shape index: {}]   ;;  %s5531_s3 = inlined_call_operand.vmem [shape: bf16[32,338], index: 3, kind: output, shape index: {}]  }
   0x1   :  { %v3811_v0 = vld [vmem:[%s5528_s1 + $0x4] ss:$12 sps:$4 sm:$0xff]   ;;  %3809 = vset.pattern.permute.xlu0 %v4231_v1  ;;  %3810 = vset.pattern.permute.xlu1 %v4231_v1  ;;  %v3813_v2 = vld [vmem:[%s5528_s1 + $0xc8] ss:$12 sps:$4 sm:$0xff]   ;;  %v3814_v3 = vld [vmem:[%s5528_s1] ss:$12 sps:$4 sm:$0xff]  }
   0x2   :  { %568 = vmatprep.subr.bf16.mxu0 %v3811_v0  ;;  %3664 = vmatprep.subr.bf16.mxu1 %v3813_v2  ;;  %v3815_v4 = vld [vmem:[%s5528_s1 + $0x8] ss:$12 sps:$4 sm:$0xff]   ;;  %v3818_v6 = vld [vmem:[%s5528_s1 + $0xe0] ss:$12 sps:$4 sm:$0xff]   ;;  %v3819_v7 = vld [vmem:[%s5528_s1 + $0x18] ss:$12 sps:$4 sm:$0xff]  }
   0x3   :  { %569 = vmatpush1.bf16.msra.mxu0 %v3814_v3  ;;  %v3816_v5 = vld [vmem:[%s5528_s1 + $0x1c] ss:$12 sps:$4 sm:$0xff]   ;;  %3665 = vmatpush3.bf16.msra.mxu1 %v3815_v4  ;;  %v3820_v8 = vld [vmem:[%s5528_s1 + $0x20] ss:$12 sps:$4 sm:$0xff]   ;;  %v3823_v10 = vld [vmem:[%s5528_s1 + $0xf8] ss:$12 sps:$4 sm:$0xff]  }
   0x4   :  { %570 = vmatprep.subr.bf16.mxu0 %v3816_v5  ;;  %3666 = vmatprep.subr.bf16.mxu1 %v3818_v6  ;;  %v3821_v9 = vld [vmem:[%s5528_s1 + $0x34] ss:$12 sps:$4 sm:$0xff]   ;;  %v3824_v11 = vld [vmem:[%s5528_s1 + $0x30] ss:$12 sps:$4 sm:$0xff]   ;;  %v3825_v12 = vld [vmem:[%s5528_s1 + $0x38] ss:$12 sps:$4 sm:$0xff]  }
   0x5   :  { %v3826_v13 = vld [vmem:[%s5528_s1 + $0x4c] ss:$12 sps:$4 sm:$0xff]   ;;  %v3828_v14 = vld [vmem:[%s5528_s1 + $0x110] ss:$12 sps:$4 sm:$0xff]   ;;  %v3829_v15 = vld [vmem:[%s5528_s1 + $0x48] ss:$12 sps:$4 sm:$0xff]  }
   0x6   :  { %v3830_v16 = vld [vmem:[%s5528_s1 + $0x50] ss:$12 sps:$4 sm:$0xff]   ;;  %v3833_v18 = vld [vmem:[%s5528_s1 + $0x128] ss:$12 sps:$4 sm:$0xff]   ;;  %v3834_v19 = vld [vmem:[%s5528_s1 + $0x60] ss:$12 sps:$4 sm:$0xff]  }
   0x7   :  { %571 = vmatpush1.bf16.msra.mxu0 %v3819_v7  ;;  %3667 = vmatpush3.bf16.msra.mxu1 %v3820_v8  ;;  %v3831_v17 = vld [vmem:[%s5528_s1 + $0x64] ss:$12 sps:$4 sm:$0xff]   ;;  %v3835_v20 = vld [vmem:[%s5528_s1 + $0x68] ss:$12 sps:$4 sm:$0xff]   ;;  %v3838_v22 = vld [vmem:[%s5528_s1 + $0x140] ss:$12 sps:$4 sm:$0xff]  }
   0x8   :  { %572 = vmatprep.subr.bf16.mxu0 %v3821_v9  ;;  %3668 = vmatprep.subr.bf16.mxu1 %v3823_v10  ;;  %v3836_v21 = vld [vmem:[%s5528_s1 + $0x7c] ss:$12 sps:$4 sm:$0xff]   ;;  %v3839_v23 = vld [vmem:[%s5528_s1 + $0x78] ss:$12 sps:$4 sm:$0xff]   ;;  %v3840_v24 = vld [vmem:[%s5528_s1 + $0x80] ss:$12 sps:$4 sm:$0xff]  }
   0x9   :  { %v3841_v25 = vld [vmem:[%s5528_s1 + $0x94] ss:$12 sps:$4 sm:$0xff]   ;;  %v3843_v26 = vld [vmem:[%s5528_s1 + $0x158] ss:$12 sps:$4 sm:$0xff]   ;;  %v3844_v27 = vld [vmem:[%s5528_s1 + $0x90] ss:$12 sps:$4 sm:$0xff]  }
   0xa   :  { %v3845_v28 = vld [vmem:[%s5528_s1 + $0x98] ss:$12 sps:$4 sm:$0xff]   ;;  %v3848_v30 = vld [vmem:[%s5528_s1 + $0x170] ss:$12 sps:$4 sm:$0xff]   ;;  %v3849_v32 = vld [vmem:[%s5528_s1 + $0xa8] ss:$12 sps:$4 sm:$0xff]  }
   0xb   :  { %573 = vmatpush1.bf16.msra.mxu0 %v3824_v11  ;;  %3669 = vmatpush3.bf16.msra.mxu1 %v3825_v12  ;;  %v3846_v29 = vld [vmem:[%s5528_s1 + $0xac] ss:$12 sps:$4 sm:$0xff]   ;;  %v4347_v31 = vld [vmem:[%s5529_s0 + $0x4] ss:$16 sps:$4 sm:$0xff]   ;;  %v3850_v33 = vld [vmem:[%s5528_s1 + $0xb0] ss:$12 sps:$4 sm:$0xff]  }
   0xc   :  { %574 = vmatprep.subr.bf16.mxu0 %v3826_v13  ;;  %3670 = vmatprep.subr.bf16.mxu1 %v3828_v14  ;;  %v3853_v34 = vld [vmem:[%s5528_s1 + $0xc4] ss:$12 sps:$4 sm:$0xff]   ;;  %v3856_v36 = vld [vmem:[%s5528_s1 + $0xc0] ss:$12 sps:$4 sm:$0xff]   ;;  %v3857_v37 = vld [vmem:[%s5528_s1 + $0x188] ss:$12 sps:$4 sm:$0xff]  }
   0xd   :  { %706 = vmatprep.mubr.bf16.mxu1 %v4347_v31  ;;  %v4362_v35 = vld [vmem:[%s5529_s0] ss:$16 sps:$4 sm:$0xff]   ;;  %600 = vmatprep.mubr.bf16.mxu0 %v4347_v31  ;;  %v3858_v38 = vld [vmem:[%s5528_s1 + $0xdc] ss:$12 sps:$4 sm:$0xff]   ;;  %v3860_v39 = vld [vmem:[%s5528_s1 + $0xd8] ss:$12 sps:$4 sm:$0xff]  }
   0xe   :  { %v3861_v40 = vld [vmem:[%s5528_s1 + $0x1a0] ss:$12 sps:$4 sm:$0xff]   ;;  %v3864_v42 = vld [vmem:[%s5528_s1 + $0xf0] ss:$12 sps:$4 sm:$0xff]   ;;  %v3865_v43 = vld [vmem:[%s5528_s1 + $0x1b8] ss:$12 sps:$4 sm:$0xff]  }
   0xf   :  { %575 = vmatpush1.bf16.msra.mxu0 %v3829_v15  ;;  %3671 = vmatpush3.bf16.msra.mxu1 %v3830_v16  ;;  %v3862_v41 = vld [vmem:[%s5528_s1 + $0xf4] ss:$12 sps:$4 sm:$0xff]   ;;  %v3866_v44 = vld [vmem:[%s5528_s1 + $0x10c] ss:$12 sps:$4 sm:$0xff]   ;;  %v3869_v46 = vld [vmem:[%s5528_s1 + $0x1d0] ss:$12 sps:$4 sm:$0xff]  }
  0x10   :  { %576 = vmatprep.subr.bf16.mxu0 %v3831_v17  ;;  %3672 = vmatprep.subr.bf16.mxu1 %v3833_v18  ;;  %v3868_v45 = vld [vmem:[%s5528_s1 + $0x108] ss:$12 sps:$4 sm:$0xff]   ;;  %v3870_v47 = vld [vmem:[%s5528_s1 + $0x124] ss:$12 sps:$4 sm:$0xff]   ;;  %v3872_v50 = vld [vmem:[%s5528_s1 + $0x120] ss:$12 sps:$4 sm:$0xff]  }
  0x11   :  { %v4408_v48 = vld [vmem:[%s5529_s0 + $0x24] ss:$16 sps:$4 sm:$0xff]   ;;  %v4413_v49 = vld [vmem:[%s5529_s0 + $0x20] ss:$16 sps:$4 sm:$0xff]   ;;  %v3874_v52 = vld [vmem:[%s5528_s1 + $0x13c] ss:$12 sps:$4 sm:$0xff]  }
  0x12   :  { %v3873_v51 = vld [vmem:[%s5528_s1 + $0x1e8] ss:$12 sps:$4 sm:$0xff]   ;;  %v4431_v53 = vld [vmem:[%s5529_s0 + $0xc] ss:$16 sps:$4 sm:$0xff]   ;;  %v3876_v54 = vld [vmem:[%s5528_s1 + $0x138] ss:$12 sps:$4 sm:$0xff]  }
  0x13   :  { %577 = vmatpush1.bf16.msra.mxu0 %v3834_v19  ;;  %3673 = vmatpush3.bf16.msra.mxu1 %v3835_v20  ;;  %v3877_v55 = vld [vmem:[%s5528_s1 + $0x200] ss:$12 sps:$4 sm:$0xff]   ;;  %v3880_v57 = vld [vmem:[%s5528_s1 + $0x150] ss:$12 sps:$4 sm:$0xff]   ;;  %v3881_v58 = vld [vmem:[%s5528_s1 + $0x218] ss:$12 sps:$4 sm:$0xff]  }
  0x14   :  { %578 = vmatprep.subr.bf16.mxu0 %v3836_v21  ;;  %3674 = vmatprep.subr.bf16.mxu1 %v3838_v22  ;;  %v3878_v56 = vld [vmem:[%s5528_s1 + $0x154] ss:$12 sps:$4 sm:$0xff]   ;;  %v3885_v59 = vld [vmem:[%s5528_s1 + $0x16c] ss:$12 sps:$4 sm:$0xff]   ;;  %v3888_v61 = vld [vmem:[%s5528_s1 + $0x230] ss:$12 sps:$4 sm:$0xff]  }
  0x15   :  { %v3887_v60 = vld [vmem:[%s5528_s1 + $0x168] ss:$12 sps:$4 sm:$0xff]   ;;  %v3891_v62 = vld [vmem:[%s5528_s1 + $0x184] ss:$12 sps:$4 sm:$0xff]   ;;  %v3889_v63 = vld [vmem:[%s5528_s1 + $0x180] ss:$12 sps:$4 sm:$0xff]  }
  0x16   :  { %v3892_v0 = vld [vmem:[%s5528_s1 + $0x248] ss:$12 sps:$4 sm:$0xff]   ;;  %v3895_v4 = vld [vmem:[%s5528_s1 + $0x198] ss:$12 sps:$4 sm:$0xff]   ;;  %v4500_v9 = vld [vmem:[%s5529_s0 + $0x2c] ss:$16 sps:$4 sm:$0xff]  }
  0x17   :  { %579 = vmatpush1.bf16.msra.mxu0 %v3839_v23  ;;  %3675 = vmatpush3.bf16.msra.mxu1 %v3840_v24  ;;  %v3897_v2 = vld [vmem:[%s5528_s1 + $0x19c] ss:$12 sps:$4 sm:$0xff]   ;;  %v3899_v6 = vld [vmem:[%s5528_s1 + $0x258] ss:$12 sps:$4 sm:$0xff]   ;;  %v3904_v7 = vld [vmem:[%s5528_s1 + $0x1b4] ss:$12 sps:$4 sm:$0xff]  }
  0x18   :  { %580 = vmatprep.subr.bf16.mxu0 %v3841_v25  ;;  %3676 = vmatprep.subr.bf16.mxu1 %v3843_v26  ;;  %v3901_v3 = vld [vmem:[%s5528_s1 + $0x25c] ss:$12 sps:$4 sm:$0xff]   ;;  %v3907_v8 = vld [vmem:[%s5528_s1 + $0x274] ss:$12 sps:$4 sm:$0xff]   ;;  %v3912_v12 = vld [vmem:[%s5528_s1 + $0x1cc] ss:$12 sps:$4 sm:$0xff]  }
  0x19   :  { %v4485_v5 = vld [vmem:[%s5529_s0 + $0x8] ss:$16 sps:$4 sm:$0xff]   ;;  %v3902_v10 = vld [vmem:[%s5528_s1 + $0x1b0] ss:$12 sps:$4 sm:$0xff]   ;;  %v3917_v19 = vld [vmem:[%s5528_s1 + $0x1e0] ss:$12 sps:$4 sm:$0xff]  }
  0x1a   :  { %v3905_v11 = vld [vmem:[%s5528_s1 + $0x270] ss:$12 sps:$4 sm:$0xff]   ;;  %v3916_v13 = vld [vmem:[%s5528_s1 + $0x28c] ss:$12 sps:$4 sm:$0xff]   ;;  %v3910_v14 = vld [vmem:[%s5528_s1 + $0x1c8] ss:$12 sps:$4 sm:$0xff]  }
  0x1b   :  { %581 = vmatpush1.bf16.msra.mxu0 %v3844_v27  ;;  %3677 = vmatpush3.bf16.msra.mxu1 %v3845_v28  ;;  %v4523_v15 = vld [vmem:[%s5529_s0 + $0x28] ss:$16 sps:$4 sm:$0xff]   ;;  %v3919_v17 = vld [vmem:[%s5528_s1 + $0x1e4] ss:$12 sps:$4 sm:$0xff]   ;;  %v3920_v20 = vld [vmem:[%s5528_s1 + $0x2a0] ss:$12 sps:$4 sm:$0xff]  }
  0x1c   :  { %582 = vmatprep.subr.bf16.mxu0 %v3846_v29  ;;  %3678 = vmatprep.subr.bf16.mxu1 %v3848_v30  ;;  %v3914_v16 = vld [vmem:[%s5528_s1 + $0x288] ss:$12 sps:$4 sm:$0xff]   ;;  %v3922_v18 = vld [vmem:[%s5528_s1 + $0x2a4] ss:$12 sps:$4 sm:$0xff]   ;;  %v3937_v29 = vld [vmem:[%s5528_s1 + $0x22c] ss:$12 sps:$4 sm:$0xff]  }
  0x1d   :  { %v3925_v21 = vld [vmem:[%s5528_s1 + $0x1fc] ss:$12 sps:$4 sm:$0xff]   ;;  %v3923_v23 = vld [vmem:[%s5528_s1 + $0x1f8] ss:$12 sps:$4 sm:$0xff]   ;;  %v3931_v25 = vld [vmem:[%s5528_s1 + $0x214] ss:$12 sps:$4 sm:$0xff]  }
  0x1e   :  { %v3928_v22 = vld [vmem:[%s5528_s1 + $0x2bc] ss:$12 sps:$4 sm:$0xff]   ;;  %v3926_v24 = vld [vmem:[%s5528_s1 + $0x2b8] ss:$12 sps:$4 sm:$0xff]   ;;  %v3934_v26 = vld [vmem:[%s5528_s1 + $0x2d4] ss:$12 sps:$4 sm:$0xff]  }
  0x1f   :  { %583 = vmatpush1.bf16.msra.mxu0 %v3849_v32  ;;  %3679 = vmatpush3.bf16.msra.mxu1 %v3850_v33  ;;  %v3929_v27 = vld [vmem:[%s5528_s1 + $0x210] ss:$12 sps:$4 sm:$0xff]   ;;  %v3940_v30 = vld [vmem:[%s5528_s1 + $0x2ec] ss:$12 sps:$4 sm:$0xff]   ;;  %v3935_v32 = vld [vmem:[%s5528_s1 + $0x228] ss:$12 sps:$4 sm:$0xff]  }
  0x20   :  { %584 = vmatprep.subr.bf16.mxu0 %v3853_v34  ;;  %723 = vmatprep.subr.bf16.mxu1 %v4231_v1  ;;  %v3932_v28 = vld [vmem:[%s5528_s1 + $0x2d0] ss:$12 sps:$4 sm:$0xff]   ;;  %v3938_v33 = vld [vmem:[%s5528_s1 + $0x2e8] ss:$12 sps:$4 sm:$0xff]  }
  0x21   :  { %v3943_v34 = vld [vmem:[%s5528_s1 + $0x244] ss:$12 sps:$4 sm:$0xff]  }
  0x22   :  { %707 = vmatmul.mubr.bf16.vlgmr.msra.gmra.mrb[0].mxu1 %v4362_v35 }
  0x23   :  { %585 = vmatpush1.bf16.msra.mxu0 %v3856_v36  ;;  %724 = vmatpush1.bf16.msra.mxu1 %v3857_v37  ;;  %v3946_v36 = vld [vmem:[%s5528_s1 + $0x304] ss:$12 sps:$4 sm:$0xff]   ;;  %v3941_v37 = vld [vmem:[%s5528_s1 + $0x240] ss:$12 sps:$4 sm:$0xff]  }
  0x24   :  { %586 = vmatprep.subr.bf16.mxu0 %v3858_v38  ;;  %725 = vmatprep.subr.bf16.mxu1 %v4231_v1  ;;  %v3944_v38 = vld [vmem:[%s5528_s1 + $0x300] ss:$12 sps:$4 sm:$0xff]  }
  0x25   :  { %714 = vmatprep.mubr.bf16.mxu1 %v4408_v48 }
  0x27   :  { %587 = vmatpush1.bf16.msra.mxu0 %v3860_v39  ;;  %726 = vmatpush1.bf16.msra.mxu1 %v3861_v40  ;;  %v3950_v39 = vld [vmem:[%s5528_s1 + $0x320] ss:$12 sps:$4 sm:$0xff]   ;;  %v3949_v40 = vld [vmem:[%s5528_s1 + $0x31c] ss:$12 sps:$4 sm:$0xff]  }
  0x28   :  { %588 = vmatprep.subr.bf16.mxu0 %v3862_v41  ;;  %727 = vmatprep.subr.bf16.mxu1 %v4231_v1  ;;  %v3947_v41 = vld [vmem:[%s5528_s1 + $0x318] ss:$12 sps:$4 sm:$0xff]  }
  0x2a   :  { %715 = vmatmul.mubr.bf16.gmra.mrb[4].mxu1 %v4413_v49 }
  0x2b   :  { %589 = vmatpush1.bf16.msra.mxu0 %v3864_v42  ;;  %728 = vmatpush1.bf16.msra.mxu1 %v3865_v43  ;;  %v3951_v42 = vld [vmem:[%s5528_s1 + $0x260] ss:$12 sps:$4 sm:$0xff]   ;;  %v3955_v43 = vld [vmem:[%s5528_s1 + $0x338] ss:$12 sps:$4 sm:$0xff]  }
  0x2c   :  { %590 = vmatprep.subr.bf16.mxu0 %v3866_v44  ;;  %729 = vmatprep.subr.bf16.mxu1 %v4231_v1  ;;  %v3954_v44 = vld [vmem:[%s5528_s1 + $0x334] ss:$12 sps:$4 sm:$0xff]  }
  0x2d   :  { %3109 = vmatprep.mubr.msk.bf16.mxu1 %vm561_vm0, %v4431_v53 }
  0x2f   :  { %591 = vmatpush1.bf16.msra.mxu0 %v3868_v45  ;;  %730 = vmatpush1.bf16.msra.mxu1 %v3869_v46  ;;  %v3952_v45 = vld [vmem:[%s5528_s1 + $0x330] ss:$12 sps:$4 sm:$0xff]   ;;  %v3956_v46 = vld [vmem:[%s5528_s1 + $0x278] ss:$12 sps:$4 sm:$0xff]  }
  0x30   :  { %592 = vmatprep.subr.bf16.mxu0 %v3870_v47  ;;  %731 = vmatprep.subr.bf16.mxu1 %v4231_v1  ;;  %v3960_v47 = vld [vmem:[%s5528_s1 + $0x350] ss:$12 sps:$4 sm:$0xff]  }
  0x33   :  { %593 = vmatpush1.bf16.msra.mxu0 %v3872_v50  ;;  %732 = vmatpush1.bf16.msra.mxu1 %v3873_v51  ;;  %v3959_v50 = vld [vmem:[%s5528_s1 + $0x34c] ss:$12 sps:$4 sm:$0xff]   ;;  %v3957_v51 = vld [vmem:[%s5528_s1 + $0x348] ss:$12 sps:$4 sm:$0xff]  }
  0x34   :  { %594 = vmatprep.subr.bf16.mxu0 %v3874_v52  ;;  %733 = vmatprep.subr.bf16.mxu1 %v4231_v1  ;;  %v3961_v52 = vld [vmem:[%s5528_s1 + $0x290] ss:$12 sps:$4 sm:$0xff]  }
  0x37   :  { %595 = vmatpush1.bf16.msra.mxu0 %v3876_v54  ;;  %734 = vmatpush1.bf16.msra.mxu1 %v3877_v55  ;;  %v3965_v54 = vld [vmem:[%s5528_s1 + $0x368] ss:$12 sps:$4 sm:$0xff]   ;;  %v3964_v55 = vld [vmem:[%s5528_s1 + $0x364] ss:$12 sps:$4 sm:$0xff]  }
  0x38   :  { %596 = vmatprep.subr.bf16.mxu0 %v3878_v56  ;;  %735 = vmatprep.subr.bf16.mxu1 %v4231_v1  ;;  %v3966_v56 = vld [vmem:[%s5528_s1 + $0x2a8] ss:$12 sps:$4 sm:$0xff]  }
  0x3b   :  { %597 = vmatpush1.bf16.msra.mxu0 %v3880_v57  ;;  %736 = vmatpush1.bf16.msra.mxu1 %v3881_v58  ;;  %v3962_v57 = vld [vmem:[%s5528_s1 + $0x360] ss:$12 sps:$4 sm:$0xff]  }
  0x3c   :  { %598 = vmatprep.subr.bf16.mxu0 %v3885_v59  ;;  %737 = vmatprep.subr.bf16.mxu1 %v4231_v1  ;;  %v3970_v58 = vld [vmem:[%s5528_s1 + $0x380] ss:$12 sps:$4 sm:$0xff]   ;;  %v3969_v59 = vld [vmem:[%s5528_s1 + $0x37c] ss:$12 sps:$4 sm:$0xff]  }
  0x3f   :  { %599 = vmatpush1.bf16.msra.mxu0 %v3887_v60  ;;  %738 = vmatpush1.bf16.msra.mxu1 %v3888_v61  ;;  %v3967_v60 = vld [vmem:[%s5528_s1 + $0x378] ss:$12 sps:$4 sm:$0xff]  }
  0x40   :  { %621 = vmatprep.subr.bf16.mxu0 %v3891_v62  ;;  %739 = vmatprep.subr.bf16.mxu1 %v4231_v1  ;;  %v3975_v61 = vld [vmem:[%s5528_s1 + $0x398] ss:$12 sps:$4 sm:$0xff]   ;;  %v3974_v62 = vld [vmem:[%s5528_s1 + $0x394] ss:$12 sps:$4 sm:$0xff]  }
  0x42   :  { %601 = vmatmul.mubr.bf16.vlgmr.msra.gmra.mrb[0].mxu0 %v4362_v35 }
  0x43   :  { %622 = vmatpush1.bf16.msra.mxu0 %v3889_v63  ;;  %610 = vmatprep.mubr.bf16.mxu0 %v4408_v48  ;;  %v3972_v63 = vld [vmem:[%s5528_s1 + $0x390] ss:$12 sps:$4 sm:$0xff]  }
  0x44   :  { %740 = vmatpush1.bf16.msra.mxu1 %v3892_v0  ;;  %623 = vmatprep.subr.bf16.mxu0 %v3897_v2  ;;  %v3976_v0 = vld [vmem:[%s5528_s1 + $0x2d8] ss:$12 sps:$4 sm:$0xff]   ;;  %v3980_v2 = vld [vmem:[%s5528_s1 + $0x3b0] ss:$12 sps:$4 sm:$0xff]  }
  0x45   :  { %1273 = vmatprep.subr.bf16.mxu1 %v3901_v3  ;;  %v3979_v3 = vld [vmem:[%s5528_s1 + $0x3ac] ss:$12 sps:$4 sm:$0xff]  }
  0x47   :  { %756 = vmatmul.mubr.bf16.vlgmr.msra.gmra.mrb[8].mxu1 %v4485_v5  ;;  %624 = vmatpush1.bf16.msra.mxu0 %v3895_v4  ;;  %v3977_v4 = vld [vmem:[%s5528_s1 + $0x3a8] ss:$12 sps:$4 sm:$0xff]  }
  0x48   :  { %1274 = vmatpush1.bf16.msra.mxu1 %v3899_v6  ;;  %625 = vmatprep.subr.bf16.mxu0 %v3904_v7  ;;  %v3981_v6 = vld [vmem:[%s5528_s1 + $0x2f0] ss:$12 sps:$4 sm:$0xff]   ;;  %v3985_v7 = vld [vmem:[%s5528_s1 + $0x3c8] ss:$12 sps:$4 sm:$0xff]  }
  0x49   :  { %1275 = vmatprep.subr.bf16.mxu1 %v3907_v8  ;;  %3110 = vmatprep.mubr.msk.bf16.mxu1 %vm561_vm0, %v4500_v9  ;;  %v3984_v8 = vld [vmem:[%s5528_s1 + $0x3c4] ss:$12 sps:$4 sm:$0xff]  }
  0x4a   :  { %611 = vmatmul.mubr.bf16.gmra.mrb[4].mxu0 %v4413_v49 }
  0x4b   :  { %626 = vmatpush1.bf16.msra.mxu0 %v3902_v10  ;;  %3107 = vmatprep.mubr.msk.bf16.mxu0 %vm561_vm0, %v4431_v53  ;;  %v3986_v10 = vld [vmem:[%s5528_s1 + $0x308] ss:$12 sps:$4 sm:$0xff]  }
  0x4c   :  { %1276 = vmatpush1.bf16.msra.mxu1 %v3905_v11  ;;  %627 = vmatprep.subr.bf16.mxu0 %v3912_v12  ;;  %v3982_v11 = vld [vmem:[%s5528_s1 + $0x3c0] ss:$12 sps:$4 sm:$0xff]   ;;  %v3989_v12 = vld [vmem:[%s5528_s1 + $0x3dc] ss:$12 sps:$4 sm:$0xff]  }
  0x4d   :  { %1277 = vmatprep.subr.bf16.mxu1 %v3916_v13  ;;  %v3990_v13 = vld [vmem:[%s5528_s1 + $0x3e0] ss:$12 sps:$4 sm:$0xff]  }
  0x4f   :  { %764 = vmatmul.mubr.bf16.gmra.mrb[12].mxu1 %v4523_v15  ;;  %628 = vmatpush1.bf16.msra.mxu0 %v3910_v14  ;;  %v3987_v14 = vld [vmem:[%s5528_s1 + $0x3d8] ss:$12 sps:$4 sm:$0xff]  }
  0x50   :  { %1278 = vmatpush1.bf16.msra.mxu1 %v3914_v16  ;;  %629 = vmatprep.subr.bf16.mxu0 %v3919_v17  ;;  %v3993_v16 = vld [vmem:[%s5528_s1 + $0x3f4] ss:$12 sps:$4 sm:$0xff]   ;;  %v3994_v17 = vld [vmem:[%s5528_s1 + $0x3f8] ss:$12 sps:$4 sm:$0xff]  }
  0x51   :  { %1279 = vmatprep.subr.bf16.mxu1 %v3922_v18  ;;  %1305 = vmatprep.mubr.bf16.mxu1 %v4347_v31  ;;  %v3991_v18 = vld [vmem:[%s5528_s1 + $0x3f0] ss:$12 sps:$4 sm:$0xff]  }
  0x53   :  { %630 = vmatpush1.bf16.msra.mxu0 %v3917_v19  ;;  %v3997_v19 = vld [vmem:[%s5528_s1 + $0x40c] ss:$12 sps:$4 sm:$0xff]  }
  0x54   :  { %1280 = vmatpush1.bf16.msra.mxu1 %v3920_v20  ;;  %631 = vmatprep.subr.bf16.mxu0 %v3925_v21  ;;  %v3995_v20 = vld [vmem:[%s5528_s1 + $0x408] ss:$12 sps:$4 sm:$0xff]   ;;  %v4001_v21 = vld [vmem:[%s5528_s1 + $0x424] ss:$12 sps:$4 sm:$0xff]  }
  0x55   :  { %1281 = vmatprep.subr.bf16.mxu1 %v3928_v22  ;;  %v3999_v22 = vld [vmem:[%s5528_s1 + $0x420] ss:$12 sps:$4 sm:$0xff]  }
  0x57   :  { %632 = vmatpush1.bf16.msra.mxu0 %v3923_v23  ;;  %v4005_v23 = vld [vmem:[%s5528_s1 + $0x43c] ss:$12 sps:$4 sm:$0xff]  }
  0x58   :  { %1282 = vmatpush1.bf16.msra.mxu1 %v3926_v24  ;;  %633 = vmatprep.subr.bf16.mxu0 %v3931_v25  ;;  %v4003_v24 = vld [vmem:[%s5528_s1 + $0x438] ss:$12 sps:$4 sm:$0xff]   ;;  %v4009_v25 = vld [vmem:[%s5528_s1 + $0x454] ss:$12 sps:$4 sm:$0xff]  }
  0x59   :  { %1283 = vmatprep.subr.bf16.mxu1 %v3934_v26  ;;  %v4007_v26 = vld [vmem:[%s5528_s1 + $0x450] ss:$12 sps:$4 sm:$0xff]  }
  0x5b   :  { %634 = vmatpush1.bf16.msra.mxu0 %v3929_v27  ;;  %v4013_v27 = vld [vmem:[%s5528_s1 + $0x46c] ss:$12 sps:$4 sm:$0xff]  }
  0x5c   :  { %1284 = vmatpush1.bf16.msra.mxu1 %v3932_v28  ;;  %635 = vmatprep.subr.bf16.mxu0 %v3937_v29  ;;  %v4014_v28 = vld [vmem:[%s5528_s1 + $0x470] ss:$12 sps:$4 sm:$0xff]   ;;  %v4011_v29 = vld [vmem:[%s5528_s1 + $0x468] ss:$12 sps:$4 sm:$0xff]  }
  0x5d   :  { %1285 = vmatprep.subr.bf16.mxu1 %v3940_v30  ;;  %v4017_v30 = vld [vmem:[%s5528_s1 + $0x484] ss:$12 sps:$4 sm:$0xff]  }
  0x5f   :  { %636 = vmatpush1.bf16.msra.mxu0 %v3935_v32  ;;  %v4018_v32 = vld [vmem:[%s5528_s1 + $0x488] ss:$12 sps:$4 sm:$0xff]  }
  0x60   :  { %1286 = vmatpush1.bf16.msra.mxu1 %v3938_v33  ;;  %637 = vmatprep.subr.bf16.mxu0 %v3943_v34  ;;  %v4015_v33 = vld [vmem:[%s5528_s1 + $0x480] ss:$12 sps:$4 sm:$0xff]   ;;  %v4021_v34 = vld [vmem:[%s5528_s1 + $0x49c] ss:$12 sps:$4 sm:$0xff]  }
  0x61   :  { %1287 = vmatprep.subr.bf16.mxu1 %v3946_v36  ;;  %v4019_v36 = vld [vmem:[%s5528_s1 + $0x498] ss:$12 sps:$4 sm:$0xff]  }
  0x63   :  { %638 = vmatpush1.bf16.msra.mxu0 %v3941_v37  ;;  %v4022_v37 = vld [vmem:[%s5528_s1 + $0x4a0] ss:$12 sps:$4 sm:$0xff]  }
  0x64   :  { %1288 = vmatpush1.bf16.msra.mxu1 %v3944_v38  ;;  %3692 = vmatprep.subr.bf16.mxu0 %v3950_v39  ;;  %v4025_v38 = vld [vmem:[%s5528_s1 + $0x4b4] ss:$12 sps:$4 sm:$0xff]   ;;  %v4026_v39 = vld [vmem:[%s5528_s1 + $0x578] ss:$12 sps:$4 sm:$0xff]  }
  0x65   :  { %1289 = vmatprep.subr.bf16.mxu1 %v3949_v40  ;;  %v4023_v40 = vld [vmem:[%s5528_s1 + $0x4b0] ss:$12 sps:$4 sm:$0xff]  }
  0x66   :  { %654 = vmatmul.mubr.bf16.vlgmr.msra.gmra.mrb[0].mxu0 %v4485_v5 }
  0x67   :  { %3693 = vmatpush3.bf16.msra.mxu0 %v3951_v42  ;;  %3108 = vmatprep.mubr.msk.bf16.mxu0 %vm561_vm0, %v4500_v9  ;;  %v4030_v42 = vld [vmem:[%s5528_s1 + $0x4cc] ss:$12 sps:$4 sm:$0xff]  }
  0x68   :  { %1290 = vmatpush1.bf16.msra.mxu1 %v3947_v41  ;;  %3694 = vmatprep.subr.bf16.mxu0 %v3955_v43  ;;  %v4027_v41 = vld [vmem:[%s5528_s1 + $0x4b8] ss:$12 sps:$4 sm:$0xff]   ;;  %v4031_v43 = vld [vmem:[%s5528_s1 + $0x590] ss:$12 sps:$4 sm:$0xff]  }
  0x69   :  { %1291 = vmatprep.subr.bf16.mxu1 %v3954_v44  ;;  %v4028_v44 = vld [vmem:[%s5528_s1 + $0x4c8] ss:$12 sps:$4 sm:$0xff]  }
  0x6b   :  { %3695 = vmatpush3.bf16.msra.mxu0 %v3956_v46  ;;  %v4035_v46 = vld [vmem:[%s5528_s1 + $0x4e4] ss:$12 sps:$4 sm:$0xff]  }
  0x6c   :  { %1292 = vmatpush1.bf16.msra.mxu1 %v3952_v45  ;;  %3696 = vmatprep.subr.bf16.mxu0 %v3960_v47  ;;  %v4032_v45 = vld [vmem:[%s5528_s1 + $0x4d0] ss:$12 sps:$4 sm:$0xff]   ;;  %v4033_v47 = vld [vmem:[%s5528_s1 + $0x4e0] ss:$12 sps:$4 sm:$0xff]  }
  0x6d   :  { %1293 = vmatprep.subr.bf16.mxu1 %v3959_v50  ;;  %v4037_v50 = vld [vmem:[%s5528_s1 + $0x4e8] ss:$12 sps:$4 sm:$0xff]  }
  0x6e   :  { %664 = vmatmul.mubr.bf16.gmra.mrb[4].mxu0 %v4523_v15 }
  0x6f   :  { %3697 = vmatpush3.bf16.msra.mxu0 %v3961_v52  ;;  %1411 = vmatprep.mubr.bf16.mxu0 %v4347_v31  ;;  %v3971_v31 = vld [vmem:[%s5528_s1 + $0x2c0] ss:$12 sps:$4 sm:$0xff]   ;;  %v4038_v52 = vld [vmem:[%s5528_s1 + $0x4f8] ss:$12 sps:$4 sm:$0xff]  }
  0x70   :  { %1294 = vmatpush1.bf16.msra.mxu1 %v3957_v51  ;;  %3698 = vmatprep.subr.bf16.mxu0 %v3965_v54  ;;  %v4040_v51 = vld [vmem:[%s5528_s1 + $0x4fc] ss:$12 sps:$4 sm:$0xff]   ;;  %v4042_v54 = vld [vmem:[%s5528_s1 + $0x500] ss:$12 sps:$4 sm:$0xff]  }
  0x71   :  { %1295 = vmatprep.subr.bf16.mxu1 %v3964_v55  ;;  %v4045_v55 = vld [vmem:[%s5528_s1 + $0x514] ss:$12 sps:$4 sm:$0xff]  }
  0x73   :  { %3699 = vmatpush3.bf16.msra.mxu0 %v3966_v56  ;;  %v4859_v56 = vld [vmem:[%s5529_s0 + $0x4] ss:$16 sps:$4 sm:$0xff]  }
  0x74   :  { %1296 = vmatpush1.bf16.msra.mxu1 %v3962_v57  ;;  %3700 = vmatprep.subr.bf16.mxu0 %v3970_v58  ;;  %v4043_v57 = vld [vmem:[%s5528_s1 + $0x510] ss:$12 sps:$4 sm:$0xff]   ;;  %v4047_v58 = vld [vmem:[%s5528_s1 + $0x518] ss:$12 sps:$4 sm:$0xff]  }
  0x75   :  { %1297 = vmatprep.subr.bf16.mxu1 %v3969_v59  ;;  %v4050_v59 = vld [vmem:[%s5528_s1 + $0x52c] ss:$12 sps:$4 sm:$0xff]  }
  0x77   :  { %3701 = vmatpush3.bf16.msra.mxu0 %v3971_v31  ;;  %v4048_v31 = vld [vmem:[%s5528_s1 + $0x528] ss:$12 sps:$4 sm:$0xff]  }
  0x78   :  { %1298 = vmatpush1.bf16.msra.mxu1 %v3967_v60  ;;  %3702 = vmatprep.subr.bf16.mxu0 %v3975_v61  ;;  %v4051_v60 = vld [vmem:[%s5528_s1 + $0x5f0] ss:$12 sps:$4 sm:$0xff]  }
  0x79   :  { %1299 = vmatprep.subr.bf16.mxu1 %v3974_v62  ;;  %v4052_v61 = vld [vmem:[%s5528_s1 + $0x530] ss:$12 sps:$4 sm:$0xff]  }
  0x7a   :  { %v4055_v62 = vld [vmem:[%s5528_s1 + $0x544] ss:$12 sps:$4 sm:$0xff]  }
  0x7b   :  { %3703 = vmatpush3.bf16.msra.mxu0 %v3976_v0  ;;  %v4053_v0 = vld [vmem:[%s5528_s1 + $0x540] ss:$12 sps:$4 sm:$0xff]  }
  0x7c   :  { %1300 = vmatpush1.bf16.msra.mxu1 %v3972_v63  ;;  %3704 = vmatprep.subr.bf16.mxu0 %v3980_v2  ;;  %v4056_v63 = vld [vmem:[%s5528_s1 + $0x608] ss:$12 sps:$4 sm:$0xff]  }
  0x7d   :  { %1301 = vmatprep.subr.bf16.mxu1 %v3979_v3  ;;  %v4057_v2 = vld [vmem:[%s5528_s1 + $0x548] ss:$12 sps:$4 sm:$0xff]  }
  0x7e   :  { %v4060_v3 = vld [vmem:[%s5528_s1 + $0x55c] ss:$12 sps:$4 sm:$0xff]  }
  0x7f   :  { %3705 = vmatpush3.bf16.msra.mxu0 %v3981_v6  ;;  %v4058_v6 = vld [vmem:[%s5528_s1 + $0x558] ss:$12 sps:$4 sm:$0xff]  }
  0x80   :  { %1302 = vmatpush1.bf16.msra.mxu1 %v3977_v4  ;;  %3706 = vmatprep.subr.bf16.mxu0 %v3985_v7  ;;  %v4061_v4 = vld [vmem:[%s5528_s1 + $0x620] ss:$12 sps:$4 sm:$0xff]  }
  0x81   :  { %1303 = vmatprep.subr.bf16.mxu1 %v3984_v8  ;;  %v4062_v7 = vld [vmem:[%s5528_s1 + $0x560] ss:$12 sps:$4 sm:$0xff]  }
  0x82   :  { %v4065_v8 = vld [vmem:[%s5528_s1 + $0x574] ss:$12 sps:$4 sm:$0xff]  }
  0x83   :  { %3707 = vmatpush3.bf16.msra.mxu0 %v3986_v10  ;;  %v4063_v10 = vld [vmem:[%s5528_s1 + $0x570] ss:$12 sps:$4 sm:$0xff]  }
  0x84   :  { %1304 = vmatpush1.bf16.msra.mxu1 %v3982_v11  ;;  %1428 = vmatprep.subr.bf16.mxu0 %v4231_v1  ;;  %v4066_v11 = vld [vmem:[%s5528_s1 + $0x638] ss:$12 sps:$4 sm:$0xff]  }
  0x85   :  { %1326 = vmatprep.subr.bf16.mxu1 %v3989_v12  ;;  %v4069_v12 = vld [vmem:[%s5528_s1 + $0x58c] ss:$12 sps:$4 sm:$0xff]  }
  0x86   :  { %1412 = vmatmul.mubr.bf16.vlgmr.msra.gmra.mrb[8].mxu0 %v4362_v35 }
  0x87   :  { %1306 = vmatmul.mubr.bf16.vlgmr.msra.gmra.mrb[16].mxu1 %v4362_v35  ;;  %1429 = vmatpush1.bf16.msra.mxu0 %v3990_v13  ;;  %v3998_v35 = vld [vmem:[%s5528_s1 + $0x410] ss:$12 sps:$4 sm:$0xff]  }
  0x88   :  { %1327 = vmatpush1.bf16.msra.mxu1 %v3987_v14  ;;  %1430 = vmatprep.subr.bf16.mxu0 %v4231_v1  ;;  %v4921_v13 = vld [vmem:[%s5529_s0] ss:$16 sps:$4 sm:$0xff]   ;;  %v4067_v14 = vld [vmem:[%s5528_s1 + $0x588] ss:$12 sps:$4 sm:$0xff]  }
  0x89   :  { %1328 = vmatprep.subr.bf16.mxu1 %v3993_v16  ;;  %1419 = vmatprep.mubr.bf16.mxu0 %v4408_v48  ;;  %v4070_v16 = vld [vmem:[%s5528_s1 + $0x650] ss:$12 sps:$4 sm:$0xff]  }
  0x8a   :  { %1315 = vmatprep.mubr.bf16.mxu1 %v4408_v48  ;;  %v4002_v48 = vld [vmem:[%s5528_s1 + $0x428] ss:$12 sps:$4 sm:$0xff]  }
  0x8b   :  { %1431 = vmatpush1.bf16.msra.mxu0 %v3994_v17  ;;  %v4073_v17 = vld [vmem:[%s5528_s1 + $0x5a4] ss:$12 sps:$4 sm:$0xff]  }
  0x8c   :  { %1329 = vmatpush1.bf16.msra.mxu1 %v3991_v18  ;;  %1432 = vmatprep.subr.bf16.mxu0 %v4231_v1  ;;  %v4937_v18 = vld [vmem:[%s5529_s0 + $0x24] ss:$16 sps:$4 sm:$0xff]  }
  0x8d   :  { %1330 = vmatprep.subr.bf16.mxu1 %v3997_v19  ;;  %v4071_v19 = vld [vmem:[%s5528_s1 + $0x5a0] ss:$12 sps:$4 sm:$0xff]  }
  0x8e   :  { %1420 = vmatmul.mubr.bf16.gmra.mrb[12].mxu0 %v4413_v49 }
  0x8f   :  { %1433 = vmatpush1.bf16.msra.mxu0 %v3998_v35  ;;  %1316 = vmatmul.mubr.bf16.gmra.mrb[20].mxu1 %v4413_v49  ;;  %v4006_v49 = vld [vmem:[%s5528_s1 + $0x440] ss:$12 sps:$4 sm:$0xff]   ;;  %v4074_v35 = vld [vmem:[%s5528_s1 + $0x668] ss:$12 sps:$4 sm:$0xff]  }
  0x90   :  { %1331 = vmatpush1.bf16.msra.mxu1 %v3995_v20  ;;  %1434 = vmatprep.subr.bf16.mxu0 %v4231_v1  ;;  %v4077_v20 = vld [vmem:[%s5528_s1 + $0x5bc] ss:$12 sps:$4 sm:$0xff]  }
  0x91   :  { %1332 = vmatprep.subr.bf16.mxu1 %v4001_v21  ;;  %3286 = vmatprep.mubr.msk.bf16.mxu1 %vm561_vm0, %v4431_v53  ;;  %v4075_v21 = vld [vmem:[%s5528_s1 + $0x5b8] ss:$12 sps:$4 sm:$0xff]  }
  0x92   :  { %3288 = vmatprep.mubr.msk.bf16.mxu0 %vm561_vm0, %v4431_v53  ;;  %v4010_v53 = vld [vmem:[%s5528_s1 + $0x458] ss:$12 sps:$4 sm:$0xff]  }
  0x93   :  { %1435 = vmatpush1.bf16.msra.mxu0 %v4002_v48  ;;  %v4078_v48 = vld [vmem:[%s5528_s1 + $0x680] ss:$12 sps:$4 sm:$0xff]  }
  0x94   :  { %1333 = vmatpush1.bf16.msra.mxu1 %v3999_v22  ;;  %1436 = vmatprep.subr.bf16.mxu0 %v4231_v1  ;;  %v4959_v22 = vld [vmem:[%s5529_s0 + $0x20] ss:$16 sps:$4 sm:$0xff]  }
  0x95   :  { %1334 = vmatprep.subr.bf16.mxu1 %v4005_v23  ;;  %v4081_v23 = vld [vmem:[%s5528_s1 + $0x5d4] ss:$12 sps:$4 sm:$0xff]  }
  0x97   :  { %1437 = vmatpush1.bf16.msra.mxu0 %v4006_v49  ;;  %v4969_v49 = vld [vmem:[%s5529_s0 + $0xc] ss:$16 sps:$4 sm:$0xff]  }
  0x98   :  { %1335 = vmatpush1.bf16.msra.mxu1 %v4003_v24  ;;  %1438 = vmatprep.subr.bf16.mxu0 %v4231_v1  ;;  %v4079_v24 = vld [vmem:[%s5528_s1 + $0x5d0] ss:$12 sps:$4 sm:$0xff]  }
  0x99   :  { %1336 = vmatprep.subr.bf16.mxu1 %v4009_v25  ;;  %v4082_v25 = vld [vmem:[%s5528_s1 + $0x698] ss:$12 sps:$4 sm:$0xff]  }
  0x9b   :  { %1439 = vmatpush1.bf16.msra.mxu0 %v4010_v53  ;;  %v4085_v53 = vld [vmem:[%s5528_s1 + $0x5ec] ss:$12 sps:$4 sm:$0xff]  }
  0x9c   :  { %1337 = vmatpush1.bf16.msra.mxu1 %v4007_v26  ;;  %1440 = vmatprep.subr.bf16.mxu0 %v4231_v1  ;;  %v4083_v26 = vld [vmem:[%s5528_s1 + $0x5e8] ss:$12 sps:$4 sm:$0xff]  }
  0x9d   :  { %1338 = vmatprep.subr.bf16.mxu1 %v4013_v27  ;;  %v4086_v27 = vld [vmem:[%s5528_s1 + $0x6b0] ss:$12 sps:$4 sm:$0xff]  }
  0x9f   :  { %1441 = vmatpush1.bf16.msra.mxu0 %v4014_v28  ;;  %v4089_v28 = vld [vmem:[%s5528_s1 + $0x604] ss:$12 sps:$4 sm:$0xff]  }
  0xa0   :  { %1339 = vmatpush1.bf16.msra.mxu1 %v4011_v29  ;;  %1442 = vmatprep.subr.bf16.mxu0 %v4231_v1  ;;  %v4087_v29 = vld [vmem:[%s5528_s1 + $0x600] ss:$12 sps:$4 sm:$0xff]  }
  0xa1   :  { %1340 = vmatprep.subr.bf16.mxu1 %v4017_v30  ;;  %v4090_v30 = vld [vmem:[%s5528_s1 + $0x6c8] ss:$12 sps:$4 sm:$0xff]  }
  0xa3   :  { %1443 = vmatpush1.bf16.msra.mxu0 %v4018_v32  ;;  %v4093_v32 = vld [vmem:[%s5528_s1 + $0x61c] ss:$12 sps:$4 sm:$0xff]  }
  0xa4   :  { %1341 = vmatpush1.bf16.msra.mxu1 %v4015_v33  ;;  %1444 = vmatprep.subr.bf16.mxu0 %v4231_v1  ;;  %v4091_v33 = vld [vmem:[%s5528_s1 + $0x618] ss:$12 sps:$4 sm:$0xff]  }
  0xa5   :  { %1342 = vmatprep.subr.bf16.mxu1 %v4021_v34  ;;  %v4094_v34 = vld [vmem:[%s5528_s1 + $0x6e0] ss:$12 sps:$4 sm:$0xff]  }
  0xa7   :  { %1445 = vmatpush1.bf16.msra.mxu0 %v4022_v37  ;;  %v4095_v37 = vld [vmem:[%s5528_s1 + $0x630] ss:$12 sps:$4 sm:$0xff]  }
  0xa8   :  { %1343 = vmatpush1.bf16.msra.mxu1 %v4019_v36  ;;  %1978 = vmatprep.subr.bf16.mxu0 %v4025_v38  ;;  %v4097_v36 = vld [vmem:[%s5528_s1 + $0x634] ss:$12 sps:$4 sm:$0xff]   ;;  %v4098_v38 = vld [vmem:[%s5528_s1 + $0x6f8] ss:$12 sps:$4 sm:$0xff]  }
  0xa9   :  { %3720 = vmatprep.subr.bf16.mxu1 %v4026_v39  ;;  %v4101_v39 = vld [vmem:[%s5528_s1 + $0x64c] ss:$12 sps:$4 sm:$0xff]  }
  0xaa   :  { %1461 = vmatmul.mubr.bf16.vlgmr.msra.gmra.mrb[16].mxu0 %v4485_v5 }
  0xab   :  { %1359 = vmatmul.mubr.bf16.vlgmr.msra.gmra.mrb[16].mxu1 %v4485_v5  ;;  %1979 = vmatpush1.bf16.msra.mxu0 %v4023_v40  ;;  %v4036_v5 = vld [vmem:[%s5528_s1 + $0x5a8] ss:$12 sps:$4 sm:$0xff]   ;;  %v4104_v40 = vld [vmem:[%s5528_s1 + $0x70c] ss:$12 sps:$4 sm:$0xff]  }
  0xac   :  { %3721 = vmatpush3.bf16.msra.mxu1 %v4027_v41  ;;  %1980 = vmatprep.subr.bf16.mxu0 %v4030_v42  ;;  %v4099_v41 = vld [vmem:[%s5528_s1 + $0x648] ss:$12 sps:$4 sm:$0xff]  }
  0xad   :  { %3722 = vmatprep.subr.bf16.mxu1 %v4031_v43  ;;  %3287 = vmatprep.mubr.msk.bf16.mxu1 %vm561_vm0, %v4500_v9  ;;  %v4102_v42 = vld [vmem:[%s5528_s1 + $0x708] ss:$12 sps:$4 sm:$0xff]   ;;  %v4107_v43 = vld [vmem:[%s5528_s1 + $0x664] ss:$12 sps:$4 sm:$0xff]  }
  0xae   :  { %3289 = vmatprep.mubr.msk.bf16.mxu0 %vm561_vm0, %v4500_v9  ;;  %v4041_v9 = vld [vmem:[%s5528_s1 + $0x5c0] ss:$12 sps:$4 sm:$0xff]  }
  0xaf   :  { %1981 = vmatpush1.bf16.msra.mxu0 %v4028_v44  ;;  %v4110_v44 = vld [vmem:[%s5528_s1 + $0x724] ss:$12 sps:$4 sm:$0xff]  }
  0xb0   :  { %3723 = vmatpush3.bf16.msra.mxu1 %v4032_v45  ;;  %1982 = vmatprep.subr.bf16.mxu0 %v4035_v46  ;;  %v5043_v45 = vld [vmem:[%s5529_s0 + $0x8] ss:$16 sps:$4 sm:$0xff]   ;;  %v4105_v46 = vld [vmem:[%s5528_s1 + $0x660] ss:$12 sps:$4 sm:$0xff]  }
  0xb1   :  { %3724 = vmatprep.subr.bf16.mxu1 %v4036_v5  ;;  %v4108_v5 = vld [vmem:[%s5528_s1 + $0x720] ss:$12 sps:$4 sm:$0xff]  }
  0xb2   :  { %1469 = vmatmul.mubr.bf16.gmra.mrb[20].mxu0 %v4523_v15 }
  0xb3   :  { %1369 = vmatmul.mubr.bf16.gmra.mrb[20].mxu1 %v4523_v15  ;;  %1983 = vmatpush1.bf16.msra.mxu0 %v4033_v47  ;;  %v4046_v15 = vld [vmem:[%s5528_s1 + $0x5d8] ss:$12 sps:$4 sm:$0xff]   ;;  %v4113_v47 = vld [vmem:[%s5528_s1 + $0x67c] ss:$12 sps:$4 sm:$0xff]  }
  0xb4   :  { %3725 = vmatpush3.bf16.msra.mxu1 %v4037_v50  ;;  %1984 = vmatprep.subr.bf16.mxu0 %v4040_v51  ;;  %v5058_v50 = vld [vmem:[%s5529_s0 + $0x2c] ss:$16 sps:$4 sm:$0xff]  }
  0xb5   :  { %3726 = vmatprep.subr.bf16.mxu1 %v4041_v9  ;;  %2116 = vmatprep.mubr.bf16.mxu1 %v4859_v56  ;;  %v4116_v51 = vld [vmem:[%s5528_s1 + $0x73c] ss:$12 sps:$4 sm:$0xff]   ;;  %v4111_v9 = vld [vmem:[%s5528_s1 + $0x678] ss:$12 sps:$4 sm:$0xff]  }
  0xb6   :  { %2010 = vmatprep.mubr.bf16.mxu0 %v4859_v56 }
  0xb7   :  { %1985 = vmatpush1.bf16.msra.mxu0 %v4038_v52  ;;  %v4114_v52 = vld [vmem:[%s5528_s1 + $0x738] ss:$12 sps:$4 sm:$0xff]  }
  0xb8   :  { %3727 = vmatpush3.bf16.msra.mxu1 %v4042_v54  ;;  %1986 = vmatprep.subr.bf16.mxu0 %v4045_v55  ;;  %v4119_v54 = vld [vmem:[%s5528_s1 + $0x694] ss:$12 sps:$4 sm:$0xff]  }
  0xb9   :  { %3728 = vmatprep.subr.bf16.mxu1 %v4046_v15  ;;  %v4122_v55 = vld [vmem:[%s5528_s1 + $0x754] ss:$12 sps:$4 sm:$0xff]  }
  0xbb   :  { %1987 = vmatpush1.bf16.msra.mxu0 %v4043_v57 }
  0xbc   :  { %3729 = vmatpush3.bf16.msra.mxu1 %v4047_v58  ;;  %1988 = vmatprep.subr.bf16.mxu0 %v4050_v59  ;;  %v5083_v58 = vld [vmem:[%s5529_s0 + $0x28] ss:$16 sps:$4 sm:$0xff]   ;;  %v4117_v59 = vld [vmem:[%s5528_s1 + $0x690] ss:$12 sps:$4 sm:$0xff]  }
  0xbd   :  { %3730 = vmatprep.subr.bf16.mxu1 %v4051_v60 }
  0xbf   :  { %1989 = vmatpush1.bf16.msra.mxu0 %v4048_v31 }
  0xc0   :  { %3731 = vmatpush3.bf16.msra.mxu1 %v4052_v61  ;;  %1990 = vmatprep.subr.bf16.mxu0 %v4055_v62  ;;  %v4120_v61 = vld [vmem:[%s5528_s1 + $0x750] ss:$12 sps:$4 sm:$0xff]   ;;  %v4125_v62 = vld [vmem:[%s5528_s1 + $0x6ac] ss:$12 sps:$4 sm:$0xff]  }
  0xc1   :  { %3732 = vmatprep.subr.bf16.mxu1 %v4056_v63 }
  0xc3   :  { %1991 = vmatpush1.bf16.msra.mxu0 %v4053_v0  ;;  %v4128_v0 = vld [vmem:[%s5528_s1 + $0x76c] ss:$12 sps:$4 sm:$0xff]  }
  0xc4   :  { %3733 = vmatpush3.bf16.msra.mxu1 %v4057_v2  ;;  %1992 = vmatprep.subr.bf16.mxu0 %v4060_v3  ;;  %v4123_v3 = vld [vmem:[%s5528_s1 + $0x6a8] ss:$12 sps:$4 sm:$0xff]  }
  0xc5   :  { %3734 = vmatprep.subr.bf16.mxu1 %v4061_v4  ;;  %v4126_v4 = vld [vmem:[%s5528_s1 + $0x768] ss:$12 sps:$4 sm:$0xff]  }
  0xc7   :  { %1993 = vmatpush1.bf16.msra.mxu0 %v4058_v6  ;;  %v4131_v6 = vld [vmem:[%s5528_s1 + $0x6c4] ss:$12 sps:$4 sm:$0xff]  }
  0xc8   :  { %3735 = vmatpush3.bf16.msra.mxu1 %v4062_v7  ;;  %1994 = vmatprep.subr.bf16.mxu0 %v4065_v8  ;;  %v4134_v7 = vld [vmem:[%s5528_s1 + $0x784] ss:$12 sps:$4 sm:$0xff]   ;;  %v4129_v8 = vld [vmem:[%s5528_s1 + $0x6c0] ss:$12 sps:$4 sm:$0xff]  }
  0xc9   :  { %2133 = vmatprep.subr.bf16.mxu1 %v4231_v1 }
  0xcb   :  { %2117 = vmatmul.mubr.bf16.vlgmr.msra.gmra.mrb[24].mxu1 %v4921_v13  ;;  %1995 = vmatpush1.bf16.msra.mxu0 %v4063_v10  ;;  %v4132_v10 = vld [vmem:[%s5528_s1 + $0x780] ss:$12 sps:$4 sm:$0xff]  }
  0xcc   :  { %2134 = vmatpush1.bf16.msra.mxu1 %v4066_v11  ;;  %1996 = vmatprep.subr.bf16.mxu0 %v4069_v12  ;;  %v4137_v11 = vld [vmem:[%s5528_s1 + $0x6dc] ss:$12 sps:$4 sm:$0xff]  }
  0xcd   :  { %2135 = vmatprep.subr.bf16.mxu1 %v4231_v1  ;;  %2124 = vmatprep.mubr.bf16.mxu1 %v4937_v18  ;;  %v4140_v12 = vld [vmem:[%s5528_s1 + $0x79c] ss:$12 sps:$4 sm:$0xff]  }
  0xcf   :  { %1997 = vmatpush1.bf16.msra.mxu0 %v4067_v14 }
  0xd0   :  { %2136 = vmatpush1.bf16.msra.mxu1 %v4070_v16  ;;  %1998 = vmatprep.subr.bf16.mxu0 %v4073_v17  ;;  %v4135_v16 = vld [vmem:[%s5528_s1 + $0x6d8] ss:$12 sps:$4 sm:$0xff]  }
  0xd1   :  { %2137 = vmatprep.subr.bf16.mxu1 %v4231_v1 }
  0xd3   :  { %1999 = vmatpush1.bf16.msra.mxu0 %v4071_v19  ;;  %2125 = vmatmul.mubr.bf16.gmra.mrb[28].mxu1 %v4959_v22  ;;  %v4138_v19 = vld [vmem:[%s5528_s1 + $0x798] ss:$12 sps:$4 sm:$0xff]  }
  0xd4   :  { %2138 = vmatpush1.bf16.msra.mxu1 %v4074_v35  ;;  %2000 = vmatprep.subr.bf16.mxu0 %v4077_v20  ;;  %v4143_v35 = vld [vmem:[%s5528_s1 + $0x6f4] ss:$12 sps:$4 sm:$0xff]  }
  0xd5   :  { %2139 = vmatprep.subr.bf16.mxu1 %v4231_v1  ;;  %3467 = vmatprep.mubr.msk.bf16.mxu1 %vm561_vm0, %v4969_v49 }
  0xd7   :  { %2001 = vmatpush1.bf16.msra.mxu0 %v4075_v21 }
  0xd8   :  { %2140 = vmatpush1.bf16.msra.mxu1 %v4078_v48  ;;  %2002 = vmatprep.subr.bf16.mxu0 %v4081_v23  ;;  %v4146_v48 = vld [vmem:[%s5528_s1 + $0x7b4] ss:$12 sps:$4 sm:$0xff]  }
  0xd9   :  { %2141 = vmatprep.subr.bf16.mxu1 %v4231_v1 }
  0xdb   :  { %2003 = vmatpush1.bf16.msra.mxu0 %v4079_v24 }
  0xdc   :  { %2142 = vmatpush1.bf16.msra.mxu1 %v4082_v25  ;;  %2004 = vmatprep.subr.bf16.mxu0 %v4085_v53  ;;  %v4141_v25 = vld [vmem:[%s5528_s1 + $0x6f0] ss:$12 sps:$4 sm:$0xff]  }
  0xdd   :  { %2143 = vmatprep.subr.bf16.mxu1 %v4231_v1  ;;  %v4144_v53 = vld [vmem:[%s5528_s1 + $0x7b0] ss:$12 sps:$4 sm:$0xff]  }
  0xdf   :  { %2005 = vmatpush1.bf16.msra.mxu0 %v4083_v26  ;;  %v4150_v26 = vld [vmem:[%s5528_s1 + $0x7d0] ss:$12 sps:$4 sm:$0xff]  }
  0xe0   :  { %2144 = vmatpush1.bf16.msra.mxu1 %v4086_v27  ;;  %2006 = vmatprep.subr.bf16.mxu0 %v4089_v28  ;;  %v4149_v27 = vld [vmem:[%s5528_s1 + $0x7cc] ss:$12 sps:$4 sm:$0xff]   ;;  %v4151_v28 = vld [vmem:[%s5528_s1 + $0x710] ss:$12 sps:$4 sm:$0xff]  }
  0xe1   :  { %2145 = vmatprep.subr.bf16.mxu1 %v4231_v1 }
  0xe3   :  { %2007 = vmatpush1.bf16.msra.mxu0 %v4087_v29  ;;  %v4147_v29 = vld [vmem:[%s5528_s1 + $0x7c8] ss:$12 sps:$4 sm:$0xff]  }
  0xe4   :  { %2146 = vmatpush1.bf16.msra.mxu1 %v4090_v30  ;;  %2008 = vmatprep.subr.bf16.mxu0 %v4093_v32  ;;  %v4155_v30 = vld [vmem:[%s5528_s1 + $0x7e8] ss:$12 sps:$4 sm:$0xff]   ;;  %v4154_v32 = vld [vmem:[%s5528_s1 + $0x7e4] ss:$12 sps:$4 sm:$0xff]  }
  0xe5   :  { %2147 = vmatprep.subr.bf16.mxu1 %v4231_v1 }
  0xe7   :  { %2009 = vmatpush1.bf16.msra.mxu0 %v4091_v33  ;;  %v4156_v33 = vld [vmem:[%s5528_s1 + $0x728] ss:$12 sps:$4 sm:$0xff]  }
  0xe8   :  { %2148 = vmatpush1.bf16.msra.mxu1 %v4094_v34  ;;  %2031 = vmatprep.subr.bf16.mxu0 %v4097_v36  ;;  %v4152_v34 = vld [vmem:[%s5528_s1 + $0x7e0] ss:$12 sps:$4 sm:$0xff]  }
  0xe9   :  { %2149 = vmatprep.subr.bf16.mxu1 %v4231_v1  ;;  %v4160_v36 = vld [vmem:[%s5528_s1 + $0x800] ss:$12 sps:$4 sm:$0xff]  }
  0xea   :  { %2011 = vmatmul.mubr.bf16.vlgmr.msra.gmra.mrb[24].mxu0 %v4921_v13 }
  0xeb   :  { %2032 = vmatpush1.bf16.msra.mxu0 %v4095_v37  ;;  %2020 = vmatprep.mubr.bf16.mxu0 %v4937_v18  ;;  %v4159_v37 = vld [vmem:[%s5528_s1 + $0x7fc] ss:$12 sps:$4 sm:$0xff]  }
  0xec   :  { %2150 = vmatpush1.bf16.msra.mxu1 %v4098_v38  ;;  %2033 = vmatprep.subr.bf16.mxu0 %v4101_v39  ;;  %v4161_v38 = vld [vmem:[%s5528_s1 + $0x740] ss:$12 sps:$4 sm:$0xff]   ;;  %v4157_v39 = vld [vmem:[%s5528_s1 + $0x7f8] ss:$12 sps:$4 sm:$0xff]  }
  0xed   :  { %2683 = vmatprep.subr.bf16.mxu1 %v4104_v40  ;;  %v4165_v40 = vld [vmem:[%s5528_s1 + $0x818] ss:$12 sps:$4 sm:$0xff]  }
  0xef   :  { %2166 = vmatmul.mubr.bf16.vlgmr.msra.gmra.mrb[32].mxu1 %v5043_v45  ;;  %2034 = vmatpush1.bf16.msra.mxu0 %v4099_v41  ;;  %v4164_v41 = vld [vmem:[%s5528_s1 + $0x814] ss:$12 sps:$4 sm:$0xff]  }
  0xf0   :  { %2684 = vmatpush1.bf16.msra.mxu1 %v4102_v42  ;;  %2035 = vmatprep.subr.bf16.mxu0 %v4107_v43  ;;  %v4166_v42 = vld [vmem:[%s5528_s1 + $0x758] ss:$12 sps:$4 sm:$0xff]   ;;  %v4162_v43 = vld [vmem:[%s5528_s1 + $0x810] ss:$12 sps:$4 sm:$0xff]  }
  0xf1   :  { %2685 = vmatprep.subr.bf16.mxu1 %v4110_v44  ;;  %3468 = vmatprep.mubr.msk.bf16.mxu1 %vm561_vm0, %v5058_v50  ;;  %v4170_v44 = vld [vmem:[%s5528_s1 + $0x830] ss:$12 sps:$4 sm:$0xff]  }
  0xf2   :  { %2021 = vmatmul.mubr.bf16.gmra.mrb[28].mxu0 %v4959_v22 }
  0xf3   :  { %2036 = vmatpush1.bf16.msra.mxu0 %v4105_v46  ;;  %3465 = vmatprep.mubr.msk.bf16.mxu0 %vm561_vm0, %v4969_v49  ;;  %v4169_v46 = vld [vmem:[%s5528_s1 + $0x82c] ss:$12 sps:$4 sm:$0xff]  }
  0xf4   :  { %2686 = vmatpush1.bf16.msra.mxu1 %v4108_v5  ;;  %2037 = vmatprep.subr.bf16.mxu0 %v4113_v47 }
  0xf5   :  { %2687 = vmatprep.subr.bf16.mxu1 %v4116_v51  ;;  %v3680_v15 = vpop.f32.mrb[0].mxu1  ;;  %v4171_v51 = vld [vmem:[%s5528_s1 + $0x770] ss:$12 sps:$4 sm:$0xff]  }
  0xf6   :  { %v3681_v57 = vpop.f32.mrb[1].mxu1 }
  0xf7   :  { %2174 = vmatmul.mubr.bf16.gmra.mrb[36].mxu1 %v5083_v58  ;;  %2038 = vmatpush1.bf16.msra.mxu0 %v4111_v9  ;;  %v5089_v60 = vadd.f32 %v3681_v57, %v3680_v15  ;;  %v3683_v31 = vpop.f32.mrb[2].mxu1  ;;  %v4174_v57 = vld [vmem:[%s5528_s1 + $0x844] ss:$12 sps:$4 sm:$0xff]  }
  0xf8   :  { %2688 = vmatpush1.bf16.msra.mxu1 %v4114_v52  ;;  %2039 = vmatprep.subr.bf16.mxu0 %v4119_v54  ;;  %v3684_v63 = vpop.f32.mrb[3].mxu1  ;;  %v4167_v52 = vld [vmem:[%s5528_s1 + $0x828] ss:$12 sps:$4 sm:$0xff]  }
  0xf9   :  { %2689 = vmatprep.subr.bf16.mxu1 %v4122_v55  ;;  %2715 = vmatprep.mubr.bf16.mxu1 %v4859_v56  ;;  %v5101_v2 = vadd.f32 %v3684_v63, %v3683_v31  ;;  %v4175_v54 = vld [vmem:[%s5528_s1 + $0x848] ss:$12 sps:$4 sm:$0xff]   ;;  %v4180_v31 = vld [vmem:[%s5528_s1 + $0x860] ss:$12 sps:$4 sm:$0xff]  }
  0xfb   :  { %2040 = vmatpush1.bf16.msra.mxu0 %v4117_v59  ;;  %v4176_v59 = vld [vmem:[%s5528_s1 + $0x788] ss:$12 sps:$4 sm:$0xff]  }
  0xfc   :  { %2690 = vmatpush1.bf16.msra.mxu1 %v4120_v61  ;;  %2041 = vmatprep.subr.bf16.mxu0 %v4125_v62  ;;  %v4179_v61 = vld [vmem:[%s5528_s1 + $0x85c] ss:$12 sps:$4 sm:$0xff]  }
  0xfd   :  { %2691 = vmatprep.subr.bf16.mxu1 %v4128_v0  ;;  %v3686_v14 = vpop.f32.mrb[4].mxu1 }
  0xfe   :  { %v3687_v17 = vpop.f32.mrb[5].mxu1 }
  0xff   :  { %2042 = vmatpush1.bf16.msra.mxu0 %v4123_v3  ;;  %v5136_v20 = vadd.f32 %v3687_v17, %v3686_v14  ;;  %v3689_v21 = vpop.f32.mrb[6].mxu1  ;;  %v2923_v3 = vld [vmem:[%s5530_s2] sm:$0xff]  ;;  %v2924_v14 = vld [vmem:[%s5530_s2 + $0x8] sm:$0xff]  ;;  %v2926_v17 = vld [vmem:[%s5530_s2 + $0x18] sm:$0xff] }
 0x100   :  { %2692 = vmatpush1.bf16.msra.mxu1 %v4126_v4  ;;  %2043 = vmatprep.subr.bf16.mxu0 %v4131_v6  ;;  %v3690_v23 = vpop.f32.mrb[7].mxu1  ;;  %v2925_v4 = vld [vmem:[%s5530_s2 + $0x10] sm:$0xff] }
 0x101   :  { %2693 = vmatprep.subr.bf16.mxu1 %v4134_v7  ;;  %v5141_v24 = vadd.f32 %v3690_v23, %v3689_v21  ;;  %v4177_v7 = vld [vmem:[%s5528_s1 + $0x858] ss:$12 sps:$4 sm:$0xff]   ;;  %2929 = vperm.xlu0 %3809, %v2923_v3   ;;  %v4187_v21 = vld [vmem:[%s5528_s1 + $0x888] ss:$12 sps:$4 sm:$0xff]  }
 0x102   :  { %2939 = vperm.xlu1 %3810, %v2925_v4   ;;  %v4194_v23 = vld [vmem:[%s5528_s1 + $0x8a8] ss:$12 sps:$4 sm:$0xff]  }
 0x103   :  { %2044 = vmatpush1.bf16.msra.mxu0 %v4129_v8  ;;  %v4185_v8 = vld [vmem:[%s5528_s1 + $0x878] ss:$12 sps:$4 sm:$0xff]  }
 0x104   :  { %2694 = vmatpush1.bf16.msra.mxu1 %v4132_v10  ;;  %2045 = vmatprep.subr.bf16.mxu0 %v4137_v11  ;;  %v4184_v11 = vld [vmem:[%s5528_s1 + $0x874] ss:$12 sps:$4 sm:$0xff]  }
 0x105   :  { %2695 = vmatprep.subr.bf16.mxu1 %v4140_v12  ;;  %2934 = vperm.xlu0 %3809, %v2924_v14  }
 0x106   :  { %2944 = vperm.xlu1 %3810, %v2926_v17  }
 0x107   :  { %2046 = vmatpush1.bf16.msra.mxu0 %v4135_v16  ;;  %v4186_v16 = vld [vmem:[%s5528_s1 + $0x7b8] ss:$12 sps:$4 sm:$0xff]  }
 0x108   :  { %2696 = vmatpush1.bf16.msra.mxu1 %v4138_v19  ;;  %2047 = vmatprep.subr.bf16.mxu0 %v4143_v35  ;;  %v4182_v19 = vld [vmem:[%s5528_s1 + $0x870] ss:$12 sps:$4 sm:$0xff]   ;;  %v4189_v35 = vld [vmem:[%s5528_s1 + $0x88c] ss:$12 sps:$4 sm:$0xff]  }
 0x109   :  { %2697 = vmatprep.subr.bf16.mxu1 %v4146_v48  ;;  %v4193_v48 = vld [vmem:[%s5528_s1 + $0x8a4] ss:$12 sps:$4 sm:$0xff]  }
 0x10b   :  { %2048 = vmatpush1.bf16.msra.mxu0 %v4141_v25  ;;  %v4197_v25 = vld [vmem:[%s5528_s1 + $0x8bc] ss:$12 sps:$4 sm:$0xff]  }
 0x10c   :  { %2698 = vmatpush1.bf16.msra.mxu1 %v4144_v53  ;;  %3748 = vmatprep.subr.bf16.mxu0 %v4150_v26  ;;  %v4195_v53 = vld [vmem:[%s5528_s1 + $0x8b8] ss:$12 sps:$4 sm:$0xff]   ;;  %v4201_v26 = vld [vmem:[%s5528_s1 + $0x8d4] ss:$12 sps:$4 sm:$0xff]  }
 0x10d   :  { %2699 = vmatprep.subr.bf16.mxu1 %v4149_v27  ;;  %v4199_v27 = vld [vmem:[%s5528_s1 + $0x8d0] ss:$12 sps:$4 sm:$0xff]  }
 0x10e   :  { %2064 = vmatmul.mubr.bf16.vlgmr.msra.gmra.mrb[24].mxu0 %v5043_v45 }
 0x10f   :  { %3749 = vmatpush3.bf16.msra.mxu0 %v4151_v28  ;;  %3466 = vmatprep.mubr.msk.bf16.mxu0 %vm561_vm0, %v5058_v50 }
 0x110   :  { %2700 = vmatpush1.bf16.msra.mxu1 %v4147_v29  ;;  %3750 = vmatprep.subr.bf16.mxu0 %v4155_v30  ;;  %v4205_v29 = vld [vmem:[%s5528_s1 + $0x8ec] ss:$12 sps:$4 sm:$0xff]  }
 0x111   :  { %2701 = vmatprep.subr.bf16.mxu1 %v4154_v32  ;;  %v4206_v32 = vld [vmem:[%s5528_s1 + $0x8f0] ss:$12 sps:$4 sm:$0xff]  }
 0x113   :  { %3751 = vmatpush3.bf16.msra.mxu0 %v4156_v33 }
 0x114   :  { %2702 = vmatpush1.bf16.msra.mxu1 %v4152_v34  ;;  %3752 = vmatprep.subr.bf16.mxu0 %v4160_v36  ;;  %v4203_v34 = vld [vmem:[%s5528_s1 + $0x8e8] ss:$12 sps:$4 sm:$0xff]  }
 0x115   :  { %2703 = vmatprep.subr.bf16.mxu1 %v4159_v37  ;;  %v4210_v36 = vld [vmem:[%s5528_s1 + $0x908] ss:$12 sps:$4 sm:$0xff]   ;;  %v4207_v37 = vld [vmem:[%s5528_s1 + $0x900] ss:$12 sps:$4 sm:$0xff]  }
 0x116   :  { %2074 = vmatmul.mubr.bf16.gmra.mrb[28].mxu0 %v5083_v58 }
 0x117   :  { %3753 = vmatpush3.bf16.msra.mxu0 %v4161_v38  ;;  %2821 = vmatprep.mubr.bf16.mxu0 %v4859_v56 }
 0x118   :  { %2704 = vmatpush1.bf16.msra.mxu1 %v4157_v39  ;;  %3754 = vmatprep.subr.bf16.mxu0 %v4165_v40  ;;  %v4213_v39 = vld [vmem:[%s5528_s1 + $0x91c] ss:$12 sps:$4 sm:$0xff]  }
 0x119   :  { %2705 = vmatprep.subr.bf16.mxu1 %v4164_v41 }
 0x11a   :  { %v757_v5 = vpop.f32.mrb[8].mxu1 }
 0x11b   :  { %v5209_v47 = vadd.f32 %v5089_v60, %v757_v5  ;;  %v759_v56 = vpop.f32.mrb[9].mxu1  ;;  %3755 = vmatpush3.bf16.msra.mxu0 %v4166_v42  ;;  %v4172_v60 = vld [vmem:[%s5528_s1 + $0x840] ss:$12 sps:$4 sm:$0xff]   ;;  %v4218_v5 = vld [vmem:[%s5528_s1 + $0x938] ss:$12 sps:$4 sm:$0xff]  }
 0x11c   :  { %v760_v9 = vpop.f32.mrb[10].mxu1  ;;  %2706 = vmatpush1.bf16.msra.mxu1 %v4162_v43  ;;  %3756 = vmatprep.subr.bf16.mxu0 %v4170_v44  ;;  %v4214_v42 = vld [vmem:[%s5528_s1 + $0x920] ss:$12 sps:$4 sm:$0xff]   ;;  %v4211_v44 = vld [vmem:[%s5528_s1 + $0x918] ss:$12 sps:$4 sm:$0xff]  }
 0x11d   :  { %v5221_v55 = vadd.f32 %v5101_v2, %v760_v9  ;;  %v762_v15 = vpop.f32.mrb[11].mxu1  ;;  %2707 = vmatprep.subr.bf16.mxu1 %v4169_v46  ;;  %v4181_v2 = vld [vmem:[%s5528_s1 + $0x7a0] ss:$12 sps:$4 sm:$0xff]   ;;  %v4215_v56 = vld [vmem:[%s5528_s1 + $0x930] ss:$12 sps:$4 sm:$0xff]  }
 0x11e   :  { %v4217_v46 = vld [vmem:[%s5528_s1 + $0x934] ss:$12 sps:$4 sm:$0xff]   ;;  %v4222_v9 = vld [vmem:[%s5528_s1 + $0x950] ss:$12 sps:$4 sm:$0xff]  }
 0x11f   :  { %3757 = vmatpush3.bf16.msra.mxu0 %v4171_v51  ;;  %v4221_v51 = vld [vmem:[%s5528_s1 + $0x94c] ss:$12 sps:$4 sm:$0xff]  }
 0x120   :  { %2708 = vmatpush1.bf16.msra.mxu1 %v4167_v52  ;;  %3758 = vmatprep.subr.bf16.mxu0 %v4175_v54  ;;  %v4219_v52 = vld [vmem:[%s5528_s1 + $0x948] ss:$12 sps:$4 sm:$0xff]  }
 0x121   :  { %2709 = vmatprep.subr.bf16.mxu1 %v4174_v57 }
 0x122   :  { %v765_v62 = vpop.f32.mrb[12].mxu1 }
 0x123   :  { %v5239_v63 = vadd.f32 %v5136_v20, %v765_v62  ;;  %v767_v0 = vpop.f32.mrb[13].mxu1  ;;  %3759 = vmatpush3.bf16.msra.mxu0 %v4176_v59  ;;  %v4190_v20 = vld [vmem:[%s5528_s1 + $0x890] ss:$12 sps:$4 sm:$0xff]  }
 0x124   :  { %v768_v6 = vpop.f32.mrb[14].mxu1  ;;  %2710 = vmatpush1.bf16.msra.mxu1 %v4172_v60  ;;  %3760 = vmatprep.subr.bf16.mxu0 %v4180_v31 }
 0x125   :  { %v5257_v10 = vadd.f32 %v5141_v24, %v768_v6  ;;  %2711 = vmatprep.subr.bf16.mxu1 %v4179_v61  ;;  %v770_v12 = vpop.f32.mrb[15].mxu1  ;;  %v4191_v24 = vld [vmem:[%s5528_s1 + $0x8a0] ss:$12 sps:$4 sm:$0xff]  }
 0x127   :  { %3761 = vmatpush3.bf16.msra.mxu0 %v4181_v2 }
 0x128   :  { %2712 = vmatpush1.bf16.msra.mxu1 %v4177_v7  ;;  %3762 = vmatprep.subr.bf16.mxu0 %v4185_v8 }
 0x129   :  { %2713 = vmatprep.subr.bf16.mxu1 %v4184_v11 }
 0x12b   :  { %3763 = vmatpush3.bf16.msra.mxu0 %v4186_v16 }
 0x12c   :  { %2714 = vmatpush1.bf16.msra.mxu1 %v4182_v19  ;;  %2838 = vmatprep.subr.bf16.mxu0 %v4231_v1 }
 0x12d   :  { %2736 = vmatprep.subr.bf16.mxu1 %v4189_v35 }
 0x12e   :  { %2822 = vmatmul.mubr.bf16.vlgmr.msra.gmra.mrb[32].mxu0 %v4921_v13 }
 0x12f   :  { %2716 = vmatmul.mubr.bf16.vlgmr.msra.gmra.mrb[40].mxu1 %v4921_v13  ;;  %2839 = vmatpush1.bf16.msra.mxu0 %v4190_v20  ;;  %v4198_v13 = vld [vmem:[%s5528_s1 + $0x8c0] ss:$12 sps:$4 sm:$0xff]  }
 0x130   :  { %2737 = vmatpush1.bf16.msra.mxu1 %v4187_v21  ;;  %2840 = vmatprep.subr.bf16.mxu0 %v4231_v1 }
 0x131   :  { %2738 = vmatprep.subr.bf16.mxu1 %v4193_v48  ;;  %2829 = vmatprep.mubr.bf16.mxu0 %v4937_v18 }
 0x132   :  { %2725 = vmatprep.mubr.bf16.mxu1 %v4937_v18  ;;  %v4202_v18 = vld [vmem:[%s5528_s1 + $0x8d8] ss:$12 sps:$4 sm:$0xff]  }
 0x133   :  { %2841 = vmatpush1.bf16.msra.mxu0 %v4194_v23 }
 0x134   :  { %2739 = vmatpush1.bf16.msra.mxu1 %v4191_v24  ;;  %2842 = vmatprep.subr.bf16.mxu0 %v4231_v1 }
 0x135   :  { %2740 = vmatprep.subr.bf16.mxu1 %v4197_v25 }
 0x136   :  { %2830 = vmatmul.mubr.bf16.gmra.mrb[36].mxu0 %v4959_v22 }
 0x137   :  { %2843 = vmatpush1.bf16.msra.mxu0 %v4198_v13  ;;  %2726 = vmatmul.mubr.bf16.gmra.mrb[44].mxu1 %v4959_v22 }
 0x138   :  { %2741 = vmatpush1.bf16.msra.mxu1 %v4195_v53  ;;  %2844 = vmatprep.subr.bf16.mxu0 %v4231_v1 }
 0x139   :  { %v5320_v28 = vpop.f32.mrb[0].mxu0  ;;  %2742 = vmatprep.subr.bf16.mxu1 %v4201_v26  ;;  %3644 = vmatprep.mubr.msk.bf16.mxu1 %vm561_vm0, %v4969_v49 }
 0x13a   :  { %v5327_v30 = vpop.f32.mrb[1].mxu0  ;;  %3646 = vmatprep.mubr.msk.bf16.mxu0 %vm561_vm0, %v4969_v49  ;;  %v4209_v49 = vld [vmem:[%s5528_s1 + $0x904] ss:$12 sps:$4 sm:$0xff]  }
 0x13b   :  { %v5331_v22 = vpop.f32.mrb[2].mxu0  ;;  %2845 = vmatpush1.bf16.msra.mxu0 %v4202_v18 }
 0x13c   :  { %2743 = vmatpush1.bf16.msra.mxu1 %v4199_v27  ;;  %v5336_v33 = vpop.f32.mrb[3].mxu0  ;;  %2846 = vmatprep.subr.bf16.mxu0 %v4231_v1 }
 0x13d   :  { %2744 = vmatprep.subr.bf16.mxu1 %v4205_v29 }
 0x13f   :  { %2847 = vmatpush1.bf16.msra.mxu0 %v4206_v32 }
 0x140   :  { %2745 = vmatpush1.bf16.msra.mxu1 %v4203_v34  ;;  %2848 = vmatprep.subr.bf16.mxu0 %v4231_v1 }
 0x141   :  { %v5352_v38 = vpop.f32.mrb[4].mxu0  ;;  %2746 = vmatprep.subr.bf16.mxu1 %v4209_v49 }
 0x142   :  { %v5357_v40 = vpop.f32.mrb[5].mxu0 }
 0x143   :  { %v5359_v41 = vpop.f32.mrb[6].mxu0  ;;  %2849 = vmatpush1.bf16.msra.mxu0 %v4210_v36 }
 0x144   :  { %2747 = vmatpush1.bf16.msra.mxu1 %v4207_v37  ;;  %v5364_v43 = vpop.f32.mrb[7].mxu0  ;;  %2850 = vmatprep.subr.bf16.mxu0 %v4231_v1 }
 0x145   :  { %2748 = vmatprep.subr.bf16.mxu1 %v4213_v39 }
 0x147   :  { %2851 = vmatpush1.bf16.msra.mxu0 %v4214_v42 }
 0x148   :  { %2749 = vmatpush1.bf16.msra.mxu1 %v4211_v44  ;;  %2852 = vmatprep.subr.bf16.mxu0 %v4231_v1 }
 0x149   :  { %2750 = vmatprep.subr.bf16.mxu1 %v4217_v46 }
 0x14b   :  { %2853 = vmatpush1.bf16.msra.mxu0 %v4218_v5 }
 0x14c   :  { %2751 = vmatpush1.bf16.msra.mxu1 %v4215_v56  ;;  %2854 = vmatprep.subr.bf16.mxu0 %v4231_v1 }
 0x14d   :  { %2752 = vmatprep.subr.bf16.mxu1 %v4221_v51 }
 0x14f   :  { %2855 = vmatpush1.bf16.msra.mxu0 %v4222_v9 }
 0x150   :  { %2753 = vmatpush1.bf16.msra.mxu1 %v4219_v52 }
 0x152   :  { %2871 = vmatmul.mubr.bf16.vlgmr.msra.gmra.mrb[40].mxu0 %v5043_v45 }
 0x153   :  { %2769 = vmatmul.mubr.bf16.vlgmr.msra.gmra.mrb[40].mxu1 %v5043_v45  ;;  %3647 = vmatprep.mubr.msk.bf16.mxu0 %vm561_vm0, %v5058_v50 }
 0x154   :  { %3645 = vmatprep.mubr.msk.bf16.mxu1 %vm561_vm0, %v5058_v50 }
 0x159   :  { %v3708_v54 = vpop.f32.mrb[8].mxu0 }
 0x15a   :  { %v3709_v15 = vpop.f32.mrb[9].mxu0  ;;  %2879 = vmatmul.mubr.bf16.gmra.mrb[44].mxu0 %v5083_v58 }
 0x15b   :  { %v3710_v57 = vadd.f32 %v3709_v15, %v3708_v54  ;;  %2779 = vmatmul.mubr.bf16.gmra.mrb[44].mxu1 %v5083_v58  ;;  %v3711_v1 = vpop.f32.mrb[10].mxu0 }
 0x15c   :  { %v3712_v59 = vpop.f32.mrb[11].mxu0 }
 0x15d   :  { %v3713_v60 = vadd.f32 %v3712_v59, %v3711_v1 }
 0x161   :  { %v3714_v31 = vpop.f32.mrb[12].mxu0 }
 0x162   :  { %v3715_v61 = vpop.f32.mrb[13].mxu0 }
 0x163   :  { %v3716_v62 = vadd.f32 %v3715_v61, %v3714_v31  ;;  %v3717_v45 = vpop.f32.mrb[14].mxu0 }
 0x164   :  { %v3718_v0 = vpop.f32.mrb[15].mxu0 }
 0x165   :  { %v3719_v2 = vadd.f32 %v3718_v0, %v3717_v45 }
 0x17d   :  { %v1462_v3 = vpop.f32.mrb[16].mxu0 }
 0x17e   :  { %v5398_v4 = vpop.f32.mrb[16].mxu1  ;;  %v5400_v50 = vadd.f32 %v3710_v57, %v1462_v3  ;;  %v1464_v6 = vpop.f32.mrb[17].mxu0 }
 0x17f   :  { %v2887_v7 = vmax.f32 %v5320_v28, %v5398_v4  ;;  %v5404_v8 = vpop.f32.mrb[17].mxu1  ;;  %v1465_v58 = vpop.f32.mrb[18].mxu0 }
 0x180   :  { %v2889_v11 = vmax.f32 %v5209_v47, %v5400_v50  ;;  %v2888_v12 = vmax.f32 %v5327_v30, %v5404_v8  ;;  %v5410_v14 = vpop.f32.mrb[18].mxu1  ;;  %v5412_v16 = vadd.f32 %v3713_v60, %v1465_v58  ;;  %v1467_v17 = vpop.f32.mrb[19].mxu0 }
 0x181   :  { %v2890_v19 = vmax.f32 %v5331_v22, %v5410_v14  ;;  %v5416_v35 = vpop.f32.mrb[19].mxu1 }
 0x182   :  { %v2891_v21 = vmax.f32 %v5336_v33, %v5416_v35  ;;  %v5532_v47 = vmax.f32 %v5221_v55, %v5412_v16 }
 0x185   :  { %v1470_v48 = vpop.f32.mrb[20].mxu0 }
 0x186   :  { %v5422_v23 = vpop.f32.mrb[20].mxu1  ;;  %v5424_v24 = vadd.f32 %v3716_v62, %v1470_v48  ;;  %v1472_v25 = vpop.f32.mrb[21].mxu0 }
 0x187   :  { %v5428_v53 = vpop.f32.mrb[21].mxu1  ;;  %v1473_v26 = vpop.f32.mrb[22].mxu0 }
 0x188   :  { %v5434_v29 = vpop.f32.mrb[22].mxu1  ;;  %v5436_v32 = vadd.f32 %v3719_v2, %v1473_v26  ;;  %v1475_v34 = vpop.f32.mrb[23].mxu0 }
 0x189   :  { %v5440_v36 = vpop.f32.mrb[23].mxu1 }
 0x19e   :  { %v3736_v42 = vpop.f32.mrb[24].mxu1 }
 0x19f   :  { %v3737_v44 = vpop.f32.mrb[25].mxu1 }
 0x1a0   :  { %v3738_v46 = vadd.f32 %v3737_v44, %v3736_v42  ;;  %v3739_v5 = vpop.f32.mrb[26].mxu1 }
 0x1a1   :  { %v3740_v56 = vpop.f32.mrb[27].mxu1 }
 0x1a2   :  { %v3741_v51 = vadd.f32 %v3740_v56, %v3739_v5 }
 0x1a6   :  { %v3742_v9 = vpop.f32.mrb[28].mxu1 }
 0x1a7   :  { %v3743_v52 = vpop.f32.mrb[29].mxu1 }
 0x1a8   :  { %v3744_v54 = vadd.f32 %v3743_v52, %v3742_v9  ;;  %v3745_v15 = vpop.f32.mrb[30].mxu1 }
 0x1a9   :  { %v3746_v57 = vpop.f32.mrb[31].mxu1 }
 0x1aa   :  { %v3747_v1 = vadd.f32 %v3746_v57, %v3745_v15 }
 0x1c2   :  { %v2167_v59 = vpop.f32.mrb[32].mxu1 }
 0x1c3   :  { %v2168_v60 = vadd.f32 %v3738_v46, %v2167_v59  ;;  %v2169_v31 = vpop.f32.mrb[33].mxu1 }
 0x1c4   :  { %v2170_v61 = vpop.f32.mrb[34].mxu1 }
 0x1c5   :  { %v2171_v62 = vadd.f32 %v3741_v51, %v2170_v61  ;;  %v2172_v45 = vpop.f32.mrb[35].mxu1 }
 0x1ca   :  { %v2175_v0 = vpop.f32.mrb[36].mxu1 }
 0x1cb   :  { %v5446_v2 = vadd.f32 %v3744_v54, %v2175_v0  ;;  %v2177_v3 = vpop.f32.mrb[37].mxu1  ;;  %v2930_v0 = vpop.permute.xlu0 %2929 }
 0x1cc   :  { %v2178_v6 = vpop.f32.mrb[38].mxu1 }
 0x1cd   :  { %v5448_v58 = vadd.f32 %v3747_v1, %v2178_v6  ;;  %v2180_v17 = vpop.f32.mrb[39].mxu1 }
 0x1e1   :  { %v2065_v48 = vpop.f32.mrb[24].mxu0 }
 0x1e2   :  { %v2067_v25 = vpop.f32.mrb[25].mxu0 }
 0x1e3   :  { %v2069_v26 = vpop.f32.mrb[26].mxu0 }
 0x1e4   :  { %v2071_v34 = vpop.f32.mrb[27].mxu0 }
 0x1e9   :  { %v5450_v42 = vpop.f32.mrb[28].mxu0 }
 0x1ea   :  { %v5452_v44 = vpop.f32.mrb[29].mxu0 }
 0x1eb   :  { %v5454_v46 = vpop.f32.mrb[30].mxu0 }
 0x1ec   :  { %v5456_v5 = vpop.f32.mrb[31].mxu0 }
 0x201   :  { %v3764_v56 = vpop.f32.mrb[32].mxu0 }
 0x202   :  { %v3765_v51 = vpop.f32.mrb[33].mxu0 }
 0x203   :  { %v3766_v9 = vadd.f32 %v3765_v51, %v3764_v56  ;;  %v3767_v52 = vpop.f32.mrb[34].mxu0 }
 0x204   :  { %v3768_v54 = vpop.f32.mrb[35].mxu0 }
 0x205   :  { %v3769_v15 = vadd.f32 %v3768_v54, %v3767_v52 }
 0x209   :  { %v3770_v57 = vpop.f32.mrb[36].mxu0 }
 0x20a   :  { %v3771_v1 = vpop.f32.mrb[37].mxu0 }
 0x20b   :  { %v3772_v59 = vadd.f32 %v3771_v1, %v3770_v57  ;;  %v3773_v31 = vpop.f32.mrb[38].mxu0 }
 0x20c   :  { %v3774_v61 = vpop.f32.mrb[39].mxu0 }
 0x20d   :  { %v3775_v45 = vadd.f32 %v3774_v61, %v3773_v31  ;;  %v5533_v31 = vmax.f32 %v5352_v38, %v5422_v23 }
 0x225   :  { %v2872_v3 = vpop.f32.mrb[40].mxu0 }
 0x226   :  { %v2770_v6 = vpop.f32.mrb[40].mxu1  ;;  %v2873_v17 = vadd.f32 %v3766_v9, %v2872_v3  ;;  %v2874_v37 = vpop.f32.mrb[41].mxu0 }
 0x227   :  { %v2899_v39 = vmax.f32 %v2065_v48, %v2770_v6  ;;  %v2772_v49 = vpop.f32.mrb[41].mxu1  ;;  %v2875_v27 = vpop.f32.mrb[42].mxu0 }
 0x228   :  { %v2901_v18 = vmax.f32 %v2168_v60, %v2873_v17  ;;  %v2900_v13 = vmax.f32 %v2067_v25, %v2772_v49  ;;  %v2774_v56 = vpop.f32.mrb[42].mxu1  ;;  %v2876_v51 = vadd.f32 %v3769_v15, %v2875_v27  ;;  %v2877_v20 = vpop.f32.mrb[43].mxu0 }
 0x229   :  { %v2911_v52 = vmax.f32 %v2887_v7, %v2899_v39  ;;  %v2902_v54 = vmax.f32 %v2069_v26, %v2774_v56  ;;  %v2776_v57 = vpop.f32.mrb[43].mxu1  ;;  %v2935_v49 = vpop.permute.xlu0 %2934  ;;  %v5535_v56 = vmax.f32 %v5357_v40, %v5428_v53 }
 0x22a   :  { %v2913_v1 = vmax.f32 %v2889_v11, %v2901_v18  ;;  %v2912_v37 = vmax.f32 %v2888_v12, %v2900_v13  ;;  %v2904_v48 = vmax.f32 %v2171_v62, %v2876_v51  ;;  %v2903_v60 = vmax.f32 %v2071_v34, %v2776_v57  ;;  %v2940_v11 = vpop.permute.xlu1 %2939 }
 0x22b   :  { %v2947_v25 = vadd.f32 %v2930_v0, %v2911_v52  ;;  %v2914_v20 = vmax.f32 %v2890_v19, %v2902_v54  ;;  %v5536_v52 = vmax.f32 %v5359_v41, %v5434_v29  ;;  %v5538_v57 = vmax.f32 %v5257_v10, %v5436_v32 }
 0x22c   :  { %v2948_v28 = vadd.f32 %v2930_v0, %v2912_v37  ;;  %v2949_v4 = vadd.f32 %v2930_v0, %v2913_v1  ;;  %v2915_v7 = vmax.f32 %v2891_v21, %v2903_v60  ;;  %v2916_v50 = vmax.f32 %v5532_v47, %v2904_v48 }
 0x22d   :  { %v2959_v30 = vmax.f32 %v2947_v25, 0.0  ;;  %v2950_v8 = vadd.f32 %v2935_v49, %v2914_v20  ;;  %v2880_v12 = vpop.f32.mrb[44].mxu0 }
 0x22e   :  { %v2960_v13 = vmax.f32 %v2948_v28, 0.0  ;;  %v2961_v18 = vmax.f32 %v2949_v4, 0.0  ;;  %v2951_v27 = vadd.f32 %v2935_v49, %v2915_v7  ;;  %v2952_v39 = vadd.f32 %v2935_v49, %v2916_v50  ;;  %v2780_v22 = vpop.f32.mrb[44].mxu1  ;;  %v2882_v14 = vpop.f32.mrb[45].mxu0 }
 0x22f   :  { %v2962_v19 = vmax.f32 %v2950_v8, 0.0  ;;  %v2905_v62 = vmax.f32 %v5450_v42, %v2780_v22  ;;  %v2881_v33 = vadd.f32 %v3772_v59, %v2880_v12  ;;  %v2782_v35 = vpop.f32.mrb[45].mxu1  ;;  %v2883_v21 = vpop.f32.mrb[46].mxu0 }
 0x230   :  { %v3656_v26 = vpack.c.bf16 %v2960_v13, %v2959_v30  ;;  %v3657_v55 = vpack.c.bf16 %v2961_v18, %v2961_v18  ;;  %v2963_v16 = vmax.f32 %v2951_v27, 0.0  ;;  %v2964_v34 = vmax.f32 %v2952_v39, 0.0  ;;  %v2784_v9 = vpop.f32.mrb[46].mxu1  ;;  %v2885_v15 = vpop.f32.mrb[47].mxu0 }
 0x231   :  { %v2917_v61 = vmax.f32 %v5533_v31, %v2905_v62  ;;  %v2907_v0 = vmax.f32 %v5446_v2, %v2881_v33  ;;  %v2906_v3 = vmax.f32 %v5452_v44, %v2782_v35  ;;  %v2908_v6 = vmax.f32 %v5454_v46, %v2784_v9  ;;  %v2786_v42 = vpop.f32.mrb[47].mxu1  ;;  %v2945_v53 = vpop.permute.xlu1 %2944 }
 0x232   :  { %3011 = vst [vmem:[%s5531_s3] sm:$0xff] %v3656_v26  ;;  %3013 = vst.msk [vmem:[%s5531_s3 + $0x8] sm:$0xf] %vm3012_vm1, %v3657_v55  ;;  %v3658_v59 = vpack.c.bf16 %v2963_v16, %v2962_v19  ;;  %v3659_v17 = vpack.c.bf16 %v2964_v34, %v2964_v34  ;;  %v2884_v38 = vadd.f32 %v3775_v45, %v2883_v21 }
 0x233   :  { %v2909_v23 = vmax.f32 %v5456_v5, %v2786_v42  ;;  %v2953_v2 = vadd.f32 %v2940_v11, %v2917_v61  ;;  %v5534_v44 = vmax.f32 %v5239_v63, %v5424_v24  ;;  %v2918_v51 = vmax.f32 %v5535_v56, %v2906_v3 }
 0x234   :  { %v2920_v54 = vmax.f32 %v5536_v52, %v2908_v6  ;;  %3014 = vst [vmem:[%s5531_s3 + $0xc] sm:$0xff] %v3658_v59  ;;  %3015 = vst.msk [vmem:[%s5531_s3 + $0x14] sm:$0xf] %vm3012_vm1, %v3659_v17  ;;  %v2910_v63 = vmax.f32 %v5448_v58, %v2884_v38  ;;  %v5537_v24 = vmax.f32 %v5364_v43, %v5440_v36 }
 0x235   :  { %v2919_v46 = vmax.f32 %v5534_v44, %v2907_v0  ;;  %v2965_v5 = vmax.f32 %v2953_v2, 0.0  ;;  %v2954_v41 = vadd.f32 %v2940_v11, %v2918_v51 }
 0x236   :  { %v2921_v40 = vmax.f32 %v5537_v24, %v2909_v23  ;;  %v2956_v29 = vadd.f32 %v2945_v53, %v2920_v54  ;;  %v2922_v1 = vmax.f32 %v5538_v57, %v2910_v63 }
 0x237   :  { %v2955_v45 = vadd.f32 %v2940_v11, %v2919_v46  ;;  %v2966_v60 = vmax.f32 %v2954_v41, 0.0 }
 0x238   :  { %v2957_v37 = vadd.f32 %v2945_v53, %v2921_v40  ;;  %v2968_v49 = vmax.f32 %v2956_v29, 0.0  ;;  %v2958_v25 = vadd.f32 %v2945_v53, %v2922_v1 }
 0x239   :  { %v2967_v48 = vmax.f32 %v2955_v45, 0.0  ;;  %v3660_v28 = vpack.c.bf16 %v2966_v60, %v2965_v5 }
 0x23a   :  { %v2969_v20 = vmax.f32 %v2957_v37, 0.0  ;;  %v2970_v4 = vmax.f32 %v2958_v25, 0.0 }
 0x23b   :  { %v3661_v58 = vpack.c.bf16 %v2967_v48, %v2967_v48  ;;  %3016 = vst [vmem:[%s5531_s3 + $0x18] sm:$0xff] %v3660_v28 }
 0x23c   :  { %v3662_v43 = vpack.c.bf16 %v2969_v20, %v2968_v49  ;;  %v3663_v10 = vpack.c.bf16 %v2970_v4, %v2970_v4 }
 0x23d   :  { %3017 = vst.msk [vmem:[%s5531_s3 + $0x20] sm:$0xf] %vm3012_vm1, %v3661_v58 }
 0x23e   :  { %3018 = vst [vmem:[%s5531_s3 + $0x24] sm:$0xff] %v3662_v43  ;;  %3019 = vst.msk [vmem:[%s5531_s3 + $0x2c] sm:$0xf] %vm3012_vm1, %v3663_v10 }

// kernel: cnn_forward.6
= control target key start
LH: loop header
LB: loop body
LE: loop exit
PB: predicated region body
PF: predicated region fallthrough
CT: control target
= control target key end

     0   :  { %v1883_v1 = vmov 0   ;;  %vm235_vm0 = vcmask 261120   ;;  %vm1323_vm1 = vcmask 584704   ;;  %s2396_s1 = inlined_call_operand.vmem [shape: bf16[4,288,72], index: 1, kind: input, shape index: {}]   ;;  %s2397_s0 = inlined_call_operand.vmem [shape: bf16[64,288], index: 0, kind: input, shape index: {}]   ;;  %s2398_s2 = inlined_call_operand.vmem [shape: f32[64,1], index: 2, kind: input, shape index: {}]   ;;  %s2399_s3 = inlined_call_operand.vmem [shape: bf16[64,72], index: 3, kind: output, shape index: {}]  }
   0x1   :  { %v1795_v0 = vld [vmem:[%s2396_s1 + $0x40] sm:$0xff]   ;;  %1794 = vset.pattern.permute.xlu1 %v1883_v1  ;;  %1793 = vset.pattern.permute.xlu0 %v1883_v1  ;;  %v1796_v2 = vld [vmem:[%s2396_s1 + $0xd0] sm:$0xff]   ;;  %v1799_v5 = vld [vmem:[%s2396_s1 + $0x48] sm:$0xff]  }
   0x2   :  { %1560 = vmatprep.subr.bf16.mxu0 %v1795_v0  ;;  %v1797_v3 = vld [vmem:[%s2396_s1] sm:$0xff]   ;;  %1606 = vmatprep.subr.bf16.mxu1 %v1796_v2  ;;  %v1798_v4 = vld [vmem:[%s2396_s1 + $0x90] sm:$0xff]   ;;  %v1800_v6 = vld [vmem:[%s2396_s1 + $0xd8] sm:$0xff]  }
   0x3   :  { %1561 = vmatpush3.bf16.msra.mxu0 %v1797_v3  ;;  %1607 = vmatpush3.bf16.msra.mxu1 %v1798_v4  ;;  %v1801_v7 = vld [vmem:[%s2396_s1 + $0x8] sm:$0xff]   ;;  %v1802_v8 = vld [vmem:[%s2396_s1 + $0x98] sm:$0xff]   ;;  %v1803_v9 = vld [vmem:[%s2396_s1 + $0x50] sm:$0xff]  }
   0x4   :  { %1562 = vmatprep.subr.bf16.mxu0 %v1799_v5  ;;  %1608 = vmatprep.subr.bf16.mxu1 %v1800_v6  ;;  %v1804_v10 = vld [vmem:[%s2396_s1 + $0xe0] sm:$0xff]   ;;  %v1805_v11 = vld [vmem:[%s2396_s1 + $0x10] sm:$0xff]   ;;  %v1807_v13 = vld [vmem:[%s2396_s1 + $0x58] sm:$0xff]  }
   0x5   :  { %v1806_v12 = vld [vmem:[%s2396_s1 + $0xa0] sm:$0xff]   ;;  %v1808_v14 = vld [vmem:[%s2396_s1 + $0xe8] sm:$0xff]   ;;  %v1809_v15 = vld [vmem:[%s2396_s1 + $0x18] sm:$0xff]  }
   0x6   :  { %v1810_v16 = vld [vmem:[%s2396_s1 + $0xa8] sm:$0xff]   ;;  %v1811_v17 = vld [vmem:[%s2396_s1 + $0x60] sm:$0xff]   ;;  %v1812_v18 = vld [vmem:[%s2396_s1 + $0xf0] sm:$0xff]  }
   0x7   :  { %1563 = vmatpush3.bf16.msra.mxu0 %v1801_v7  ;;  %1609 = vmatpush3.bf16.msra.mxu1 %v1802_v8  ;;  %v1813_v19 = vld [vmem:[%s2396_s1 + $0x20] sm:$0xff]   ;;  %v1814_v20 = vld [vmem:[%s2396_s1 + $0xb0] sm:$0xff]   ;;  %v1815_v21 = vld [vmem:[%s2396_s1 + $0x68] sm:$0xff]  }
   0x8   :  { %1564 = vmatprep.subr.bf16.mxu0 %v1803_v9  ;;  %1610 = vmatprep.subr.bf16.mxu1 %v1804_v10  ;;  %v1816_v22 = vld [vmem:[%s2396_s1 + $0xf8] sm:$0xff]   ;;  %v1817_v23 = vld [vmem:[%s2396_s1 + $0x28] sm:$0xff]   ;;  %v1819_v25 = vld [vmem:[%s2396_s1 + $0x70] sm:$0xff]  }
   0x9   :  { %v1818_v24 = vld [vmem:[%s2396_s1 + $0xb8] sm:$0xff]   ;;  %v1820_v26 = vld [vmem:[%s2396_s1 + $0x100] sm:$0xff]   ;;  %v1821_v27 = vld [vmem:[%s2396_s1 + $0x30] sm:$0xff]  }
   0xa   :  { %v1822_v28 = vld [vmem:[%s2396_s1 + $0xc0] sm:$0xff]   ;;  %v1823_v29 = vld [vmem:[%s2396_s1 + $0x78] sm:$0xff]   ;;  %v1824_v30 = vld [vmem:[%s2396_s1 + $0x108] sm:$0xff]  }
   0xb   :  { %1565 = vmatpush3.bf16.msra.mxu0 %v1805_v11  ;;  %1611 = vmatpush3.bf16.msra.mxu1 %v1806_v12  ;;  %v1825_v31 = vld [vmem:[%s2396_s1 + $0x38] sm:$0xff]   ;;  %v1826_v32 = vld [vmem:[%s2396_s1 + $0xc8] sm:$0xff]   ;;  %v2003_v33 = vld [vmem:[%s2397_s0 + $0x4] ss:$12 sps:$4 sm:$0xff]  }
   0xc   :  { %1566 = vmatprep.subr.bf16.mxu0 %v1807_v13  ;;  %1612 = vmatprep.subr.bf16.mxu1 %v1808_v14  ;;  %v2008_v34 = vld [vmem:[%s2397_s0] ss:$12 sps:$4 sm:$0xff]   ;;  %v2032_v40 = vld [vmem:[%s2397_s0 + $0x1c] ss:$12 sps:$4 sm:$0xff]   ;;  %v2037_v41 = vld [vmem:[%s2397_s0 + $0x18] ss:$12 sps:$4 sm:$0xff]  }
   0xd   :  { %280 = vmatprep.mubr.bf16.mxu0 %v2003_v33  ;;  %555 = vmatprep.mubr.bf16.mxu1 %v2003_v33  ;;  %v1830_v35 = vld [vmem:[%s2396_s1 + $0x160] sm:$0xff]   ;;  %v1833_v38 = vld [vmem:[%s2396_s1 + $0x168] sm:$0xff]   ;;  %v1838_v42 = vld [vmem:[%s2396_s1 + $0x170] sm:$0xff]  }
   0xe   :  { %v1831_v36 = vld [vmem:[%s2396_s1 + $0x120] sm:$0xff]   ;;  %v1834_v39 = vld [vmem:[%s2396_s1 + $0x128] sm:$0xff]   ;;  %v1839_v43 = vld [vmem:[%s2396_s1 + $0x130] sm:$0xff]  }
   0xf   :  { %1567 = vmatpush3.bf16.msra.mxu0 %v1809_v15  ;;  %1613 = vmatpush3.bf16.msra.mxu1 %v1810_v16  ;;  %v1832_v37 = vld [vmem:[%s2396_s1 + $0x80] sm:$0xff]   ;;  %v1840_v44 = vld [vmem:[%s2396_s1 + $0x178] sm:$0xff]   ;;  %v1847_v49 = vld [vmem:[%s2396_s1 + $0x88] sm:$0xff]  }
  0x10   :  { %1568 = vmatprep.subr.bf16.mxu0 %v1811_v17  ;;  %1614 = vmatprep.subr.bf16.mxu1 %v1812_v18  ;;  %v1841_v45 = vld [vmem:[%s2396_s1 + $0x138] sm:$0xff]   ;;  %v2058_v46 = vld [vmem:[%s2397_s0 + $0x34] ss:$12 sps:$4 sm:$0xff]   ;;  %v1848_v51 = vld [vmem:[%s2396_s1 + $0x188] sm:$0xff]  }
  0x11   :  { %v2063_v47 = vld [vmem:[%s2397_s0 + $0x30] ss:$12 sps:$4 sm:$0xff]   ;;  %v1845_v48 = vld [vmem:[%s2396_s1 + $0x180] sm:$0xff]   ;;  %v2082_v52 = vld [vmem:[%s2397_s0 + $0x4c] ss:$12 sps:$4 sm:$0xff]  }
  0x12   :  { %v1846_v50 = vld [vmem:[%s2396_s1 + $0x140] sm:$0xff]   ;;  %v1849_v53 = vld [vmem:[%s2396_s1 + $0x148] sm:$0xff]   ;;  %v1853_v54 = vld [vmem:[%s2396_s1 + $0x190] sm:$0xff]  }
  0x13   :  { %1569 = vmatpush3.bf16.msra.mxu0 %v1813_v19  ;;  %1615 = vmatpush3.bf16.msra.mxu1 %v1814_v20  ;;  %v2097_v55 = vld [vmem:[%s2397_s0 + $0x48] ss:$12 sps:$4 sm:$0xff]   ;;  %v1855_v58 = vld [vmem:[%s2396_s1 + $0x198] sm:$0xff]   ;;  %v2127_v62 = vld [vmem:[%s2397_s0 + $0x20] ss:$12 sps:$4 sm:$0xff]  }
  0x14   :  { %1570 = vmatprep.subr.bf16.mxu0 %v1815_v21  ;;  %1616 = vmatprep.subr.bf16.mxu1 %v1816_v22  ;;  %v2102_v56 = vld [vmem:[%s2397_s0 + $0x8] ss:$12 sps:$4 sm:$0xff]   ;;  %v1856_v60 = vld [vmem:[%s2396_s1 + $0x158] sm:$0xff]   ;;  %v1866_v4 = vld [vmem:[%s2396_s1 + $0x200] sm:$0xff]  }
  0x15   :  { %v1854_v57 = vld [vmem:[%s2396_s1 + $0x150] sm:$0xff]   ;;  %v2135_v0 = vld [vmem:[%s2397_s0 + $0x38] ss:$12 sps:$4 sm:$0xff]   ;;  %v1869_v8 = vld [vmem:[%s2396_s1 + $0x208] sm:$0xff]  }
  0x16   :  { %v1861_v59 = vld [vmem:[%s2396_s1 + $0x110] sm:$0xff]   ;;  %v1862_v1 = vld [vmem:[%s2396_s1 + $0x1f8] sm:$0xff]   ;;  %v1873_v6 = vld [vmem:[%s2396_s1 + $0x1a0] sm:$0xff]  }
  0x17   :  { %1571 = vmatpush3.bf16.msra.mxu0 %v1817_v23  ;;  %1617 = vmatpush3.bf16.msra.mxu1 %v1818_v24  ;;  %v1859_v61 = vld [vmem:[%s2396_s1 + $0x1f0] sm:$0xff]   ;;  %v1868_v2 = vld [vmem:[%s2396_s1 + $0x118] sm:$0xff]   ;;  %v1867_v7 = vld [vmem:[%s2396_s1 + $0x1c0] sm:$0xff]  }
  0x18   :  { %1572 = vmatprep.subr.bf16.mxu0 %v1819_v25  ;;  %1618 = vmatprep.subr.bf16.mxu1 %v1820_v26  ;;  %v1860_v63 = vld [vmem:[%s2396_s1 + $0x1b0] sm:$0xff]   ;;  %v1863_v3 = vld [vmem:[%s2396_s1 + $0x1b8] sm:$0xff]   ;;  %v1870_v9 = vld [vmem:[%s2396_s1 + $0x1c8] sm:$0xff]  }
  0x19   :  { %v2158_v5 = vld [vmem:[%s2397_s0 + $0x50] ss:$12 sps:$4 sm:$0xff]   ;;  %v1227_v13 = vld [vmem:[%s2398_s2] sm:$0xff]  ;;  %v1878_v15 = vld [vmem:[%s2396_s1 + $0x1a8] sm:$0xff]  }
  0x1a   :  { %v1871_v10 = vld [vmem:[%s2396_s1 + $0x210] sm:$0xff]   ;;  %v1874_v14 = vld [vmem:[%s2396_s1 + $0x218] sm:$0xff]   ;;  %1237 = vperm.xlu0 %1793, %v1227_v13   ;;  %v1228_v19 = vld [vmem:[%s2398_s2 + $0x8] sm:$0xff] }
  0x1b   :  { %1573 = vmatpush3.bf16.msra.mxu0 %v1821_v27  ;;  %1619 = vmatpush3.bf16.msra.mxu1 %v1822_v28  ;;  %v1872_v11 = vld [vmem:[%s2396_s1 + $0x1d0] sm:$0xff]   ;;  %v1230_v16 = vld [vmem:[%s2398_s2 + $0x18] sm:$0xff]  ;;  %v1876_v20 = vld [vmem:[%s2396_s1 + $0x220] sm:$0xff]  }
  0x1c   :  { %1574 = vmatprep.subr.bf16.mxu0 %v1823_v29  ;;  %1620 = vmatprep.subr.bf16.mxu1 %v1824_v30  ;;  %v1229_v12 = vld [vmem:[%s2398_s2 + $0x10] sm:$0xff]  ;;  %v1875_v17 = vld [vmem:[%s2396_s1 + $0x1d8] sm:$0xff]   ;;  %v1232_v21 = vld [vmem:[%s2398_s2 + $0x28] sm:$0xff] }
  0x1d   :  { %1247 = vperm.xlu1 %1794, %v1229_v12   ;;  %v1881_v18 = vld [vmem:[%s2396_s1 + $0x230] sm:$0xff]   ;;  %v1877_v22 = vld [vmem:[%s2396_s1 + $0x1e0] sm:$0xff]   ;;  %v1879_v23 = vld [vmem:[%s2396_s1 + $0x228] sm:$0xff]  }
  0x1e   :  { %1242 = vperm.xlu0 %1793, %v1228_v19   ;;  %v1231_v24 = vld [vmem:[%s2398_s2 + $0x20] sm:$0xff]  ;;  %v1234_v25 = vld [vmem:[%s2398_s2 + $0x38] sm:$0xff]  ;;  %v1880_v26 = vld [vmem:[%s2396_s1 + $0x1e8] sm:$0xff]  }
  0x1f   :  { %1575 = vmatpush3.bf16.msra.mxu0 %v1825_v31  ;;  %1621 = vmatpush3.bf16.msra.mxu1 %v1826_v32  ;;  %v1233_v27 = vld [vmem:[%s2398_s2 + $0x30] sm:$0xff]  ;;  %v1882_v28 = vld [vmem:[%s2396_s1 + $0x238] sm:$0xff]  }
  0x20   :  { %1652 = vmatprep.subr.bf16.mxu1 %v1830_v35  ;;  %1744 = vmatprep.subr.bf16.mxu0 %v1832_v37 }
  0x21   :  { %1252 = vperm.xlu1 %1794, %v1230_v16  }
  0x22   :  { %281 = vmatmul.mubr.bf16.vlgmr.msra.gmra.mrb[0].mxu0 %v2008_v34  ;;  %556 = vmatmul.mubr.bf16.vlgmr.msra.gmra.mrb[0].mxu1 %v2008_v34 }
  0x23   :  { %1653 = vmatpush3.bf16.msra.mxu1 %v1831_v36  ;;  %1745 = vmatpush3.bf16.msra.mxu0 %v1832_v37 }
  0x24   :  { %1654 = vmatprep.subr.bf16.mxu1 %v1833_v38  ;;  %288 = vmatprep.mubr.bf16.mxu0 %v2032_v40 }
  0x25   :  { %563 = vmatprep.mubr.bf16.mxu1 %v2032_v40  ;;  %1746 = vmatprep.subr.bf16.mxu0 %v1847_v49 }
  0x26   :  { %1262 = vperm.xlu1 %1794, %v1232_v21   ;;  %1257 = vperm.xlu0 %1793, %v1231_v24  }
  0x27   :  { %1655 = vmatpush3.bf16.msra.mxu1 %v1834_v39  ;;  %1747 = vmatpush3.bf16.msra.mxu0 %v1847_v49 }
  0x28   :  { %1656 = vmatprep.subr.bf16.mxu1 %v1838_v42  ;;  %1756 = vmatprep.subr.bf16.mxu0 %v1861_v59 }
  0x2a   :  { %289 = vmatmul.mubr.bf16.gmra.mrb[4].mxu0 %v2037_v41  ;;  %564 = vmatmul.mubr.bf16.gmra.mrb[4].mxu1 %v2037_v41 }
  0x2b   :  { %1657 = vmatpush3.bf16.msra.mxu1 %v1839_v43  ;;  %296 = vmatprep.mubr.bf16.mxu0 %v2058_v46 }
  0x2c   :  { %1658 = vmatprep.subr.bf16.mxu1 %v1840_v44  ;;  %571 = vmatprep.mubr.bf16.mxu1 %v2058_v46 }
  0x2d   :  { %1272 = vperm.xlu1 %1794, %v1234_v25   ;;  %1267 = vperm.xlu0 %1793, %v1233_v27  }
  0x2f   :  { %1659 = vmatpush3.bf16.msra.mxu1 %v1841_v45 }
  0x30   :  { %1660 = vmatprep.subr.bf16.mxu1 %v1845_v48 }
  0x32   :  { %297 = vmatmul.mubr.bf16.gmra.mrb[8].mxu0 %v2063_v47  ;;  %572 = vmatmul.mubr.bf16.gmra.mrb[8].mxu1 %v2063_v47 }
  0x33   :  { %304 = vmatprep.mubr.bf16.mxu0 %v2082_v52  ;;  %1661 = vmatpush3.bf16.msra.mxu1 %v1846_v50 }
  0x34   :  { %579 = vmatprep.mubr.bf16.mxu1 %v2082_v52  ;;  %1662 = vmatprep.subr.bf16.mxu1 %v1848_v51 }
  0x37   :  { %1663 = vmatpush3.bf16.msra.mxu1 %v1849_v53 }
  0x38   :  { %1664 = vmatprep.subr.bf16.mxu1 %v1853_v54 }
  0x3a   :  { %305 = vmatmul.mubr.bf16.gmra.mrb[12].mxu0 %v2097_v55  ;;  %580 = vmatmul.mubr.bf16.gmra.mrb[12].mxu1 %v2097_v55 }
  0x3b   :  { %1748 = vmatprep.mubr.msk.bf16.mxu0 %vm235_vm0, %v2102_v56  ;;  %1665 = vmatpush3.bf16.msra.mxu1 %v1854_v57 }
  0x3c   :  { %830 = vmatprep.mubr.bf16.mxu1 %v2003_v33  ;;  %1666 = vmatprep.subr.bf16.mxu1 %v1855_v58 }
  0x3f   :  { %1667 = vmatpush3.bf16.msra.mxu1 %v1856_v60 }
  0x40   :  { %1698 = vmatprep.subr.bf16.mxu1 %v1859_v61 }
  0x42   :  { %1749 = vmatmul.mubr.msk.bf16.vlgmr.msra.gmra.mrb[16].mxu0 %vm235_vm0, %v2127_v62  ;;  %831 = vmatmul.mubr.bf16.vlgmr.msra.gmra.mrb[16].mxu1 %v2008_v34 }
  0x43   :  { %1757 = vmatpush3.bf16.msra.mxu0 %v1861_v59  ;;  %1699 = vmatpush3.bf16.msra.mxu1 %v1860_v63 }
  0x44   :  { %1752 = vmatprep.mubr.msk.bf16.mxu0 %vm235_vm0, %v2135_v0  ;;  %1700 = vmatprep.subr.bf16.mxu1 %v1862_v1 }
  0x45   :  { %838 = vmatprep.mubr.bf16.mxu1 %v2032_v40  ;;  %1758 = vmatprep.subr.bf16.mxu0 %v1868_v2 }
  0x47   :  { %1759 = vmatpush3.bf16.msra.mxu0 %v1868_v2  ;;  %1701 = vmatpush3.bf16.msra.mxu1 %v1863_v3 }
  0x48   :  { %1702 = vmatprep.subr.bf16.mxu1 %v1866_v4  ;;  %1768 = vmatprep.subr.bf16.mxu0 %v1873_v6 }
  0x4a   :  { %1753 = vmatmul.mubr.msk.bf16.gmra.mrb[20].mxu0 %vm235_vm0, %v2158_v5  ;;  %839 = vmatmul.mubr.bf16.gmra.mrb[20].mxu1 %v2037_v41 }
  0x4b   :  { %1760 = vmatprep.mubr.msk.bf16.mxu0 %vm235_vm0, %v2102_v56  ;;  %1703 = vmatpush3.bf16.msra.mxu1 %v1867_v7 }
  0x4c   :  { %846 = vmatprep.mubr.bf16.mxu1 %v2058_v46  ;;  %1704 = vmatprep.subr.bf16.mxu1 %v1869_v8 }
  0x4f   :  { %1705 = vmatpush3.bf16.msra.mxu1 %v1870_v9 }
  0x50   :  { %1706 = vmatprep.subr.bf16.mxu1 %v1871_v10 }
  0x52   :  { %1761 = vmatmul.mubr.msk.bf16.vlgmr.msra.gmra.mrb[24].mxu0 %vm235_vm0, %v2127_v62  ;;  %847 = vmatmul.mubr.bf16.gmra.mrb[24].mxu1 %v2063_v47 }
  0x53   :  { %1769 = vmatpush3.bf16.msra.mxu0 %v1873_v6  ;;  %1707 = vmatpush3.bf16.msra.mxu1 %v1872_v11 }
  0x54   :  { %1764 = vmatprep.mubr.msk.bf16.mxu0 %vm235_vm0, %v2135_v0  ;;  %1708 = vmatprep.subr.bf16.mxu1 %v1874_v14 }
  0x55   :  { %854 = vmatprep.mubr.bf16.mxu1 %v2082_v52  ;;  %1770 = vmatprep.subr.bf16.mxu0 %v1878_v15 }
  0x57   :  { %1771 = vmatpush3.bf16.msra.mxu0 %v1878_v15  ;;  %1709 = vmatpush3.bf16.msra.mxu1 %v1875_v17 }
  0x58   :  { %1780 = vmatprep.subr.bf16.mxu0 %v1881_v18  ;;  %1710 = vmatprep.subr.bf16.mxu1 %v1876_v20 }
  0x5a   :  { %1765 = vmatmul.mubr.msk.bf16.gmra.mrb[28].mxu0 %vm235_vm0, %v2158_v5  ;;  %855 = vmatmul.mubr.bf16.gmra.mrb[28].mxu1 %v2097_v55 }
  0x5b   :  { %1772 = vmatprep.mubr.msk.bf16.mxu0 %vm235_vm0, %v2102_v56  ;;  %1711 = vmatpush3.bf16.msra.mxu1 %v1877_v22 }
  0x5c   :  { %1105 = vmatprep.mubr.bf16.mxu1 %v2003_v33  ;;  %1712 = vmatprep.subr.bf16.mxu1 %v1879_v23 }
  0x5f   :  { %1713 = vmatpush3.bf16.msra.mxu1 %v1880_v26 }
  0x62   :  { %1773 = vmatmul.mubr.msk.bf16.vlgmr.msra.gmra.mrb[32].mxu0 %vm235_vm0, %v2127_v62  ;;  %1106 = vmatmul.mubr.bf16.vlgmr.msra.gmra.mrb[32].mxu1 %v2008_v34 }
  0x63   :  { %1781 = vmatpush3.bf16.msra.mxu0 %v1881_v18  ;;  %1776 = vmatprep.mubr.msk.bf16.mxu0 %vm235_vm0, %v2135_v0 }
  0x64   :  { %1113 = vmatprep.mubr.bf16.mxu1 %v2032_v40  ;;  %1782 = vmatprep.subr.bf16.mxu0 %v1882_v28 }
  0x67   :  { %1783 = vmatpush3.bf16.msra.mxu0 %v1882_v28 }
  0x6a   :  { %1777 = vmatmul.mubr.msk.bf16.gmra.mrb[36].mxu0 %vm235_vm0, %v2158_v5  ;;  %1114 = vmatmul.mubr.bf16.gmra.mrb[36].mxu1 %v2037_v41 }
  0x6b   :  { %1784 = vmatprep.mubr.msk.bf16.mxu0 %vm235_vm0, %v2102_v56  ;;  %1121 = vmatprep.mubr.bf16.mxu1 %v2058_v46 }
  0x72   :  { %1785 = vmatmul.mubr.msk.bf16.vlgmr.msra.gmra.mrb[40].mxu0 %vm235_vm0, %v2127_v62  ;;  %1122 = vmatmul.mubr.bf16.gmra.mrb[40].mxu1 %v2063_v47 }
  0x73   :  { %1788 = vmatprep.mubr.msk.bf16.mxu0 %vm235_vm0, %v2135_v0  ;;  %1129 = vmatprep.mubr.bf16.mxu1 %v2082_v52 }
  0x7a   :  { %1789 = vmatmul.mubr.msk.bf16.gmra.mrb[44].mxu0 %vm235_vm0, %v2158_v5  ;;  %1130 = vmatmul.mubr.bf16.gmra.mrb[44].mxu1 %v2097_v55 }
  0xf5   :  { %v1576_v29 = vpop.f32.mrb[0].mxu0  ;;  %v1622_v30 = vpop.f32.mrb[0].mxu1 }
  0xf6   :  { %v1577_v31 = vpop.f32.mrb[1].mxu0  ;;  %v1623_v33 = vpop.f32.mrb[1].mxu1 }
  0xf7   :  { %v1578_v32 = vadd.f32 %v1577_v31, %v1576_v29  ;;  %v1579_v34 = vpop.f32.mrb[2].mxu0  ;;  %v2268_v35 = vadd.f32 %v1623_v33, %v1622_v30  ;;  %v1625_v36 = vpop.f32.mrb[2].mxu1 }
  0xf8   :  { %v1580_v37 = vpop.f32.mrb[3].mxu0  ;;  %v1626_v39 = vpop.f32.mrb[3].mxu1 }
  0xf9   :  { %v1581_v38 = vadd.f32 %v1580_v37, %v1579_v34  ;;  %v2270_v40 = vadd.f32 %v1626_v39, %v1625_v36 }
  0xfd   :  { %v1582_v41 = vpop.f32.mrb[4].mxu0  ;;  %v1628_v42 = vpop.f32.mrb[4].mxu1 }
  0xfe   :  { %v1583_v43 = vpop.f32.mrb[5].mxu0  ;;  %v1629_v45 = vpop.f32.mrb[5].mxu1 }
  0xff   :  { %v1584_v44 = vadd.f32 %v1583_v43, %v1582_v41  ;;  %v1585_v46 = vpop.f32.mrb[6].mxu0  ;;  %v1630_v47 = vadd.f32 %v1629_v45, %v1628_v42  ;;  %v1631_v48 = vpop.f32.mrb[6].mxu1 }
 0x100   :  { %v1586_v49 = vpop.f32.mrb[7].mxu0  ;;  %v1632_v51 = vpop.f32.mrb[7].mxu1 }
 0x101   :  { %v1587_v50 = vadd.f32 %v1586_v49, %v1585_v46  ;;  %v1633_v52 = vadd.f32 %v1632_v51, %v1631_v48 }
 0x105   :  { %v1588_v53 = vpop.f32.mrb[8].mxu0  ;;  %v1634_v54 = vpop.f32.mrb[8].mxu1 }
 0x106   :  { %v1589_v55 = vpop.f32.mrb[9].mxu0  ;;  %v1635_v57 = vpop.f32.mrb[9].mxu1 }
 0x107   :  { %v1590_v56 = vadd.f32 %v1589_v55, %v1588_v53  ;;  %v1591_v58 = vpop.f32.mrb[10].mxu0  ;;  %v2272_v59 = vadd.f32 %v1635_v57, %v1634_v54  ;;  %v1637_v60 = vpop.f32.mrb[10].mxu1 }
 0x108   :  { %v1592_v61 = vpop.f32.mrb[11].mxu0  ;;  %v1638_v63 = vpop.f32.mrb[11].mxu1 }
 0x109   :  { %v1593_v62 = vadd.f32 %v1592_v61, %v1591_v58  ;;  %v2274_v0 = vadd.f32 %v1638_v63, %v1637_v60 }
 0x10d   :  { %v1594_v1 = vpop.f32.mrb[12].mxu0  ;;  %v1640_v2 = vpop.f32.mrb[12].mxu1 }
 0x10e   :  { %v1595_v3 = vpop.f32.mrb[13].mxu0  ;;  %v1641_v5 = vpop.f32.mrb[13].mxu1 }
 0x10f   :  { %v1596_v4 = vadd.f32 %v1595_v3, %v1594_v1  ;;  %v1597_v6 = vpop.f32.mrb[14].mxu0  ;;  %v1642_v7 = vadd.f32 %v1641_v5, %v1640_v2  ;;  %v1643_v8 = vpop.f32.mrb[14].mxu1 }
 0x110   :  { %v1598_v9 = vpop.f32.mrb[15].mxu0  ;;  %v1644_v11 = vpop.f32.mrb[15].mxu1 }
 0x111   :  { %v1599_v10 = vadd.f32 %v1598_v9, %v1597_v6  ;;  %v1645_v12 = vadd.f32 %v1644_v11, %v1643_v8 }
 0x115   :  { %v1750_v13 = vpop.f32.mrb[16].mxu0  ;;  %v1668_v15 = vpop.f32.mrb[16].mxu1 }
 0x116   :  { %v2276_v14 = vadd.f32 %v1750_v13, %v1584_v44  ;;  %v347_v16 = vpop.f32.mrb[17].mxu0  ;;  %v1669_v18 = vpop.f32.mrb[17].mxu1 }
 0x117   :  { %v2278_v17 = vadd.f32 %v1578_v32, %v347_v16  ;;  %v1751_v19 = vpop.f32.mrb[18].mxu0  ;;  %v1670_v20 = vadd.f32 %v1669_v18, %v1668_v15  ;;  %v1671_v22 = vpop.f32.mrb[18].mxu1 }
 0x118   :  { %v2280_v21 = vadd.f32 %v1751_v19, %v1587_v50  ;;  %v350_v23 = vpop.f32.mrb[19].mxu0  ;;  %v1672_v25 = vpop.f32.mrb[19].mxu1 }
 0x119   :  { %v2282_v24 = vadd.f32 %v1581_v38, %v350_v23  ;;  %v1673_v26 = vadd.f32 %v1672_v25, %v1671_v22 }
 0x11d   :  { %v1754_v27 = vpop.f32.mrb[20].mxu0  ;;  %v1674_v29 = vpop.f32.mrb[20].mxu1 }
 0x11e   :  { %v2284_v28 = vadd.f32 %v1754_v27, %v1596_v4  ;;  %v363_v30 = vpop.f32.mrb[21].mxu0  ;;  %v1675_v32 = vpop.f32.mrb[21].mxu1 }
 0x11f   :  { %v2286_v31 = vadd.f32 %v1590_v56, %v363_v30  ;;  %v1755_v33 = vpop.f32.mrb[22].mxu0  ;;  %v1676_v34 = vadd.f32 %v1675_v32, %v1674_v29  ;;  %v1677_v37 = vpop.f32.mrb[22].mxu1 }
 0x120   :  { %v2288_v36 = vadd.f32 %v1755_v33, %v1599_v10  ;;  %v366_v39 = vpop.f32.mrb[23].mxu0  ;;  %v1678_v38 = vpop.f32.mrb[23].mxu1 }
 0x121   :  { %v2290_v41 = vadd.f32 %v1593_v62, %v366_v39  ;;  %v1679_v42 = vadd.f32 %v1678_v38, %v1677_v37 }
 0x125   :  { %v1762_v43 = vpop.f32.mrb[24].mxu0  ;;  %v1680_v45 = vpop.f32.mrb[24].mxu1 }
 0x126   :  { %v2292_v44 = vadd.f32 %v1762_v43, %v1630_v47  ;;  %v622_v46 = vpop.f32.mrb[25].mxu0  ;;  %v1681_v49 = vpop.f32.mrb[25].mxu1 }
 0x127   :  { %v2295_v48 = vadd.f32 %v2268_v35, %v622_v46  ;;  %v1763_v50 = vpop.f32.mrb[26].mxu0  ;;  %v1682_v53 = vadd.f32 %v1681_v49, %v1680_v45  ;;  %v1683_v55 = vpop.f32.mrb[26].mxu1 }
 0x128   :  { %v1205_v51 = vmax.f32 %v2276_v14, %v2292_v44  ;;  %v2299_v54 = vadd.f32 %v1763_v50, %v1633_v52  ;;  %v625_v56 = vpop.f32.mrb[27].mxu0  ;;  %v1684_v58 = vpop.f32.mrb[27].mxu1 }
 0x129   :  { %v1203_v57 = vmax.f32 %v2278_v17, %v2295_v48  ;;  %v2304_v47 = vadd.f32 %v2270_v40, %v625_v56  ;;  %v1685_v60 = vadd.f32 %v1684_v58, %v1683_v55 }
 0x12a   :  { %v1206_v35 = vmax.f32 %v2280_v21, %v2299_v54 }
 0x12b   :  { %v1204_v61 = vmax.f32 %v2282_v24, %v2304_v47 }
 0x12d   :  { %v1766_v62 = vpop.f32.mrb[28].mxu0  ;;  %v1686_v52 = vpop.f32.mrb[28].mxu1 }
 0x12e   :  { %v2310_v63 = vadd.f32 %v1766_v62, %v1642_v7  ;;  %v638_v1 = vpop.f32.mrb[29].mxu0  ;;  %v1687_v3 = vpop.f32.mrb[29].mxu1 }
 0x12f   :  { %v2313_v2 = vadd.f32 %v2272_v59, %v638_v1  ;;  %v1767_v4 = vpop.f32.mrb[30].mxu0  ;;  %v1688_v5 = vadd.f32 %v1687_v3, %v1686_v52  ;;  %v1689_v8 = vpop.f32.mrb[30].mxu1 }
 0x130   :  { %v1209_v40 = vmax.f32 %v2284_v28, %v2310_v63  ;;  %v2317_v6 = vadd.f32 %v1767_v4, %v1645_v12  ;;  %v641_v9 = vpop.f32.mrb[31].mxu0  ;;  %v1690_v11 = vpop.f32.mrb[31].mxu1 }
 0x131   :  { %v1207_v10 = vmax.f32 %v2286_v31, %v2313_v2  ;;  %v2322_v7 = vadd.f32 %v2274_v0, %v641_v9  ;;  %v1691_v13 = vadd.f32 %v1690_v11, %v1689_v8  ;;  %v1248_v62 = vpop.permute.xlu1 %1247  ;;  %v1238_v52 = vpop.permute.xlu0 %1237 }
 0x132   :  { %v1210_v59 = vmax.f32 %v2288_v36, %v2317_v6 }
 0x133   :  { %v1208_v15 = vmax.f32 %v2290_v41, %v2322_v7 }
 0x135   :  { %v1774_v16 = vpop.f32.mrb[32].mxu0  ;;  %v1714_v12 = vpop.f32.mrb[32].mxu1 }
 0x136   :  { %v906_v18 = vadd.f32 %v1774_v16, %v1676_v34  ;;  %v897_v19 = vpop.f32.mrb[33].mxu0  ;;  %v1715_v23 = vpop.f32.mrb[33].mxu1 }
 0x137   :  { %v898_v22 = vadd.f32 %v1670_v20, %v897_v19  ;;  %v1775_v25 = vpop.f32.mrb[34].mxu0  ;;  %v1716_v27 = vadd.f32 %v1715_v23, %v1714_v12  ;;  %v1717_v30 = vpop.f32.mrb[34].mxu1 }
 0x138   :  { %v909_v29 = vadd.f32 %v1775_v25, %v1679_v42  ;;  %v900_v0 = vpop.f32.mrb[35].mxu0  ;;  %v1718_v33 = vpop.f32.mrb[35].mxu1 }
 0x139   :  { %v901_v32 = vadd.f32 %v1673_v26, %v900_v0  ;;  %v1719_v37 = vadd.f32 %v1718_v33, %v1717_v30 }
 0x13d   :  { %v1778_v39 = vpop.f32.mrb[36].mxu0  ;;  %v1720_v43 = vpop.f32.mrb[36].mxu1 }
 0x13e   :  { %v2328_v38 = vadd.f32 %v1778_v39, %v1688_v5  ;;  %v913_v45 = vpop.f32.mrb[37].mxu0  ;;  %v1721_v34 = vpop.f32.mrb[37].mxu1 }
 0x13f   :  { %v2330_v46 = vadd.f32 %v1682_v53, %v913_v45  ;;  %v1779_v49 = vpop.f32.mrb[38].mxu0  ;;  %v1722_v50 = vadd.f32 %v1721_v34, %v1720_v43  ;;  %v1723_v55 = vpop.f32.mrb[38].mxu1 }
 0x140   :  { %v2332_v20 = vadd.f32 %v1779_v49, %v1691_v13  ;;  %v916_v56 = vpop.f32.mrb[39].mxu0  ;;  %v1724_v58 = vpop.f32.mrb[39].mxu1 }
 0x141   :  { %v2334_v42 = vadd.f32 %v1685_v60, %v916_v56  ;;  %v1725_v26 = vadd.f32 %v1724_v58, %v1723_v55  ;;  %v1243_v39 = vpop.permute.xlu0 %1242 }
 0x145   :  { %v1786_v1 = vpop.f32.mrb[40].mxu0  ;;  %v1726_v3 = vpop.f32.mrb[40].mxu1 }
 0x146   :  { %v1181_v4 = vadd.f32 %v1786_v1, %v1722_v50  ;;  %v1172_v5 = vpop.f32.mrb[41].mxu0  ;;  %v1727_v8 = vpop.f32.mrb[41].mxu1 }
 0x147   :  { %v1173_v53 = vadd.f32 %v1716_v27, %v1172_v5  ;;  %v1787_v9 = vpop.f32.mrb[42].mxu0  ;;  %v1728_v16 = vadd.f32 %v1727_v8, %v1726_v3  ;;  %v1729_v12 = vpop.f32.mrb[42].mxu1 }
 0x148   :  { %v1213_v11 = vmax.f32 %v906_v18, %v1181_v4  ;;  %v1184_v13 = vadd.f32 %v1787_v9, %v1725_v26  ;;  %v1175_v19 = vpop.f32.mrb[43].mxu0  ;;  %v1730_v25 = vpop.f32.mrb[43].mxu1 }
 0x149   :  { %v1211_v23 = vmax.f32 %v898_v22, %v1173_v53  ;;  %v1176_v60 = vadd.f32 %v1719_v37, %v1175_v19  ;;  %v1731_v33 = vadd.f32 %v1730_v25, %v1729_v12  ;;  %v1253_v22 = vpop.permute.xlu1 %1252  ;;  %v1258_v24 = vpop.permute.xlu0 %1257 }
 0x14a   :  { %v1221_v30 = vmax.f32 %v1205_v51, %v1213_v11  ;;  %v1214_v0 = vmax.f32 %v909_v29, %v1184_v13 }
 0x14b   :  { %v1219_v27 = vmax.f32 %v1203_v57, %v1211_v23  ;;  %v1212_v43 = vmax.f32 %v901_v32, %v1176_v60 }
 0x14c   :  { %v1277_v18 = vadd.f32 %v1248_v62, %v1221_v30  ;;  %v1222_v45 = vmax.f32 %v1206_v35, %v1214_v0 }
 0x14d   :  { %v1275_v34 = vadd.f32 %v1238_v52, %v1219_v27  ;;  %v1220_v14 = vmax.f32 %v1204_v61, %v1212_v43  ;;  %v1790_v44 = vpop.f32.mrb[44].mxu0  ;;  %v1732_v37 = vpop.f32.mrb[44].mxu1 }
 0x14e   :  { %v1285_v51 = vmax.f32 %v1277_v18, 0.0  ;;  %v1278_v29 = vadd.f32 %v1253_v22, %v1222_v45  ;;  %v1188_v49 = vpop.f32.mrb[45].mxu0  ;;  %v1733_v57 = vpop.f32.mrb[45].mxu1 }
 0x14f   :  { %v1283_v17 = vmax.f32 %v1275_v34, 0.0  ;;  %v1276_v48 = vadd.f32 %v1243_v39, %v1220_v14  ;;  %v1189_v32 = vadd.f32 %v1728_v16, %v1188_v49  ;;  %v1791_v50 = vpop.f32.mrb[46].mxu0  ;;  %v1734_v54 = vadd.f32 %v1733_v57, %v1732_v37  ;;  %v1735_v35 = vpop.f32.mrb[46].mxu1 }
 0x150   :  { %v1554_v55 = vpack.c.bf16 %v1285_v51, %v1285_v51  ;;  %v1286_v21 = vmax.f32 %v1278_v29, 0.0  ;;  %v1191_v56 = vpop.f32.mrb[47].mxu0  ;;  %v1736_v61 = vpop.f32.mrb[47].mxu1 }
 0x151   :  { %v1552_v58 = vpack.c.bf16 %v1283_v17, %v1283_v17  ;;  %v1284_v26 = vmax.f32 %v1276_v48, 0.0  ;;  %v1215_v47 = vmax.f32 %v2330_v46, %v1189_v32  ;;  %v1192_v62 = vadd.f32 %v1731_v33, %v1191_v56  ;;  %v1263_v5 = vpop.permute.xlu1 %1262 }
 0x152   :  { %1326 = vst.msk [vmem:[%s2399_s3 + $0x8] sm:$0xf] %vm1323_vm1, %v1554_v55  ;;  %v1555_v52 = vpack.c.bf16 %v1286_v21, %v1286_v21  ;;  %v1197_v1 = vadd.f32 %v1790_v44, %v1734_v54  ;;  %v1737_v3 = vadd.f32 %v1736_v61, %v1735_v35 }
 0x153   :  { %1324 = vst.msk [vmem:[%s2399_s3] sm:$0xf] %vm1323_vm1, %v1552_v58  ;;  %v1553_v4 = vpack.c.bf16 %v1284_v26, %v1284_v26  ;;  %v1223_v46 = vmax.f32 %v1207_v10, %v1215_v47  ;;  %v1216_v8 = vmax.f32 %v2334_v42, %v1192_v62  ;;  %v1268_v42 = vpop.permute.xlu0 %1267 }
 0x154   :  { %1327 = vst.msk [vmem:[%s2399_s3 + $0xc] sm:$0xf] %vm1323_vm1, %v1555_v52  ;;  %v1217_v53 = vmax.f32 %v2328_v38, %v1197_v1  ;;  %v1200_v9 = vadd.f32 %v1791_v50, %v1737_v3 }
 0x155   :  { %1325 = vst.msk [vmem:[%s2399_s3 + $0x4] sm:$0xf] %vm1323_vm1, %v1553_v4  ;;  %v1279_v11 = vadd.f32 %v1258_v24, %v1223_v46  ;;  %v1224_v31 = vmax.f32 %v1208_v15, %v1216_v8  ;;  %v1273_v19 = vpop.permute.xlu1 %1272 }
 0x156   :  { %v1225_v2 = vmax.f32 %v1209_v40, %v1217_v53  ;;  %v1218_v10 = vmax.f32 %v2332_v20, %v1200_v9 }
 0x157   :  { %v1287_v16 = vmax.f32 %v1279_v11, 0.0  ;;  %v1280_v38 = vadd.f32 %v1263_v5, %v1224_v31 }
 0x158   :  { %v1281_v12 = vadd.f32 %v1268_v42, %v1225_v2  ;;  %v1226_v13 = vmax.f32 %v1210_v59, %v1218_v10 }
 0x159   :  { %v1556_v23 = vpack.c.bf16 %v1287_v16, %v1287_v16  ;;  %v1288_v25 = vmax.f32 %v1280_v38, 0.0 }
 0x15a   :  { %v1289_v60 = vmax.f32 %v1281_v12, 0.0  ;;  %v1282_v41 = vadd.f32 %v1273_v19, %v1226_v13 }
 0x15b   :  { %1328 = vst.msk [vmem:[%s2399_s3 + $0x10] sm:$0xf] %vm1323_vm1, %v1556_v23  ;;  %v1557_v28 = vpack.c.bf16 %v1288_v25, %v1288_v25 }
 0x15c   :  { %v1558_v63 = vpack.c.bf16 %v1289_v60, %v1289_v60  ;;  %v1290_v40 = vmax.f32 %v1282_v41, 0.0 }
 0x15d   :  { %1329 = vst.msk [vmem:[%s2399_s3 + $0x14] sm:$0xf] %vm1323_vm1, %v1557_v28 }
 0x15e   :  { %1330 = vst.msk [vmem:[%s2399_s3 + $0x18] sm:$0xf] %vm1323_vm1, %v1558_v63  ;;  %v1559_v36 = vpack.c.bf16 %v1290_v40, %v1290_v40 }
 0x160   :  { %1331 = vst.msk [vmem:[%s2399_s3 + $0x1c] sm:$0xf] %vm1323_vm1, %v1559_v36 }

// kernel: cnn_forward.7
= control target key start
LH: loop header
LB: loop body
LE: loop exit
PB: predicated region body
PF: predicated region fallthrough
CT: control target
= control target key end

     0   :  { %v609_v36 = vlaneseq  ;;  %v6539_v37 = vmov 1966171168   ;;  %s8544_s0 = inlined_call_operand.vmem [shape: bf16[2,2304], index: 0, kind: input, shape index: {}]   ;;  %s8545_s1 = inlined_call_operand.vmem [shape: bf16[2304,500], index: 1, kind: input, shape index: {}]   ;;  %s8546_s2 = inlined_call_operand.vmem [shape: f32[1,500], index: 2, kind: input, shape index: {}]   ;;  %s8547_s3 = inlined_call_operand.vmem [shape: bf16[500,50], index: 3, kind: input, shape index: {}]   ;;  %s8548_s4 = inlined_call_operand.vmem [shape: f32[1,50], index: 4, kind: input, shape index: {}]   ;;  %s8549_s5 = inlined_call_operand.vmem [shape: bf16[50,4], index: 5, kind: input, shape index: {}]   ;;  %s8550_s6 = inlined_call_operand.vmem [shape: f32[1,4], index: 6, kind: input, shape index: {}]   ;;  %s8551_s7 = inlined_call_operand.hbm [shape: f32[2,4], index: 7, kind: output, shape index: {}]  }
   0x1   :  { %v5607_v0 = vld [vmem:[%s8545_s1 + $0x4] ss:$16 sps:$4 sm:$0xff]   ;;  %v5609_v1 = vld [vmem:[%s8545_s1 + $0xc] ss:$16 sps:$4 sm:$0xff]   ;;  %v5611_v2 = vld [vmem:[%s8545_s1] ss:$16 sps:$4 sm:$0xff]   ;;  %v634_v38 = vunpack.c.l.s4 %v6539_v37 }
   0x2   :  { %3650 = vmatprep.subr.bf16.mxu0 %v5607_v0  ;;  %v5612_v3 = vld [vmem:[%s8545_s1 + $0x8] ss:$16 sps:$4 sm:$0xff]   ;;  %4019 = vmatprep.subr.bf16.mxu1 %v5609_v1  ;;  %v5613_v4 = vld [vmem:[%s8545_s1 + $0x24] ss:$16 sps:$4 sm:$0xff]   ;;  %v5615_v5 = vld [vmem:[%s8545_s1 + $0x2c] ss:$16 sps:$4 sm:$0xff]  }
   0x3   :  { %3651 = vmatpush1.bf16.msra.mxu0 %v5611_v2  ;;  %4020 = vmatpush1.bf16.msra.mxu1 %v5612_v3  ;;  %v5617_v6 = vld [vmem:[%s8545_s1 + $0x20] ss:$16 sps:$4 sm:$0xff]   ;;  %v5618_v7 = vld [vmem:[%s8545_s1 + $0x28] ss:$16 sps:$4 sm:$0xff]   ;;  %v5619_v8 = vld [vmem:[%s8545_s1 + $0x44] ss:$16 sps:$4 sm:$0xff]   ;;  %v635_v43 = vunpack.c.0.s8 %v634_v38 }
   0x4   :  { %3652 = vmatprep.subr.bf16.mxu0 %v5613_v4  ;;  %4021 = vmatprep.subr.bf16.mxu1 %v5615_v5  ;;  %v5621_v9 = vld [vmem:[%s8545_s1 + $0x4c] ss:$16 sps:$4 sm:$0xff]   ;;  %v5623_v10 = vld [vmem:[%s8545_s1 + $0x40] ss:$16 sps:$4 sm:$0xff]   ;;  %v5624_v11 = vld [vmem:[%s8545_s1 + $0x48] ss:$16 sps:$4 sm:$0xff]  }
   0x5   :  { %v5625_v12 = vld [vmem:[%s8545_s1 + $0x64] ss:$16 sps:$4 sm:$0xff]   ;;  %v5627_v13 = vld [vmem:[%s8545_s1 + $0x6c] ss:$16 sps:$4 sm:$0xff]   ;;  %v5629_v14 = vld [vmem:[%s8545_s1 + $0x60] ss:$16 sps:$4 sm:$0xff]  }
   0x6   :  { %v5630_v15 = vld [vmem:[%s8545_s1 + $0x68] ss:$16 sps:$4 sm:$0xff]   ;;  %v5631_v16 = vld [vmem:[%s8545_s1 + $0x84] ss:$16 sps:$4 sm:$0xff]   ;;  %v5633_v17 = vld [vmem:[%s8545_s1 + $0x8c] ss:$16 sps:$4 sm:$0xff]  }
   0x7   :  { %3653 = vmatpush1.bf16.msra.mxu0 %v5617_v6  ;;  %4022 = vmatpush1.bf16.msra.mxu1 %v5618_v7  ;;  %v5635_v18 = vld [vmem:[%s8545_s1 + $0x80] ss:$16 sps:$4 sm:$0xff]   ;;  %v5636_v19 = vld [vmem:[%s8545_s1 + $0x88] ss:$16 sps:$4 sm:$0xff]   ;;  %v5637_v20 = vld [vmem:[%s8545_s1 + $0xa4] ss:$16 sps:$4 sm:$0xff]  }
   0x8   :  { %3654 = vmatprep.subr.bf16.mxu0 %v5619_v8  ;;  %4023 = vmatprep.subr.bf16.mxu1 %v5621_v9  ;;  %v5639_v21 = vld [vmem:[%s8545_s1 + $0xac] ss:$16 sps:$4 sm:$0xff]   ;;  %v5641_v22 = vld [vmem:[%s8545_s1 + $0xa0] ss:$16 sps:$4 sm:$0xff]   ;;  %v5642_v23 = vld [vmem:[%s8545_s1 + $0xa8] ss:$16 sps:$4 sm:$0xff]  }
   0x9   :  { %v5643_v24 = vld [vmem:[%s8545_s1 + $0xc4] ss:$16 sps:$4 sm:$0xff]   ;;  %v5645_v25 = vld [vmem:[%s8545_s1 + $0xcc] ss:$16 sps:$4 sm:$0xff]   ;;  %v5647_v26 = vld [vmem:[%s8545_s1 + $0xc0] ss:$16 sps:$4 sm:$0xff]  }
   0xa   :  { %v5648_v27 = vld [vmem:[%s8545_s1 + $0xc8] ss:$16 sps:$4 sm:$0xff]   ;;  %v5649_v28 = vld [vmem:[%s8545_s1 + $0xe4] ss:$16 sps:$4 sm:$0xff]   ;;  %v5651_v29 = vld [vmem:[%s8545_s1 + $0xec] ss:$16 sps:$4 sm:$0xff]  }
   0xb   :  { %3655 = vmatpush1.bf16.msra.mxu0 %v5623_v10  ;;  %4024 = vmatpush1.bf16.msra.mxu1 %v5624_v11  ;;  %v5653_v30 = vld [vmem:[%s8545_s1 + $0xe0] ss:$16 sps:$4 sm:$0xff]   ;;  %v5654_v31 = vld [vmem:[%s8545_s1 + $0xe8] ss:$16 sps:$4 sm:$0xff]   ;;  %v5655_v32 = vld [vmem:[%s8545_s1 + $0x104] ss:$16 sps:$4 sm:$0xff]  }
   0xc   :  { %3656 = vmatprep.subr.bf16.mxu0 %v5625_v12  ;;  %4025 = vmatprep.subr.bf16.mxu1 %v5627_v13  ;;  %v5657_v33 = vld [vmem:[%s8545_s1 + $0x10c] ss:$16 sps:$4 sm:$0xff]   ;;  %v5659_v34 = vld [vmem:[%s8545_s1 + $0x100] ss:$16 sps:$4 sm:$0xff]   ;;  %v5660_v35 = vld [vmem:[%s8545_s1 + $0x108] ss:$16 sps:$4 sm:$0xff]  }
   0xd   :  { %v5661_v39 = vld [vmem:[%s8545_s1 + $0x124] ss:$16 sps:$4 sm:$0xff]   ;;  %v5663_v40 = vld [vmem:[%s8545_s1 + $0x12c] ss:$16 sps:$4 sm:$0xff]   ;;  %v5665_v41 = vld [vmem:[%s8545_s1 + $0x120] ss:$16 sps:$4 sm:$0xff]  }
   0xe   :  { %v6700_v42 = vshrl.u32 %v609_v36, 7  ;;  %v5666_v44 = vld [vmem:[%s8545_s1 + $0x128] ss:$16 sps:$4 sm:$0xff]   ;;  %v5667_v45 = vld [vmem:[%s8545_s1 + $0x144] ss:$16 sps:$4 sm:$0xff]  }
   0xf   :  { %3657 = vmatpush1.bf16.msra.mxu0 %v5629_v14  ;;  %4026 = vmatpush1.bf16.msra.mxu1 %v5630_v15  ;;  %v5669_v46 = vld [vmem:[%s8545_s1 + $0x14c] ss:$16 sps:$4 sm:$0xff]   ;;  %v5671_v47 = vld [vmem:[%s8545_s1 + $0x140] ss:$16 sps:$4 sm:$0xff]   ;;  %v5672_v48 = vld [vmem:[%s8545_s1 + $0x148] ss:$16 sps:$4 sm:$0xff]  }
  0x10   :  { %3658 = vmatprep.subr.bf16.mxu0 %v5631_v16  ;;  %4027 = vmatprep.subr.bf16.mxu1 %v5633_v17  ;;  %v6718_v49 = vsub.s32 %v635_v43, %v6700_v42  ;;  %v5673_v50 = vld [vmem:[%s8545_s1 + $0x164] ss:$16 sps:$4 sm:$0xff]   ;;  %v5675_v51 = vld [vmem:[%s8545_s1 + $0x16c] ss:$16 sps:$4 sm:$0xff]   ;;  %v5677_v53 = vld [vmem:[%s8545_s1 + $0x160] ss:$16 sps:$4 sm:$0xff]  }
  0x11   :  { %v6729_v52 = vld [vmem:[%s8544_s0] sm:$0xff]  ;;  %v5678_v55 = vld [vmem:[%s8545_s1 + $0x168] ss:$16 sps:$4 sm:$0xff]   ;;  %v5681_v57 = vld [vmem:[%s8545_s1 + $0x18c] ss:$16 sps:$4 sm:$0xff]  }
  0x12   :  { %v639_v54 = vrot.slane %v6729_v52, %v6718_v49  ;;  %v5679_v56 = vld [vmem:[%s8545_s1 + $0x184] ss:$16 sps:$4 sm:$0xff]   ;;  %v5683_v59 = vld [vmem:[%s8545_s1 + $0x180] ss:$16 sps:$4 sm:$0xff]   ;;  %v5684_v61 = vld [vmem:[%s8545_s1 + $0x188] ss:$16 sps:$4 sm:$0xff]  }
  0x13   :  { %3659 = vmatpush1.bf16.msra.mxu0 %v5635_v18  ;;  %4028 = vmatpush1.bf16.msra.mxu1 %v5636_v19  ;;  %v5685_v62 = vld [vmem:[%s8545_s1 + $0x1a4] ss:$16 sps:$4 sm:$0xff]   ;;  %v5687_v63 = vld [vmem:[%s8545_s1 + $0x1ac] ss:$16 sps:$4 sm:$0xff]   ;;  %v5689_v0 = vld [vmem:[%s8545_s1 + $0x1a0] ss:$16 sps:$4 sm:$0xff]  }
  0x14   :  { %3660 = vmatprep.subr.bf16.mxu0 %v5637_v20  ;;  %4029 = vmatprep.subr.bf16.mxu1 %v5639_v21  ;;  %v647_v58 = vcombine.high %v639_v54, %v639_v54  ;;  %v5690_v1 = vld [vmem:[%s8545_s1 + $0x1a8] ss:$16 sps:$4 sm:$0xff]   ;;  %v5691_v2 = vld [vmem:[%s8545_s1 + $0x1c4] ss:$16 sps:$4 sm:$0xff]   ;;  %v5693_v3 = vld [vmem:[%s8545_s1 + $0x1cc] ss:$16 sps:$4 sm:$0xff]   ;;  %v6798_v13 = vrot.slane %v639_v54, %v6718_v49 }
  0x15   :  { %v5695_v4 = vld [vmem:[%s8545_s1 + $0x1c0] ss:$16 sps:$4 sm:$0xff]   ;;  %v5696_v5 = vld [vmem:[%s8545_s1 + $0x1c8] ss:$16 sps:$4 sm:$0xff]   ;;  %v5697_v6 = vld [vmem:[%s8545_s1 + $0x1e4] ss:$16 sps:$4 sm:$0xff]  }
  0x16   :  { %v669_v60 = vrot.slane %v647_v58, %v6718_v49  ;;  %v5699_v7 = vld [vmem:[%s8545_s1 + $0x1ec] ss:$16 sps:$4 sm:$0xff]   ;;  %v5701_v8 = vld [vmem:[%s8545_s1 + $0x1e0] ss:$16 sps:$4 sm:$0xff]   ;;  %v5702_v9 = vld [vmem:[%s8545_s1 + $0x1e8] ss:$16 sps:$4 sm:$0xff]  }
  0x17   :  { %3661 = vmatpush1.bf16.msra.mxu0 %v5641_v22  ;;  %4030 = vmatpush1.bf16.msra.mxu1 %v5642_v23  ;;  %v5705_v10 = vld [vmem:[%s8545_s1 + $0x204] ss:$16 sps:$4 sm:$0xff]   ;;  %v5708_v11 = vld [vmem:[%s8545_s1 + $0x20c] ss:$16 sps:$4 sm:$0xff]   ;;  %v5703_v12 = vld [vmem:[%s8545_s1 + $0x200] ss:$16 sps:$4 sm:$0xff]  }
  0x18   :  { %3662 = vmatprep.subr.bf16.mxu0 %v5643_v24  ;;  %4031 = vmatprep.subr.bf16.mxu1 %v5645_v25  ;;  %v5706_v14 = vld [vmem:[%s8545_s1 + $0x208] ss:$16 sps:$4 sm:$0xff]   ;;  %v5711_v15 = vld [vmem:[%s8545_s1 + $0x224] ss:$16 sps:$4 sm:$0xff]   ;;  %v5714_v16 = vld [vmem:[%s8545_s1 + $0x22c] ss:$16 sps:$4 sm:$0xff]   ;;  %v679_v17 = vcombine.high %v669_v60, %v669_v60 }
  0x19   :  { %3682 = vmatprep.mubr.bf16.mxu0 %v669_v60  ;;  %4051 = vmatprep.mubr.bf16.mxu1 %v669_v60  ;;  %v5709_v18 = vld [vmem:[%s8545_s1 + $0x220] ss:$16 sps:$4 sm:$0xff]   ;;  %v5712_v19 = vld [vmem:[%s8545_s1 + $0x228] ss:$16 sps:$4 sm:$0xff]   ;;  %v5717_v20 = vld [vmem:[%s8545_s1 + $0x244] ss:$16 sps:$4 sm:$0xff]  }
  0x1a   :  { %v5720_v21 = vld [vmem:[%s8545_s1 + $0x24c] ss:$16 sps:$4 sm:$0xff]   ;;  %v5715_v22 = vld [vmem:[%s8545_s1 + $0x240] ss:$16 sps:$4 sm:$0xff]   ;;  %v5718_v23 = vld [vmem:[%s8545_s1 + $0x248] ss:$16 sps:$4 sm:$0xff]  }
  0x1b   :  { %3663 = vmatpush1.bf16.msra.mxu0 %v5647_v26  ;;  %4032 = vmatpush1.bf16.msra.mxu1 %v5648_v27  ;;  %v5723_v24 = vld [vmem:[%s8545_s1 + $0x264] ss:$16 sps:$4 sm:$0xff]   ;;  %v5726_v25 = vld [vmem:[%s8545_s1 + $0x26c] ss:$16 sps:$4 sm:$0xff]   ;;  %v5721_v26 = vld [vmem:[%s8545_s1 + $0x260] ss:$16 sps:$4 sm:$0xff]  }
  0x1c   :  { %3664 = vmatprep.subr.bf16.mxu0 %v5649_v28  ;;  %4033 = vmatprep.subr.bf16.mxu1 %v5651_v29  ;;  %v5724_v27 = vld [vmem:[%s8545_s1 + $0x268] ss:$16 sps:$4 sm:$0xff]   ;;  %v5729_v28 = vld [vmem:[%s8545_s1 + $0x284] ss:$16 sps:$4 sm:$0xff]   ;;  %v5732_v29 = vld [vmem:[%s8545_s1 + $0x28c] ss:$16 sps:$4 sm:$0xff]  }
  0x1d   :  { %v5741_v36 = vld [vmem:[%s8545_s1 + $0x2c4] ss:$16 sps:$4 sm:$0xff]   ;;  %v5744_v37 = vld [vmem:[%s8545_s1 + $0x2cc] ss:$16 sps:$4 sm:$0xff]   ;;  %v5739_v38 = vld [vmem:[%s8545_s1 + $0x2c0] ss:$16 sps:$4 sm:$0xff]  }
  0x1e   :  { %v5745_v43 = vld [vmem:[%s8545_s1 + $0x2e0] ss:$16 sps:$4 sm:$0xff]   ;;  %v5760_v54 = vld [vmem:[%s8545_s1 + $0x328] ss:$16 sps:$4 sm:$0xff]   ;;  %v5774_v60 = vld [vmem:[%s8545_s1 + $0x36c] ss:$16 sps:$4 sm:$0xff]  }
  0x1f   :  { %3665 = vmatpush1.bf16.msra.mxu0 %v5653_v30  ;;  %4034 = vmatpush1.bf16.msra.mxu1 %v5654_v31  ;;  %v5727_v30 = vld [vmem:[%s8545_s1 + $0x280] ss:$16 sps:$4 sm:$0xff]   ;;  %v5730_v31 = vld [vmem:[%s8545_s1 + $0x288] ss:$16 sps:$4 sm:$0xff]  }
  0x20   :  { %3666 = vmatprep.subr.bf16.mxu0 %v5655_v32  ;;  %4035 = vmatprep.subr.bf16.mxu1 %v5657_v33  ;;  %v5735_v32 = vld [vmem:[%s8545_s1 + $0x2a4] ss:$16 sps:$4 sm:$0xff]   ;;  %v5738_v33 = vld [vmem:[%s8545_s1 + $0x2ac] ss:$16 sps:$4 sm:$0xff]   ;;  %v5766_v58 = vld [vmem:[%s8545_s1 + $0x348] ss:$16 sps:$4 sm:$0xff]  }
  0x23   :  { %3667 = vmatpush1.bf16.msra.mxu0 %v5659_v34  ;;  %4036 = vmatpush1.bf16.msra.mxu1 %v5660_v35  ;;  %v5733_v34 = vld [vmem:[%s8545_s1 + $0x2a0] ss:$16 sps:$4 sm:$0xff]   ;;  %v5736_v35 = vld [vmem:[%s8545_s1 + $0x2a8] ss:$16 sps:$4 sm:$0xff]  }
  0x24   :  { %3668 = vmatprep.subr.bf16.mxu0 %v5661_v39  ;;  %4037 = vmatprep.subr.bf16.mxu1 %v5663_v40  ;;  %v5742_v39 = vld [vmem:[%s8545_s1 + $0x2c8] ss:$16 sps:$4 sm:$0xff]   ;;  %v5747_v40 = vld [vmem:[%s8545_s1 + $0x2e4] ss:$16 sps:$4 sm:$0xff]  }
  0x27   :  { %3669 = vmatpush1.bf16.msra.mxu0 %v5665_v41  ;;  %4038 = vmatpush1.bf16.msra.mxu1 %v5666_v44  ;;  %v5750_v41 = vld [vmem:[%s8545_s1 + $0x2ec] ss:$16 sps:$4 sm:$0xff]   ;;  %v5748_v44 = vld [vmem:[%s8545_s1 + $0x2e8] ss:$16 sps:$4 sm:$0xff]  }
  0x28   :  { %3670 = vmatprep.subr.bf16.mxu0 %v5667_v45  ;;  %4039 = vmatprep.subr.bf16.mxu1 %v5669_v46  ;;  %v5753_v45 = vld [vmem:[%s8545_s1 + $0x304] ss:$16 sps:$4 sm:$0xff]   ;;  %v5756_v46 = vld [vmem:[%s8545_s1 + $0x30c] ss:$16 sps:$4 sm:$0xff]  }
  0x2b   :  { %3671 = vmatpush1.bf16.msra.mxu0 %v5671_v47  ;;  %4040 = vmatpush1.bf16.msra.mxu1 %v5672_v48  ;;  %v5751_v47 = vld [vmem:[%s8545_s1 + $0x300] ss:$16 sps:$4 sm:$0xff]   ;;  %v5754_v48 = vld [vmem:[%s8545_s1 + $0x308] ss:$16 sps:$4 sm:$0xff]  }
  0x2c   :  { %3672 = vmatprep.subr.bf16.mxu0 %v5673_v50  ;;  %4041 = vmatprep.subr.bf16.mxu1 %v5675_v51  ;;  %v5759_v50 = vld [vmem:[%s8545_s1 + $0x324] ss:$16 sps:$4 sm:$0xff]   ;;  %v5762_v51 = vld [vmem:[%s8545_s1 + $0x32c] ss:$16 sps:$4 sm:$0xff]  }
  0x2f   :  { %3673 = vmatpush1.bf16.msra.mxu0 %v5677_v53  ;;  %4042 = vmatpush1.bf16.msra.mxu1 %v5678_v55  ;;  %v5757_v53 = vld [vmem:[%s8545_s1 + $0x320] ss:$16 sps:$4 sm:$0xff]   ;;  %v5765_v55 = vld [vmem:[%s8545_s1 + $0x344] ss:$16 sps:$4 sm:$0xff]  }
  0x30   :  { %3674 = vmatprep.subr.bf16.mxu0 %v5679_v56  ;;  %4043 = vmatprep.subr.bf16.mxu1 %v5681_v57  ;;  %v5768_v56 = vld [vmem:[%s8545_s1 + $0x34c] ss:$16 sps:$4 sm:$0xff]   ;;  %v5763_v57 = vld [vmem:[%s8545_s1 + $0x340] ss:$16 sps:$4 sm:$0xff]  }
  0x33   :  { %3675 = vmatpush1.bf16.msra.mxu0 %v5683_v59  ;;  %4044 = vmatpush1.bf16.msra.mxu1 %v5684_v61  ;;  %v5771_v59 = vld [vmem:[%s8545_s1 + $0x364] ss:$16 sps:$4 sm:$0xff]   ;;  %v5769_v61 = vld [vmem:[%s8545_s1 + $0x360] ss:$16 sps:$4 sm:$0xff]  }
  0x34   :  { %3676 = vmatprep.subr.bf16.mxu0 %v5685_v62  ;;  %4045 = vmatprep.subr.bf16.mxu1 %v5687_v63  ;;  %v5772_v62 = vld [vmem:[%s8545_s1 + $0x368] ss:$16 sps:$4 sm:$0xff]   ;;  %v5777_v63 = vld [vmem:[%s8545_s1 + $0x384] ss:$16 sps:$4 sm:$0xff]  }
  0x37   :  { %3677 = vmatpush1.bf16.msra.mxu0 %v5689_v0  ;;  %4046 = vmatpush1.bf16.msra.mxu1 %v5690_v1  ;;  %v5780_v0 = vld [vmem:[%s8545_s1 + $0x38c] ss:$16 sps:$4 sm:$0xff]   ;;  %v5775_v1 = vld [vmem:[%s8545_s1 + $0x380] ss:$16 sps:$4 sm:$0xff]  }
  0x38   :  { %3678 = vmatprep.subr.bf16.mxu0 %v5691_v2  ;;  %4047 = vmatprep.subr.bf16.mxu1 %v5693_v3  ;;  %v5778_v2 = vld [vmem:[%s8545_s1 + $0x388] ss:$16 sps:$4 sm:$0xff]   ;;  %v5783_v3 = vld [vmem:[%s8545_s1 + $0x3a4] ss:$16 sps:$4 sm:$0xff]  }
  0x3b   :  { %3679 = vmatpush1.bf16.msra.mxu0 %v5695_v4  ;;  %4048 = vmatpush1.bf16.msra.mxu1 %v5696_v5  ;;  %v5786_v4 = vld [vmem:[%s8545_s1 + $0x3ac] ss:$16 sps:$4 sm:$0xff]   ;;  %v5781_v5 = vld [vmem:[%s8545_s1 + $0x3a0] ss:$16 sps:$4 sm:$0xff]  }
  0x3c   :  { %3680 = vmatprep.subr.bf16.mxu0 %v5697_v6  ;;  %4049 = vmatprep.subr.bf16.mxu1 %v5699_v7  ;;  %v5784_v6 = vld [vmem:[%s8545_s1 + $0x3a8] ss:$16 sps:$4 sm:$0xff]   ;;  %v5789_v7 = vld [vmem:[%s8545_s1 + $0x3c4] ss:$16 sps:$4 sm:$0xff]  }
  0x3f   :  { %3681 = vmatpush1.bf16.msra.mxu0 %v5701_v8  ;;  %4050 = vmatpush1.bf16.msra.mxu1 %v5702_v9  ;;  %v5792_v8 = vld [vmem:[%s8545_s1 + $0x3cc] ss:$16 sps:$4 sm:$0xff]   ;;  %v632_v9 = vcombine.high %v6729_v52, %v6729_v52 }
  0x40   :  { %3691 = vmatprep.subr.bf16.mxu0 %v5705_v10  ;;  %4060 = vmatprep.subr.bf16.mxu1 %v5708_v11  ;;  %v5787_v10 = vld [vmem:[%s8545_s1 + $0x3c0] ss:$16 sps:$4 sm:$0xff]   ;;  %v5790_v11 = vld [vmem:[%s8545_s1 + $0x3c8] ss:$16 sps:$4 sm:$0xff]   ;;  %v5798_v52 = vld [vmem:[%s8545_s1 + $0x3ec] ss:$16 sps:$4 sm:$0xff]  }
  0x42   :  { %3683 = vmatmul.mubr.bf16.vlgmr.msra.gmra.mrb[0].mxu0 %v6798_v13  ;;  %4052 = vmatmul.mubr.bf16.vlgmr.msra.gmra.mrb[0].mxu1 %v6798_v13 }
  0x43   :  { %3692 = vmatpush1.bf16.msra.mxu0 %v5703_v12  ;;  %4061 = vmatpush1.bf16.msra.mxu1 %v5706_v14  ;;  %v5795_v12 = vld [vmem:[%s8545_s1 + $0x3e4] ss:$16 sps:$4 sm:$0xff]   ;;  %v6982_v14 = vrot.slane %v632_v9, %v6718_v49  ;;  %v5874_v9 = vld [vmem:[%s8545_s1 + $0x588] ss:$16 sps:$4 sm:$0xff]  }
  0x44   :  { %3693 = vmatprep.subr.bf16.mxu0 %v5711_v15  ;;  %4062 = vmatprep.subr.bf16.mxu1 %v5714_v16  ;;  %v5793_v15 = vld [vmem:[%s8545_s1 + $0x3e0] ss:$16 sps:$4 sm:$0xff]   ;;  %v5796_v16 = vld [vmem:[%s8545_s1 + $0x3e8] ss:$16 sps:$4 sm:$0xff]  }
  0x45   :  { %3723 = vmatprep.mubr.bf16.mxu0 %v679_v17  ;;  %4092 = vmatprep.mubr.bf16.mxu1 %v679_v17  ;;  %v5801_v17 = vld [vmem:[%s8545_s1 + $0x404] ss:$16 sps:$4 sm:$0xff]  }
  0x47   :  { %3694 = vmatpush1.bf16.msra.mxu0 %v5709_v18  ;;  %4063 = vmatpush1.bf16.msra.mxu1 %v5712_v19  ;;  %v5804_v18 = vld [vmem:[%s8545_s1 + $0x40c] ss:$16 sps:$4 sm:$0xff]   ;;  %v648_v19 = vcombine.high %v6982_v14, %v6982_v14 }
  0x48   :  { %3695 = vmatprep.subr.bf16.mxu0 %v5717_v20  ;;  %4064 = vmatprep.subr.bf16.mxu1 %v5720_v21  ;;  %v5799_v20 = vld [vmem:[%s8545_s1 + $0x400] ss:$16 sps:$4 sm:$0xff]   ;;  %v677_v21 = vcombine.high %v6798_v13, %v6798_v13 }
  0x49   :  { %v5805_v13 = vld [vmem:[%s8545_s1 + $0x420] ss:$16 sps:$4 sm:$0xff]  }
  0x4b   :  { %3696 = vmatpush1.bf16.msra.mxu0 %v5715_v22  ;;  %4065 = vmatpush1.bf16.msra.mxu1 %v5718_v23  ;;  %v5802_v22 = vld [vmem:[%s8545_s1 + $0x408] ss:$16 sps:$4 sm:$0xff]   ;;  %v5807_v23 = vld [vmem:[%s8545_s1 + $0x424] ss:$16 sps:$4 sm:$0xff]  }
  0x4c   :  { %3697 = vmatprep.subr.bf16.mxu0 %v5723_v24  ;;  %4066 = vmatprep.subr.bf16.mxu1 %v5726_v25  ;;  %v5810_v24 = vld [vmem:[%s8545_s1 + $0x42c] ss:$16 sps:$4 sm:$0xff]   ;;  %v7013_v25 = vrot.slane %v648_v19, %v6718_v49  ;;  %v5891_v19 = vld [vmem:[%s8545_s1 + $0x5e4] ss:$16 sps:$4 sm:$0xff]  }
  0x4f   :  { %3698 = vmatpush1.bf16.msra.mxu0 %v5721_v26  ;;  %4067 = vmatpush1.bf16.msra.mxu1 %v5724_v27  ;;  %v5808_v26 = vld [vmem:[%s8545_s1 + $0x428] ss:$16 sps:$4 sm:$0xff]   ;;  %v5813_v27 = vld [vmem:[%s8545_s1 + $0x444] ss:$16 sps:$4 sm:$0xff]  }
  0x50   :  { %3699 = vmatprep.subr.bf16.mxu0 %v5729_v28  ;;  %4068 = vmatprep.subr.bf16.mxu1 %v5732_v29  ;;  %v5816_v28 = vld [vmem:[%s8545_s1 + $0x44c] ss:$16 sps:$4 sm:$0xff]   ;;  %v5811_v29 = vld [vmem:[%s8545_s1 + $0x440] ss:$16 sps:$4 sm:$0xff]  }
  0x53   :  { %3700 = vmatpush1.bf16.msra.mxu0 %v5727_v30  ;;  %4069 = vmatpush1.bf16.msra.mxu1 %v5730_v31  ;;  %v5814_v30 = vld [vmem:[%s8545_s1 + $0x448] ss:$16 sps:$4 sm:$0xff]   ;;  %v5819_v31 = vld [vmem:[%s8545_s1 + $0x464] ss:$16 sps:$4 sm:$0xff]  }
  0x54   :  { %3701 = vmatprep.subr.bf16.mxu0 %v5735_v32  ;;  %4070 = vmatprep.subr.bf16.mxu1 %v5738_v33  ;;  %v5822_v32 = vld [vmem:[%s8545_s1 + $0x46c] ss:$16 sps:$4 sm:$0xff]   ;;  %v5817_v33 = vld [vmem:[%s8545_s1 + $0x460] ss:$16 sps:$4 sm:$0xff]  }
  0x57   :  { %3702 = vmatpush1.bf16.msra.mxu0 %v5733_v34  ;;  %4071 = vmatpush1.bf16.msra.mxu1 %v5736_v35  ;;  %v5820_v34 = vld [vmem:[%s8545_s1 + $0x468] ss:$16 sps:$4 sm:$0xff]   ;;  %v5825_v35 = vld [vmem:[%s8545_s1 + $0x484] ss:$16 sps:$4 sm:$0xff]  }
  0x58   :  { %3703 = vmatprep.subr.bf16.mxu0 %v5741_v36  ;;  %4072 = vmatprep.subr.bf16.mxu1 %v5744_v37  ;;  %v5828_v36 = vld [vmem:[%s8545_s1 + $0x48c] ss:$16 sps:$4 sm:$0xff]   ;;  %v5823_v37 = vld [vmem:[%s8545_s1 + $0x480] ss:$16 sps:$4 sm:$0xff]  }
  0x5b   :  { %3704 = vmatpush1.bf16.msra.mxu0 %v5739_v38  ;;  %4073 = vmatpush1.bf16.msra.mxu1 %v5742_v39  ;;  %v5826_v38 = vld [vmem:[%s8545_s1 + $0x488] ss:$16 sps:$4 sm:$0xff]   ;;  %v5831_v39 = vld [vmem:[%s8545_s1 + $0x4a4] ss:$16 sps:$4 sm:$0xff]  }
  0x5c   :  { %3705 = vmatprep.subr.bf16.mxu0 %v5747_v40  ;;  %4074 = vmatprep.subr.bf16.mxu1 %v5750_v41  ;;  %v5834_v40 = vld [vmem:[%s8545_s1 + $0x4ac] ss:$16 sps:$4 sm:$0xff]   ;;  %v5829_v41 = vld [vmem:[%s8545_s1 + $0x4a0] ss:$16 sps:$4 sm:$0xff]  }
  0x5f   :  { %3706 = vmatpush1.bf16.msra.mxu0 %v5745_v43  ;;  %4075 = vmatpush1.bf16.msra.mxu1 %v5748_v44  ;;  %v5832_v43 = vld [vmem:[%s8545_s1 + $0x4a8] ss:$16 sps:$4 sm:$0xff]   ;;  %v5837_v44 = vld [vmem:[%s8545_s1 + $0x4c4] ss:$16 sps:$4 sm:$0xff]  }
  0x60   :  { %3707 = vmatprep.subr.bf16.mxu0 %v5753_v45  ;;  %4076 = vmatprep.subr.bf16.mxu1 %v5756_v46  ;;  %v5840_v45 = vld [vmem:[%s8545_s1 + $0x4cc] ss:$16 sps:$4 sm:$0xff]   ;;  %v5835_v46 = vld [vmem:[%s8545_s1 + $0x4c0] ss:$16 sps:$4 sm:$0xff]  }
  0x63   :  { %3708 = vmatpush1.bf16.msra.mxu0 %v5751_v47  ;;  %4077 = vmatpush1.bf16.msra.mxu1 %v5754_v48  ;;  %v5838_v47 = vld [vmem:[%s8545_s1 + $0x4c8] ss:$16 sps:$4 sm:$0xff]   ;;  %v5843_v48 = vld [vmem:[%s8545_s1 + $0x4e4] ss:$16 sps:$4 sm:$0xff]  }
  0x64   :  { %3709 = vmatprep.subr.bf16.mxu0 %v5759_v50  ;;  %4078 = vmatprep.subr.bf16.mxu1 %v5762_v51  ;;  %v5846_v50 = vld [vmem:[%s8545_s1 + $0x4ec] ss:$16 sps:$4 sm:$0xff]   ;;  %v5841_v51 = vld [vmem:[%s8545_s1 + $0x4e0] ss:$16 sps:$4 sm:$0xff]  }
  0x67   :  { %3710 = vmatpush1.bf16.msra.mxu0 %v5757_v53  ;;  %4079 = vmatpush1.bf16.msra.mxu1 %v5760_v54  ;;  %v5844_v53 = vld [vmem:[%s8545_s1 + $0x4e8] ss:$16 sps:$4 sm:$0xff]   ;;  %v5849_v54 = vld [vmem:[%s8545_s1 + $0x504] ss:$16 sps:$4 sm:$0xff]  }
  0x68   :  { %3711 = vmatprep.subr.bf16.mxu0 %v5765_v55  ;;  %4080 = vmatprep.subr.bf16.mxu1 %v5768_v56  ;;  %v5852_v55 = vld [vmem:[%s8545_s1 + $0x50c] ss:$16 sps:$4 sm:$0xff]   ;;  %v5847_v56 = vld [vmem:[%s8545_s1 + $0x500] ss:$16 sps:$4 sm:$0xff]  }
  0x6b   :  { %3712 = vmatpush1.bf16.msra.mxu0 %v5763_v57  ;;  %4081 = vmatpush1.bf16.msra.mxu1 %v5766_v58  ;;  %v5850_v57 = vld [vmem:[%s8545_s1 + $0x508] ss:$16 sps:$4 sm:$0xff]   ;;  %v5855_v58 = vld [vmem:[%s8545_s1 + $0x524] ss:$16 sps:$4 sm:$0xff]  }
  0x6c   :  { %3713 = vmatprep.subr.bf16.mxu0 %v5771_v59  ;;  %4082 = vmatprep.subr.bf16.mxu1 %v5774_v60  ;;  %v5858_v59 = vld [vmem:[%s8545_s1 + $0x52c] ss:$16 sps:$4 sm:$0xff]   ;;  %v5853_v60 = vld [vmem:[%s8545_s1 + $0x520] ss:$16 sps:$4 sm:$0xff]  }
  0x6f   :  { %3714 = vmatpush1.bf16.msra.mxu0 %v5769_v61  ;;  %4083 = vmatpush1.bf16.msra.mxu1 %v5772_v62  ;;  %v5856_v61 = vld [vmem:[%s8545_s1 + $0x528] ss:$16 sps:$4 sm:$0xff]   ;;  %v5861_v62 = vld [vmem:[%s8545_s1 + $0x544] ss:$16 sps:$4 sm:$0xff]  }
  0x70   :  { %3715 = vmatprep.subr.bf16.mxu0 %v5777_v63  ;;  %4084 = vmatprep.subr.bf16.mxu1 %v5780_v0  ;;  %v5864_v63 = vld [vmem:[%s8545_s1 + $0x54c] ss:$16 sps:$4 sm:$0xff]   ;;  %v5859_v0 = vld [vmem:[%s8545_s1 + $0x540] ss:$16 sps:$4 sm:$0xff]  }
  0x73   :  { %3716 = vmatpush1.bf16.msra.mxu0 %v5775_v1  ;;  %4085 = vmatpush1.bf16.msra.mxu1 %v5778_v2  ;;  %v5862_v1 = vld [vmem:[%s8545_s1 + $0x548] ss:$16 sps:$4 sm:$0xff]   ;;  %v5867_v2 = vld [vmem:[%s8545_s1 + $0x564] ss:$16 sps:$4 sm:$0xff]  }
  0x74   :  { %3717 = vmatprep.subr.bf16.mxu0 %v5783_v3  ;;  %4086 = vmatprep.subr.bf16.mxu1 %v5786_v4  ;;  %v5870_v3 = vld [vmem:[%s8545_s1 + $0x56c] ss:$16 sps:$4 sm:$0xff]   ;;  %v5865_v4 = vld [vmem:[%s8545_s1 + $0x560] ss:$16 sps:$4 sm:$0xff]  }
  0x77   :  { %3718 = vmatpush1.bf16.msra.mxu0 %v5781_v5  ;;  %4087 = vmatpush1.bf16.msra.mxu1 %v5784_v6  ;;  %v5868_v5 = vld [vmem:[%s8545_s1 + $0x568] ss:$16 sps:$4 sm:$0xff]   ;;  %v5873_v6 = vld [vmem:[%s8545_s1 + $0x584] ss:$16 sps:$4 sm:$0xff]  }
  0x78   :  { %3719 = vmatprep.subr.bf16.mxu0 %v5789_v7  ;;  %4088 = vmatprep.subr.bf16.mxu1 %v5792_v8  ;;  %v5876_v7 = vld [vmem:[%s8545_s1 + $0x58c] ss:$16 sps:$4 sm:$0xff]   ;;  %v5871_v8 = vld [vmem:[%s8545_s1 + $0x580] ss:$16 sps:$4 sm:$0xff]  }
  0x7b   :  { %3720 = vmatpush1.bf16.msra.mxu0 %v5787_v10  ;;  %4089 = vmatpush1.bf16.msra.mxu1 %v5790_v11  ;;  %v5879_v10 = vld [vmem:[%s8545_s1 + $0x5a4] ss:$16 sps:$4 sm:$0xff]   ;;  %v5882_v11 = vld [vmem:[%s8545_s1 + $0x5ac] ss:$16 sps:$4 sm:$0xff]  }
  0x7c   :  { %3721 = vmatprep.subr.bf16.mxu0 %v5795_v12  ;;  %4090 = vmatprep.subr.bf16.mxu1 %v5798_v52  ;;  %v5877_v12 = vld [vmem:[%s8545_s1 + $0x5a0] ss:$16 sps:$4 sm:$0xff]   ;;  %v5880_v52 = vld [vmem:[%s8545_s1 + $0x5a8] ss:$16 sps:$4 sm:$0xff]  }
  0x7f   :  { %3722 = vmatpush1.bf16.msra.mxu0 %v5793_v15  ;;  %4091 = vmatpush1.bf16.msra.mxu1 %v5796_v16  ;;  %v5885_v15 = vld [vmem:[%s8545_s1 + $0x5c4] ss:$16 sps:$4 sm:$0xff]   ;;  %v5888_v16 = vld [vmem:[%s8545_s1 + $0x5cc] ss:$16 sps:$4 sm:$0xff]  }
  0x80   :  { %3732 = vmatprep.subr.bf16.mxu0 %v5801_v17  ;;  %4101 = vmatprep.subr.bf16.mxu1 %v5804_v18  ;;  %v5883_v17 = vld [vmem:[%s8545_s1 + $0x5c0] ss:$16 sps:$4 sm:$0xff]   ;;  %v5886_v18 = vld [vmem:[%s8545_s1 + $0x5c8] ss:$16 sps:$4 sm:$0xff]  }
  0x82   :  { %3724 = vmatmul.mubr.bf16.vlgmr.msra.gmra.mrb[0].mxu0 %v677_v21  ;;  %4093 = vmatmul.mubr.bf16.vlgmr.msra.gmra.mrb[0].mxu1 %v677_v21  ;;  %v5889_v21 = vld [vmem:[%s8545_s1 + $0x5e0] ss:$16 sps:$4 sm:$0xff]  }
  0x83   :  { %3733 = vmatpush1.bf16.msra.mxu0 %v5799_v20  ;;  %4102 = vmatpush1.bf16.msra.mxu1 %v5802_v22  ;;  %v5894_v20 = vld [vmem:[%s8545_s1 + $0x5ec] ss:$16 sps:$4 sm:$0xff]   ;;  %v5892_v22 = vld [vmem:[%s8545_s1 + $0x5e8] ss:$16 sps:$4 sm:$0xff]  }
  0x84   :  { %3734 = vmatprep.subr.bf16.mxu0 %v5807_v23  ;;  %4103 = vmatprep.subr.bf16.mxu1 %v5810_v24  ;;  %v5898_v23 = vld [vmem:[%s8545_s1 + $0x604] ss:$16 sps:$4 sm:$0xff]   ;;  %v5901_v24 = vld [vmem:[%s8545_s1 + $0x60c] ss:$16 sps:$4 sm:$0xff]  }
  0x85   :  { %3764 = vmatprep.mubr.bf16.mxu0 %v7013_v25  ;;  %4133 = vmatprep.mubr.bf16.mxu1 %v7013_v25 }
  0x87   :  { %3735 = vmatpush1.bf16.msra.mxu0 %v5805_v13  ;;  %4104 = vmatpush1.bf16.msra.mxu1 %v5808_v26  ;;  %v5896_v13 = vld [vmem:[%s8545_s1 + $0x600] ss:$16 sps:$4 sm:$0xff]   ;;  %v7202_v26 = vrot.slane %v6982_v14, %v6718_v49  ;;  %v680_v14 = vcombine.high %v7013_v25, %v7013_v25  ;;  %v5910_v25 = vld [vmem:[%s8545_s1 + $0x644] ss:$16 sps:$4 sm:$0xff]  }
  0x88   :  { %3736 = vmatprep.subr.bf16.mxu0 %v5813_v27  ;;  %4105 = vmatprep.subr.bf16.mxu1 %v5816_v28  ;;  %v5899_v27 = vld [vmem:[%s8545_s1 + $0x608] ss:$16 sps:$4 sm:$0xff]   ;;  %v5904_v28 = vld [vmem:[%s8545_s1 + $0x624] ss:$16 sps:$4 sm:$0xff]  }
  0x8b   :  { %3737 = vmatpush1.bf16.msra.mxu0 %v5811_v29  ;;  %4106 = vmatpush1.bf16.msra.mxu1 %v5814_v30  ;;  %v5907_v29 = vld [vmem:[%s8545_s1 + $0x62c] ss:$16 sps:$4 sm:$0xff]   ;;  %v5902_v30 = vld [vmem:[%s8545_s1 + $0x620] ss:$16 sps:$4 sm:$0xff]  }
  0x8c   :  { %3738 = vmatprep.subr.bf16.mxu0 %v5819_v31  ;;  %4107 = vmatprep.subr.bf16.mxu1 %v5822_v32  ;;  %v5905_v31 = vld [vmem:[%s8545_s1 + $0x628] ss:$16 sps:$4 sm:$0xff]   ;;  %v5913_v32 = vld [vmem:[%s8545_s1 + $0x64c] ss:$16 sps:$4 sm:$0xff]  }
  0x8f   :  { %3739 = vmatpush1.bf16.msra.mxu0 %v5817_v33  ;;  %4108 = vmatpush1.bf16.msra.mxu1 %v5820_v34  ;;  %v5908_v33 = vld [vmem:[%s8545_s1 + $0x640] ss:$16 sps:$4 sm:$0xff]   ;;  %v5911_v34 = vld [vmem:[%s8545_s1 + $0x648] ss:$16 sps:$4 sm:$0xff]  }
  0x90   :  { %3740 = vmatprep.subr.bf16.mxu0 %v5825_v35  ;;  %4109 = vmatprep.subr.bf16.mxu1 %v5828_v36  ;;  %v5916_v35 = vld [vmem:[%s8545_s1 + $0x664] ss:$16 sps:$4 sm:$0xff]   ;;  %v5919_v36 = vld [vmem:[%s8545_s1 + $0x66c] ss:$16 sps:$4 sm:$0xff]  }
  0x93   :  { %3741 = vmatpush1.bf16.msra.mxu0 %v5823_v37  ;;  %4110 = vmatpush1.bf16.msra.mxu1 %v5826_v38  ;;  %v5914_v37 = vld [vmem:[%s8545_s1 + $0x660] ss:$16 sps:$4 sm:$0xff]   ;;  %v5917_v38 = vld [vmem:[%s8545_s1 + $0x668] ss:$16 sps:$4 sm:$0xff]  }
  0x94   :  { %3742 = vmatprep.subr.bf16.mxu0 %v5831_v39  ;;  %4111 = vmatprep.subr.bf16.mxu1 %v5834_v40  ;;  %v5922_v39 = vld [vmem:[%s8545_s1 + $0x684] ss:$16 sps:$4 sm:$0xff]   ;;  %v5925_v40 = vld [vmem:[%s8545_s1 + $0x68c] ss:$16 sps:$4 sm:$0xff]  }
  0x97   :  { %3743 = vmatpush1.bf16.msra.mxu0 %v5829_v41  ;;  %4112 = vmatpush1.bf16.msra.mxu1 %v5832_v43  ;;  %v5920_v41 = vld [vmem:[%s8545_s1 + $0x680] ss:$16 sps:$4 sm:$0xff]   ;;  %v5923_v43 = vld [vmem:[%s8545_s1 + $0x688] ss:$16 sps:$4 sm:$0xff]  }
  0x98   :  { %3744 = vmatprep.subr.bf16.mxu0 %v5837_v44  ;;  %4113 = vmatprep.subr.bf16.mxu1 %v5840_v45  ;;  %v5928_v44 = vld [vmem:[%s8545_s1 + $0x6a4] ss:$16 sps:$4 sm:$0xff]   ;;  %v5931_v45 = vld [vmem:[%s8545_s1 + $0x6ac] ss:$16 sps:$4 sm:$0xff]  }
  0x9b   :  { %3745 = vmatpush1.bf16.msra.mxu0 %v5835_v46  ;;  %4114 = vmatpush1.bf16.msra.mxu1 %v5838_v47  ;;  %v5926_v46 = vld [vmem:[%s8545_s1 + $0x6a0] ss:$16 sps:$4 sm:$0xff]   ;;  %v5929_v47 = vld [vmem:[%s8545_s1 + $0x6a8] ss:$16 sps:$4 sm:$0xff]  }
  0x9c   :  { %3746 = vmatprep.subr.bf16.mxu0 %v5843_v48  ;;  %4115 = vmatprep.subr.bf16.mxu1 %v5846_v50  ;;  %v5934_v48 = vld [vmem:[%s8545_s1 + $0x6c4] ss:$16 sps:$4 sm:$0xff]   ;;  %v5937_v50 = vld [vmem:[%s8545_s1 + $0x6cc] ss:$16 sps:$4 sm:$0xff]  }
  0x9f   :  { %3747 = vmatpush1.bf16.msra.mxu0 %v5841_v51  ;;  %4116 = vmatpush1.bf16.msra.mxu1 %v5844_v53  ;;  %v5932_v51 = vld [vmem:[%s8545_s1 + $0x6c0] ss:$16 sps:$4 sm:$0xff]   ;;  %v5935_v53 = vld [vmem:[%s8545_s1 + $0x6c8] ss:$16 sps:$4 sm:$0xff]  }
  0xa0   :  { %3748 = vmatprep.subr.bf16.mxu0 %v5849_v54  ;;  %4117 = vmatprep.subr.bf16.mxu1 %v5852_v55  ;;  %v5940_v54 = vld [vmem:[%s8545_s1 + $0x6e4] ss:$16 sps:$4 sm:$0xff]   ;;  %v5943_v55 = vld [vmem:[%s8545_s1 + $0x6ec] ss:$16 sps:$4 sm:$0xff]  }
  0xa3   :  { %3749 = vmatpush1.bf16.msra.mxu0 %v5847_v56  ;;  %4118 = vmatpush1.bf16.msra.mxu1 %v5850_v57  ;;  %v5938_v56 = vld [vmem:[%s8545_s1 + $0x6e0] ss:$16 sps:$4 sm:$0xff]   ;;  %v5941_v57 = vld [vmem:[%s8545_s1 + $0x6e8] ss:$16 sps:$4 sm:$0xff]  }
  0xa4   :  { %3750 = vmatprep.subr.bf16.mxu0 %v5855_v58  ;;  %4119 = vmatprep.subr.bf16.mxu1 %v5858_v59  ;;  %v5946_v58 = vld [vmem:[%s8545_s1 + $0x704] ss:$16 sps:$4 sm:$0xff]   ;;  %v5949_v59 = vld [vmem:[%s8545_s1 + $0x70c] ss:$16 sps:$4 sm:$0xff]  }
  0xa7   :  { %3751 = vmatpush1.bf16.msra.mxu0 %v5853_v60  ;;  %4120 = vmatpush1.bf16.msra.mxu1 %v5856_v61  ;;  %v5944_v60 = vld [vmem:[%s8545_s1 + $0x700] ss:$16 sps:$4 sm:$0xff]   ;;  %v5947_v61 = vld [vmem:[%s8545_s1 + $0x708] ss:$16 sps:$4 sm:$0xff]  }
  0xa8   :  { %3752 = vmatprep.subr.bf16.mxu0 %v5861_v62  ;;  %4121 = vmatprep.subr.bf16.mxu1 %v5864_v63  ;;  %v5952_v62 = vld [vmem:[%s8545_s1 + $0x724] ss:$16 sps:$4 sm:$0xff]   ;;  %v5955_v63 = vld [vmem:[%s8545_s1 + $0x72c] ss:$16 sps:$4 sm:$0xff]  }
  0xab   :  { %3753 = vmatpush1.bf16.msra.mxu0 %v5859_v0  ;;  %4122 = vmatpush1.bf16.msra.mxu1 %v5862_v1  ;;  %v5950_v0 = vld [vmem:[%s8545_s1 + $0x720] ss:$16 sps:$4 sm:$0xff]   ;;  %v5953_v1 = vld [vmem:[%s8545_s1 + $0x728] ss:$16 sps:$4 sm:$0xff]  }
  0xac   :  { %3754 = vmatprep.subr.bf16.mxu0 %v5867_v2  ;;  %4123 = vmatprep.subr.bf16.mxu1 %v5870_v3  ;;  %v5958_v2 = vld [vmem:[%s8545_s1 + $0x744] ss:$16 sps:$4 sm:$0xff]   ;;  %v5961_v3 = vld [vmem:[%s8545_s1 + $0x74c] ss:$16 sps:$4 sm:$0xff]  }
  0xaf   :  { %3755 = vmatpush1.bf16.msra.mxu0 %v5865_v4  ;;  %4124 = vmatpush1.bf16.msra.mxu1 %v5868_v5  ;;  %v5956_v4 = vld [vmem:[%s8545_s1 + $0x740] ss:$16 sps:$4 sm:$0xff]   ;;  %v5959_v5 = vld [vmem:[%s8545_s1 + $0x748] ss:$16 sps:$4 sm:$0xff]  }
  0xb0   :  { %3756 = vmatprep.subr.bf16.mxu0 %v5873_v6  ;;  %4125 = vmatprep.subr.bf16.mxu1 %v5876_v7  ;;  %v5964_v6 = vld [vmem:[%s8545_s1 + $0x764] ss:$16 sps:$4 sm:$0xff]   ;;  %v5967_v7 = vld [vmem:[%s8545_s1 + $0x76c] ss:$16 sps:$4 sm:$0xff]  }
  0xb3   :  { %3757 = vmatpush1.bf16.msra.mxu0 %v5871_v8  ;;  %4126 = vmatpush1.bf16.msra.mxu1 %v5874_v9  ;;  %v5962_v8 = vld [vmem:[%s8545_s1 + $0x760] ss:$16 sps:$4 sm:$0xff]   ;;  %v5965_v9 = vld [vmem:[%s8545_s1 + $0x768] ss:$16 sps:$4 sm:$0xff]  }
  0xb4   :  { %3758 = vmatprep.subr.bf16.mxu0 %v5879_v10  ;;  %4127 = vmatprep.subr.bf16.mxu1 %v5882_v11  ;;  %v5970_v10 = vld [vmem:[%s8545_s1 + $0x784] ss:$16 sps:$4 sm:$0xff]   ;;  %v5973_v11 = vld [vmem:[%s8545_s1 + $0x78c] ss:$16 sps:$4 sm:$0xff]  }
  0xb7   :  { %3759 = vmatpush1.bf16.msra.mxu0 %v5877_v12  ;;  %4128 = vmatpush1.bf16.msra.mxu1 %v5880_v52  ;;  %v5968_v12 = vld [vmem:[%s8545_s1 + $0x780] ss:$16 sps:$4 sm:$0xff]   ;;  %v5971_v52 = vld [vmem:[%s8545_s1 + $0x788] ss:$16 sps:$4 sm:$0xff]  }
  0xb8   :  { %3760 = vmatprep.subr.bf16.mxu0 %v5885_v15  ;;  %4129 = vmatprep.subr.bf16.mxu1 %v5888_v16  ;;  %v5976_v15 = vld [vmem:[%s8545_s1 + $0x7a4] ss:$16 sps:$4 sm:$0xff]   ;;  %v5979_v16 = vld [vmem:[%s8545_s1 + $0x7ac] ss:$16 sps:$4 sm:$0xff]  }
  0xbb   :  { %3761 = vmatpush1.bf16.msra.mxu0 %v5883_v17  ;;  %4130 = vmatpush1.bf16.msra.mxu1 %v5886_v18  ;;  %v5974_v17 = vld [vmem:[%s8545_s1 + $0x7a0] ss:$16 sps:$4 sm:$0xff]   ;;  %v5977_v18 = vld [vmem:[%s8545_s1 + $0x7a8] ss:$16 sps:$4 sm:$0xff]  }
  0xbc   :  { %3762 = vmatprep.subr.bf16.mxu0 %v5891_v19  ;;  %4131 = vmatprep.subr.bf16.mxu1 %v5894_v20  ;;  %v5982_v19 = vld [vmem:[%s8545_s1 + $0x7c4] ss:$16 sps:$4 sm:$0xff]   ;;  %v5985_v20 = vld [vmem:[%s8545_s1 + $0x7cc] ss:$16 sps:$4 sm:$0xff]  }
  0xbf   :  { %3763 = vmatpush1.bf16.msra.mxu0 %v5889_v21  ;;  %4132 = vmatpush1.bf16.msra.mxu1 %v5892_v22  ;;  %v7376_v21 = vld.sshfl [vmem:[%s8544_s0 + $0x8] sm:$0xff pattern:$0x75316420]  ;;  %v5980_v22 = vld [vmem:[%s8545_s1 + $0x7c0] ss:$16 sps:$4 sm:$0xff]  }
  0xc0   :  { %3773 = vmatprep.subr.bf16.mxu0 %v5898_v23  ;;  %4142 = vmatprep.subr.bf16.mxu1 %v5901_v24  ;;  %v5983_v23 = vld [vmem:[%s8545_s1 + $0x7c8] ss:$16 sps:$4 sm:$0xff]   ;;  %v5988_v24 = vld [vmem:[%s8545_s1 + $0x7e4] ss:$16 sps:$4 sm:$0xff]  }
  0xc2   :  { %3765 = vmatmul.mubr.bf16.vlgmr.msra.gmra.mrb[0].mxu0 %v7202_v26  ;;  %4134 = vmatmul.mubr.bf16.vlgmr.msra.gmra.mrb[0].mxu1 %v7202_v26 }
  0xc3   :  { %3774 = vmatpush1.bf16.msra.mxu0 %v5896_v13  ;;  %4143 = vmatpush1.bf16.msra.mxu1 %v5899_v27  ;;  %v5991_v13 = vld [vmem:[%s8545_s1 + $0x7ec] ss:$16 sps:$4 sm:$0xff]   ;;  %v5986_v27 = vld [vmem:[%s8545_s1 + $0x7e0] ss:$16 sps:$4 sm:$0xff]  }
  0xc4   :  { %3775 = vmatprep.subr.bf16.mxu0 %v5904_v28  ;;  %4144 = vmatprep.subr.bf16.mxu1 %v5907_v29  ;;  %v5989_v28 = vld [vmem:[%s8545_s1 + $0x7e8] ss:$16 sps:$4 sm:$0xff]   ;;  %v5994_v29 = vld [vmem:[%s8545_s1 + $0x804] ss:$16 sps:$4 sm:$0xff]  }
  0xc5   :  { %3805 = vmatprep.mubr.bf16.mxu0 %v680_v14  ;;  %4174 = vmatprep.mubr.bf16.mxu1 %v680_v14  ;;  %v5997_v14 = vld [vmem:[%s8545_s1 + $0x80c] ss:$16 sps:$4 sm:$0xff]  }
  0xc7   :  { %3776 = vmatpush1.bf16.msra.mxu0 %v5902_v30  ;;  %4145 = vmatpush1.bf16.msra.mxu1 %v5905_v31  ;;  %v696_v30 = vcombine.high %v7376_v21, %v7376_v21  ;;  %v678_v31 = vcombine.high %v7202_v26, %v7202_v26  ;;  %v6003_v26 = vld [vmem:[%s8545_s1 + $0x82c] ss:$16 sps:$4 sm:$0xff]  }
  0xc8   :  { %3777 = vmatprep.subr.bf16.mxu0 %v5910_v25  ;;  %4146 = vmatprep.subr.bf16.mxu1 %v5913_v32  ;;  %v5992_v25 = vld [vmem:[%s8545_s1 + $0x800] ss:$16 sps:$4 sm:$0xff]   ;;  %v5995_v32 = vld [vmem:[%s8545_s1 + $0x808] ss:$16 sps:$4 sm:$0xff]  }
  0xcb   :  { %3778 = vmatpush1.bf16.msra.mxu0 %v5908_v33  ;;  %4147 = vmatpush1.bf16.msra.mxu1 %v5911_v34  ;;  %v6000_v33 = vld [vmem:[%s8545_s1 + $0x824] ss:$16 sps:$4 sm:$0xff]   ;;  %v7419_v34 = vrot.slane %v696_v30, %v6718_v49 }
  0xcc   :  { %3779 = vmatprep.subr.bf16.mxu0 %v5916_v35  ;;  %4148 = vmatprep.subr.bf16.mxu1 %v5919_v36  ;;  %v5998_v35 = vld [vmem:[%s8545_s1 + $0x820] ss:$16 sps:$4 sm:$0xff]   ;;  %v6001_v36 = vld [vmem:[%s8545_s1 + $0x828] ss:$16 sps:$4 sm:$0xff]   ;;  %v6084_v30 = vld [vmem:[%s8545_s1 + $0x9e4] ss:$16 sps:$4 sm:$0xff]  }
  0xcf   :  { %3780 = vmatpush1.bf16.msra.mxu0 %v5914_v37  ;;  %4149 = vmatpush1.bf16.msra.mxu1 %v5917_v38  ;;  %v6006_v37 = vld [vmem:[%s8545_s1 + $0x844] ss:$16 sps:$4 sm:$0xff]   ;;  %v6009_v38 = vld [vmem:[%s8545_s1 + $0x84c] ss:$16 sps:$4 sm:$0xff]  }
  0xd0   :  { %3781 = vmatprep.subr.bf16.mxu0 %v5922_v39  ;;  %4150 = vmatprep.subr.bf16.mxu1 %v5925_v40  ;;  %v6004_v39 = vld [vmem:[%s8545_s1 + $0x840] ss:$16 sps:$4 sm:$0xff]   ;;  %v6007_v40 = vld [vmem:[%s8545_s1 + $0x848] ss:$16 sps:$4 sm:$0xff]  }
  0xd3   :  { %3782 = vmatpush1.bf16.msra.mxu0 %v5920_v41  ;;  %4151 = vmatpush1.bf16.msra.mxu1 %v5923_v43  ;;  %v6012_v41 = vld [vmem:[%s8545_s1 + $0x864] ss:$16 sps:$4 sm:$0xff]   ;;  %v6015_v43 = vld [vmem:[%s8545_s1 + $0x86c] ss:$16 sps:$4 sm:$0xff]  }
  0xd4   :  { %3783 = vmatprep.subr.bf16.mxu0 %v5928_v44  ;;  %4152 = vmatprep.subr.bf16.mxu1 %v5931_v45  ;;  %v6010_v44 = vld [vmem:[%s8545_s1 + $0x860] ss:$16 sps:$4 sm:$0xff]   ;;  %v6013_v45 = vld [vmem:[%s8545_s1 + $0x868] ss:$16 sps:$4 sm:$0xff]  }
  0xd7   :  { %3784 = vmatpush1.bf16.msra.mxu0 %v5926_v46  ;;  %4153 = vmatpush1.bf16.msra.mxu1 %v5929_v47  ;;  %v6018_v46 = vld [vmem:[%s8545_s1 + $0x884] ss:$16 sps:$4 sm:$0xff]   ;;  %v6021_v47 = vld [vmem:[%s8545_s1 + $0x88c] ss:$16 sps:$4 sm:$0xff]  }
  0xd8   :  { %3785 = vmatprep.subr.bf16.mxu0 %v5934_v48  ;;  %4154 = vmatprep.subr.bf16.mxu1 %v5937_v50  ;;  %v6016_v48 = vld [vmem:[%s8545_s1 + $0x880] ss:$16 sps:$4 sm:$0xff]   ;;  %v6019_v50 = vld [vmem:[%s8545_s1 + $0x888] ss:$16 sps:$4 sm:$0xff]  }
  0xdb   :  { %3786 = vmatpush1.bf16.msra.mxu0 %v5932_v51  ;;  %4155 = vmatpush1.bf16.msra.mxu1 %v5935_v53  ;;  %v6024_v51 = vld [vmem:[%s8545_s1 + $0x8a4] ss:$16 sps:$4 sm:$0xff]   ;;  %v6027_v53 = vld [vmem:[%s8545_s1 + $0x8ac] ss:$16 sps:$4 sm:$0xff]  }
  0xdc   :  { %3787 = vmatprep.subr.bf16.mxu0 %v5940_v54  ;;  %4156 = vmatprep.subr.bf16.mxu1 %v5943_v55  ;;  %v6022_v54 = vld [vmem:[%s8545_s1 + $0x8a0] ss:$16 sps:$4 sm:$0xff]   ;;  %v6025_v55 = vld [vmem:[%s8545_s1 + $0x8a8] ss:$16 sps:$4 sm:$0xff]  }
  0xdf   :  { %3788 = vmatpush1.bf16.msra.mxu0 %v5938_v56  ;;  %4157 = vmatpush1.bf16.msra.mxu1 %v5941_v57  ;;  %v6030_v56 = vld [vmem:[%s8545_s1 + $0x8c4] ss:$16 sps:$4 sm:$0xff]   ;;  %v6033_v57 = vld [vmem:[%s8545_s1 + $0x8cc] ss:$16 sps:$4 sm:$0xff]  }
  0xe0   :  { %3789 = vmatprep.subr.bf16.mxu0 %v5946_v58  ;;  %4158 = vmatprep.subr.bf16.mxu1 %v5949_v59  ;;  %v6028_v58 = vld [vmem:[%s8545_s1 + $0x8c0] ss:$16 sps:$4 sm:$0xff]   ;;  %v6031_v59 = vld [vmem:[%s8545_s1 + $0x8c8] ss:$16 sps:$4 sm:$0xff]  }
  0xe3   :  { %3790 = vmatpush1.bf16.msra.mxu0 %v5944_v60  ;;  %4159 = vmatpush1.bf16.msra.mxu1 %v5947_v61  ;;  %v6036_v60 = vld [vmem:[%s8545_s1 + $0x8e4] ss:$16 sps:$4 sm:$0xff]   ;;  %v6039_v61 = vld [vmem:[%s8545_s1 + $0x8ec] ss:$16 sps:$4 sm:$0xff]  }
  0xe4   :  { %3791 = vmatprep.subr.bf16.mxu0 %v5952_v62  ;;  %4160 = vmatprep.subr.bf16.mxu1 %v5955_v63  ;;  %v6034_v62 = vld [vmem:[%s8545_s1 + $0x8e0] ss:$16 sps:$4 sm:$0xff]   ;;  %v6037_v63 = vld [vmem:[%s8545_s1 + $0x8e8] ss:$16 sps:$4 sm:$0xff]  }
  0xe7   :  { %3792 = vmatpush1.bf16.msra.mxu0 %v5950_v0  ;;  %4161 = vmatpush1.bf16.msra.mxu1 %v5953_v1  ;;  %v6042_v0 = vld [vmem:[%s8545_s1 + $0x904] ss:$16 sps:$4 sm:$0xff]   ;;  %v6045_v1 = vld [vmem:[%s8545_s1 + $0x90c] ss:$16 sps:$4 sm:$0xff]  }
  0xe8   :  { %3793 = vmatprep.subr.bf16.mxu0 %v5958_v2  ;;  %4162 = vmatprep.subr.bf16.mxu1 %v5961_v3  ;;  %v6040_v2 = vld [vmem:[%s8545_s1 + $0x900] ss:$16 sps:$4 sm:$0xff]   ;;  %v6043_v3 = vld [vmem:[%s8545_s1 + $0x908] ss:$16 sps:$4 sm:$0xff]  }
  0xeb   :  { %3794 = vmatpush1.bf16.msra.mxu0 %v5956_v4  ;;  %4163 = vmatpush1.bf16.msra.mxu1 %v5959_v5  ;;  %v6048_v4 = vld [vmem:[%s8545_s1 + $0x924] ss:$16 sps:$4 sm:$0xff]   ;;  %v6051_v5 = vld [vmem:[%s8545_s1 + $0x92c] ss:$16 sps:$4 sm:$0xff]  }
  0xec   :  { %3795 = vmatprep.subr.bf16.mxu0 %v5964_v6  ;;  %4164 = vmatprep.subr.bf16.mxu1 %v5967_v7  ;;  %v6046_v6 = vld [vmem:[%s8545_s1 + $0x920] ss:$16 sps:$4 sm:$0xff]   ;;  %v6049_v7 = vld [vmem:[%s8545_s1 + $0x928] ss:$16 sps:$4 sm:$0xff]  }
  0xef   :  { %3796 = vmatpush1.bf16.msra.mxu0 %v5962_v8  ;;  %4165 = vmatpush1.bf16.msra.mxu1 %v5965_v9  ;;  %v6054_v8 = vld [vmem:[%s8545_s1 + $0x944] ss:$16 sps:$4 sm:$0xff]   ;;  %v6057_v9 = vld [vmem:[%s8545_s1 + $0x94c] ss:$16 sps:$4 sm:$0xff]  }
  0xf0   :  { %3797 = vmatprep.subr.bf16.mxu0 %v5970_v10  ;;  %4166 = vmatprep.subr.bf16.mxu1 %v5973_v11  ;;  %v6052_v10 = vld [vmem:[%s8545_s1 + $0x940] ss:$16 sps:$4 sm:$0xff]   ;;  %v6055_v11 = vld [vmem:[%s8545_s1 + $0x948] ss:$16 sps:$4 sm:$0xff]  }
  0xf3   :  { %3798 = vmatpush1.bf16.msra.mxu0 %v5968_v12  ;;  %4167 = vmatpush1.bf16.msra.mxu1 %v5971_v52  ;;  %v6060_v12 = vld [vmem:[%s8545_s1 + $0x964] ss:$16 sps:$4 sm:$0xff]   ;;  %v6063_v52 = vld [vmem:[%s8545_s1 + $0x96c] ss:$16 sps:$4 sm:$0xff]  }
  0xf4   :  { %3799 = vmatprep.subr.bf16.mxu0 %v5976_v15  ;;  %4168 = vmatprep.subr.bf16.mxu1 %v5979_v16  ;;  %v6058_v15 = vld [vmem:[%s8545_s1 + $0x960] ss:$16 sps:$4 sm:$0xff]   ;;  %v6061_v16 = vld [vmem:[%s8545_s1 + $0x968] ss:$16 sps:$4 sm:$0xff]  }
  0xf7   :  { %3800 = vmatpush1.bf16.msra.mxu0 %v5974_v17  ;;  %4169 = vmatpush1.bf16.msra.mxu1 %v5977_v18  ;;  %v6066_v17 = vld [vmem:[%s8545_s1 + $0x984] ss:$16 sps:$4 sm:$0xff]   ;;  %v6069_v18 = vld [vmem:[%s8545_s1 + $0x98c] ss:$16 sps:$4 sm:$0xff]  }
  0xf8   :  { %3801 = vmatprep.subr.bf16.mxu0 %v5982_v19  ;;  %4170 = vmatprep.subr.bf16.mxu1 %v5985_v20  ;;  %v6064_v19 = vld [vmem:[%s8545_s1 + $0x980] ss:$16 sps:$4 sm:$0xff]   ;;  %v6067_v20 = vld [vmem:[%s8545_s1 + $0x988] ss:$16 sps:$4 sm:$0xff]  }
  0xfb   :  { %3802 = vmatpush1.bf16.msra.mxu0 %v5980_v22  ;;  %4171 = vmatpush1.bf16.msra.mxu1 %v5983_v23  ;;  %v6072_v22 = vld [vmem:[%s8545_s1 + $0x9a4] ss:$16 sps:$4 sm:$0xff]   ;;  %v6075_v23 = vld [vmem:[%s8545_s1 + $0x9ac] ss:$16 sps:$4 sm:$0xff]  }
  0xfc   :  { %3803 = vmatprep.subr.bf16.mxu0 %v5988_v24  ;;  %4172 = vmatprep.subr.bf16.mxu1 %v5991_v13  ;;  %v6070_v24 = vld [vmem:[%s8545_s1 + $0x9a0] ss:$16 sps:$4 sm:$0xff]   ;;  %v6073_v13 = vld [vmem:[%s8545_s1 + $0x9a8] ss:$16 sps:$4 sm:$0xff]  }
  0xff   :  { %3804 = vmatpush1.bf16.msra.mxu0 %v5986_v27  ;;  %4173 = vmatpush1.bf16.msra.mxu1 %v5989_v28  ;;  %v6078_v27 = vld [vmem:[%s8545_s1 + $0x9c4] ss:$16 sps:$4 sm:$0xff]   ;;  %v6081_v28 = vld [vmem:[%s8545_s1 + $0x9cc] ss:$16 sps:$4 sm:$0xff]  }
 0x100   :  { %3814 = vmatprep.subr.bf16.mxu0 %v5994_v29  ;;  %4183 = vmatprep.subr.bf16.mxu1 %v5997_v14  ;;  %v6076_v29 = vld [vmem:[%s8545_s1 + $0x9c0] ss:$16 sps:$4 sm:$0xff]   ;;  %v6079_v14 = vld [vmem:[%s8545_s1 + $0x9c8] ss:$16 sps:$4 sm:$0xff]  }
 0x102   :  { %3806 = vmatmul.mubr.bf16.vlgmr.msra.gmra.mrb[0].mxu0 %v678_v31  ;;  %4175 = vmatmul.mubr.bf16.vlgmr.msra.gmra.mrb[0].mxu1 %v678_v31  ;;  %v6087_v31 = vld [vmem:[%s8545_s1 + $0x9ec] ss:$16 sps:$4 sm:$0xff]  }
 0x103   :  { %3815 = vmatpush1.bf16.msra.mxu0 %v5992_v25  ;;  %4184 = vmatpush1.bf16.msra.mxu1 %v5995_v32  ;;  %v6082_v25 = vld [vmem:[%s8545_s1 + $0x9e0] ss:$16 sps:$4 sm:$0xff]   ;;  %v6085_v32 = vld [vmem:[%s8545_s1 + $0x9e8] ss:$16 sps:$4 sm:$0xff]  }
 0x104   :  { %3816 = vmatprep.subr.bf16.mxu0 %v6000_v33  ;;  %4185 = vmatprep.subr.bf16.mxu1 %v6003_v26  ;;  %v6090_v33 = vld [vmem:[%s8545_s1 + $0xa04] ss:$16 sps:$4 sm:$0xff]   ;;  %v6093_v26 = vld [vmem:[%s8545_s1 + $0xa0c] ss:$16 sps:$4 sm:$0xff]  }
 0x105   :  { %3846 = vmatprep.mubr.bf16.mxu0 %v7419_v34  ;;  %4215 = vmatprep.mubr.bf16.mxu1 %v7419_v34 }
 0x107   :  { %3817 = vmatpush1.bf16.msra.mxu0 %v5998_v35  ;;  %4186 = vmatpush1.bf16.msra.mxu1 %v6001_v36  ;;  %v7605_v35 = vrot.slane %v7376_v21, %v6718_v49  ;;  %v6088_v36 = vld [vmem:[%s8545_s1 + $0xa00] ss:$16 sps:$4 sm:$0xff]   ;;  %v6099_v21 = vld [vmem:[%s8545_s1 + $0xa2c] ss:$16 sps:$4 sm:$0xff]  }
 0x108   :  { %3818 = vmatprep.subr.bf16.mxu0 %v6006_v37  ;;  %4187 = vmatprep.subr.bf16.mxu1 %v6009_v38  ;;  %v6091_v37 = vld [vmem:[%s8545_s1 + $0xa08] ss:$16 sps:$4 sm:$0xff]   ;;  %v6096_v38 = vld [vmem:[%s8545_s1 + $0xa24] ss:$16 sps:$4 sm:$0xff]  }
 0x10b   :  { %3819 = vmatpush1.bf16.msra.mxu0 %v6004_v39  ;;  %4188 = vmatpush1.bf16.msra.mxu1 %v6007_v40  ;;  %v728_v39 = vcombine.high %v7419_v34, %v7419_v34  ;;  %v6094_v40 = vld [vmem:[%s8545_s1 + $0xa20] ss:$16 sps:$4 sm:$0xff]   ;;  %v6102_v34 = vld [vmem:[%s8545_s1 + $0xa44] ss:$16 sps:$4 sm:$0xff]  }
 0x10c   :  { %3820 = vmatprep.subr.bf16.mxu0 %v6012_v41  ;;  %4189 = vmatprep.subr.bf16.mxu1 %v6015_v43  ;;  %v6097_v41 = vld [vmem:[%s8545_s1 + $0xa28] ss:$16 sps:$4 sm:$0xff]   ;;  %v6105_v43 = vld [vmem:[%s8545_s1 + $0xa4c] ss:$16 sps:$4 sm:$0xff]  }
 0x10f   :  { %3821 = vmatpush1.bf16.msra.mxu0 %v6010_v44  ;;  %4190 = vmatpush1.bf16.msra.mxu1 %v6013_v45  ;;  %v6100_v44 = vld [vmem:[%s8545_s1 + $0xa40] ss:$16 sps:$4 sm:$0xff]   ;;  %v6103_v45 = vld [vmem:[%s8545_s1 + $0xa48] ss:$16 sps:$4 sm:$0xff]  }
 0x110   :  { %3822 = vmatprep.subr.bf16.mxu0 %v6018_v46  ;;  %4191 = vmatprep.subr.bf16.mxu1 %v6021_v47  ;;  %v6108_v46 = vld [vmem:[%s8545_s1 + $0xa64] ss:$16 sps:$4 sm:$0xff]   ;;  %v6111_v47 = vld [vmem:[%s8545_s1 + $0xa6c] ss:$16 sps:$4 sm:$0xff]  }
 0x113   :  { %3823 = vmatpush1.bf16.msra.mxu0 %v6016_v48  ;;  %4192 = vmatpush1.bf16.msra.mxu1 %v6019_v50  ;;  %v6106_v48 = vld [vmem:[%s8545_s1 + $0xa60] ss:$16 sps:$4 sm:$0xff]   ;;  %v6109_v50 = vld [vmem:[%s8545_s1 + $0xa68] ss:$16 sps:$4 sm:$0xff]  }
 0x114   :  { %3824 = vmatprep.subr.bf16.mxu0 %v6024_v51  ;;  %4193 = vmatprep.subr.bf16.mxu1 %v6027_v53  ;;  %v6114_v51 = vld [vmem:[%s8545_s1 + $0xa84] ss:$16 sps:$4 sm:$0xff]   ;;  %v6117_v53 = vld [vmem:[%s8545_s1 + $0xa8c] ss:$16 sps:$4 sm:$0xff]  }
 0x117   :  { %3825 = vmatpush1.bf16.msra.mxu0 %v6022_v54  ;;  %4194 = vmatpush1.bf16.msra.mxu1 %v6025_v55  ;;  %v6112_v54 = vld [vmem:[%s8545_s1 + $0xa80] ss:$16 sps:$4 sm:$0xff]   ;;  %v6115_v55 = vld [vmem:[%s8545_s1 + $0xa88] ss:$16 sps:$4 sm:$0xff]  }
 0x118   :  { %3826 = vmatprep.subr.bf16.mxu0 %v6030_v56  ;;  %4195 = vmatprep.subr.bf16.mxu1 %v6033_v57  ;;  %v6120_v56 = vld [vmem:[%s8545_s1 + $0xaa4] ss:$16 sps:$4 sm:$0xff]   ;;  %v6123_v57 = vld [vmem:[%s8545_s1 + $0xaac] ss:$16 sps:$4 sm:$0xff]  }
 0x11b   :  { %3827 = vmatpush1.bf16.msra.mxu0 %v6028_v58  ;;  %4196 = vmatpush1.bf16.msra.mxu1 %v6031_v59  ;;  %v6118_v58 = vld [vmem:[%s8545_s1 + $0xaa0] ss:$16 sps:$4 sm:$0xff]   ;;  %v6121_v59 = vld [vmem:[%s8545_s1 + $0xaa8] ss:$16 sps:$4 sm:$0xff]  }
 0x11c   :  { %3828 = vmatprep.subr.bf16.mxu0 %v6036_v60  ;;  %4197 = vmatprep.subr.bf16.mxu1 %v6039_v61  ;;  %v6126_v60 = vld [vmem:[%s8545_s1 + $0xac4] ss:$16 sps:$4 sm:$0xff]   ;;  %v6129_v61 = vld [vmem:[%s8545_s1 + $0xacc] ss:$16 sps:$4 sm:$0xff]  }
 0x11f   :  { %3829 = vmatpush1.bf16.msra.mxu0 %v6034_v62  ;;  %4198 = vmatpush1.bf16.msra.mxu1 %v6037_v63  ;;  %v6124_v62 = vld [vmem:[%s8545_s1 + $0xac0] ss:$16 sps:$4 sm:$0xff]   ;;  %v6127_v63 = vld [vmem:[%s8545_s1 + $0xac8] ss:$16 sps:$4 sm:$0xff]  }
 0x120   :  { %3830 = vmatprep.subr.bf16.mxu0 %v6042_v0  ;;  %4199 = vmatprep.subr.bf16.mxu1 %v6045_v1  ;;  %v6132_v0 = vld [vmem:[%s8545_s1 + $0xae4] ss:$16 sps:$4 sm:$0xff]   ;;  %v6135_v1 = vld [vmem:[%s8545_s1 + $0xaec] ss:$16 sps:$4 sm:$0xff]  }
 0x123   :  { %3831 = vmatpush1.bf16.msra.mxu0 %v6040_v2  ;;  %4200 = vmatpush1.bf16.msra.mxu1 %v6043_v3  ;;  %v6130_v2 = vld [vmem:[%s8545_s1 + $0xae0] ss:$16 sps:$4 sm:$0xff]   ;;  %v6133_v3 = vld [vmem:[%s8545_s1 + $0xae8] ss:$16 sps:$4 sm:$0xff]  }
 0x124   :  { %3832 = vmatprep.subr.bf16.mxu0 %v6048_v4  ;;  %4201 = vmatprep.subr.bf16.mxu1 %v6051_v5  ;;  %v6138_v4 = vld [vmem:[%s8545_s1 + $0xb04] ss:$16 sps:$4 sm:$0xff]   ;;  %v6141_v5 = vld [vmem:[%s8545_s1 + $0xb0c] ss:$16 sps:$4 sm:$0xff]  }
 0x127   :  { %3833 = vmatpush1.bf16.msra.mxu0 %v6046_v6  ;;  %4202 = vmatpush1.bf16.msra.mxu1 %v6049_v7  ;;  %v6136_v6 = vld [vmem:[%s8545_s1 + $0xb00] ss:$16 sps:$4 sm:$0xff]   ;;  %v6139_v7 = vld [vmem:[%s8545_s1 + $0xb08] ss:$16 sps:$4 sm:$0xff]  }
 0x128   :  { %3834 = vmatprep.subr.bf16.mxu0 %v6054_v8  ;;  %4203 = vmatprep.subr.bf16.mxu1 %v6057_v9  ;;  %v6144_v8 = vld [vmem:[%s8545_s1 + $0xb24] ss:$16 sps:$4 sm:$0xff]   ;;  %v6147_v9 = vld [vmem:[%s8545_s1 + $0xb2c] ss:$16 sps:$4 sm:$0xff]  }
 0x12b   :  { %3835 = vmatpush1.bf16.msra.mxu0 %v6052_v10  ;;  %4204 = vmatpush1.bf16.msra.mxu1 %v6055_v11  ;;  %v6142_v10 = vld [vmem:[%s8545_s1 + $0xb20] ss:$16 sps:$4 sm:$0xff]   ;;  %v6145_v11 = vld [vmem:[%s8545_s1 + $0xb28] ss:$16 sps:$4 sm:$0xff]  }
 0x12c   :  { %3836 = vmatprep.subr.bf16.mxu0 %v6060_v12  ;;  %4205 = vmatprep.subr.bf16.mxu1 %v6063_v52  ;;  %v6150_v12 = vld [vmem:[%s8545_s1 + $0xb44] ss:$16 sps:$4 sm:$0xff]   ;;  %v6153_v52 = vld [vmem:[%s8545_s1 + $0xb4c] ss:$16 sps:$4 sm:$0xff]  }
 0x12f   :  { %3837 = vmatpush1.bf16.msra.mxu0 %v6058_v15  ;;  %4206 = vmatpush1.bf16.msra.mxu1 %v6061_v16  ;;  %v6148_v15 = vld [vmem:[%s8545_s1 + $0xb40] ss:$16 sps:$4 sm:$0xff]   ;;  %v6151_v16 = vld [vmem:[%s8545_s1 + $0xb48] ss:$16 sps:$4 sm:$0xff]  }
 0x130   :  { %3838 = vmatprep.subr.bf16.mxu0 %v6066_v17  ;;  %4207 = vmatprep.subr.bf16.mxu1 %v6069_v18  ;;  %v6156_v17 = vld [vmem:[%s8545_s1 + $0xb64] ss:$16 sps:$4 sm:$0xff]   ;;  %v6159_v18 = vld [vmem:[%s8545_s1 + $0xb6c] ss:$16 sps:$4 sm:$0xff]  }
 0x133   :  { %3839 = vmatpush1.bf16.msra.mxu0 %v6064_v19  ;;  %4208 = vmatpush1.bf16.msra.mxu1 %v6067_v20  ;;  %v6154_v19 = vld [vmem:[%s8545_s1 + $0xb60] ss:$16 sps:$4 sm:$0xff]   ;;  %v6157_v20 = vld [vmem:[%s8545_s1 + $0xb68] ss:$16 sps:$4 sm:$0xff]  }
 0x134   :  { %3840 = vmatprep.subr.bf16.mxu0 %v6072_v22  ;;  %4209 = vmatprep.subr.bf16.mxu1 %v6075_v23  ;;  %v6162_v22 = vld [vmem:[%s8545_s1 + $0xb84] ss:$16 sps:$4 sm:$0xff]   ;;  %v6165_v23 = vld [vmem:[%s8545_s1 + $0xb8c] ss:$16 sps:$4 sm:$0xff]  }
 0x137   :  { %3841 = vmatpush1.bf16.msra.mxu0 %v6070_v24  ;;  %4210 = vmatpush1.bf16.msra.mxu1 %v6073_v13  ;;  %v6160_v24 = vld [vmem:[%s8545_s1 + $0xb80] ss:$16 sps:$4 sm:$0xff]   ;;  %v6163_v13 = vld [vmem:[%s8545_s1 + $0xb88] ss:$16 sps:$4 sm:$0xff]  }
 0x138   :  { %3842 = vmatprep.subr.bf16.mxu0 %v6078_v27  ;;  %4211 = vmatprep.subr.bf16.mxu1 %v6081_v28  ;;  %v6168_v27 = vld [vmem:[%s8545_s1 + $0xba4] ss:$16 sps:$4 sm:$0xff]   ;;  %v6171_v28 = vld [vmem:[%s8545_s1 + $0xbac] ss:$16 sps:$4 sm:$0xff]  }
 0x13b   :  { %3843 = vmatpush1.bf16.msra.mxu0 %v6076_v29  ;;  %4212 = vmatpush1.bf16.msra.mxu1 %v6079_v14  ;;  %v6166_v29 = vld [vmem:[%s8545_s1 + $0xba0] ss:$16 sps:$4 sm:$0xff]   ;;  %v6169_v14 = vld [vmem:[%s8545_s1 + $0xba8] ss:$16 sps:$4 sm:$0xff]  }
 0x13c   :  { %3844 = vmatprep.subr.bf16.mxu0 %v6084_v30  ;;  %4213 = vmatprep.subr.bf16.mxu1 %v6087_v31  ;;  %v6174_v30 = vld [vmem:[%s8545_s1 + $0xbc4] ss:$16 sps:$4 sm:$0xff]   ;;  %v6177_v31 = vld [vmem:[%s8545_s1 + $0xbcc] ss:$16 sps:$4 sm:$0xff]  }
 0x13f   :  { %3845 = vmatpush1.bf16.msra.mxu0 %v6082_v25  ;;  %4214 = vmatpush1.bf16.msra.mxu1 %v6085_v32  ;;  %v6513_v25 = vld [vmem:[%s8544_s0 + $0x8] sm:$0xff] }
 0x140   :  { %3855 = vmatprep.subr.bf16.mxu0 %v6090_v33  ;;  %4224 = vmatprep.subr.bf16.mxu1 %v6093_v26  ;;  %v681_v32 = vcombine.high %v6513_v25, %v6513_v25  ;;  %v6172_v33 = vld [vmem:[%s8545_s1 + $0xbc0] ss:$16 sps:$4 sm:$0xff]   ;;  %v6175_v26 = vld [vmem:[%s8545_s1 + $0xbc8] ss:$16 sps:$4 sm:$0xff]  }
 0x142   :  { %3847 = vmatmul.mubr.bf16.vlgmr.msra.gmra.mrb[0].mxu0 %v7605_v35  ;;  %4216 = vmatmul.mubr.bf16.vlgmr.msra.gmra.mrb[0].mxu1 %v7605_v35 }
 0x143   :  { %3856 = vmatpush1.bf16.msra.mxu0 %v6088_v36  ;;  %4225 = vmatpush1.bf16.msra.mxu1 %v6091_v37  ;;  %v6180_v36 = vld [vmem:[%s8545_s1 + $0xbe4] ss:$16 sps:$4 sm:$0xff]   ;;  %v6183_v37 = vld [vmem:[%s8545_s1 + $0xbec] ss:$16 sps:$4 sm:$0xff]  }
 0x144   :  { %3857 = vmatprep.subr.bf16.mxu0 %v6096_v38  ;;  %4226 = vmatprep.subr.bf16.mxu1 %v6099_v21  ;;  %v7795_v38 = vrot.slane %v681_v32, %v6718_v49  ;;  %v6178_v21 = vld [vmem:[%s8545_s1 + $0xbe0] ss:$16 sps:$4 sm:$0xff]  }
 0x145   :  { %3887 = vmatprep.mubr.bf16.mxu0 %v728_v39  ;;  %4256 = vmatprep.mubr.bf16.mxu1 %v728_v39  ;;  %v6181_v39 = vld [vmem:[%s8545_s1 + $0xbe8] ss:$16 sps:$4 sm:$0xff]  }
 0x147   :  { %3858 = vmatpush1.bf16.msra.mxu0 %v6094_v40  ;;  %4227 = vmatpush1.bf16.msra.mxu1 %v6097_v41  ;;  %v6186_v40 = vld [vmem:[%s8545_s1 + $0xc04] ss:$16 sps:$4 sm:$0xff]   ;;  %v6189_v41 = vld [vmem:[%s8545_s1 + $0xc0c] ss:$16 sps:$4 sm:$0xff]  }
 0x148   :  { %3859 = vmatprep.subr.bf16.mxu0 %v6102_v34  ;;  %4228 = vmatprep.subr.bf16.mxu1 %v6105_v43  ;;  %v697_v34 = vcombine.high %v7795_v38, %v7795_v38  ;;  %v726_v43 = vcombine.high %v7605_v35, %v7605_v35  ;;  %v6195_v35 = vld [vmem:[%s8545_s1 + $0xc2c] ss:$16 sps:$4 sm:$0xff]  }
 0x14b   :  { %3860 = vmatpush1.bf16.msra.mxu0 %v6100_v44  ;;  %4229 = vmatpush1.bf16.msra.mxu1 %v6103_v45  ;;  %v6184_v44 = vld [vmem:[%s8545_s1 + $0xc00] ss:$16 sps:$4 sm:$0xff]   ;;  %v6187_v45 = vld [vmem:[%s8545_s1 + $0xc08] ss:$16 sps:$4 sm:$0xff]  }
 0x14c   :  { %3861 = vmatprep.subr.bf16.mxu0 %v6108_v46  ;;  %4230 = vmatprep.subr.bf16.mxu1 %v6111_v47  ;;  %v6192_v46 = vld [vmem:[%s8545_s1 + $0xc24] ss:$16 sps:$4 sm:$0xff]   ;;  %v7826_v47 = vrot.slane %v697_v34, %v6718_v49 }
 0x14f   :  { %3862 = vmatpush1.bf16.msra.mxu0 %v6106_v48  ;;  %4231 = vmatpush1.bf16.msra.mxu1 %v6109_v50  ;;  %v6190_v48 = vld [vmem:[%s8545_s1 + $0xc20] ss:$16 sps:$4 sm:$0xff]   ;;  %v6193_v50 = vld [vmem:[%s8545_s1 + $0xc28] ss:$16 sps:$4 sm:$0xff]  }
 0x150   :  { %3863 = vmatprep.subr.bf16.mxu0 %v6114_v51  ;;  %4232 = vmatprep.subr.bf16.mxu1 %v6117_v53 }
 0x153   :  { %3864 = vmatpush1.bf16.msra.mxu0 %v6112_v54  ;;  %4233 = vmatpush1.bf16.msra.mxu1 %v6115_v55 }
 0x154   :  { %3865 = vmatprep.subr.bf16.mxu0 %v6120_v56  ;;  %4234 = vmatprep.subr.bf16.mxu1 %v6123_v57 }
 0x157   :  { %3866 = vmatpush1.bf16.msra.mxu0 %v6118_v58  ;;  %4235 = vmatpush1.bf16.msra.mxu1 %v6121_v59 }
 0x158   :  { %3867 = vmatprep.subr.bf16.mxu0 %v6126_v60  ;;  %4236 = vmatprep.subr.bf16.mxu1 %v6129_v61 }
 0x15b   :  { %3868 = vmatpush1.bf16.msra.mxu0 %v6124_v62  ;;  %4237 = vmatpush1.bf16.msra.mxu1 %v6127_v63 }
 0x15c   :  { %3869 = vmatprep.subr.bf16.mxu0 %v6132_v0  ;;  %4238 = vmatprep.subr.bf16.mxu1 %v6135_v1 }
 0x15f   :  { %3870 = vmatpush1.bf16.msra.mxu0 %v6130_v2  ;;  %4239 = vmatpush1.bf16.msra.mxu1 %v6133_v3 }
 0x160   :  { %3871 = vmatprep.subr.bf16.mxu0 %v6138_v4  ;;  %4240 = vmatprep.subr.bf16.mxu1 %v6141_v5 }
 0x163   :  { %3872 = vmatpush1.bf16.msra.mxu0 %v6136_v6  ;;  %4241 = vmatpush1.bf16.msra.mxu1 %v6139_v7 }
 0x164   :  { %3873 = vmatprep.subr.bf16.mxu0 %v6144_v8  ;;  %4242 = vmatprep.subr.bf16.mxu1 %v6147_v9 }
 0x167   :  { %3874 = vmatpush1.bf16.msra.mxu0 %v6142_v10  ;;  %4243 = vmatpush1.bf16.msra.mxu1 %v6145_v11 }
 0x168   :  { %3875 = vmatprep.subr.bf16.mxu0 %v6150_v12  ;;  %4244 = vmatprep.subr.bf16.mxu1 %v6153_v52 }
 0x16b   :  { %3876 = vmatpush1.bf16.msra.mxu0 %v6148_v15  ;;  %4245 = vmatpush1.bf16.msra.mxu1 %v6151_v16 }
 0x16c   :  { %3877 = vmatprep.subr.bf16.mxu0 %v6156_v17  ;;  %4246 = vmatprep.subr.bf16.mxu1 %v6159_v18 }
 0x16f   :  { %3878 = vmatpush1.bf16.msra.mxu0 %v6154_v19  ;;  %4247 = vmatpush1.bf16.msra.mxu1 %v6157_v20 }
 0x170   :  { %3879 = vmatprep.subr.bf16.mxu0 %v6162_v22  ;;  %4248 = vmatprep.subr.bf16.mxu1 %v6165_v23 }
 0x173   :  { %3880 = vmatpush1.bf16.msra.mxu0 %v6160_v24  ;;  %4249 = vmatpush1.bf16.msra.mxu1 %v6163_v13 }
 0x174   :  { %3881 = vmatprep.subr.bf16.mxu0 %v6168_v27  ;;  %4250 = vmatprep.subr.bf16.mxu1 %v6171_v28 }
 0x177   :  { %3882 = vmatpush1.bf16.msra.mxu0 %v6166_v29  ;;  %4251 = vmatpush1.bf16.msra.mxu1 %v6169_v14 }
 0x178   :  { %3883 = vmatprep.subr.bf16.mxu0 %v6174_v30  ;;  %4252 = vmatprep.subr.bf16.mxu1 %v6177_v31 }
 0x17b   :  { %3884 = vmatpush1.bf16.msra.mxu0 %v6172_v33  ;;  %4253 = vmatpush1.bf16.msra.mxu1 %v6175_v26 }
 0x17c   :  { %3885 = vmatprep.subr.bf16.mxu0 %v6180_v36  ;;  %4254 = vmatprep.subr.bf16.mxu1 %v6183_v37 }
 0x17f   :  { %3886 = vmatpush1.bf16.msra.mxu0 %v6178_v21  ;;  %4255 = vmatpush1.bf16.msra.mxu1 %v6181_v39 }
 0x180   :  { %3896 = vmatprep.subr.bf16.mxu0 %v6186_v40  ;;  %4265 = vmatprep.subr.bf16.mxu1 %v6189_v41 }
 0x182   :  { %3888 = vmatmul.mubr.bf16.vlgmr.msra.gmra.mrb[0].mxu0 %v726_v43  ;;  %4257 = vmatmul.mubr.bf16.vlgmr.msra.gmra.mrb[0].mxu1 %v726_v43 }
 0x183   :  { %3897 = vmatpush1.bf16.msra.mxu0 %v6184_v44  ;;  %4266 = vmatpush1.bf16.msra.mxu1 %v6187_v45 }
 0x184   :  { %12 = vsyncpa [#allocation3], 0  ;;  %3898 = vmatprep.subr.bf16.mxu0 %v6192_v46  ;;  %4267 = vmatprep.subr.bf16.mxu1 %v6195_v35  ;;  %v6198_v51 = vld [vmem:[%s8545_s1 + $0xc44] ss:$16 sps:$4 sm:$0xff]   ;;  %v6201_v53 = vld [vmem:[%s8545_s1 + $0xc4c] ss:$16 sps:$4 sm:$0xff]  }
 0x185   :  { %3928 = vmatprep.mubr.bf16.mxu0 %v7826_v47  ;;  %4297 = vmatprep.mubr.bf16.mxu1 %v7826_v47  ;;  %v6196_v54 = vld [vmem:[%s8545_s1 + $0xc40] ss:$16 sps:$4 sm:$0xff]   ;;  %v6199_v55 = vld [vmem:[%s8545_s1 + $0xc48] ss:$16 sps:$4 sm:$0xff]   ;;  %v6204_v56 = vld [vmem:[%s8545_s1 + $0xc64] ss:$16 sps:$4 sm:$0xff]  }
 0x186   :  { %v6207_v57 = vld [vmem:[%s8545_s1 + $0xc6c] ss:$16 sps:$4 sm:$0xff]   ;;  %v6202_v58 = vld [vmem:[%s8545_s1 + $0xc60] ss:$16 sps:$4 sm:$0xff]   ;;  %v6205_v59 = vld [vmem:[%s8545_s1 + $0xc68] ss:$16 sps:$4 sm:$0xff]  }
 0x187   :  { %3899 = vmatpush1.bf16.msra.mxu0 %v6190_v48  ;;  %4268 = vmatpush1.bf16.msra.mxu1 %v6193_v50  ;;  %v6210_v60 = vld [vmem:[%s8545_s1 + $0xc84] ss:$16 sps:$4 sm:$0xff]   ;;  %v6213_v61 = vld [vmem:[%s8545_s1 + $0xc8c] ss:$16 sps:$4 sm:$0xff]   ;;  %v6208_v62 = vld [vmem:[%s8545_s1 + $0xc80] ss:$16 sps:$4 sm:$0xff]   ;;  %v8012_v48 = vrot.slane %v7795_v38, %v6718_v49 }
 0x188   :  { %3900 = vmatprep.subr.bf16.mxu0 %v6198_v51  ;;  %4269 = vmatprep.subr.bf16.mxu1 %v6201_v53  ;;  %v6211_v63 = vld [vmem:[%s8545_s1 + $0xc88] ss:$16 sps:$4 sm:$0xff]   ;;  %v6216_v0 = vld [vmem:[%s8545_s1 + $0xca4] ss:$16 sps:$4 sm:$0xff]   ;;  %v6219_v1 = vld [vmem:[%s8545_s1 + $0xcac] ss:$16 sps:$4 sm:$0xff]  }
 0x189   :  { %v6214_v2 = vld [vmem:[%s8545_s1 + $0xca0] ss:$16 sps:$4 sm:$0xff]   ;;  %v6217_v3 = vld [vmem:[%s8545_s1 + $0xca8] ss:$16 sps:$4 sm:$0xff]   ;;  %v6222_v4 = vld [vmem:[%s8545_s1 + $0xcc4] ss:$16 sps:$4 sm:$0xff]  }
 0x18a   :  { %v6225_v5 = vld [vmem:[%s8545_s1 + $0xccc] ss:$16 sps:$4 sm:$0xff]   ;;  %v6220_v6 = vld [vmem:[%s8545_s1 + $0xcc0] ss:$16 sps:$4 sm:$0xff]   ;;  %v6223_v7 = vld [vmem:[%s8545_s1 + $0xcc8] ss:$16 sps:$4 sm:$0xff]  }
 0x18b   :  { %3901 = vmatpush1.bf16.msra.mxu0 %v6196_v54  ;;  %4270 = vmatpush1.bf16.msra.mxu1 %v6199_v55  ;;  %v6228_v8 = vld [vmem:[%s8545_s1 + $0xce4] ss:$16 sps:$4 sm:$0xff]   ;;  %v6231_v9 = vld [vmem:[%s8545_s1 + $0xcec] ss:$16 sps:$4 sm:$0xff]   ;;  %v6226_v10 = vld [vmem:[%s8545_s1 + $0xce0] ss:$16 sps:$4 sm:$0xff]   ;;  %v729_v54 = vcombine.high %v7826_v47, %v7826_v47 }
 0x18c   :  { %3902 = vmatprep.subr.bf16.mxu0 %v6204_v56  ;;  %4271 = vmatprep.subr.bf16.mxu1 %v6207_v57  ;;  %v6229_v11 = vld [vmem:[%s8545_s1 + $0xce8] ss:$16 sps:$4 sm:$0xff]   ;;  %v6234_v12 = vld [vmem:[%s8545_s1 + $0xd04] ss:$16 sps:$4 sm:$0xff]   ;;  %v6237_v52 = vld [vmem:[%s8545_s1 + $0xd0c] ss:$16 sps:$4 sm:$0xff]  }
 0x18d   :  { %v6232_v15 = vld [vmem:[%s8545_s1 + $0xd00] ss:$16 sps:$4 sm:$0xff]   ;;  %v6235_v16 = vld [vmem:[%s8545_s1 + $0xd08] ss:$16 sps:$4 sm:$0xff]   ;;  %v6240_v17 = vld [vmem:[%s8545_s1 + $0xd24] ss:$16 sps:$4 sm:$0xff]  }
 0x18e   :  { %v6243_v18 = vld [vmem:[%s8545_s1 + $0xd2c] ss:$16 sps:$4 sm:$0xff]   ;;  %v6238_v19 = vld [vmem:[%s8545_s1 + $0xd20] ss:$16 sps:$4 sm:$0xff]   ;;  %v6241_v20 = vld [vmem:[%s8545_s1 + $0xd28] ss:$16 sps:$4 sm:$0xff]  }
 0x18f   :  { %3903 = vmatpush1.bf16.msra.mxu0 %v6202_v58  ;;  %4272 = vmatpush1.bf16.msra.mxu1 %v6205_v59  ;;  %v6246_v22 = vld [vmem:[%s8545_s1 + $0xd44] ss:$16 sps:$4 sm:$0xff]   ;;  %v6249_v23 = vld [vmem:[%s8545_s1 + $0xd4c] ss:$16 sps:$4 sm:$0xff]   ;;  %v6244_v24 = vld [vmem:[%s8545_s1 + $0xd40] ss:$16 sps:$4 sm:$0xff]  }
 0x190   :  { %3904 = vmatprep.subr.bf16.mxu0 %v6210_v60  ;;  %4273 = vmatprep.subr.bf16.mxu1 %v6213_v61  ;;  %v6247_v13 = vld [vmem:[%s8545_s1 + $0xd48] ss:$16 sps:$4 sm:$0xff]   ;;  %v6252_v27 = vld [vmem:[%s8545_s1 + $0xd64] ss:$16 sps:$4 sm:$0xff]   ;;  %v6255_v28 = vld [vmem:[%s8545_s1 + $0xd6c] ss:$16 sps:$4 sm:$0xff]  }
 0x191   :  { %v6250_v29 = vld [vmem:[%s8545_s1 + $0xd60] ss:$16 sps:$4 sm:$0xff]   ;;  %v6253_v14 = vld [vmem:[%s8545_s1 + $0xd68] ss:$16 sps:$4 sm:$0xff]   ;;  %v6258_v30 = vld [vmem:[%s8545_s1 + $0xd84] ss:$16 sps:$4 sm:$0xff]  }
 0x192   :  { %v6261_v31 = vld [vmem:[%s8545_s1 + $0xd8c] ss:$16 sps:$4 sm:$0xff]   ;;  %v6256_v25 = vld [vmem:[%s8545_s1 + $0xd80] ss:$16 sps:$4 sm:$0xff]   ;;  %v6259_v32 = vld [vmem:[%s8545_s1 + $0xd88] ss:$16 sps:$4 sm:$0xff]  }
 0x193   :  { %3905 = vmatpush1.bf16.msra.mxu0 %v6208_v62  ;;  %4274 = vmatpush1.bf16.msra.mxu1 %v6211_v63  ;;  %v6264_v33 = vld [vmem:[%s8545_s1 + $0xda4] ss:$16 sps:$4 sm:$0xff]   ;;  %v6267_v26 = vld [vmem:[%s8545_s1 + $0xdac] ss:$16 sps:$4 sm:$0xff]   ;;  %v6262_v36 = vld [vmem:[%s8545_s1 + $0xda0] ss:$16 sps:$4 sm:$0xff]  }
 0x194   :  { %3906 = vmatprep.subr.bf16.mxu0 %v6216_v0  ;;  %4275 = vmatprep.subr.bf16.mxu1 %v6219_v1  ;;  %v6265_v37 = vld [vmem:[%s8545_s1 + $0xda8] ss:$16 sps:$4 sm:$0xff]   ;;  %v6270_v21 = vld [vmem:[%s8545_s1 + $0xdc4] ss:$16 sps:$4 sm:$0xff]   ;;  %v6273_v39 = vld [vmem:[%s8545_s1 + $0xdcc] ss:$16 sps:$4 sm:$0xff]  }
 0x195   :  { %v6268_v40 = vld [vmem:[%s8545_s1 + $0xdc0] ss:$16 sps:$4 sm:$0xff]   ;;  %v6271_v41 = vld [vmem:[%s8545_s1 + $0xdc8] ss:$16 sps:$4 sm:$0xff]   ;;  %v6276_v34 = vld [vmem:[%s8545_s1 + $0xde4] ss:$16 sps:$4 sm:$0xff]  }
 0x196   :  { %v6279_v43 = vld [vmem:[%s8545_s1 + $0xdec] ss:$16 sps:$4 sm:$0xff]   ;;  %v6274_v44 = vld [vmem:[%s8545_s1 + $0xde0] ss:$16 sps:$4 sm:$0xff]   ;;  %v6277_v45 = vld [vmem:[%s8545_s1 + $0xde8] ss:$16 sps:$4 sm:$0xff]  }
 0x197   :  { %3907 = vmatpush1.bf16.msra.mxu0 %v6214_v2  ;;  %4276 = vmatpush1.bf16.msra.mxu1 %v6217_v3  ;;  %v6283_v46 = vld [vmem:[%s8545_s1 + $0xe04] ss:$16 sps:$4 sm:$0xff]   ;;  %v6286_v35 = vld [vmem:[%s8545_s1 + $0xe0c] ss:$16 sps:$4 sm:$0xff]   ;;  %v6281_v50 = vld [vmem:[%s8545_s1 + $0xe00] ss:$16 sps:$4 sm:$0xff]  }
 0x198   :  { %3908 = vmatprep.subr.bf16.mxu0 %v6222_v4  ;;  %4277 = vmatprep.subr.bf16.mxu1 %v6225_v5  ;;  %v6284_v51 = vld [vmem:[%s8545_s1 + $0xe08] ss:$16 sps:$4 sm:$0xff]   ;;  %v6289_v53 = vld [vmem:[%s8545_s1 + $0xe24] ss:$16 sps:$4 sm:$0xff]   ;;  %v6292_v38 = vld [vmem:[%s8545_s1 + $0xe2c] ss:$16 sps:$4 sm:$0xff]  }
 0x199   :  { %v6287_v55 = vld [vmem:[%s8545_s1 + $0xe20] ss:$16 sps:$4 sm:$0xff]   ;;  %v6290_v56 = vld [vmem:[%s8545_s1 + $0xe28] ss:$16 sps:$4 sm:$0xff]   ;;  %v6295_v47 = vld [vmem:[%s8545_s1 + $0xe44] ss:$16 sps:$4 sm:$0xff]  }
 0x19a   :  { %v6298_v57 = vld [vmem:[%s8545_s1 + $0xe4c] ss:$16 sps:$4 sm:$0xff]   ;;  %v6293_v58 = vld [vmem:[%s8545_s1 + $0xe40] ss:$16 sps:$4 sm:$0xff]   ;;  %v6296_v59 = vld [vmem:[%s8545_s1 + $0xe48] ss:$16 sps:$4 sm:$0xff]  }
 0x19b   :  { %3909 = vmatpush1.bf16.msra.mxu0 %v6220_v6  ;;  %4278 = vmatpush1.bf16.msra.mxu1 %v6223_v7  ;;  %v6301_v60 = vld [vmem:[%s8545_s1 + $0xe64] ss:$16 sps:$4 sm:$0xff]   ;;  %v6304_v61 = vld [vmem:[%s8545_s1 + $0xe6c] ss:$16 sps:$4 sm:$0xff]   ;;  %v6299_v62 = vld [vmem:[%s8545_s1 + $0xe60] ss:$16 sps:$4 sm:$0xff]  }
 0x19c   :  { %3910 = vmatprep.subr.bf16.mxu0 %v6228_v8  ;;  %4279 = vmatprep.subr.bf16.mxu1 %v6231_v9  ;;  %v6302_v63 = vld [vmem:[%s8545_s1 + $0xe68] ss:$16 sps:$4 sm:$0xff]   ;;  %v6307_v0 = vld [vmem:[%s8545_s1 + $0xe84] ss:$16 sps:$4 sm:$0xff]   ;;  %v6310_v1 = vld [vmem:[%s8545_s1 + $0xe8c] ss:$16 sps:$4 sm:$0xff]  }
 0x19d   :  { %v6305_v2 = vld [vmem:[%s8545_s1 + $0xe80] ss:$16 sps:$4 sm:$0xff]   ;;  %v6308_v3 = vld [vmem:[%s8545_s1 + $0xe88] ss:$16 sps:$4 sm:$0xff]   ;;  %v6313_v4 = vld [vmem:[%s8545_s1 + $0xea4] ss:$16 sps:$4 sm:$0xff]  }
 0x19e   :  { %v6316_v5 = vld [vmem:[%s8545_s1 + $0xeac] ss:$16 sps:$4 sm:$0xff]   ;;  %v6311_v6 = vld [vmem:[%s8545_s1 + $0xea0] ss:$16 sps:$4 sm:$0xff]   ;;  %v6314_v7 = vld [vmem:[%s8545_s1 + $0xea8] ss:$16 sps:$4 sm:$0xff]  }
 0x19f   :  { %3911 = vmatpush1.bf16.msra.mxu0 %v6226_v10  ;;  %4280 = vmatpush1.bf16.msra.mxu1 %v6229_v11  ;;  %v6319_v8 = vld [vmem:[%s8545_s1 + $0xec4] ss:$16 sps:$4 sm:$0xff]   ;;  %v6322_v9 = vld [vmem:[%s8545_s1 + $0xecc] ss:$16 sps:$4 sm:$0xff]   ;;  %v6317_v10 = vld [vmem:[%s8545_s1 + $0xec0] ss:$16 sps:$4 sm:$0xff]  }
 0x1a0   :  { %3912 = vmatprep.subr.bf16.mxu0 %v6234_v12  ;;  %4281 = vmatprep.subr.bf16.mxu1 %v6237_v52  ;;  %v6320_v11 = vld [vmem:[%s8545_s1 + $0xec8] ss:$16 sps:$4 sm:$0xff]   ;;  %v6325_v12 = vld [vmem:[%s8545_s1 + $0xee4] ss:$16 sps:$4 sm:$0xff]   ;;  %v6328_v52 = vld [vmem:[%s8545_s1 + $0xeec] ss:$16 sps:$4 sm:$0xff]  }
 0x1a1   :  { %vm4659_vm0 = vcmask 1041408   ;;  %vm4655_vm1 = vcmask 949248   ;;  %vm4784_vm2 = vcmask 1040384   ;;  %vm6541_vm3 = vmmov 0  }
 0x1a2   :  { %vm4780_vm4 = vcmask 408576   ;;  %vm4828_vm5 = vcmask 25600  }
 0x1a3   :  { %3913 = vmatpush1.bf16.msra.mxu0 %v6232_v15  ;;  %4282 = vmatpush1.bf16.msra.mxu1 %v6235_v16  ;;  %v6323_v15 = vld [vmem:[%s8545_s1 + $0xee0] ss:$16 sps:$4 sm:$0xff]   ;;  %v6326_v16 = vld [vmem:[%s8545_s1 + $0xee8] ss:$16 sps:$4 sm:$0xff]  }
 0x1a4   :  { %3914 = vmatprep.subr.bf16.mxu0 %v6240_v17  ;;  %4283 = vmatprep.subr.bf16.mxu1 %v6243_v18  ;;  %v6331_v17 = vld [vmem:[%s8545_s1 + $0xf04] ss:$16 sps:$4 sm:$0xff]   ;;  %v6334_v18 = vld [vmem:[%s8545_s1 + $0xf0c] ss:$16 sps:$4 sm:$0xff]  }
 0x1a7   :  { %3915 = vmatpush1.bf16.msra.mxu0 %v6238_v19  ;;  %4284 = vmatpush1.bf16.msra.mxu1 %v6241_v20  ;;  %v6329_v19 = vld [vmem:[%s8545_s1 + $0xf00] ss:$16 sps:$4 sm:$0xff]   ;;  %v6332_v20 = vld [vmem:[%s8545_s1 + $0xf08] ss:$16 sps:$4 sm:$0xff]  }
 0x1a8   :  { %3916 = vmatprep.subr.bf16.mxu0 %v6246_v22  ;;  %4285 = vmatprep.subr.bf16.mxu1 %v6249_v23  ;;  %v6337_v22 = vld [vmem:[%s8545_s1 + $0xf24] ss:$16 sps:$4 sm:$0xff]   ;;  %v6340_v23 = vld [vmem:[%s8545_s1 + $0xf2c] ss:$16 sps:$4 sm:$0xff]  }
 0x1ab   :  { %3917 = vmatpush1.bf16.msra.mxu0 %v6244_v24  ;;  %4286 = vmatpush1.bf16.msra.mxu1 %v6247_v13  ;;  %v6335_v24 = vld [vmem:[%s8545_s1 + $0xf20] ss:$16 sps:$4 sm:$0xff]   ;;  %v6338_v13 = vld [vmem:[%s8545_s1 + $0xf28] ss:$16 sps:$4 sm:$0xff]  }
 0x1ac   :  { %3918 = vmatprep.subr.bf16.mxu0 %v6252_v27  ;;  %4287 = vmatprep.subr.bf16.mxu1 %v6255_v28  ;;  %v6343_v27 = vld [vmem:[%s8545_s1 + $0xf44] ss:$16 sps:$4 sm:$0xff]   ;;  %v6346_v28 = vld [vmem:[%s8545_s1 + $0xf4c] ss:$16 sps:$4 sm:$0xff]  }
 0x1af   :  { %3919 = vmatpush1.bf16.msra.mxu0 %v6250_v29  ;;  %4288 = vmatpush1.bf16.msra.mxu1 %v6253_v14  ;;  %v6341_v29 = vld [vmem:[%s8545_s1 + $0xf40] ss:$16 sps:$4 sm:$0xff]   ;;  %v6344_v14 = vld [vmem:[%s8545_s1 + $0xf48] ss:$16 sps:$4 sm:$0xff]  }
 0x1b0   :  { %3920 = vmatprep.subr.bf16.mxu0 %v6258_v30  ;;  %4289 = vmatprep.subr.bf16.mxu1 %v6261_v31  ;;  %v6349_v30 = vld [vmem:[%s8545_s1 + $0xf64] ss:$16 sps:$4 sm:$0xff]   ;;  %v6352_v31 = vld [vmem:[%s8545_s1 + $0xf6c] ss:$16 sps:$4 sm:$0xff]  }
 0x1b3   :  { %3921 = vmatpush1.bf16.msra.mxu0 %v6256_v25  ;;  %4290 = vmatpush1.bf16.msra.mxu1 %v6259_v32  ;;  %v6347_v25 = vld [vmem:[%s8545_s1 + $0xf60] ss:$16 sps:$4 sm:$0xff]   ;;  %v6350_v32 = vld [vmem:[%s8545_s1 + $0xf68] ss:$16 sps:$4 sm:$0xff]  }
 0x1b4   :  { %3922 = vmatprep.subr.bf16.mxu0 %v6264_v33  ;;  %4291 = vmatprep.subr.bf16.mxu1 %v6267_v26  ;;  %v6355_v33 = vld [vmem:[%s8545_s1 + $0xf84] ss:$16 sps:$4 sm:$0xff]   ;;  %v6358_v26 = vld [vmem:[%s8545_s1 + $0xf8c] ss:$16 sps:$4 sm:$0xff]  }
 0x1b7   :  { %3923 = vmatpush1.bf16.msra.mxu0 %v6262_v36  ;;  %4292 = vmatpush1.bf16.msra.mxu1 %v6265_v37  ;;  %v6353_v36 = vld [vmem:[%s8545_s1 + $0xf80] ss:$16 sps:$4 sm:$0xff]   ;;  %v6356_v37 = vld [vmem:[%s8545_s1 + $0xf88] ss:$16 sps:$4 sm:$0xff]  }
 0x1b8   :  { %3924 = vmatprep.subr.bf16.mxu0 %v6270_v21  ;;  %4293 = vmatprep.subr.bf16.mxu1 %v6273_v39  ;;  %v6361_v21 = vld [vmem:[%s8545_s1 + $0xfa4] ss:$16 sps:$4 sm:$0xff]   ;;  %v6364_v39 = vld [vmem:[%s8545_s1 + $0xfac] ss:$16 sps:$4 sm:$0xff]  }
 0x1bb   :  { %3925 = vmatpush1.bf16.msra.mxu0 %v6268_v40  ;;  %4294 = vmatpush1.bf16.msra.mxu1 %v6271_v41  ;;  %v6359_v40 = vld [vmem:[%s8545_s1 + $0xfa0] ss:$16 sps:$4 sm:$0xff]   ;;  %v6362_v41 = vld [vmem:[%s8545_s1 + $0xfa8] ss:$16 sps:$4 sm:$0xff]  }
 0x1bc   :  { %3926 = vmatprep.subr.bf16.mxu0 %v6276_v34  ;;  %4295 = vmatprep.subr.bf16.mxu1 %v6279_v43  ;;  %v6367_v34 = vld [vmem:[%s8545_s1 + $0xfc4] ss:$16 sps:$4 sm:$0xff]   ;;  %v6370_v43 = vld [vmem:[%s8545_s1 + $0xfcc] ss:$16 sps:$4 sm:$0xff]  }
 0x1bf   :  { %3927 = vmatpush1.bf16.msra.mxu0 %v6274_v44  ;;  %4296 = vmatpush1.bf16.msra.mxu1 %v6277_v45  ;;  %v6365_v44 = vld [vmem:[%s8545_s1 + $0xfc0] ss:$16 sps:$4 sm:$0xff]   ;;  %v6368_v45 = vld [vmem:[%s8545_s1 + $0xfc8] ss:$16 sps:$4 sm:$0xff]  }
 0x1c0   :  { %3937 = vmatprep.subr.bf16.mxu0 %v6283_v46  ;;  %4306 = vmatprep.subr.bf16.mxu1 %v6286_v35  ;;  %v6373_v46 = vld [vmem:[%s8545_s1 + $0xfe4] ss:$16 sps:$4 sm:$0xff]   ;;  %v6376_v35 = vld [vmem:[%s8545_s1 + $0xfec] ss:$16 sps:$4 sm:$0xff]  }
 0x1c2   :  { %3929 = vmatmul.mubr.bf16.vlgmr.msra.gmra.mrb[0].mxu0 %v8012_v48  ;;  %4298 = vmatmul.mubr.bf16.vlgmr.msra.gmra.mrb[0].mxu1 %v8012_v48 }
 0x1c3   :  { %3938 = vmatpush1.bf16.msra.mxu0 %v6281_v50  ;;  %4307 = vmatpush1.bf16.msra.mxu1 %v6284_v51  ;;  %v8201_v50 = vld.sshfl [vmem:[%s8544_s0 + $0x10] sm:$0x11 pattern:$0x75316420] }
 0x1c4   :  { %3939 = vmatprep.subr.bf16.mxu0 %v6289_v53  ;;  %4308 = vmatprep.subr.bf16.mxu1 %v6292_v38  ;;  %v6371_v51 = vld [vmem:[%s8545_s1 + $0xfe0] ss:$16 sps:$4 sm:$0xff]   ;;  %v6374_v53 = vld [vmem:[%s8545_s1 + $0xfe8] ss:$16 sps:$4 sm:$0xff]   ;;  %v6379_v38 = vld [vmem:[%s8545_s1 + $0x1004] ss:$16 sps:$4 sm:$0xff]  }
 0x1c5   :  { %3969 = vmatprep.mubr.bf16.mxu0 %v729_v54  ;;  %4338 = vmatprep.mubr.bf16.mxu1 %v729_v54  ;;  %v6382_v54 = vld [vmem:[%s8545_s1 + $0x100c] ss:$16 sps:$4 sm:$0xff]  }
 0x1c7   :  { %3940 = vmatpush1.bf16.msra.mxu0 %v6287_v55  ;;  %4309 = vmatpush1.bf16.msra.mxu1 %v6290_v56  ;;  %v737_v55 = vcombine.high %v8201_v50, %v8201_v50  ;;  %v727_v56 = vcombine.high %v8012_v48, %v8012_v48  ;;  %v6388_v48 = vld [vmem:[%s8545_s1 + $0x102c] ss:$16 sps:$4 sm:$0xff]  }
 0x1c8   :  { %3941 = vmatprep.subr.bf16.mxu0 %v6295_v47  ;;  %4310 = vmatprep.subr.bf16.mxu1 %v6298_v57  ;;  %v6377_v47 = vld [vmem:[%s8545_s1 + $0x1000] ss:$16 sps:$4 sm:$0xff]   ;;  %v6380_v57 = vld [vmem:[%s8545_s1 + $0x1008] ss:$16 sps:$4 sm:$0xff]  }
 0x1cb   :  { %3942 = vmatpush1.bf16.msra.mxu0 %v6293_v58  ;;  %4311 = vmatpush1.bf16.msra.mxu1 %v6296_v59  ;;  %v6385_v58 = vld [vmem:[%s8545_s1 + $0x1024] ss:$16 sps:$4 sm:$0xff]   ;;  %v751_v59 = vrot.slane %v737_v55, %v6718_v49 }
 0x1cc   :  { %3943 = vmatprep.subr.bf16.mxu0 %v6301_v60  ;;  %4312 = vmatprep.subr.bf16.mxu1 %v6304_v61  ;;  %v6383_v60 = vld [vmem:[%s8545_s1 + $0x1020] ss:$16 sps:$4 sm:$0xff]   ;;  %v6386_v61 = vld [vmem:[%s8545_s1 + $0x1028] ss:$16 sps:$4 sm:$0xff]   ;;  %v6469_v55 = vld [vmem:[%s8545_s1 + $0x11e4] ss:$16 sps:$4 sm:$0xff]  }
 0x1cf   :  { %3944 = vmatpush1.bf16.msra.mxu0 %v6299_v62  ;;  %4313 = vmatpush1.bf16.msra.mxu1 %v6302_v63  ;;  %v6391_v62 = vld [vmem:[%s8545_s1 + $0x1044] ss:$16 sps:$4 sm:$0xff]   ;;  %v6394_v63 = vld [vmem:[%s8545_s1 + $0x104c] ss:$16 sps:$4 sm:$0xff]  }
 0x1d0   :  { %3945 = vmatprep.subr.bf16.mxu0 %v6307_v0  ;;  %4314 = vmatprep.subr.bf16.mxu1 %v6310_v1  ;;  %v6389_v0 = vld [vmem:[%s8545_s1 + $0x1040] ss:$16 sps:$4 sm:$0xff]   ;;  %v6392_v1 = vld [vmem:[%s8545_s1 + $0x1048] ss:$16 sps:$4 sm:$0xff]  }
 0x1d3   :  { %3946 = vmatpush1.bf16.msra.mxu0 %v6305_v2  ;;  %4315 = vmatpush1.bf16.msra.mxu1 %v6308_v3  ;;  %v6397_v2 = vld [vmem:[%s8545_s1 + $0x1064] ss:$16 sps:$4 sm:$0xff]   ;;  %v6400_v3 = vld [vmem:[%s8545_s1 + $0x106c] ss:$16 sps:$4 sm:$0xff]  }
 0x1d4   :  { %3947 = vmatprep.subr.bf16.mxu0 %v6313_v4  ;;  %4316 = vmatprep.subr.bf16.mxu1 %v6316_v5  ;;  %v6395_v4 = vld [vmem:[%s8545_s1 + $0x1060] ss:$16 sps:$4 sm:$0xff]   ;;  %v6398_v5 = vld [vmem:[%s8545_s1 + $0x1068] ss:$16 sps:$4 sm:$0xff]  }
 0x1d7   :  { %3948 = vmatpush1.bf16.msra.mxu0 %v6311_v6  ;;  %4317 = vmatpush1.bf16.msra.mxu1 %v6314_v7  ;;  %v6403_v6 = vld [vmem:[%s8545_s1 + $0x1084] ss:$16 sps:$4 sm:$0xff]   ;;  %v6406_v7 = vld [vmem:[%s8545_s1 + $0x108c] ss:$16 sps:$4 sm:$0xff]  }
 0x1d8   :  { %3949 = vmatprep.subr.bf16.mxu0 %v6319_v8  ;;  %4318 = vmatprep.subr.bf16.mxu1 %v6322_v9  ;;  %v6401_v8 = vld [vmem:[%s8545_s1 + $0x1080] ss:$16 sps:$4 sm:$0xff]   ;;  %v6404_v9 = vld [vmem:[%s8545_s1 + $0x1088] ss:$16 sps:$4 sm:$0xff]  }
 0x1db   :  { %3950 = vmatpush1.bf16.msra.mxu0 %v6317_v10  ;;  %4319 = vmatpush1.bf16.msra.mxu1 %v6320_v11  ;;  %v6409_v10 = vld [vmem:[%s8545_s1 + $0x10a4] ss:$16 sps:$4 sm:$0xff]   ;;  %v6412_v11 = vld [vmem:[%s8545_s1 + $0x10ac] ss:$16 sps:$4 sm:$0xff]  }
 0x1dc   :  { %3951 = vmatprep.subr.bf16.mxu0 %v6325_v12  ;;  %4320 = vmatprep.subr.bf16.mxu1 %v6328_v52  ;;  %v6407_v12 = vld [vmem:[%s8545_s1 + $0x10a0] ss:$16 sps:$4 sm:$0xff]   ;;  %v6410_v52 = vld [vmem:[%s8545_s1 + $0x10a8] ss:$16 sps:$4 sm:$0xff]  }
 0x1df   :  { %3952 = vmatpush1.bf16.msra.mxu0 %v6323_v15  ;;  %4321 = vmatpush1.bf16.msra.mxu1 %v6326_v16  ;;  %v6415_v15 = vld [vmem:[%s8545_s1 + $0x10c4] ss:$16 sps:$4 sm:$0xff]   ;;  %v6418_v16 = vld [vmem:[%s8545_s1 + $0x10cc] ss:$16 sps:$4 sm:$0xff]  }
 0x1e0   :  { %3953 = vmatprep.subr.bf16.mxu0 %v6331_v17  ;;  %4322 = vmatprep.subr.bf16.mxu1 %v6334_v18  ;;  %v6413_v17 = vld [vmem:[%s8545_s1 + $0x10c0] ss:$16 sps:$4 sm:$0xff]   ;;  %v6416_v18 = vld [vmem:[%s8545_s1 + $0x10c8] ss:$16 sps:$4 sm:$0xff]  }
 0x1e3   :  { %3954 = vmatpush1.bf16.msra.mxu0 %v6329_v19  ;;  %4323 = vmatpush1.bf16.msra.mxu1 %v6332_v20  ;;  %v6421_v19 = vld [vmem:[%s8545_s1 + $0x10e4] ss:$16 sps:$4 sm:$0xff]   ;;  %v6424_v20 = vld [vmem:[%s8545_s1 + $0x10ec] ss:$16 sps:$4 sm:$0xff]  }
 0x1e4   :  { %3955 = vmatprep.subr.bf16.mxu0 %v6337_v22  ;;  %4324 = vmatprep.subr.bf16.mxu1 %v6340_v23  ;;  %v6419_v22 = vld [vmem:[%s8545_s1 + $0x10e0] ss:$16 sps:$4 sm:$0xff]   ;;  %v6422_v23 = vld [vmem:[%s8545_s1 + $0x10e8] ss:$16 sps:$4 sm:$0xff]  }
 0x1e7   :  { %3956 = vmatpush1.bf16.msra.mxu0 %v6335_v24  ;;  %4325 = vmatpush1.bf16.msra.mxu1 %v6338_v13  ;;  %v6427_v24 = vld [vmem:[%s8545_s1 + $0x1104] ss:$16 sps:$4 sm:$0xff]   ;;  %v6430_v13 = vld [vmem:[%s8545_s1 + $0x110c] ss:$16 sps:$4 sm:$0xff]  }
 0x1e8   :  { %3957 = vmatprep.subr.bf16.mxu0 %v6343_v27  ;;  %4326 = vmatprep.subr.bf16.mxu1 %v6346_v28  ;;  %v6425_v27 = vld [vmem:[%s8545_s1 + $0x1100] ss:$16 sps:$4 sm:$0xff]   ;;  %v6428_v28 = vld [vmem:[%s8545_s1 + $0x1108] ss:$16 sps:$4 sm:$0xff]  }
 0x1eb   :  { %3958 = vmatpush1.bf16.msra.mxu0 %v6341_v29  ;;  %4327 = vmatpush1.bf16.msra.mxu1 %v6344_v14  ;;  %v6433_v29 = vld [vmem:[%s8545_s1 + $0x1124] ss:$16 sps:$4 sm:$0xff]   ;;  %v6436_v14 = vld [vmem:[%s8545_s1 + $0x112c] ss:$16 sps:$4 sm:$0xff]  }
 0x1ec   :  { %3959 = vmatprep.subr.bf16.mxu0 %v6349_v30  ;;  %4328 = vmatprep.subr.bf16.mxu1 %v6352_v31  ;;  %v6431_v30 = vld [vmem:[%s8545_s1 + $0x1120] ss:$16 sps:$4 sm:$0xff]   ;;  %v6434_v31 = vld [vmem:[%s8545_s1 + $0x1128] ss:$16 sps:$4 sm:$0xff]  }
 0x1ef   :  { %3960 = vmatpush1.bf16.msra.mxu0 %v6347_v25  ;;  %4329 = vmatpush1.bf16.msra.mxu1 %v6350_v32  ;;  %v6439_v25 = vld [vmem:[%s8545_s1 + $0x1144] ss:$16 sps:$4 sm:$0xff]   ;;  %v6442_v32 = vld [vmem:[%s8545_s1 + $0x114c] ss:$16 sps:$4 sm:$0xff]  }
 0x1f0   :  { %3961 = vmatprep.subr.bf16.mxu0 %v6355_v33  ;;  %4330 = vmatprep.subr.bf16.mxu1 %v6358_v26  ;;  %v6437_v33 = vld [vmem:[%s8545_s1 + $0x1140] ss:$16 sps:$4 sm:$0xff]   ;;  %v6440_v26 = vld [vmem:[%s8545_s1 + $0x1148] ss:$16 sps:$4 sm:$0xff]  }
 0x1f3   :  { %3962 = vmatpush1.bf16.msra.mxu0 %v6353_v36  ;;  %4331 = vmatpush1.bf16.msra.mxu1 %v6356_v37  ;;  %v6445_v36 = vld [vmem:[%s8545_s1 + $0x1164] ss:$16 sps:$4 sm:$0xff]   ;;  %v6448_v37 = vld [vmem:[%s8545_s1 + $0x116c] ss:$16 sps:$4 sm:$0xff]  }
 0x1f4   :  { %3963 = vmatprep.subr.bf16.mxu0 %v6361_v21  ;;  %4332 = vmatprep.subr.bf16.mxu1 %v6364_v39  ;;  %v6443_v21 = vld [vmem:[%s8545_s1 + $0x1160] ss:$16 sps:$4 sm:$0xff]   ;;  %v6446_v39 = vld [vmem:[%s8545_s1 + $0x1168] ss:$16 sps:$4 sm:$0xff]  }
 0x1f7   :  { %3964 = vmatpush1.bf16.msra.mxu0 %v6359_v40  ;;  %4333 = vmatpush1.bf16.msra.mxu1 %v6362_v41  ;;  %v6451_v40 = vld [vmem:[%s8545_s1 + $0x1184] ss:$16 sps:$4 sm:$0xff]   ;;  %v6454_v41 = vld [vmem:[%s8545_s1 + $0x118c] ss:$16 sps:$4 sm:$0xff]  }
 0x1f8   :  { %3965 = vmatprep.subr.bf16.mxu0 %v6367_v34  ;;  %4334 = vmatprep.subr.bf16.mxu1 %v6370_v43  ;;  %v6449_v34 = vld [vmem:[%s8545_s1 + $0x1180] ss:$16 sps:$4 sm:$0xff]   ;;  %v6452_v43 = vld [vmem:[%s8545_s1 + $0x1188] ss:$16 sps:$4 sm:$0xff]  }
 0x1fb   :  { %3966 = vmatpush1.bf16.msra.mxu0 %v6365_v44  ;;  %4335 = vmatpush1.bf16.msra.mxu1 %v6368_v45  ;;  %v6457_v44 = vld [vmem:[%s8545_s1 + $0x11a4] ss:$16 sps:$4 sm:$0xff]   ;;  %v6460_v45 = vld [vmem:[%s8545_s1 + $0x11ac] ss:$16 sps:$4 sm:$0xff]  }
 0x1fc   :  { %3967 = vmatprep.subr.bf16.mxu0 %v6373_v46  ;;  %4336 = vmatprep.subr.bf16.mxu1 %v6376_v35  ;;  %v6455_v46 = vld [vmem:[%s8545_s1 + $0x11a0] ss:$16 sps:$4 sm:$0xff]   ;;  %v6458_v35 = vld [vmem:[%s8545_s1 + $0x11a8] ss:$16 sps:$4 sm:$0xff]  }
 0x1ff   :  { %3968 = vmatpush1.bf16.msra.mxu0 %v6371_v51  ;;  %4337 = vmatpush1.bf16.msra.mxu1 %v6374_v53  ;;  %v6463_v51 = vld [vmem:[%s8545_s1 + $0x11c4] ss:$16 sps:$4 sm:$0xff]   ;;  %v6466_v53 = vld [vmem:[%s8545_s1 + $0x11cc] ss:$16 sps:$4 sm:$0xff]  }
 0x200   :  { %3978 = vmatprep.subr.bf16.mxu0 %v6379_v38  ;;  %4347 = vmatprep.subr.bf16.mxu1 %v6382_v54  ;;  %v6461_v38 = vld [vmem:[%s8545_s1 + $0x11c0] ss:$16 sps:$4 sm:$0xff]   ;;  %v6464_v54 = vld [vmem:[%s8545_s1 + $0x11c8] ss:$16 sps:$4 sm:$0xff]  }
 0x202   :  { %3970 = vmatmul.mubr.bf16.vlgmr.msra.gmra.mrb[0].mxu0 %v727_v56  ;;  %4339 = vmatmul.mubr.bf16.vlgmr.msra.gmra.mrb[0].mxu1 %v727_v56  ;;  %v6472_v56 = vld [vmem:[%s8545_s1 + $0x11ec] ss:$16 sps:$4 sm:$0xff]  }
 0x203   :  { %3979 = vmatpush1.bf16.msra.mxu0 %v6377_v47  ;;  %4348 = vmatpush1.bf16.msra.mxu1 %v6380_v57  ;;  %v6467_v47 = vld [vmem:[%s8545_s1 + $0x11e0] ss:$16 sps:$4 sm:$0xff]   ;;  %v6470_v57 = vld [vmem:[%s8545_s1 + $0x11e8] ss:$16 sps:$4 sm:$0xff]  }
 0x204   :  { %3980 = vmatprep.subr.bf16.mxu0 %v6385_v58  ;;  %4349 = vmatprep.subr.bf16.mxu1 %v6388_v48  ;;  %v6473_v58 = vld [vmem:[%s8547_s3 + $0x40] sm:$0xff]  }
 0x205   :  { %4010 = vmatprep.mubr.bf16.mxu0 %v751_v59  ;;  %4379 = vmatprep.mubr.bf16.mxu1 %v751_v59  ;;  %v6474_v48 = vld [vmem:[%s8547_s3 + $0xc0] sm:$0xff]   ;;  %v744_v59 = vrot.slane %v8201_v50, %v6718_v49  ;;  %v6478_v49 = vld [vmem:[%s8547_s3 + $0xc8] sm:$0xff]  }
 0x206   :  { %v6479_v50 = vld [vmem:[%s8547_s3 + $0x8] sm:$0xff]  }
 0x207   :  { %3981 = vmatpush1.bf16.msra.mxu0 %v6383_v60  ;;  %4350 = vmatpush1.bf16.msra.mxu1 %v6386_v61  ;;  %v6475_v60 = vld [vmem:[%s8547_s3] sm:$0xff]  }
 0x208   :  { %3982 = vmatprep.subr.bf16.mxu0 %v6391_v62  ;;  %4351 = vmatprep.subr.bf16.mxu1 %v6394_v63  ;;  %v6476_v61 = vld [vmem:[%s8547_s3 + $0x80] sm:$0xff]   ;;  %v6477_v62 = vld [vmem:[%s8547_s3 + $0x48] sm:$0xff]  }
 0x209   :  { %v6480_v63 = vld [vmem:[%s8547_s3 + $0x88] sm:$0xff]  }
 0x20b   :  { %3983 = vmatpush1.bf16.msra.mxu0 %v6389_v0  ;;  %4352 = vmatpush1.bf16.msra.mxu1 %v6392_v1  ;;  %v6481_v0 = vld [vmem:[%s8547_s3 + $0x50] sm:$0xff]  }
 0x20c   :  { %3984 = vmatprep.subr.bf16.mxu0 %v6397_v2  ;;  %4353 = vmatprep.subr.bf16.mxu1 %v6400_v3  ;;  %v6482_v1 = vld [vmem:[%s8547_s3 + $0xd0] sm:$0xff]  }
 0x20d   :  { %v6483_v2 = vld [vmem:[%s8547_s3 + $0x10] sm:$0xff]  }
 0x20e   :  { %v6484_v3 = vld [vmem:[%s8547_s3 + $0x90] sm:$0xff]  }
 0x20f   :  { %3985 = vmatpush1.bf16.msra.mxu0 %v6395_v4  ;;  %4354 = vmatpush1.bf16.msra.mxu1 %v6398_v5  ;;  %v6485_v4 = vld [vmem:[%s8547_s3 + $0x58] sm:$0xff]  }
 0x210   :  { %3986 = vmatprep.subr.bf16.mxu0 %v6403_v6  ;;  %4355 = vmatprep.subr.bf16.mxu1 %v6406_v7  ;;  %v6486_v5 = vld [vmem:[%s8547_s3 + $0xd8] sm:$0xff]  }
 0x211   :  { %v6487_v6 = vld [vmem:[%s8547_s3 + $0x18] sm:$0xff]  }
 0x212   :  { %v6488_v7 = vld [vmem:[%s8547_s3 + $0x98] sm:$0xff]  }
 0x213   :  { %3987 = vmatpush1.bf16.msra.mxu0 %v6401_v8  ;;  %4356 = vmatpush1.bf16.msra.mxu1 %v6404_v9  ;;  %v6489_v8 = vld [vmem:[%s8547_s3 + $0x60] sm:$0xff]  }
 0x214   :  { %3988 = vmatprep.subr.bf16.mxu0 %v6409_v10  ;;  %4357 = vmatprep.subr.bf16.mxu1 %v6412_v11  ;;  %v6490_v9 = vld [vmem:[%s8547_s3 + $0xe0] sm:$0xff]  }
 0x215   :  { %v6491_v10 = vld [vmem:[%s8547_s3 + $0x20] sm:$0xff]  }
 0x216   :  { %v6492_v11 = vld [vmem:[%s8547_s3 + $0xa0] sm:$0xff]  }
 0x217   :  { %3989 = vmatpush1.bf16.msra.mxu0 %v6407_v12  ;;  %4358 = vmatpush1.bf16.msra.mxu1 %v6410_v52  ;;  %v6493_v12 = vld [vmem:[%s8547_s3 + $0x68] sm:$0xff]  }
 0x218   :  { %3990 = vmatprep.subr.bf16.mxu0 %v6415_v15  ;;  %4359 = vmatprep.subr.bf16.mxu1 %v6418_v16  ;;  %v6494_v52 = vld [vmem:[%s8547_s3 + $0xe8] sm:$0xff]  }
 0x219   :  { %v6495_v15 = vld [vmem:[%s8547_s3 + $0x28] sm:$0xff]  }
 0x21a   :  { %v6496_v16 = vld [vmem:[%s8547_s3 + $0xa8] sm:$0xff]  }
 0x21b   :  { %3991 = vmatpush1.bf16.msra.mxu0 %v6413_v17  ;;  %4360 = vmatpush1.bf16.msra.mxu1 %v6416_v18  ;;  %v6497_v17 = vld [vmem:[%s8547_s3 + $0x70] sm:$0xff]  }
 0x21c   :  { %3992 = vmatprep.subr.bf16.mxu0 %v6421_v19  ;;  %4361 = vmatprep.subr.bf16.mxu1 %v6424_v20  ;;  %v6498_v18 = vld [vmem:[%s8547_s3 + $0xf0] sm:$0xff]  }
 0x21d   :  { %v6499_v19 = vld [vmem:[%s8547_s3 + $0x30] sm:$0xff]  }
 0x21e   :  { %v6500_v20 = vld [vmem:[%s8547_s3 + $0xb0] sm:$0xff]  }
 0x21f   :  { %3993 = vmatpush1.bf16.msra.mxu0 %v6419_v22  ;;  %4362 = vmatpush1.bf16.msra.mxu1 %v6422_v23  ;;  %v6501_v22 = vld [vmem:[%s8547_s3 + $0x78] sm:$0xff]  }
 0x220   :  { %3994 = vmatprep.subr.bf16.mxu0 %v6427_v24  ;;  %4363 = vmatprep.subr.bf16.mxu1 %v6430_v13  ;;  %v6502_v23 = vld [vmem:[%s8547_s3 + $0xf8] ss:$0 sps:$4 sm:$0x33]  }
 0x221   :  { %v6503_v24 = vld [vmem:[%s8547_s3 + $0x38] sm:$0xff]  }
 0x222   :  { %v6504_v13 = vld [vmem:[%s8547_s3 + $0xb8] sm:$0xff]  }
 0x223   :  { %3995 = vmatpush1.bf16.msra.mxu0 %v6425_v27  ;;  %4364 = vmatpush1.bf16.msra.mxu1 %v6428_v28  ;;  %v6540_v27 = vmov 0.0   ;;  %v611_v28 = vsub.s32 0, %v6700_v42 }
 0x224   :  { %3996 = vmatprep.subr.bf16.mxu0 %v6433_v29  ;;  %4365 = vmatprep.subr.bf16.mxu1 %v6436_v14  ;;  %v619_v29 = vsub.s32 2, %v6700_v42  ;;  %v607_v14 = vld [vmem:[%s8546_s2] sm:$0xf] }
 0x227   :  { %3997 = vmatpush1.bf16.msra.mxu0 %v6431_v30  ;;  %4366 = vmatpush1.bf16.msra.mxu1 %v6434_v31  ;;  %v615_v30 = vsub.s32 1, %v6700_v42  ;;  %v623_v31 = vsub.s32 3, %v6700_v42 }
 0x228   :  { %3998 = vmatprep.subr.bf16.mxu0 %v6439_v25  ;;  %4367 = vmatprep.subr.bf16.mxu1 %v6442_v32  ;;  %v612_v25 = vrot.slane %v607_v14, %v611_v28  ;;  %v620_v32 = vrot.slane %v607_v14, %v619_v29 }
 0x22b   :  { %3999 = vmatpush1.bf16.msra.mxu0 %v6437_v33  ;;  %4368 = vmatpush1.bf16.msra.mxu1 %v6440_v26  ;;  %v616_v33 = vrot.slane %v607_v14, %v615_v30  ;;  %v624_v26 = vrot.slane %v607_v14, %v623_v31 }
 0x22c   :  { %4000 = vmatprep.subr.bf16.mxu0 %v6445_v36  ;;  %4369 = vmatprep.subr.bf16.mxu1 %v6448_v37 }
 0x22f   :  { %4001 = vmatpush1.bf16.msra.mxu0 %v6443_v21  ;;  %4370 = vmatpush1.bf16.msra.mxu1 %v6446_v39 }
 0x230   :  { %4002 = vmatprep.subr.bf16.mxu0 %v6451_v40  ;;  %4371 = vmatprep.subr.bf16.mxu1 %v6454_v41 }
 0x233   :  { %4003 = vmatpush1.bf16.msra.mxu0 %v6449_v34  ;;  %4372 = vmatpush1.bf16.msra.mxu1 %v6452_v43 }
 0x234   :  { %4004 = vmatprep.subr.bf16.mxu0 %v6457_v44  ;;  %4373 = vmatprep.subr.bf16.mxu1 %v6460_v45 }
 0x237   :  { %4005 = vmatpush1.bf16.msra.mxu0 %v6455_v46  ;;  %4374 = vmatpush1.bf16.msra.mxu1 %v6458_v35 }
 0x238   :  { %4006 = vmatprep.subr.bf16.mxu0 %v6463_v51  ;;  %4375 = vmatprep.subr.bf16.mxu1 %v6466_v53 }
 0x23b   :  { %4007 = vmatpush1.bf16.msra.mxu0 %v6461_v38  ;;  %4376 = vmatpush1.bf16.msra.mxu1 %v6464_v54 }
 0x23c   :  { %4008 = vmatprep.subr.bf16.mxu0 %v6469_v55  ;;  %4377 = vmatprep.subr.bf16.mxu1 %v6472_v56  ;;  %v6505_v56 = vld [vmem:[%s8549_s5] sm:$0xff]  }
 0x23f   :  { %4009 = vmatpush1.bf16.msra.mxu0 %v6467_v47  ;;  %4378 = vmatpush1.bf16.msra.mxu1 %v6470_v57 }
 0x240   :  { %5473 = vmatprep.subr.bf16.mxu0 %v6473_v58  ;;  %5495 = vmatprep.subr.bf16.mxu1 %v6474_v48  ;;  %v6506_v58 = vld [vmem:[%s8549_s5 + $0x8] sm:$0xff]   ;;  %v6507_v48 = vld [vmem:[%s8549_s5 + $0x10] sm:$0xff]  }
 0x242   :  { %4011 = vmatmul.mubr.bf16.vlgmr.msra.gmra.mrb[0].mxu0 %v744_v59  ;;  %4380 = vmatmul.mubr.bf16.vlgmr.msra.gmra.mrb[0].mxu1 %v744_v59  ;;  %v6508_v59 = vld [vmem:[%s8549_s5 + $0x18] ss:$0 sps:$4 sm:$0x11]  }
 0x243   :  { %5474 = vmatpush3.bf16.msra.mxu0 %v6475_v60  ;;  %5496 = vmatpush3.bf16.msra.mxu1 %v6476_v61  ;;  %v4786_v60 = vsel %vm4784_vm2, %v6508_v59, 0 }
 0x244   :  { %5475 = vmatprep.subr.bf16.mxu0 %v6477_v62  ;;  %5497 = vmatprep.subr.bf16.mxu1 %v6478_v49  ;;  %v5433_v49 = vld [vmem:[%s8548_s4] ss:$0 sm:$0xff]  ;;  %s6542_s4 = smov [#allocation2]  }
 0x247   :  { %5476 = vmatpush3.bf16.msra.mxu0 %v6479_v50  ;;  %5498 = vmatpush3.bf16.msra.mxu1 %v6480_v63 }
 0x248   :  { %5477 = vmatprep.subr.bf16.mxu0 %v6481_v0  ;;  %5499 = vmatprep.subr.bf16.mxu1 %v6482_v1 }
 0x24b   :  { %5478 = vmatpush3.bf16.msra.mxu0 %v6483_v2  ;;  %5500 = vmatpush3.bf16.msra.mxu1 %v6484_v3 }
 0x24c   :  { %5479 = vmatprep.subr.bf16.mxu0 %v6485_v4  ;;  %5501 = vmatprep.subr.bf16.mxu1 %v6486_v5 }
 0x24f   :  { %5480 = vmatpush3.bf16.msra.mxu0 %v6487_v6  ;;  %5502 = vmatpush3.bf16.msra.mxu1 %v6488_v7 }
 0x250   :  { %5481 = vmatprep.subr.bf16.mxu0 %v6489_v8  ;;  %5503 = vmatprep.subr.bf16.mxu1 %v6490_v9 }
 0x253   :  { %5482 = vmatpush3.bf16.msra.mxu0 %v6491_v10  ;;  %5504 = vmatpush3.bf16.msra.mxu1 %v6492_v11  ;;  %v5467_v10 = vld [vmem:[%s8550_s6] ss:$0 sm:$0xff]  ;;  %s4848_s6 = sshll.u32 %s6542_s4, 4  ;;  %s4849_s6 = int_to_ptr.vmem [resolvable:$true] %s4848_s6 }
 0x254   :  { %5483 = vmatprep.subr.bf16.mxu0 %v6493_v12  ;;  %5505 = vmatprep.subr.bf16.mxu1 %v6494_v52  ;;  %s6515_s28 = scalar_lea.vmem %s4849_s6, 32  ;;  %p6520_p1 = scmp.lt.s32.totalorder %s4849_s6, %s4849_s6 }
 0x255   :  { %p6516_p0 = scmp.ne.s32.totalorder %s4849_s6, %s6515_s28  ;;  %p6521_p2 = scmp.lt.s32.totalorder %s6515_s28, %s6515_s28 }
 0x257   :  { %5484 = vmatpush3.bf16.msra.mxu0 %v6495_v15  ;;  %5506 = vmatpush3.bf16.msra.mxu1 %v6496_v16  ;;  %p6522_p3 = por %p6521_p2, %p6520_p1 }
 0x258   :  { %5485 = vmatprep.subr.bf16.mxu0 %v6497_v17  ;;  %5507 = vmatprep.subr.bf16.mxu1 %v6498_v18 }
 0x259   :  { %p6523_p4 = pnand %p6522_p3, %p6516_p0 }
 0x25b   :  { %5486 = vmatpush3.bf16.msra.mxu0 %v6499_v19  ;;  %5508 = vmatpush3.bf16.msra.mxu1 %v6500_v20 }
 0x25c   :  { %5487 = vmatprep.subr.bf16.mxu0 %v6501_v22  ;;  %5602 = vmatprep.subr.msk.bf16.mxu1 %vm4659_vm0, %v6502_v23 }
 0x25f   :  { %5488 = vmatpush3.bf16.msra.mxu0 %v6503_v24  ;;  %5510 = vmatpush3.bf16.msra.mxu1 %v6504_v13 }
 0x260   :  { %5522 = vmatprep.subr.bf16.mxu0 %v6540_v27 }
 0x315   :  { %v4012_v36 = vpop.f32.mrb[0].mxu0  ;;  %v4381_v37 = vpop.f32.mrb[0].mxu1 }
 0x316   :  { %v5534_v21 = vadd.f32 %v4012_v36, %v612_v25  ;;  %v5536_v39 = vadd.f32 %v4381_v37, %v620_v32  ;;  %v4014_v40 = vpop.f32.mrb[1].mxu0  ;;  %v4383_v41 = vpop.f32.mrb[1].mxu1 }
 0x317   :  { %v5535_v34 = vadd.f32 %v4014_v40, %v616_v33  ;;  %v5537_v43 = vadd.f32 %v4383_v41, %v624_v26  ;;  %v4016_v44 = vpop.f32.mrb[2].mxu0  ;;  %v4385_v45 = vpop.f32.mrb[2].mxu1 }
 0x318   :  { %v4388_v46 = vmax.f32 %v5534_v21, 0.0  ;;  %v4390_v35 = vmax.f32 %v5536_v39, 0.0  ;;  %v4017_v51 = vpop.f32.mrb[3].mxu0  ;;  %v4386_v53 = vpop.f32.mrb[3].mxu1 }
 0x319   :  { %v4389_v38 = vmax.f32 %v5535_v34, 0.0  ;;  %v4391_v42 = vmax.f32 %v5537_v43, 0.0 }
 0x31a   :  { %v4392_v47 = vpack.c.bf16 %v4388_v46, %v4388_v46  ;;  %v4394_v57 = vpack.c.bf16 %v4390_v35, %v4390_v35 }
 0x31b   :  { %v4393_v54 = vpack.c.bf16 %v4389_v38, %v4389_v38  ;;  %v4395_v55 = vpack.c.bf16 %v4391_v42, %v4391_v42 }
 0x31d   :  { %4695 = vmatprep.mubr.bf16.mxu0 %v4393_v54  ;;  %5466 = vmatprep.mubr.msk.bf16.mxu1 %vm4655_vm1, %v4395_v55 }
 0x31e   :  { %4696 = vmatmul.mubr.bf16.vlgmr.msra.gmra.mrb[4].mxu0 %v4392_v47  ;;  %4736 = vmatmul.mubr.bf16.vlgmr.msra.gmra.mrb[4].mxu1 %v4394_v57 }
 0x31f   :  { %5523 = vmatpush3.bf16.msra.mxu0 %v6505_v56  ;;  %5530 = vmatprep.mubr.msk.bf16.mxu0 %vm6541_vm3, %v6540_v27 }
 0x320   :  { %5524 = vmatprep.subr.bf16.mxu0 %v6540_v27 }
 0x323   :  { %5525 = vmatpush3.bf16.msra.mxu0 %v6506_v58 }
 0x324   :  { %5526 = vmatprep.subr.bf16.mxu0 %v6540_v27 }
 0x327   :  { %5527 = vmatpush3.bf16.msra.mxu0 %v6507_v48 }
 0x328   :  { %5528 = vmatprep.subr.bf16.mxu0 %v6540_v27 }
 0x32b   :  { %5529 = vmatpush3.bf16.msra.mxu0 %v4786_v60 }
 0x3f1   :  { %v5489_v61 = vpop.f32.mrb[4].mxu0  ;;  %v5511_v62 = vpop.f32.mrb[4].mxu1 }
 0x3f2   :  { %v5490_v50 = vpop.f32.mrb[5].mxu0  ;;  %v5512_v63 = vpop.f32.mrb[5].mxu1 }
 0x3f3   :  { %v5491_v0 = vadd.f32 %v5490_v50, %v5489_v61  ;;  %v5513_v1 = vadd.f32 %v5512_v63, %v5511_v62  ;;  %v5492_v2 = vpop.f32.mrb[6].mxu0  ;;  %v5514_v3 = vpop.f32.mrb[6].mxu1 }
 0x3f4   :  { %v5493_v4 = vpop.f32.mrb[7].mxu0  ;;  %v5515_v5 = vpop.f32.mrb[7].mxu1 }
 0x3f5   :  { %v4698_v6 = vadd.f32 %v5491_v0, %v5433_v49 }
 0x3f7   :  { %v4738_v7 = vadd.f32 %v5513_v1, %v4698_v6 }
 0x3f9   :  { %v4743_v8 = vmax.f32 %v4738_v7, 0.0 }
 0x3fb   :  { %v4744_v9 = vpack.c.bf16 %v4743_v8, %v4743_v8 }
 0x3fd   :  { %5531 = vmatmul.mubr.msk.bf16.vlgmr.msra.gmra.mrb[8].mxu0 %vm4780_vm4, %v4744_v9 }
 0x4d0   :  { %v4822_v11 = vpop.f32.mrb[8].mxu0 }
 0x4d1   :  { %v4823_v12 = vadd.f32 %v5467_v10, %v4822_v11  ;;  %v5532_v52 = vpop.f32.mrb[9].mxu0 }
 0x4d2   :  { %v4825_v15 = vpop.f32.mrb[10].mxu0 }
 0x4d3   :  { %v5533_v16 = vpop.f32.mrb[11].mxu0  ;;  %v4829_v17 = vsel %vm4828_vm5, %v4823_v12, -inf }
 0x4d4   :  { %4830 = vmax.xlane.f32.xlu0 %v4829_v17 }
 0x561   :  { %v4831_v18 = vpop.xlane.xlu0 %4830 }
 0x562   :  { %v4832_v19 = vsub.f32 %v4823_v12, %v4831_v18 }
 0x564   :  { %v4833_v20 = vmul.f32 1.442695, %v4832_v19 }
 0x566   :  { %6509 = vpow2.f32 %v4833_v20 }
 0x570   :  { %v6510_v22 = vpop.eup %6509 }
 0x571   :  { %v4835_v23 = vsel %vm4828_vm5, %v6510_v22, 0.0 }
 0x572   :  { %4836 = vadd.xlane.f32.xlu0 %v4835_v23 }
 0x5ff   :  { %v4837_v24 = vpop.xlane.xlu0 %4836 }
 0x600   :  { %6511 = vlog2.f32 %v4837_v24 }
 0x60a   :  { %v6512_v13 = vpop.eup %6511 }
 0x60b   :  { %v4839_v27 = vmul.f32 0.6931472, %v6512_v13 }
 0x60d   :  { %v4840_v28 = vsub.f32 %v4832_v19, %v4839_v27 }
 0x60f   :  { %4841 = vst.msk [vmem:[#allocation2] sm:$0x3] %vm4828_vm5, %v4840_v28 }
 0x610   :  { %6526 = shalt.err (!%p6523_p4)
}
 0x611   :  { %s6527_s8 = scalar_lea.hbm %s8551_s7, 32 }
 0x612   :  { %p6528_p5 = scmp.ne.s32.totalorder %s8551_s7, %s6527_s8  ;;  %p6531_p6 = scmp.lt.u32.totalorder %s6527_s8, %s8551_s7 }
 0x614   :  { %p6533_p7 = pnand %p6531_p6, %p6528_p5 }
 0x616   :  { %6536 = shalt.err (!%p6533_p7)
}
 0x617   :  { %4851 = dma.vmem_to_hbm [thread:$0]  %s4849_s6, 32, %s8551_s7, [#allocation3]  }
 0x618   :  { %6537 = dma.done.wait [#allocation3], 32  }
 0x619   :  { %6538 = vsyncadd [#allocation3], 4294967264 }
 0x61a   :  { %4855 = vsyncpa [#allocation3], 1 }

</bundles_post_ra>
